<compile_context>
chip_gen: v7x
topology: tpu7x:2x2x1
jax: 0.10.0
libtpu: 0.0.40
codegen_flags: <defaults>
</compile_context>

<pallas_src>
import functools
import math

import jax
import jax.numpy as jnp
from jax.experimental import pallas as pl
from jax.experimental.pallas import tpu as pltpu

F32 = jnp.float32
BF16 = jnp.bfloat16
_NEG = -1e9


def _const_spec(a):
    """BlockSpec for a grid-invariant (weight) input: full array every step."""
    nd = a.ndim
    shape = a.shape
    return pl.BlockSpec(shape, lambda b: (0,) * nd)


# ----------------------------------------------------------------------------
# Fused transformer layer (cond-LN + MHA + conv-FFN) — one pallas_call
# ----------------------------------------------------------------------------
def fused_transformer_layer(x, style3, kbias, nonpad, lp, nh):
    """x:[B,T,H] f32, style3:[B,1,S], kbias:[B,1,T] additive key mask,
    nonpad:[B,T,1].  Returns [B,T,H]."""
    B, T, H = x.shape
    S = style3.shape[-1]
    KH, Fh = lp["ffn_w"].shape
    K = KH // H
    pad = (K - 1) // 2
    dh = H // nh
    scale = 1.0 / math.sqrt(dh)

    def kernel(x_ref, st_ref, kb_ref, np_ref,
               ln1w, ln1b, qkvw, qkvb, ow, ob,
               ln2w, ln2b, ffnw, ffnb, outw, outb,
               o_ref, pad_buf):
        xb = x_ref[...]                      # [T,H] f32
        st = st_ref[...].astype(BF16)        # [1,S]
        kb = kb_ref[...]                     # [1,T] additive mask
        npd = np_ref[...]                    # [T,1]

        def cln(v, w_ref, b_ref):
            mu = jnp.mean(v, -1, keepdims=True)
            var = jnp.mean((v - mu) ** 2, -1, keepdims=True)
            vn = (v - mu) * jax.lax.rsqrt(var + 1e-5)
            gb = jnp.dot(st, w_ref[...], preferred_element_type=F32) + b_ref[...]
            return vn * (1.0 + gb[:, :H]) + gb[:, H:]

        # ---- self-attention (fused QKV, per-head static loop) -------------
        h1 = cln(xb, ln1w, ln1b)
        qkv = jnp.dot(h1.astype(BF16), qkvw[...],
                      preferred_element_type=F32) + qkvb[...]      # [T,3H]
        attn = jnp.zeros((T, H), F32)
        for hh in range(nh):
            q = qkv[:, hh * dh:(hh + 1) * dh].astype(BF16)
            k = qkv[:, H + hh * dh:H + (hh + 1) * dh].astype(BF16)
            v = qkv[:, 2 * H + hh * dh:2 * H + (hh + 1) * dh].astype(BF16)
            s = jax.lax.dot_general(q, k, (((1,), (1,)), ((), ())),
                                    preferred_element_type=F32) * scale + kb
            s = s - jnp.max(s, axis=-1, keepdims=True)
            p = jnp.exp(s)
            inv = pl.reciprocal(jnp.sum(p, axis=-1, keepdims=True), approx=True)
            oh = jnp.dot(p.astype(BF16), v, preferred_element_type=F32) * inv
            attn = attn + jnp.dot(oh.astype(BF16),
                                  ow[hh * dh:(hh + 1) * dh, :],
                                  preferred_element_type=F32)
        x1 = (xb + attn + ob[...]) * npd

        # ---- conv-FFN: taps as matmuls over a zero-padded VMEM scratch ----
        h2 = cln(x1, ln2w, ln2b)
        pad_buf[...] = jnp.zeros_like(pad_buf)
        pad_buf[pad:pad + T, :] = h2
        acc = jnp.zeros((T, Fh), F32)
        for kk in range(K):
            acc = acc + jnp.dot(pad_buf[kk:kk + T, :].astype(BF16),
                                ffnw[kk * H:(kk + 1) * H, :],
                                preferred_element_type=F32)
        f = jnp.maximum(acc + ffnb[...], 0.0)
        y = jnp.dot(f.astype(BF16), outw[...],
                    preferred_element_type=F32) + outb[...]
        o_ref[...] = (x1 + y) * npd

    weights = [lp["ln1_w"], lp["ln1_b"], lp["qkv_w"], lp["qkv_b"],
               lp["o_w"], lp["o_b"], lp["ln2_w"], lp["ln2_b"],
               lp["ffn_w"], lp["ffn_b"], lp["out_w"], lp["out_b"]]
    in_specs = ([pl.BlockSpec((None, T, H), lambda b: (b, 0, 0)),
                 pl.BlockSpec((None, 1, S), lambda b: (b, 0, 0)),
                 pl.BlockSpec((None, 1, T), lambda b: (b, 0, 0)),
                 pl.BlockSpec((None, T, 1), lambda b: (b, 0, 0))]
                + [_const_spec(w) for w in weights])
    return pl.pallas_call(
        kernel,
        out_shape=jax.ShapeDtypeStruct((B, T, H), F32),
        grid=(B,),
        in_specs=in_specs,
        out_specs=pl.BlockSpec((None, T, H), lambda b: (b, 0, 0)),
        scratch_shapes=[pltpu.VMEM((T + K - 1, H), F32)],
        compiler_params=pltpu.CompilerParams(dimension_semantics=("parallel",)),
    )(x, style3, kbias, nonpad, *weights)


# ----------------------------------------------------------------------------
# Fused final cond-LN (optionally + output projection, e.g. mel_out)
# ----------------------------------------------------------------------------
def fused_cln_out(x, style3, nonpad, ln_w, ln_b, proj_w=None, proj_b=None):
    B, T, H = x.shape
    S = style3.shape[-1]
    has_proj = proj_w is not None
    O = proj_w.shape[1] if has_proj else H

    def kernel(x_ref, st_ref, np_ref, lnw, lnb, *rest):
        if has_proj:
            pw, pb, o_ref = rest
        else:
            (o_ref,) = rest
        xb = x_ref[...]
        st = st_ref[...].astype(BF16)
        mu = jnp.mean(xb, -1, keepdims=True)
        var = jnp.mean((xb - mu) ** 2, -1, keepdims=True)
        xn = (xb - mu) * jax.lax.rsqrt(var + 1e-5)
        gb = jnp.dot(st, lnw[...], preferred_element_type=F32) + lnb[...]
        y = (xn * (1.0 + gb[:, :H]) + gb[:, H:]) * np_ref[...]
        if has_proj:
            y = jnp.dot(y.astype(BF16), pw[...],
                        preferred_element_type=F32) + pb[...]
        o_ref[...] = y

    in_specs = [pl.BlockSpec((None, T, H), lambda b: (b, 0, 0)),
                pl.BlockSpec((None, 1, S), lambda b: (b, 0, 0)),
                pl.BlockSpec((None, T, 1), lambda b: (b, 0, 0)),
                _const_spec(ln_w), _const_spec(ln_b)]
    args = [x, style3, nonpad, ln_w, ln_b]
    if has_proj:
        in_specs += [_const_spec(proj_w), _const_spec(proj_b)]
        args += [proj_w, proj_b]
    return pl.pallas_call(
        kernel,
        out_shape=jax.ShapeDtypeStruct((B, T, O), F32),
        grid=(B,),
        in_specs=in_specs,
        out_specs=pl.BlockSpec((None, T, O), lambda b: (b, 0, 0)),
        compiler_params=pltpu.CompilerParams(dimension_semantics=("parallel",)),
    )(*args)


# ----------------------------------------------------------------------------
# Fused conv predictor (duration / pitch): conv-ReLU-LN stack + output linear
# ----------------------------------------------------------------------------
def fused_predictor(x, nonpad, layers, out_w, out_b, kernel_size, mask_between):
    B, T, Cin0 = x.shape
    P = layers[0]["ln_g"].shape[-1]
    odim = out_w.shape[1]
    K = kernel_size
    pad = (K - 1) // 2
    nl = len(layers)
    Cmax = max([Cin0] + [l["w"].shape[0] // K for l in layers])

    def kernel(*refs):
        x_ref, np_ref = refs[0], refs[1]
        w_refs = refs[2:2 + 4 * nl]
        ow, ob_ = refs[2 + 4 * nl], refs[3 + 4 * nl]
        o_ref = refs[4 + 4 * nl]
        pad_buf = refs[5 + 4 * nl]
        h = x_ref[...]
        npd = np_ref[...]
        for i in range(nl):
            cw, cb, lg, lb = w_refs[4 * i:4 * i + 4]
            cin = cw.shape[0] // K
            pad_buf[...] = jnp.zeros_like(pad_buf)
            pad_buf[pad:pad + T, :cin] = h
            acc = jnp.zeros((T, P), F32)
            for kk in range(K):
                acc = acc + jnp.dot(pad_buf[kk:kk + T, :cin].astype(BF16),
                                    cw[kk * cin:(kk + 1) * cin, :],
                                    preferred_element_type=F32)
            h = jnp.maximum(acc + cb[...], 0.0)
            mu = jnp.mean(h, -1, keepdims=True)
            var = jnp.mean((h - mu) ** 2, -1, keepdims=True)
            h = (h - mu) * jax.lax.rsqrt(var + 1e-5) * lg[...] + lb[...]
            if mask_between:
                h = h * npd          # dropout omitted (inference)
        y = jnp.dot(h.astype(BF16), ow[...],
                    preferred_element_type=F32) + ob_[...]
        if mask_between:
            y = y * npd
        o_ref[...] = y

    args = [x, nonpad]
    in_specs = [pl.BlockSpec((None, T, Cin0), lambda b: (b, 0, 0)),
                pl.BlockSpec((None, T, 1), lambda b: (b, 0, 0))]
    for lyr in layers:
        for name in ("w", "b", "ln_g", "ln_b"):
            a = lyr[name]
            args.append(a)
            in_specs.append(_const_spec(a))
    args += [out_w, out_b]
    in_specs += [_const_spec(out_w), _const_spec(out_b)]
    return pl.pallas_call(
        kernel,
        out_shape=jax.ShapeDtypeStruct((B, T, odim), F32),
        grid=(B,),
        in_specs=in_specs,
        out_specs=pl.BlockSpec((None, T, odim), lambda b: (b, 0, 0)),
        scratch_shapes=[pltpu.VMEM((T + K - 1, Cmax), F32)],
        compiler_params=pltpu.CompilerParams(dimension_semantics=("parallel",)),
    )(*args)


# ----------------------------------------------------------------------------
# Plain-JAX glue (positional embedding, f0 utilities)
# ----------------------------------------------------------------------------
def sinusoidal_pos_emb(T, H):
    half = H // 2
    pos = jnp.arange(T, dtype=F32)[:, None]
    inv = jnp.exp(jnp.arange(half, dtype=F32) * (-math.log(10000.0) / (half - 1)))
    ang = pos * inv[None, :]
    return jnp.concatenate([jnp.sin(ang), jnp.cos(ang)], axis=-1)[None]  # [1,T,H]


def denorm_f0(f0, uv, pitch_padding=None):
    f0 = jnp.exp2(f0)
    if uv is not None:
        f0 = jnp.where(uv > 0, 0.0, f0)
    if pitch_padding is not None:
        f0 = jnp.where(pitch_padding, 0.0, f0)
    return f0


_F0_BIN, _F0_MIN, _F0_MAX = 256, 50.0, 1100.0
_F0_MEL_MIN = 1127.0 * math.log(1 + _F0_MIN / 700.0)
_F0_MEL_MAX = 1127.0 * math.log(1 + _F0_MAX / 700.0)


def f0_to_coarse(f0):
    f0_mel = 1127.0 * jnp.log(1.0 + f0 / 700.0)
    f0_mel = jnp.where(
        f0_mel > 0,
        (f0_mel - _F0_MEL_MIN) * (_F0_BIN - 2) / (_F0_MEL_MAX - _F0_MEL_MIN) + 1.0,
        f0_mel,
    )
    f0_mel = jnp.where(f0_mel <= 1.0, 1.0, f0_mel)
    f0_mel = jnp.where(f0_mel > _F0_BIN - 1, float(_F0_BIN - 1), f0_mel)
    return (f0_mel + 0.5).astype(jnp.int32)


# ----------------------------------------------------------------------------
# PromptTTS forward
# ----------------------------------------------------------------------------
def prompt_tts_forward(params, hp, ph_token, style_embed, mel2ph, f0, uv):
    ret = {}
    H = hp["hidden_size"]
    nh = hp["num_heads"]
    B, Tt = ph_token.shape
    style3 = style_embed[:, None, :].astype(F32)                 # [B,1,S]

    # ---- content encoder (relative-pos attn approximated by absolute) ----
    # TODO(synk): relative-position attention + conv prenet of
    # RelTransformerEncoder are approximated by absolute attention / no prenet.
    src_key = ph_token > 0
    src_nonpad = src_key.astype(F32)[:, :, None]                 # [B,Tt,1]
    enc_kbias = jnp.where(src_key, 0.0, _NEG).astype(F32)[:, None, :]  # [B,1,Tt]
    x = jnp.take(params["emb"], ph_token, axis=0) * math.sqrt(H) * src_nonpad
    ce = params["content_encoder"]
    for lp in ce["layers"]:
        x = fused_transformer_layer(x, style3, enc_kbias, src_nonpad, lp, nh)
    h_ling = fused_cln_out(x, style3, src_nonpad,
                           ce["ln_out"]["w"], ce["ln_out"]["b"])
    dur_inp = h_ling

    # ---- forward_dur (mel2ph given, so LengthRegulator is not invoked) ----
    src_padding = ph_token == 100        # matches reference forward_dur
    dur_nonpad = (1.0 - src_padding.astype(F32))[:, :, None]
    dp = params["dur_predictor"]
    dur = fused_predictor(dur_inp, dur_nonpad, dp["layers"],
                          dp["out_w"], dp["out_b"],
                          kernel_size=hp["dur_predictor_kernel"],
                          mask_between=True)[..., 0]
    ret["dur"] = dur
    max_frames = mel2ph.shape[1] // hp["frames_multiple"] * hp["frames_multiple"]
    mel2ph = mel2ph[:, :max_frames]
    ret["mel2ph"] = mel2ph
    Tm = mel2ph.shape[1]

    tgt_key = mel2ph > 0
    tgt_nonpad = tgt_key.astype(F32)[:, :, None]                 # [B,Tm,1]
    dec_kbias = jnp.where(tgt_key, 0.0, _NEG).astype(F32)[:, None, :]

    # ---- expand_states: gather encoder states by mel2ph ----
    h_pad = jnp.pad(dur_inp, ((0, 0), (1, 0), (0, 0)))
    idx = jnp.broadcast_to(mel2ph[:, :, None], (B, Tm, H))
    decoder_inp = jnp.take_along_axis(h_pad, idx, axis=1) * tgt_nonpad

    posemb = sinusoidal_pos_emb(Tm, H)                           # hoisted, reused

    # ---- forward_pitch (pitch_type == 'frame', f0 given) ----
    if hp["use_pitch_embed"]:
        pitch_padding = mel2ph == 0
        pp = params["pitch_predictor"]
        pitch_inp = decoder_inp + pp["alpha"] * posemb
        pitch_pred = fused_predictor(pitch_inp, tgt_nonpad, pp["layers"],
                                     pp["out_w"], pp["out_b"],
                                     kernel_size=hp["predictor_kernel"],
                                     mask_between=False)
        ret["pitch_pred"] = pitch_pred
        use_uv = hp["use_uv"]
        f0_denorm = denorm_f0(f0, uv if use_uv else None, pitch_padding)
        pitch = f0_to_coarse(f0_denorm)
        ret["f0_denorm"] = f0_denorm
        ret["f0_denorm_pred"] = denorm_f0(
            pitch_pred[:, :, 0],
            (pitch_pred[:, :, 1] > 0).astype(F32) if use_uv else None,
            pitch_padding,
        )
        decoder_inp = decoder_inp + jnp.take(params["pitch_embed"], pitch, axis=0)

    # ---- FastSpeech decoder + mel projection (fused into final kernel) ----
    dec = params["decoder"]
    x = decoder_inp + posemb
    for lp in dec["layers"]:
        x = fused_transformer_layer(x, style3, dec_kbias, tgt_nonpad, lp, nh)
    mel = fused_cln_out(x, style3, tgt_nonpad,
                        dec["ln_out"]["w"], dec["ln_out"]["b"],
                        proj_w=params["mel_w"], proj_b=params["mel_b"])
    ret["mel_out"] = mel
    return ret


# ----------------------------------------------------------------------------
# Deterministic parameter init (fused / kernel-friendly layout, bf16 weights)
# ----------------------------------------------------------------------------
def init_params(hp, dict_size):
    H = hp["hidden_size"]
    Fh = hp["ffn_hidden_size"]
    S = H
    P = hp["predictor_hidden"] if hp["predictor_hidden"] > 0 else H
    base = jax.random.PRNGKey(0)
    ctr = [0]

    def nk():
        ctr[0] += 1
        return jax.random.fold_in(base, ctr[0])

    def w(shape, scale=0.05):
        return (scale * jax.random.normal(nk(), shape, F32)).astype(BF16)

    def b(n):
        return jnp.zeros((1, n), F32)

    def tf_layer(K):
        return {
            "ln1_w": w((S, 2 * H)), "ln1_b": b(2 * H),
            "qkv_w": w((H, 3 * H)), "qkv_b": b(3 * H),
            "o_w": w((H, H)), "o_b": b(H),
            "ln2_w": w((S, 2 * H)), "ln2_b": b(2 * H),
            "ffn_w": w((K * H, Fh)), "ffn_b": b(Fh),
            "out_w": w((Fh, H)), "out_b": b(H),
        }

    def predictor(n_layers, K, in_dim, odim):
        layers = []
        for i in range(n_layers):
            cin = in_dim if i == 0 else P
            layers.append({"w": w((K * cin, P)), "b": b(P),
                           "ln_g": jnp.ones((1, P), F32),
                           "ln_b": jnp.zeros((1, P), F32)})
        return {"layers": layers, "out_w": w((P, odim)), "out_b": b(odim),
                "alpha": jnp.ones((), F32)}

    emb = 0.1 * jax.random.normal(nk(), (dict_size, H), F32)
    emb = emb.at[0].set(0.0)                    # padding_idx = 0
    pitch_emb = 0.1 * jax.random.normal(nk(), (300, H), F32)
    pitch_emb = pitch_emb.at[0].set(0.0)        # padding_idx = 0

    return {
        "content_encoder": {
            "layers": [tf_layer(hp["enc_ffn_kernel_size"]) for _ in range(hp["enc_layers"])],
            "ln_out": {"w": w((S, 2 * H)), "b": b(2 * H)},
        },
        "decoder": {
            "layers": [tf_layer(hp["dec_ffn_kernel_size"]) for _ in range(hp["dec_layers"])],
            "ln_out": {"w": w((S, 2 * H)), "b": b(2 * H)},
        },
        "dur_predictor": predictor(hp["dur_predictor_layers"],
                                   hp["dur_predictor_kernel"], H, 1),
        "pitch_predictor": predictor(5, hp["predictor_kernel"], H, 2),
        "emb": emb,
        "pitch_embed": pitch_emb,
        "mel_w": w((H, 80)),
        "mel_b": b(80),
    }


# ----------------------------------------------------------------------------
if __name__ == "__main__":
    hparams = dict(
        enc_layers=2, dec_layers=2, hidden_size=32, ffn_hidden_size=64,
        num_heads=2, enc_ffn_kernel_size=3, dec_ffn_kernel_size=3,
        dropout=0.0, enc_prenet=False, enc_pre_ln=True,
        predictor_hidden=32, dur_predictor_layers=2, dur_predictor_kernel=3,
        predictor_kernel=5, predictor_dropout=0.5, predictor_grad=0.1,
        use_pitch_embed=True, pitch_type="frame", use_uv=True,
        frames_multiple=4,
    )
    dict_size = 120
    B, T_txt, T_mel, H = 2, 8, 24, hparams["hidden_size"]

    params = init_params(hparams, dict_size)

    key = jax.random.PRNGKey(0)
    k1, k2, k3, k4, k5 = jax.random.split(key, 5)
    ph_token = jax.random.randint(k1, (B, T_txt), 1, dict_size, dtype=jnp.int32)
    ph_token = ph_token.at[1, -1].set(0)                       # one padded token
    style_embed = jax.random.normal(k2, (B, H), F32)
    mel2ph = jax.random.randint(k3, (B, T_mel), 1, T_txt + 1, dtype=jnp.int32)
    mel2ph = mel2ph.at[1, -3:].set(0)                          # mel padding frames
    f0 = jax.random.uniform(k4, (B, T_mel), F32, 5.0, 8.0)     # log2-f0-ish
    uv = (jax.random.uniform(k5, (B, T_mel)) < 0.2).astype(F32)

    fwd = jax.jit(functools.partial(prompt_tts_forward, params, hparams))
    ret = fwd(ph_token, style_embed, mel2ph, f0, uv)
    jax.block_until_ready(ret["mel_out"])
    assert ret["mel_out"].shape == (B, T_mel, 80)
    assert ret["dur"].shape == (B, T_txt)
    assert ret["pitch_pred"].shape == (B, T_mel, 2)
    print("KERNEL_OK")
</pallas_src>

<mosaic_0001>
module attributes {stable_mosaic.version = 11 : i64} {
  func.func @kernel(%arg0: i32, %arg1: memref<1x8x32xf32, #tpu.memory_space<vmem>>, %arg2: memref<1x1x32xf32, #tpu.memory_space<vmem>>, %arg3: memref<1x1x8xf32, #tpu.memory_space<vmem>>, %arg4: memref<1x8x1xf32, #tpu.memory_space<vmem>>, %arg5: memref<32x64xbf16, #tpu.memory_space<vmem>>, %arg6: memref<1x64xf32, #tpu.memory_space<vmem>>, %arg7: memref<32x96xbf16, #tpu.memory_space<vmem>>, %arg8: memref<1x96xf32, #tpu.memory_space<vmem>>, %arg9: memref<32x32xbf16, #tpu.memory_space<vmem>>, %arg10: memref<1x32xf32, #tpu.memory_space<vmem>>, %arg11: memref<32x64xbf16, #tpu.memory_space<vmem>>, %arg12: memref<1x64xf32, #tpu.memory_space<vmem>>, %arg13: memref<96x64xbf16, #tpu.memory_space<vmem>>, %arg14: memref<1x64xf32, #tpu.memory_space<vmem>>, %arg15: memref<64x32xbf16, #tpu.memory_space<vmem>>, %arg16: memref<1x32xf32, #tpu.memory_space<vmem>>, %arg17: memref<1x8x32xf32, #tpu.memory_space<vmem>>, %arg18: memref<10x32xf32, #tpu.memory_space<vmem>>) attributes {dimension_semantics = [#tpu.dimension_semantics<parallel>], iteration_bounds = array<i64: 2>, scalar_prefetch = 0 : i64, scratch_operands = 1 : i64, tpu.core_type = #tpu.core_type<tc>, window_params = [{transform_indices = @transform_0, window_bounds = array<i64: 1, 8, 32>}, {transform_indices = @transform_1, window_bounds = array<i64: 1, 1, 32>}, {transform_indices = @transform_2, window_bounds = array<i64: 1, 1, 8>}, {transform_indices = @transform_3, window_bounds = array<i64: 1, 8, 1>}, {pipeline_mode = #tpu.pipeline_mode<synchronous>, transform_indices = @transform_4, window_bounds = array<i64: 32, 64>}, {pipeline_mode = #tpu.pipeline_mode<synchronous>, transform_indices = @transform_5, window_bounds = array<i64: 1, 64>}, {pipeline_mode = #tpu.pipeline_mode<synchronous>, transform_indices = @transform_6, window_bounds = array<i64: 32, 96>}, {pipeline_mode = #tpu.pipeline_mode<synchronous>, transform_indices = @transform_7, window_bounds = array<i64: 1, 96>}, {pipeline_mode = #tpu.pipeline_mode<synchronous>, transform_indices = @transform_8, window_bounds = array<i64: 32, 32>}, {pipeline_mode = #tpu.pipeline_mode<synchronous>, transform_indices = @transform_9, window_bounds = array<i64: 1, 32>}, {pipeline_mode = #tpu.pipeline_mode<synchronous>, transform_indices = @transform_10, window_bounds = array<i64: 32, 64>}, {pipeline_mode = #tpu.pipeline_mode<synchronous>, transform_indices = @transform_11, window_bounds = array<i64: 1, 64>}, {pipeline_mode = #tpu.pipeline_mode<synchronous>, transform_indices = @transform_12, window_bounds = array<i64: 96, 64>}, {pipeline_mode = #tpu.pipeline_mode<synchronous>, transform_indices = @transform_13, window_bounds = array<i64: 1, 64>}, {pipeline_mode = #tpu.pipeline_mode<synchronous>, transform_indices = @transform_14, window_bounds = array<i64: 64, 32>}, {pipeline_mode = #tpu.pipeline_mode<synchronous>, transform_indices = @transform_15, window_bounds = array<i64: 1, 32>}, {transform_indices = @transform_16, window_bounds = array<i64: 1, 8, 32>}]} {
    %c0 = arith.constant 0 : index
    %c0_0 = arith.constant 0 : index
    %c0_1 = arith.constant 0 : index
    %0 = vector.load %arg1[%c0, %c0_0, %c0_1] : memref<1x8x32xf32, #tpu.memory_space<vmem>>, vector<1x8x32xf32>
    %1 = vector.shape_cast %0 : vector<1x8x32xf32> to vector<8x32xf32>
    %c0_2 = arith.constant 0 : index
    %c0_3 = arith.constant 0 : index
    %c0_4 = arith.constant 0 : index
    %2 = vector.load %arg2[%c0_2, %c0_3, %c0_4] : memref<1x1x32xf32, #tpu.memory_space<vmem>>, vector<1x1x32xf32>
    %3 = vector.shape_cast %2 : vector<1x1x32xf32> to vector<1x32xf32>
    %4 = arith.truncf %3 : vector<1x32xf32> to vector<1x32xbf16>
    %c0_5 = arith.constant 0 : index
    %c0_6 = arith.constant 0 : index
    %c0_7 = arith.constant 0 : index
    %5 = vector.load %arg3[%c0_5, %c0_6, %c0_7] : memref<1x1x8xf32, #tpu.memory_space<vmem>>, vector<1x1x8xf32>
    %6 = vector.shape_cast %5 : vector<1x1x8xf32> to vector<1x8xf32>
    %c0_8 = arith.constant 0 : index
    %c0_9 = arith.constant 0 : index
    %c0_10 = arith.constant 0 : index
    %7 = vector.load %arg4[%c0_8, %c0_9, %c0_10] : memref<1x8x1xf32, #tpu.memory_space<vmem>>, vector<1x8x1xf32>
    %8 = vector.shape_cast %7 : vector<1x8x1xf32> to vector<8x1xf32>
    %cst = arith.constant dense<0.000000e+00> : vector<8xf32>
    %9 = vector.multi_reduction <add>, %1, %cst [1] : vector<8x32xf32> to vector<8xf32>
    %10 = vector.shape_cast %9 : vector<8xf32> to vector<8x1xf32>
    %cst_11 = arith.constant 3.200000e+01 : f32
    %11 = vector.broadcast %cst_11 : f32 to vector<8x1xf32>
    %12 = arith.divf %10, %11 : vector<8x1xf32>
    %13 = vector.broadcast %12 : vector<8x1xf32> to vector<8x32xf32>
    %14 = arith.subf %1, %13 : vector<8x32xf32>
    %15 = arith.mulf %14, %14 : vector<8x32xf32>
    %cst_12 = arith.constant dense<0.000000e+00> : vector<8xf32>
    %16 = vector.multi_reduction <add>, %15, %cst_12 [1] : vector<8x32xf32> to vector<8xf32>
    %17 = vector.shape_cast %16 : vector<8xf32> to vector<8x1xf32>
    %cst_13 = arith.constant 3.200000e+01 : f32
    %18 = vector.broadcast %cst_13 : f32 to vector<8x1xf32>
    %19 = arith.divf %17, %18 : vector<8x1xf32>
    %20 = vector.broadcast %12 : vector<8x1xf32> to vector<8x32xf32>
    %21 = arith.subf %1, %20 : vector<8x32xf32>
    %cst_14 = arith.constant 9.99999974E-6 : f32
    %22 = vector.broadcast %cst_14 : f32 to vector<8x1xf32>
    %23 = arith.addf %19, %22 : vector<8x1xf32>
    %24 = math.rsqrt %23 : vector<8x1xf32>
    %25 = vector.broadcast %24 : vector<8x1xf32> to vector<8x32xf32>
    %26 = arith.mulf %21, %25 : vector<8x32xf32>
    %c0_15 = arith.constant 0 : index
    %c0_16 = arith.constant 0 : index
    %27 = vector.load %arg5[%c0_15, %c0_16] : memref<32x64xbf16, #tpu.memory_space<vmem>>, vector<32x64xbf16>
    %cst_17 = arith.constant dense<0.000000e+00> : vector<1x64xf32>
    %28 = tpu.matmul %4, %27, %cst_17 {dimension_numbers = #tpu.dot_dimension_numbers<[1], [0], [0], [1], [0, 0, 1, 1], [], []>} : vector<1x32xbf16>, vector<32x64xbf16>, vector<1x64xf32> -> vector<1x64xf32>
    %c0_18 = arith.constant 0 : index
    %c0_19 = arith.constant 0 : index
    %29 = vector.load %arg6[%c0_18, %c0_19] : memref<1x64xf32, #tpu.memory_space<vmem>>, vector<1x64xf32>
    %30 = arith.addf %28, %29 : vector<1x64xf32>
    %31 = vector.extract_strided_slice %30 {offsets = [0, 0], sizes = [1, 32], strides = [1, 1]} : vector<1x64xf32> to vector<1x32xf32>
    %cst_20 = arith.constant 1.000000e+00 : f32
    %32 = vector.broadcast %cst_20 : f32 to vector<1x32xf32>
    %33 = arith.addf %32, %31 : vector<1x32xf32>
    %34 = vector.broadcast %33 : vector<1x32xf32> to vector<8x32xf32>
    %35 = arith.mulf %26, %34 : vector<8x32xf32>
    %36 = vector.extract_strided_slice %30 {offsets = [0, 32], sizes = [1, 32], strides = [1, 1]} : vector<1x64xf32> to vector<1x32xf32>
    %37 = vector.broadcast %36 : vector<1x32xf32> to vector<8x32xf32>
    %38 = arith.addf %35, %37 : vector<8x32xf32>
    %39 = arith.truncf %38 : vector<8x32xf32> to vector<8x32xbf16>
    %c0_21 = arith.constant 0 : index
    %c0_22 = arith.constant 0 : index
    %40 = vector.load %arg7[%c0_21, %c0_22] : memref<32x96xbf16, #tpu.memory_space<vmem>>, vector<32x96xbf16>
    %cst_23 = arith.constant dense<0.000000e+00> : vector<8x96xf32>
    %41 = tpu.matmul %39, %40, %cst_23 {dimension_numbers = #tpu.dot_dimension_numbers<[1], [0], [0], [1], [0, 0, 1, 1], [], []>} : vector<8x32xbf16>, vector<32x96xbf16>, vector<8x96xf32> -> vector<8x96xf32>
    %c0_24 = arith.constant 0 : index
    %c0_25 = arith.constant 0 : index
    %42 = vector.load %arg8[%c0_24, %c0_25] : memref<1x96xf32, #tpu.memory_space<vmem>>, vector<1x96xf32>
    %43 = vector.broadcast %42 : vector<1x96xf32> to vector<8x96xf32>
    %44 = arith.addf %41, %43 : vector<8x96xf32>
    %cst_26 = arith.constant 0.000000e+00 : f32
    %45 = vector.broadcast %cst_26 : f32 to vector<8x32xf32>
    %46 = vector.extract_strided_slice %44 {offsets = [0, 0], sizes = [8, 16], strides = [1, 1]} : vector<8x96xf32> to vector<8x16xf32>
    %47 = arith.truncf %46 : vector<8x16xf32> to vector<8x16xbf16>
    %48 = vector.extract_strided_slice %44 {offsets = [0, 32], sizes = [8, 16], strides = [1, 1]} : vector<8x96xf32> to vector<8x16xf32>
    %49 = arith.truncf %48 : vector<8x16xf32> to vector<8x16xbf16>
    %50 = vector.extract_strided_slice %44 {offsets = [0, 64], sizes = [8, 16], strides = [1, 1]} : vector<8x96xf32> to vector<8x16xf32>
    %51 = arith.truncf %50 : vector<8x16xf32> to vector<8x16xbf16>
    %cst_27 = arith.constant dense<0.000000e+00> : vector<8x8xf32>
    %52 = tpu.matmul %47, %49, %cst_27 {dimension_numbers = #tpu.dot_dimension_numbers<[1], [1], [0], [0], [0, 0, 1, 0], [], []>} : vector<8x16xbf16>, vector<8x16xbf16>, vector<8x8xf32> -> vector<8x8xf32>
    %cst_28 = arith.constant 2.500000e-01 : f32
    %53 = vector.broadcast %cst_28 : f32 to vector<8x8xf32>
    %54 = arith.mulf %52, %53 : vector<8x8xf32>
    %55 = vector.broadcast %6 : vector<1x8xf32> to vector<8x8xf32>
    %56 = arith.addf %54, %55 : vector<8x8xf32>
    %cst_29 = arith.constant dense<0xFF800000> : vector<8xf32>
    %57 = vector.multi_reduction <maximumf>, %56, %cst_29 [1] : vector<8x8xf32> to vector<8xf32>
    %58 = vector.shape_cast %57 : vector<8xf32> to vector<8x1xf32>
    %59 = vector.broadcast %58 : vector<8x1xf32> to vector<8x8xf32>
    %60 = arith.subf %56, %59 : vector<8x8xf32>
    %61 = math.exp %60 : vector<8x8xf32>
    %cst_30 = arith.constant dense<0.000000e+00> : vector<8xf32>
    %62 = vector.multi_reduction <add>, %61, %cst_30 [1] : vector<8x8xf32> to vector<8xf32>
    %63 = vector.shape_cast %62 : vector<8xf32> to vector<8x1xf32>
    %64 = tpu.reciprocal %63 {approx = true} : vector<8x1xf32> -> vector<8x1xf32>
    %65 = arith.truncf %61 : vector<8x8xf32> to vector<8x8xbf16>
    %cst_31 = arith.constant dense<0.000000e+00> : vector<8x16xf32>
    %66 = tpu.matmul %65, %51, %cst_31 {dimension_numbers = #tpu.dot_dimension_numbers<[1], [0], [0], [1], [0, 0, 1, 1], [], []>} : vector<8x8xbf16>, vector<8x16xbf16>, vector<8x16xf32> -> vector<8x16xf32>
    %67 = vector.broadcast %64 : vector<8x1xf32> to vector<8x16xf32>
    %68 = arith.mulf %66, %67 : vector<8x16xf32>
    %69 = arith.truncf %68 : vector<8x16xf32> to vector<8x16xbf16>
    %c0_32 = arith.constant 0 : index
    %c0_33 = arith.constant 0 : index
    %70 = vector.load %arg9[%c0_32, %c0_33] : memref<32x32xbf16, #tpu.memory_space<vmem>>, vector<16x32xbf16>
    %cst_34 = arith.constant dense<0.000000e+00> : vector<8x32xf32>
    %71 = tpu.matmul %69, %70, %cst_34 {dimension_numbers = #tpu.dot_dimension_numbers<[1], [0], [0], [1], [0, 0, 1, 1], [], []>} : vector<8x16xbf16>, vector<16x32xbf16>, vector<8x32xf32> -> vector<8x32xf32>
    %72 = arith.addf %45, %71 : vector<8x32xf32>
    %73 = vector.extract_strided_slice %44 {offsets = [0, 16], sizes = [8, 16], strides = [1, 1]} : vector<8x96xf32> to vector<8x16xf32>
    %74 = arith.truncf %73 : vector<8x16xf32> to vector<8x16xbf16>
    %75 = vector.extract_strided_slice %44 {offsets = [0, 48], sizes = [8, 16], strides = [1, 1]} : vector<8x96xf32> to vector<8x16xf32>
    %76 = arith.truncf %75 : vector<8x16xf32> to vector<8x16xbf16>
    %77 = vector.extract_strided_slice %44 {offsets = [0, 80], sizes = [8, 16], strides = [1, 1]} : vector<8x96xf32> to vector<8x16xf32>
    %78 = arith.truncf %77 : vector<8x16xf32> to vector<8x16xbf16>
    %cst_35 = arith.constant dense<0.000000e+00> : vector<8x8xf32>
    %79 = tpu.matmul %74, %76, %cst_35 {dimension_numbers = #tpu.dot_dimension_numbers<[1], [1], [0], [0], [0, 0, 1, 0], [], []>} : vector<8x16xbf16>, vector<8x16xbf16>, vector<8x8xf32> -> vector<8x8xf32>
    %cst_36 = arith.constant 2.500000e-01 : f32
    %80 = vector.broadcast %cst_36 : f32 to vector<8x8xf32>
    %81 = arith.mulf %79, %80 : vector<8x8xf32>
    %82 = vector.broadcast %6 : vector<1x8xf32> to vector<8x8xf32>
    %83 = arith.addf %81, %82 : vector<8x8xf32>
    %cst_37 = arith.constant dense<0xFF800000> : vector<8xf32>
    %84 = vector.multi_reduction <maximumf>, %83, %cst_37 [1] : vector<8x8xf32> to vector<8xf32>
    %85 = vector.shape_cast %84 : vector<8xf32> to vector<8x1xf32>
    %86 = vector.broadcast %85 : vector<8x1xf32> to vector<8x8xf32>
    %87 = arith.subf %83, %86 : vector<8x8xf32>
    %88 = math.exp %87 : vector<8x8xf32>
    %cst_38 = arith.constant dense<0.000000e+00> : vector<8xf32>
    %89 = vector.multi_reduction <add>, %88, %cst_38 [1] : vector<8x8xf32> to vector<8xf32>
    %90 = vector.shape_cast %89 : vector<8xf32> to vector<8x1xf32>
    %91 = tpu.reciprocal %90 {approx = true} : vector<8x1xf32> -> vector<8x1xf32>
    %92 = arith.truncf %88 : vector<8x8xf32> to vector<8x8xbf16>
    %cst_39 = arith.constant dense<0.000000e+00> : vector<8x16xf32>
    %93 = tpu.matmul %92, %78, %cst_39 {dimension_numbers = #tpu.dot_dimension_numbers<[1], [0], [0], [1], [0, 0, 1, 1], [], []>} : vector<8x8xbf16>, vector<8x16xbf16>, vector<8x16xf32> -> vector<8x16xf32>
    %94 = vector.broadcast %91 : vector<8x1xf32> to vector<8x16xf32>
    %95 = arith.mulf %93, %94 : vector<8x16xf32>
    %96 = arith.truncf %95 : vector<8x16xf32> to vector<8x16xbf16>
    %c16 = arith.constant 16 : index
    %c0_40 = arith.constant 0 : index
    %97 = vector.load %arg9[%c16, %c0_40] : memref<32x32xbf16, #tpu.memory_space<vmem>>, vector<16x32xbf16>
    %cst_41 = arith.constant dense<0.000000e+00> : vector<8x32xf32>
    %98 = tpu.matmul %96, %97, %cst_41 {dimension_numbers = #tpu.dot_dimension_numbers<[1], [0], [0], [1], [0, 0, 1, 1], [], []>} : vector<8x16xbf16>, vector<16x32xbf16>, vector<8x32xf32> -> vector<8x32xf32>
    %99 = arith.addf %72, %98 : vector<8x32xf32>
    %100 = arith.addf %1, %99 : vector<8x32xf32>
    %c0_42 = arith.constant 0 : index
    %c0_43 = arith.constant 0 : index
    %101 = vector.load %arg10[%c0_42, %c0_43] : memref<1x32xf32, #tpu.memory_space<vmem>>, vector<1x32xf32>
    %102 = vector.broadcast %101 : vector<1x32xf32> to vector<8x32xf32>
    %103 = arith.addf %100, %102 : vector<8x32xf32>
    %104 = vector.broadcast %8 : vector<8x1xf32> to vector<8x32xf32>
    %105 = arith.mulf %103, %104 : vector<8x32xf32>
    %cst_44 = arith.constant dense<0.000000e+00> : vector<8xf32>
    %106 = vector.multi_reduction <add>, %105, %cst_44 [1] : vector<8x32xf32> to vector<8xf32>
    %107 = vector.shape_cast %106 : vector<8xf32> to vector<8x1xf32>
    %cst_45 = arith.constant 3.200000e+01 : f32
    %108 = vector.broadcast %cst_45 : f32 to vector<8x1xf32>
    %109 = arith.divf %107, %108 : vector<8x1xf32>
    %110 = vector.broadcast %109 : vector<8x1xf32> to vector<8x32xf32>
    %111 = arith.subf %105, %110 : vector<8x32xf32>
    %112 = arith.mulf %111, %111 : vector<8x32xf32>
    %cst_46 = arith.constant dense<0.000000e+00> : vector<8xf32>
    %113 = vector.multi_reduction <add>, %112, %cst_46 [1] : vector<8x32xf32> to vector<8xf32>
    %114 = vector.shape_cast %113 : vector<8xf32> to vector<8x1xf32>
    %cst_47 = arith.constant 3.200000e+01 : f32
    %115 = vector.broadcast %cst_47 : f32 to vector<8x1xf32>
    %116 = arith.divf %114, %115 : vector<8x1xf32>
    %117 = vector.broadcast %109 : vector<8x1xf32> to vector<8x32xf32>
    %118 = arith.subf %105, %117 : vector<8x32xf32>
    %cst_48 = arith.constant 9.99999974E-6 : f32
    %119 = vector.broadcast %cst_48 : f32 to vector<8x1xf32>
    %120 = arith.addf %116, %119 : vector<8x1xf32>
    %121 = math.rsqrt %120 : vector<8x1xf32>
    %122 = vector.broadcast %121 : vector<8x1xf32> to vector<8x32xf32>
    %123 = arith.mulf %118, %122 : vector<8x32xf32>
    %c0_49 = arith.constant 0 : index
    %c0_50 = arith.constant 0 : index
    %124 = vector.load %arg11[%c0_49, %c0_50] : memref<32x64xbf16, #tpu.memory_space<vmem>>, vector<32x64xbf16>
    %cst_51 = arith.constant dense<0.000000e+00> : vector<1x64xf32>
    %125 = tpu.matmul %4, %124, %cst_51 {dimension_numbers = #tpu.dot_dimension_numbers<[1], [0], [0], [1], [0, 0, 1, 1], [], []>} : vector<1x32xbf16>, vector<32x64xbf16>, vector<1x64xf32> -> vector<1x64xf32>
    %c0_52 = arith.constant 0 : index
    %c0_53 = arith.constant 0 : index
    %126 = vector.load %arg12[%c0_52, %c0_53] : memref<1x64xf32, #tpu.memory_space<vmem>>, vector<1x64xf32>
    %127 = arith.addf %125, %126 : vector<1x64xf32>
    %128 = vector.extract_strided_slice %127 {offsets = [0, 0], sizes = [1, 32], strides = [1, 1]} : vector<1x64xf32> to vector<1x32xf32>
    %cst_54 = arith.constant 1.000000e+00 : f32
    %129 = vector.broadcast %cst_54 : f32 to vector<1x32xf32>
    %130 = arith.addf %129, %128 : vector<1x32xf32>
    %131 = vector.broadcast %130 : vector<1x32xf32> to vector<8x32xf32>
    %132 = arith.mulf %123, %131 : vector<8x32xf32>
    %133 = vector.extract_strided_slice %127 {offsets = [0, 32], sizes = [1, 32], strides = [1, 1]} : vector<1x64xf32> to vector<1x32xf32>
    %134 = vector.broadcast %133 : vector<1x32xf32> to vector<8x32xf32>
    %135 = arith.addf %132, %134 : vector<8x32xf32>
    %cst_55 = arith.constant 0.000000e+00 : f32
    %136 = vector.broadcast %cst_55 : f32 to vector<10x32xf32>
    %c0_56 = arith.constant 0 : index
    %c0_57 = arith.constant 0 : index
    %137 = vector.load %arg18[%c0_56, %c0_57] : memref<10x32xf32, #tpu.memory_space<vmem>>, vector<10x32xf32>
    tpu.vector_store %arg18[%c0_56, %c0_57], %136 {strides = array<i32>} : memref<10x32xf32, #tpu.memory_space<vmem>>, vector<10x32xf32>,
    %c1 = arith.constant 1 : index
    %c0_58 = arith.constant 0 : index
    %138 = vector.load %arg18[%c1, %c0_58] : memref<10x32xf32, #tpu.memory_space<vmem>>, vector<8x32xf32>
    tpu.vector_store %arg18[%c1, %c0_58], %135 {strides = array<i32>} : memref<10x32xf32, #tpu.memory_space<vmem>>, vector<8x32xf32>,
    %cst_59 = arith.constant 0.000000e+00 : f32
    %139 = vector.broadcast %cst_59 : f32 to vector<8x64xf32>
    %c0_60 = arith.constant 0 : index
    %c0_61 = arith.constant 0 : index
    %140 = vector.load %arg18[%c0_60, %c0_61] : memref<10x32xf32, #tpu.memory_space<vmem>>, vector<8x32xf32>
    %141 = arith.truncf %140 : vector<8x32xf32> to vector<8x32xbf16>
    %c0_62 = arith.constant 0 : index
    %c0_63 = arith.constant 0 : index
    %142 = vector.load %arg13[%c0_62, %c0_63] : memref<96x64xbf16, #tpu.memory_space<vmem>>, vector<32x64xbf16>
    %cst_64 = arith.constant dense<0.000000e+00> : vector<8x64xf32>
    %143 = tpu.matmul %141, %142, %cst_64 {dimension_numbers = #tpu.dot_dimension_numbers<[1], [0], [0], [1], [0, 0, 1, 1], [], []>} : vector<8x32xbf16>, vector<32x64xbf16>, vector<8x64xf32> -> vector<8x64xf32>
    %144 = arith.addf %139, %143 : vector<8x64xf32>
    %c1_65 = arith.constant 1 : index
    %c0_66 = arith.constant 0 : index
    %145 = vector.load %arg18[%c1_65, %c0_66] : memref<10x32xf32, #tpu.memory_space<vmem>>, vector<8x32xf32>
    %146 = arith.truncf %145 : vector<8x32xf32> to vector<8x32xbf16>
    %c32 = arith.constant 32 : index
    %c0_67 = arith.constant 0 : index
    %147 = vector.load %arg13[%c32, %c0_67] : memref<96x64xbf16, #tpu.memory_space<vmem>>, vector<32x64xbf16>
    %cst_68 = arith.constant dense<0.000000e+00> : vector<8x64xf32>
    %148 = tpu.matmul %146, %147, %cst_68 {dimension_numbers = #tpu.dot_dimension_numbers<[1], [0], [0], [1], [0, 0, 1, 1], [], []>} : vector<8x32xbf16>, vector<32x64xbf16>, vector<8x64xf32> -> vector<8x64xf32>
    %149 = arith.addf %144, %148 : vector<8x64xf32>
    %c2 = arith.constant 2 : index
    %c0_69 = arith.constant 0 : index
    %150 = vector.load %arg18[%c2, %c0_69] : memref<10x32xf32, #tpu.memory_space<vmem>>, vector<8x32xf32>
    %151 = arith.truncf %150 : vector<8x32xf32> to vector<8x32xbf16>
    %c64 = arith.constant 64 : index
    %c0_70 = arith.constant 0 : index
    %152 = vector.load %arg13[%c64, %c0_70] : memref<96x64xbf16, #tpu.memory_space<vmem>>, vector<32x64xbf16>
    %cst_71 = arith.constant dense<0.000000e+00> : vector<8x64xf32>
    %153 = tpu.matmul %151, %152, %cst_71 {dimension_numbers = #tpu.dot_dimension_numbers<[1], [0], [0], [1], [0, 0, 1, 1], [], []>} : vector<8x32xbf16>, vector<32x64xbf16>, vector<8x64xf32> -> vector<8x64xf32>
    %154 = arith.addf %149, %153 : vector<8x64xf32>
    %c0_72 = arith.constant 0 : index
    %c0_73 = arith.constant 0 : index
    %155 = vector.load %arg14[%c0_72, %c0_73] : memref<1x64xf32, #tpu.memory_space<vmem>>, vector<1x64xf32>
    %156 = vector.broadcast %155 : vector<1x64xf32> to vector<8x64xf32>
    %157 = arith.addf %154, %156 : vector<8x64xf32>
    %cst_74 = arith.constant 0.000000e+00 : f32
    %158 = vector.broadcast %cst_74 : f32 to vector<8x64xf32>
    %159 = arith.maximumf %157, %158 : vector<8x64xf32>
    %160 = arith.truncf %159 : vector<8x64xf32> to vector<8x64xbf16>
    %c0_75 = arith.constant 0 : index
    %c0_76 = arith.constant 0 : index
    %161 = vector.load %arg15[%c0_75, %c0_76] : memref<64x32xbf16, #tpu.memory_space<vmem>>, vector<64x32xbf16>
    %cst_77 = arith.constant dense<0.000000e+00> : vector<8x32xf32>
    %162 = tpu.matmul %160, %161, %cst_77 {dimension_numbers = #tpu.dot_dimension_numbers<[1], [0], [0], [1], [0, 0, 1, 1], [], []>} : vector<8x64xbf16>, vector<64x32xbf16>, vector<8x32xf32> -> vector<8x32xf32>
    %c0_78 = arith.constant 0 : index
    %c0_79 = arith.constant 0 : index
    %163 = vector.load %arg16[%c0_78, %c0_79] : memref<1x32xf32, #tpu.memory_space<vmem>>, vector<1x32xf32>
    %164 = vector.broadcast %163 : vector<1x32xf32> to vector<8x32xf32>
    %165 = arith.addf %162, %164 : vector<8x32xf32>
    %166 = arith.addf %105, %165 : vector<8x32xf32>
    %167 = vector.broadcast %8 : vector<8x1xf32> to vector<8x32xf32>
    %168 = arith.mulf %166, %167 : vector<8x32xf32>
    %c0_80 = arith.constant 0 : index
    %c0_81 = arith.constant 0 : index
    %c0_82 = arith.constant 0 : index
    %169 = vector.load %arg17[%c0_80, %c0_81, %c0_82] : memref<1x8x32xf32, #tpu.memory_space<vmem>>, vector<1x8x32xf32>
    %170 = vector.shape_cast %169 : vector<1x8x32xf32> to vector<8x32xf32>
    %171 = vector.shape_cast %168 : vector<8x32xf32> to vector<1x8x32xf32>
    tpu.vector_store %arg17[%c0_80, %c0_81, %c0_82], %171 {strides = array<i32>} : memref<1x8x32xf32, #tpu.memory_space<vmem>>, vector<1x8x32xf32>,
    return
  }
  func.func @transform_0(%arg0: i32) -> (i32, i32, i32) {
    %c0_i32 = arith.constant 0 : i32
    %c0_i32_0 = arith.constant 0 : i32
    %c0_i32_1 = arith.constant 0 : i32
    return %arg0, %c0_i32, %c0_i32_0 : i32, i32, i32
  }
  func.func @transform_1(%arg0: i32) -> (i32, i32, i32) {
    %c0_i32 = arith.constant 0 : i32
    %c0_i32_0 = arith.constant 0 : i32
    %c0_i32_1 = arith.constant 0 : i32
    return %arg0, %c0_i32, %c0_i32_0 : i32, i32, i32
  }
  func.func @transform_2(%arg0: i32) -> (i32, i32, i32) {
    %c0_i32 = arith.constant 0 : i32
    %c0_i32_0 = arith.constant 0 : i32
    %c0_i32_1 = arith.constant 0 : i32
    return %arg0, %c0_i32, %c0_i32_0 : i32, i32, i32
  }
  func.func @transform_3(%arg0: i32) -> (i32, i32, i32) {
    %c0_i32 = arith.constant 0 : i32
    %c0_i32_0 = arith.constant 0 : i32
    %c0_i32_1 = arith.constant 0 : i32
    return %arg0, %c0_i32, %c0_i32_0 : i32, i32, i32
  }
  func.func @transform_4(%arg0: i32) -> (i32, i32) {
    %c0_i32 = arith.constant 0 : i32
    %c0_i32_0 = arith.constant 0 : i32
    %c0_i32_1 = arith.constant 0 : i32
    return %c0_i32, %c0_i32_0 : i32, i32
  }
  func.func @transform_5(%arg0: i32) -> (i32, i32) {
    %c0_i32 = arith.constant 0 : i32
    %c0_i32_0 = arith.constant 0 : i32
    %c0_i32_1 = arith.constant 0 : i32
    return %c0_i32, %c0_i32_0 : i32, i32
  }
  func.func @transform_6(%arg0: i32) -> (i32, i32) {
    %c0_i32 = arith.constant 0 : i32
    %c0_i32_0 = arith.constant 0 : i32
    %c0_i32_1 = arith.constant 0 : i32
    return %c0_i32, %c0_i32_0 : i32, i32
  }
  func.func @transform_7(%arg0: i32) -> (i32, i32) {
    %c0_i32 = arith.constant 0 : i32
    %c0_i32_0 = arith.constant 0 : i32
    %c0_i32_1 = arith.constant 0 : i32
    return %c0_i32, %c0_i32_0 : i32, i32
  }
  func.func @transform_8(%arg0: i32) -> (i32, i32) {
    %c0_i32 = arith.constant 0 : i32
    %c0_i32_0 = arith.constant 0 : i32
    %c0_i32_1 = arith.constant 0 : i32
    return %c0_i32, %c0_i32_0 : i32, i32
  }
  func.func @transform_9(%arg0: i32) -> (i32, i32) {
    %c0_i32 = arith.constant 0 : i32
    %c0_i32_0 = arith.constant 0 : i32
    %c0_i32_1 = arith.constant 0 : i32
    return %c0_i32, %c0_i32_0 : i32, i32
  }
  func.func @transform_10(%arg0: i32) -> (i32, i32) {
    %c0_i32 = arith.constant 0 : i32
    %c0_i32_0 = arith.constant 0 : i32
    %c0_i32_1 = arith.constant 0 : i32
    return %c0_i32, %c0_i32_0 : i32, i32
  }
  func.func @transform_11(%arg0: i32) -> (i32, i32) {
    %c0_i32 = arith.constant 0 : i32
    %c0_i32_0 = arith.constant 0 : i32
    %c0_i32_1 = arith.constant 0 : i32
    return %c0_i32, %c0_i32_0 : i32, i32
  }
  func.func @transform_12(%arg0: i32) -> (i32, i32) {
    %c0_i32 = arith.constant 0 : i32
    %c0_i32_0 = arith.constant 0 : i32
    %c0_i32_1 = arith.constant 0 : i32
    return %c0_i32, %c0_i32_0 : i32, i32
  }
  func.func @transform_13(%arg0: i32) -> (i32, i32) {
    %c0_i32 = arith.constant 0 : i32
    %c0_i32_0 = arith.constant 0 : i32
    %c0_i32_1 = arith.constant 0 : i32
    return %c0_i32, %c0_i32_0 : i32, i32
  }
  func.func @transform_14(%arg0: i32) -> (i32, i32) {
    %c0_i32 = arith.constant 0 : i32
    %c0_i32_0 = arith.constant 0 : i32
    %c0_i32_1 = arith.constant 0 : i32
    return %c0_i32, %c0_i32_0 : i32, i32
  }
  func.func @transform_15(%arg0: i32) -> (i32, i32) {
    %c0_i32 = arith.constant 0 : i32
    %c0_i32_0 = arith.constant 0 : i32
    %c0_i32_1 = arith.constant 0 : i32
    return %c0_i32, %c0_i32_0 : i32, i32
  }
  func.func @transform_16(%arg0: i32) -> (i32, i32, i32) {
    %c0_i32 = arith.constant 0 : i32
    %c0_i32_0 = arith.constant 0 : i32
    %c0_i32_1 = arith.constant 0 : i32
    return %arg0, %c0_i32, %c0_i32_0 : i32, i32, i32
  }
}

module attributes {stable_mosaic.version = 11 : i64} {
  func.func @kernel(%arg0: i32, %arg1: memref<1x8x32xf32, #tpu.memory_space<vmem>>, %arg2: memref<1x1x32xf32, #tpu.memory_space<vmem>>, %arg3: memref<1x8x1xf32, #tpu.memory_space<vmem>>, %arg4: memref<32x64xbf16, #tpu.memory_space<vmem>>, %arg5: memref<1x64xf32, #tpu.memory_space<vmem>>, %arg6: memref<1x8x32xf32, #tpu.memory_space<vmem>>) attributes {dimension_semantics = [#tpu.dimension_semantics<parallel>], iteration_bounds = array<i64: 2>, scalar_prefetch = 0 : i64, scratch_operands = 0 : i64, tpu.core_type = #tpu.core_type<tc>, window_params = [{transform_indices = @transform_0, window_bounds = array<i64: 1, 8, 32>}, {transform_indices = @transform_1, window_bounds = array<i64: 1, 1, 32>}, {transform_indices = @transform_2, window_bounds = array<i64: 1, 8, 1>}, {pipeline_mode = #tpu.pipeline_mode<synchronous>, transform_indices = @transform_3, window_bounds = array<i64: 32, 64>}, {pipeline_mode = #tpu.pipeline_mode<synchronous>, transform_indices = @transform_4, window_bounds = array<i64: 1, 64>}, {transform_indices = @transform_5, window_bounds = array<i64: 1, 8, 32>}]} {
    %c0 = arith.constant 0 : index
    %c0_0 = arith.constant 0 : index
    %c0_1 = arith.constant 0 : index
    %0 = vector.load %arg1[%c0, %c0_0, %c0_1] : memref<1x8x32xf32, #tpu.memory_space<vmem>>, vector<1x8x32xf32>
    %1 = vector.shape_cast %0 : vector<1x8x32xf32> to vector<8x32xf32>
    %c0_2 = arith.constant 0 : index
    %c0_3 = arith.constant 0 : index
    %c0_4 = arith.constant 0 : index
    %2 = vector.load %arg2[%c0_2, %c0_3, %c0_4] : memref<1x1x32xf32, #tpu.memory_space<vmem>>, vector<1x1x32xf32>
    %3 = vector.shape_cast %2 : vector<1x1x32xf32> to vector<1x32xf32>
    %4 = arith.truncf %3 : vector<1x32xf32> to vector<1x32xbf16>
    %cst = arith.constant dense<0.000000e+00> : vector<8xf32>
    %5 = vector.multi_reduction <add>, %1, %cst [1] : vector<8x32xf32> to vector<8xf32>
    %6 = vector.shape_cast %5 : vector<8xf32> to vector<8x1xf32>
    %cst_5 = arith.constant 3.200000e+01 : f32
    %7 = vector.broadcast %cst_5 : f32 to vector<8x1xf32>
    %8 = arith.divf %6, %7 : vector<8x1xf32>
    %9 = vector.broadcast %8 : vector<8x1xf32> to vector<8x32xf32>
    %10 = arith.subf %1, %9 : vector<8x32xf32>
    %11 = arith.mulf %10, %10 : vector<8x32xf32>
    %cst_6 = arith.constant dense<0.000000e+00> : vector<8xf32>
    %12 = vector.multi_reduction <add>, %11, %cst_6 [1] : vector<8x32xf32> to vector<8xf32>
    %13 = vector.shape_cast %12 : vector<8xf32> to vector<8x1xf32>
    %cst_7 = arith.constant 3.200000e+01 : f32
    %14 = vector.broadcast %cst_7 : f32 to vector<8x1xf32>
    %15 = arith.divf %13, %14 : vector<8x1xf32>
    %16 = vector.broadcast %8 : vector<8x1xf32> to vector<8x32xf32>
    %17 = arith.subf %1, %16 : vector<8x32xf32>
    %cst_8 = arith.constant 9.99999974E-6 : f32
    %18 = vector.broadcast %cst_8 : f32 to vector<8x1xf32>
    %19 = arith.addf %15, %18 : vector<8x1xf32>
    %20 = math.rsqrt %19 : vector<8x1xf32>
    %21 = vector.broadcast %20 : vector<8x1xf32> to vector<8x32xf32>
    %22 = arith.mulf %17, %21 : vector<8x32xf32>
    %c0_9 = arith.constant 0 : index
    %c0_10 = arith.constant 0 : index
    %23 = vector.load %arg4[%c0_9, %c0_10] : memref<32x64xbf16, #tpu.memory_space<vmem>>, vector<32x64xbf16>
    %cst_11 = arith.constant dense<0.000000e+00> : vector<1x64xf32>
    %24 = tpu.matmul %4, %23, %cst_11 {dimension_numbers = #tpu.dot_dimension_numbers<[1], [0], [0], [1], [0, 0, 1, 1], [], []>} : vector<1x32xbf16>, vector<32x64xbf16>, vector<1x64xf32> -> vector<1x64xf32>
    %c0_12 = arith.constant 0 : index
    %c0_13 = arith.constant 0 : index
    %25 = vector.load %arg5[%c0_12, %c0_13] : memref<1x64xf32, #tpu.memory_space<vmem>>, vector<1x64xf32>
    %26 = arith.addf %24, %25 : vector<1x64xf32>
    %27 = vector.extract_strided_slice %26 {offsets = [0, 0], sizes = [1, 32], strides = [1, 1]} : vector<1x64xf32> to vector<1x32xf32>
    %cst_14 = arith.constant 1.000000e+00 : f32
    %28 = vector.broadcast %cst_14 : f32 to vector<1x32xf32>
    %29 = arith.addf %28, %27 : vector<1x32xf32>
    %30 = vector.broadcast %29 : vector<1x32xf32> to vector<8x32xf32>
    %31 = arith.mulf %22, %30 : vector<8x32xf32>
    %32 = vector.extract_strided_slice %26 {offsets = [0, 32], sizes = [1, 32], strides = [1, 1]} : vector<1x64xf32> to vector<1x32xf32>
    %33 = vector.broadcast %32 : vector<1x32xf32> to vector<8x32xf32>
    %34 = arith.addf %31, %33 : vector<8x32xf32>
    %c0_15 = arith.constant 0 : index
    %c0_16 = arith.constant 0 : index
    %c0_17 = arith.constant 0 : index
    %35 = vector.load %arg3[%c0_15, %c0_16, %c0_17] : memref<1x8x1xf32, #tpu.memory_space<vmem>>, vector<1x8x1xf32>
    %36 = vector.shape_cast %35 : vector<1x8x1xf32> to vector<8x1xf32>
    %37 = vector.broadcast %36 : vector<8x1xf32> to vector<8x32xf32>
    %38 = arith.mulf %34, %37 : vector<8x32xf32>
    %c0_18 = arith.constant 0 : index
    %c0_19 = arith.constant 0 : index
    %c0_20 = arith.constant 0 : index
    %39 = vector.load %arg6[%c0_18, %c0_19, %c0_20] : memref<1x8x32xf32, #tpu.memory_space<vmem>>, vector<1x8x32xf32>
    %40 = vector.shape_cast %39 : vector<1x8x32xf32> to vector<8x32xf32>
    %41 = vector.shape_cast %38 : vector<8x32xf32> to vector<1x8x32xf32>
    tpu.vector_store %arg6[%c0_18, %c0_19, %c0_20], %41 {strides = array<i32>} : memref<1x8x32xf32, #tpu.memory_space<vmem>>, vector<1x8x32xf32>,
    return
  }
  func.func @transform_0(%arg0: i32) -> (i32, i32, i32) {
    %c0_i32 = arith.constant 0 : i32
    %c0_i32_0 = arith.constant 0 : i32
    %c0_i32_1 = arith.constant 0 : i32
    return %arg0, %c0_i32, %c0_i32_0 : i32, i32, i32
  }
  func.func @transform_1(%arg0: i32) -> (i32, i32, i32) {
    %c0_i32 = arith.constant 0 : i32
    %c0_i32_0 = arith.constant 0 : i32
    %c0_i32_1 = arith.constant 0 : i32
    return %arg0, %c0_i32, %c0_i32_0 : i32, i32, i32
  }
  func.func @transform_2(%arg0: i32) -> (i32, i32, i32) {
    %c0_i32 = arith.constant 0 : i32
    %c0_i32_0 = arith.constant 0 : i32
    %c0_i32_1 = arith.constant 0 : i32
    return %arg0, %c0_i32, %c0_i32_0 : i32, i32, i32
  }
  func.func @transform_3(%arg0: i32) -> (i32, i32) {
    %c0_i32 = arith.constant 0 : i32
    %c0_i32_0 = arith.constant 0 : i32
    %c0_i32_1 = arith.constant 0 : i32
    return %c0_i32, %c0_i32_0 : i32, i32
  }
  func.func @transform_4(%arg0: i32) -> (i32, i32) {
    %c0_i32 = arith.constant 0 : i32
    %c0_i32_0 = arith.constant 0 : i32
    %c0_i32_1 = arith.constant 0 : i32
    return %c0_i32, %c0_i32_0 : i32, i32
  }
  func.func @transform_5(%arg0: i32) -> (i32, i32, i32) {
    %c0_i32 = arith.constant 0 : i32
    %c0_i32_0 = arith.constant 0 : i32
    %c0_i32_1 = arith.constant 0 : i32
    return %arg0, %c0_i32, %c0_i32_0 : i32, i32, i32
  }
}

module attributes {stable_mosaic.version = 11 : i64} {
  func.func @kernel(%arg0: i32, %arg1: memref<1x8x32xf32, #tpu.memory_space<vmem>>, %arg2: memref<1x8x1xf32, #tpu.memory_space<vmem>>, %arg3: memref<96x32xbf16, #tpu.memory_space<vmem>>, %arg4: memref<1x32xf32, #tpu.memory_space<vmem>>, %arg5: memref<1x32xf32, #tpu.memory_space<vmem>>, %arg6: memref<1x32xf32, #tpu.memory_space<vmem>>, %arg7: memref<96x32xbf16, #tpu.memory_space<vmem>>, %arg8: memref<1x32xf32, #tpu.memory_space<vmem>>, %arg9: memref<1x32xf32, #tpu.memory_space<vmem>>, %arg10: memref<1x32xf32, #tpu.memory_space<vmem>>, %arg11: memref<32x1xbf16, #tpu.memory_space<vmem>>, %arg12: memref<1x1xf32, #tpu.memory_space<vmem>>, %arg13: memref<1x8x1xf32, #tpu.memory_space<vmem>>, %arg14: memref<10x32xf32, #tpu.memory_space<vmem>>) attributes {dimension_semantics = [#tpu.dimension_semantics<parallel>], iteration_bounds = array<i64: 2>, scalar_prefetch = 0 : i64, scratch_operands = 1 : i64, tpu.core_type = #tpu.core_type<tc>, window_params = [{transform_indices = @transform_0, window_bounds = array<i64: 1, 8, 32>}, {transform_indices = @transform_1, window_bounds = array<i64: 1, 8, 1>}, {pipeline_mode = #tpu.pipeline_mode<synchronous>, transform_indices = @transform_2, window_bounds = array<i64: 96, 32>}, {pipeline_mode = #tpu.pipeline_mode<synchronous>, transform_indices = @transform_3, window_bounds = array<i64: 1, 32>}, {pipeline_mode = #tpu.pipeline_mode<synchronous>, transform_indices = @transform_4, window_bounds = array<i64: 1, 32>}, {pipeline_mode = #tpu.pipeline_mode<synchronous>, transform_indices = @transform_5, window_bounds = array<i64: 1, 32>}, {pipeline_mode = #tpu.pipeline_mode<synchronous>, transform_indices = @transform_6, window_bounds = array<i64: 96, 32>}, {pipeline_mode = #tpu.pipeline_mode<synchronous>, transform_indices = @transform_7, window_bounds = array<i64: 1, 32>}, {pipeline_mode = #tpu.pipeline_mode<synchronous>, transform_indices = @transform_8, window_bounds = array<i64: 1, 32>}, {pipeline_mode = #tpu.pipeline_mode<synchronous>, transform_indices = @transform_9, window_bounds = array<i64: 1, 32>}, {pipeline_mode = #tpu.pipeline_mode<synchronous>, transform_indices = @transform_10, window_bounds = array<i64: 32, 1>}, {pipeline_mode = #tpu.pipeline_mode<synchronous>, transform_indices = @transform_11, window_bounds = array<i64: 1, 1>}, {transform_indices = @transform_12, window_bounds = array<i64: 1, 8, 1>}]} {
    %c0 = arith.constant 0 : index
    %c0_0 = arith.constant 0 : index
    %c0_1 = arith.constant 0 : index
    %0 = vector.load %arg1[%c0, %c0_0, %c0_1] : memref<1x8x32xf32, #tpu.memory_space<vmem>>, vector<1x8x32xf32>
    %1 = vector.shape_cast %0 : vector<1x8x32xf32> to vector<8x32xf32>
    %c0_2 = arith.constant 0 : index
    %c0_3 = arith.constant 0 : index
    %c0_4 = arith.constant 0 : index
    %2 = vector.load %arg2[%c0_2, %c0_3, %c0_4] : memref<1x8x1xf32, #tpu.memory_space<vmem>>, vector<1x8x1xf32>
    %3 = vector.shape_cast %2 : vector<1x8x1xf32> to vector<8x1xf32>
    %cst = arith.constant 0.000000e+00 : f32
    %4 = vector.broadcast %cst : f32 to vector<10x32xf32>
    %c0_5 = arith.constant 0 : index
    %c0_6 = arith.constant 0 : index
    %5 = vector.load %arg14[%c0_5, %c0_6] : memref<10x32xf32, #tpu.memory_space<vmem>>, vector<10x32xf32>
    tpu.vector_store %arg14[%c0_5, %c0_6], %4 {strides = array<i32>} : memref<10x32xf32, #tpu.memory_space<vmem>>, vector<10x32xf32>,
    %c1 = arith.constant 1 : index
    %c0_7 = arith.constant 0 : index
    %6 = vector.load %arg14[%c1, %c0_7] : memref<10x32xf32, #tpu.memory_space<vmem>>, vector<8x32xf32>
    tpu.vector_store %arg14[%c1, %c0_7], %1 {strides = array<i32>} : memref<10x32xf32, #tpu.memory_space<vmem>>, vector<8x32xf32>,
    %cst_8 = arith.constant 0.000000e+00 : f32
    %7 = vector.broadcast %cst_8 : f32 to vector<8x32xf32>
    %c0_9 = arith.constant 0 : index
    %c0_10 = arith.constant 0 : index
    %8 = vector.load %arg14[%c0_9, %c0_10] : memref<10x32xf32, #tpu.memory_space<vmem>>, vector<8x32xf32>
    %9 = arith.truncf %8 : vector<8x32xf32> to vector<8x32xbf16>
    %c0_11 = arith.constant 0 : index
    %c0_12 = arith.constant 0 : index
    %10 = vector.load %arg3[%c0_11, %c0_12] : memref<96x32xbf16, #tpu.memory_space<vmem>>, vector<32x32xbf16>
    %cst_13 = arith.constant dense<0.000000e+00> : vector<8x32xf32>
    %11 = tpu.matmul %9, %10, %cst_13 {dimension_numbers = #tpu.dot_dimension_numbers<[1], [0], [0], [1], [0, 0, 1, 1], [], []>} : vector<8x32xbf16>, vector<32x32xbf16>, vector<8x32xf32> -> vector<8x32xf32>
    %12 = arith.addf %7, %11 : vector<8x32xf32>
    %c1_14 = arith.constant 1 : index
    %c0_15 = arith.constant 0 : index
    %13 = vector.load %arg14[%c1_14, %c0_15] : memref<10x32xf32, #tpu.memory_space<vmem>>, vector<8x32xf32>
    %14 = arith.truncf %13 : vector<8x32xf32> to vector<8x32xbf16>
    %c32 = arith.constant 32 : index
    %c0_16 = arith.constant 0 : index
    %15 = vector.load %arg3[%c32, %c0_16] : memref<96x32xbf16, #tpu.memory_space<vmem>>, vector<32x32xbf16>
    %cst_17 = arith.constant dense<0.000000e+00> : vector<8x32xf32>
    %16 = tpu.matmul %14, %15, %cst_17 {dimension_numbers = #tpu.dot_dimension_numbers<[1], [0], [0], [1], [0, 0, 1, 1], [], []>} : vector<8x32xbf16>, vector<32x32xbf16>, vector<8x32xf32> -> vector<8x32xf32>
    %17 = arith.addf %12, %16 : vector<8x32xf32>
    %c2 = arith.constant 2 : index
    %c0_18 = arith.constant 0 : index
    %18 = vector.load %arg14[%c2, %c0_18] : memref<10x32xf32, #tpu.memory_space<vmem>>, vector<8x32xf32>
    %19 = arith.truncf %18 : vector<8x32xf32> to vector<8x32xbf16>
    %c64 = arith.constant 64 : index
    %c0_19 = arith.constant 0 : index
    %20 = vector.load %arg3[%c64, %c0_19] : memref<96x32xbf16, #tpu.memory_space<vmem>>, vector<32x32xbf16>
    %cst_20 = arith.constant dense<0.000000e+00> : vector<8x32xf32>
    %21 = tpu.matmul %19, %20, %cst_20 {dimension_numbers = #tpu.dot_dimension_numbers<[1], [0], [0], [1], [0, 0, 1, 1], [], []>} : vector<8x32xbf16>, vector<32x32xbf16>, vector<8x32xf32> -> vector<8x32xf32>
    %22 = arith.addf %17, %21 : vector<8x32xf32>
    %c0_21 = arith.constant 0 : index
    %c0_22 = arith.constant 0 : index
    %23 = vector.load %arg4[%c0_21, %c0_22] : memref<1x32xf32, #tpu.memory_space<vmem>>, vector<1x32xf32>
    %24 = vector.broadcast %23 : vector<1x32xf32> to vector<8x32xf32>
    %25 = arith.addf %22, %24 : vector<8x32xf32>
    %cst_23 = arith.constant 0.000000e+00 : f32
    %26 = vector.broadcast %cst_23 : f32 to vector<8x32xf32>
    %27 = arith.maximumf %25, %26 : vector<8x32xf32>
    %cst_24 = arith.constant dense<0.000000e+00> : vector<8xf32>
    %28 = vector.multi_reduction <add>, %27, %cst_24 [1] : vector<8x32xf32> to vector<8xf32>
    %29 = vector.shape_cast %28 : vector<8xf32> to vector<8x1xf32>
    %cst_25 = arith.constant 3.200000e+01 : f32
    %30 = vector.broadcast %cst_25 : f32 to vector<8x1xf32>
    %31 = arith.divf %29, %30 : vector<8x1xf32>
    %32 = vector.broadcast %31 : vector<8x1xf32> to vector<8x32xf32>
    %33 = arith.subf %27, %32 : vector<8x32xf32>
    %34 = arith.mulf %33, %33 : vector<8x32xf32>
    %cst_26 = arith.constant dense<0.000000e+00> : vector<8xf32>
    %35 = vector.multi_reduction <add>, %34, %cst_26 [1] : vector<8x32xf32> to vector<8xf32>
    %36 = vector.shape_cast %35 : vector<8xf32> to vector<8x1xf32>
    %cst_27 = arith.constant 3.200000e+01 : f32
    %37 = vector.broadcast %cst_27 : f32 to vector<8x1xf32>
    %38 = arith.divf %36, %37 : vector<8x1xf32>
    %39 = vector.broadcast %31 : vector<8x1xf32> to vector<8x32xf32>
    %40 = arith.subf %27, %39 : vector<8x32xf32>
    %cst_28 = arith.constant 9.99999974E-6 : f32
    %41 = vector.broadcast %cst_28 : f32 to vector<8x1xf32>
    %42 = arith.addf %38, %41 : vector<8x1xf32>
    %43 = math.rsqrt %42 : vector<8x1xf32>
    %44 = vector.broadcast %43 : vector<8x1xf32> to vector<8x32xf32>
    %45 = arith.mulf %40, %44 : vector<8x32xf32>
    %c0_29 = arith.constant 0 : index
    %c0_30 = arith.constant 0 : index
    %46 = vector.load %arg5[%c0_29, %c0_30] : memref<1x32xf32, #tpu.memory_space<vmem>>, vector<1x32xf32>
    %47 = vector.broadcast %46 : vector<1x32xf32> to vector<8x32xf32>
    %48 = arith.mulf %45, %47 : vector<8x32xf32>
    %c0_31 = arith.constant 0 : index
    %c0_32 = arith.constant 0 : index
    %49 = vector.load %arg6[%c0_31, %c0_32] : memref<1x32xf32, #tpu.memory_space<vmem>>, vector<1x32xf32>
    %50 = vector.broadcast %49 : vector<1x32xf32> to vector<8x32xf32>
    %51 = arith.addf %48, %50 : vector<8x32xf32>
    %52 = vector.broadcast %3 : vector<8x1xf32> to vector<8x32xf32>
    %53 = arith.mulf %51, %52 : vector<8x32xf32>
    %cst_33 = arith.constant 0.000000e+00 : f32
    %54 = vector.broadcast %cst_33 : f32 to vector<10x32xf32>
    %c0_34 = arith.constant 0 : index
    %c0_35 = arith.constant 0 : index
    %55 = vector.load %arg14[%c0_34, %c0_35] : memref<10x32xf32, #tpu.memory_space<vmem>>, vector<10x32xf32>
    tpu.vector_store %arg14[%c0_34, %c0_35], %54 {strides = array<i32>} : memref<10x32xf32, #tpu.memory_space<vmem>>, vector<10x32xf32>,
    %c1_36 = arith.constant 1 : index
    %c0_37 = arith.constant 0 : index
    %56 = vector.load %arg14[%c1_36, %c0_37] : memref<10x32xf32, #tpu.memory_space<vmem>>, vector<8x32xf32>
    tpu.vector_store %arg14[%c1_36, %c0_37], %53 {strides = array<i32>} : memref<10x32xf32, #tpu.memory_space<vmem>>, vector<8x32xf32>,
    %cst_38 = arith.constant 0.000000e+00 : f32
    %57 = vector.broadcast %cst_38 : f32 to vector<8x32xf32>
    %c0_39 = arith.constant 0 : index
    %c0_40 = arith.constant 0 : index
    %58 = vector.load %arg14[%c0_39, %c0_40] : memref<10x32xf32, #tpu.memory_space<vmem>>, vector<8x32xf32>
    %59 = arith.truncf %58 : vector<8x32xf32> to vector<8x32xbf16>
    %c0_41 = arith.constant 0 : index
    %c0_42 = arith.constant 0 : index
    %60 = vector.load %arg7[%c0_41, %c0_42] : memref<96x32xbf16, #tpu.memory_space<vmem>>, vector<32x32xbf16>
    %cst_43 = arith.constant dense<0.000000e+00> : vector<8x32xf32>
    %61 = tpu.matmul %59, %60, %cst_43 {dimension_numbers = #tpu.dot_dimension_numbers<[1], [0], [0], [1], [0, 0, 1, 1], [], []>} : vector<8x32xbf16>, vector<32x32xbf16>, vector<8x32xf32> -> vector<8x32xf32>
    %62 = arith.addf %57, %61 : vector<8x32xf32>
    %c1_44 = arith.constant 1 : index
    %c0_45 = arith.constant 0 : index
    %63 = vector.load %arg14[%c1_44, %c0_45] : memref<10x32xf32, #tpu.memory_space<vmem>>, vector<8x32xf32>
    %64 = arith.truncf %63 : vector<8x32xf32> to vector<8x32xbf16>
    %c32_46 = arith.constant 32 : index
    %c0_47 = arith.constant 0 : index
    %65 = vector.load %arg7[%c32_46, %c0_47] : memref<96x32xbf16, #tpu.memory_space<vmem>>, vector<32x32xbf16>
    %cst_48 = arith.constant dense<0.000000e+00> : vector<8x32xf32>
    %66 = tpu.matmul %64, %65, %cst_48 {dimension_numbers = #tpu.dot_dimension_numbers<[1], [0], [0], [1], [0, 0, 1, 1], [], []>} : vector<8x32xbf16>, vector<32x32xbf16>, vector<8x32xf32> -> vector<8x32xf32>
    %67 = arith.addf %62, %66 : vector<8x32xf32>
    %c2_49 = arith.constant 2 : index
    %c0_50 = arith.constant 0 : index
    %68 = vector.load %arg14[%c2_49, %c0_50] : memref<10x32xf32, #tpu.memory_space<vmem>>, vector<8x32xf32>
    %69 = arith.truncf %68 : vector<8x32xf32> to vector<8x32xbf16>
    %c64_51 = arith.constant 64 : index
    %c0_52 = arith.constant 0 : index
    %70 = vector.load %arg7[%c64_51, %c0_52] : memref<96x32xbf16, #tpu.memory_space<vmem>>, vector<32x32xbf16>
    %cst_53 = arith.constant dense<0.000000e+00> : vector<8x32xf32>
    %71 = tpu.matmul %69, %70, %cst_53 {dimension_numbers = #tpu.dot_dimension_numbers<[1], [0], [0], [1], [0, 0, 1, 1], [], []>} : vector<8x32xbf16>, vector<32x32xbf16>, vector<8x32xf32> -> vector<8x32xf32>
    %72 = arith.addf %67, %71 : vector<8x32xf32>
    %c0_54 = arith.constant 0 : index
    %c0_55 = arith.constant 0 : index
    %73 = vector.load %arg8[%c0_54, %c0_55] : memref<1x32xf32, #tpu.memory_space<vmem>>, vector<1x32xf32>
    %74 = vector.broadcast %73 : vector<1x32xf32> to vector<8x32xf32>
    %75 = arith.addf %72, %74 : vector<8x32xf32>
    %cst_56 = arith.constant 0.000000e+00 : f32
    %76 = vector.broadcast %cst_56 : f32 to vector<8x32xf32>
    %77 = arith.maximumf %75, %76 : vector<8x32xf32>
    %cst_57 = arith.constant dense<0.000000e+00> : vector<8xf32>
    %78 = vector.multi_reduction <add>, %77, %cst_57 [1] : vector<8x32xf32> to vector<8xf32>
    %79 = vector.shape_cast %78 : vector<8xf32> to vector<8x1xf32>
    %cst_58 = arith.constant 3.200000e+01 : f32
    %80 = vector.broadcast %cst_58 : f32 to vector<8x1xf32>
    %81 = arith.divf %79, %80 : vector<8x1xf32>
    %82 = vector.broadcast %81 : vector<8x1xf32> to vector<8x32xf32>
    %83 = arith.subf %77, %82 : vector<8x32xf32>
    %84 = arith.mulf %83, %83 : vector<8x32xf32>
    %cst_59 = arith.constant dense<0.000000e+00> : vector<8xf32>
    %85 = vector.multi_reduction <add>, %84, %cst_59 [1] : vector<8x32xf32> to vector<8xf32>
    %86 = vector.shape_cast %85 : vector<8xf32> to vector<8x1xf32>
    %cst_60 = arith.constant 3.200000e+01 : f32
    %87 = vector.broadcast %cst_60 : f32 to vector<8x1xf32>
    %88 = arith.divf %86, %87 : vector<8x1xf32>
    %89 = vector.broadcast %81 : vector<8x1xf32> to vector<8x32xf32>
    %90 = arith.subf %77, %89 : vector<8x32xf32>
    %cst_61 = arith.constant 9.99999974E-6 : f32
    %91 = vector.broadcast %cst_61 : f32 to vector<8x1xf32>
    %92 = arith.addf %88, %91 : vector<8x1xf32>
    %93 = math.rsqrt %92 : vector<8x1xf32>
    %94 = vector.broadcast %93 : vector<8x1xf32> to vector<8x32xf32>
    %95 = arith.mulf %90, %94 : vector<8x32xf32>
    %c0_62 = arith.constant 0 : index
    %c0_63 = arith.constant 0 : index
    %96 = vector.load %arg9[%c0_62, %c0_63] : memref<1x32xf32, #tpu.memory_space<vmem>>, vector<1x32xf32>
    %97 = vector.broadcast %96 : vector<1x32xf32> to vector<8x32xf32>
    %98 = arith.mulf %95, %97 : vector<8x32xf32>
    %c0_64 = arith.constant 0 : index
    %c0_65 = arith.constant 0 : index
    %99 = vector.load %arg10[%c0_64, %c0_65] : memref<1x32xf32, #tpu.memory_space<vmem>>, vector<1x32xf32>
    %100 = vector.broadcast %99 : vector<1x32xf32> to vector<8x32xf32>
    %101 = arith.addf %98, %100 : vector<8x32xf32>
    %102 = vector.broadcast %3 : vector<8x1xf32> to vector<8x32xf32>
    %103 = arith.mulf %101, %102 : vector<8x32xf32>
    %104 = arith.truncf %103 : vector<8x32xf32> to vector<8x32xbf16>
    %c0_66 = arith.constant 0 : index
    %c0_67 = arith.constant 0 : index
    %105 = vector.load %arg11[%c0_66, %c0_67] : memref<32x1xbf16, #tpu.memory_space<vmem>>, vector<32x1xbf16>
    %cst_68 = arith.constant dense<0.000000e+00> : vector<8x1xf32>
    %106 = tpu.matmul %104, %105, %cst_68 {dimension_numbers = #tpu.dot_dimension_numbers<[1], [0], [0], [1], [0, 0, 1, 1], [], []>} : vector<8x32xbf16>, vector<32x1xbf16>, vector<8x1xf32> -> vector<8x1xf32>
    %c0_69 = arith.constant 0 : index
    %c0_70 = arith.constant 0 : index
    %107 = vector.load %arg12[%c0_69, %c0_70] : memref<1x1xf32, #tpu.memory_space<vmem>>, vector<1x1xf32>
    %108 = vector.broadcast %107 : vector<1x1xf32> to vector<8x1xf32>
    %109 = arith.addf %106, %108 : vector<8x1xf32>
    %110 = arith.mulf %109, %3 : vector<8x1xf32>
    %c0_71 = arith.constant 0 : index
    %c0_72 = arith.constant 0 : index
    %c0_73 = arith.constant 0 : index
    %111 = vector.load %arg13[%c0_71, %c0_72, %c0_73] : memref<1x8x1xf32, #tpu.memory_space<vmem>>, vector<1x8x1xf32>
    %112 = vector.shape_cast %111 : vector<1x8x1xf32> to vector<8x1xf32>
    %113 = vector.shape_cast %110 : vector<8x1xf32> to vector<1x8x1xf32>
    tpu.vector_store %arg13[%c0_71, %c0_72, %c0_73], %113 {strides = array<i32>} : memref<1x8x1xf32, #tpu.memory_space<vmem>>, vector<1x8x1xf32>,
    return
  }
  func.func @transform_0(%arg0: i32) -> (i32, i32, i32) {
    %c0_i32 = arith.constant 0 : i32
    %c0_i32_0 = arith.constant 0 : i32
    %c0_i32_1 = arith.constant 0 : i32
    return %arg0, %c0_i32, %c0_i32_0 : i32, i32, i32
  }
  func.func @transform_1(%arg0: i32) -> (i32, i32, i32) {
    %c0_i32 = arith.constant 0 : i32
    %c0_i32_0 = arith.constant 0 : i32
    %c0_i32_1 = arith.constant 0 : i32
    return %arg0, %c0_i32, %c0_i32_0 : i32, i32, i32
  }
  func.func @transform_2(%arg0: i32) -> (i32, i32) {
    %c0_i32 = arith.constant 0 : i32
    %c0_i32_0 = arith.constant 0 : i32
    %c0_i32_1 = arith.constant 0 : i32
    return %c0_i32, %c0_i32_0 : i32, i32
  }
  func.func @transform_3(%arg0: i32) -> (i32, i32) {
    %c0_i32 = arith.constant 0 : i32
    %c0_i32_0 = arith.constant 0 : i32
    %c0_i32_1 = arith.constant 0 : i32
    return %c0_i32, %c0_i32_0 : i32, i32
  }
  func.func @transform_4(%arg0: i32) -> (i32, i32) {
    %c0_i32 = arith.constant 0 : i32
    %c0_i32_0 = arith.constant 0 : i32
    %c0_i32_1 = arith.constant 0 : i32
    return %c0_i32, %c0_i32_0 : i32, i32
  }
  func.func @transform_5(%arg0: i32) -> (i32, i32) {
    %c0_i32 = arith.constant 0 : i32
    %c0_i32_0 = arith.constant 0 : i32
    %c0_i32_1 = arith.constant 0 : i32
    return %c0_i32, %c0_i32_0 : i32, i32
  }
  func.func @transform_6(%arg0: i32) -> (i32, i32) {
    %c0_i32 = arith.constant 0 : i32
    %c0_i32_0 = arith.constant 0 : i32
    %c0_i32_1 = arith.constant 0 : i32
    return %c0_i32, %c0_i32_0 : i32, i32
  }
  func.func @transform_7(%arg0: i32) -> (i32, i32) {
    %c0_i32 = arith.constant 0 : i32
    %c0_i32_0 = arith.constant 0 : i32
    %c0_i32_1 = arith.constant 0 : i32
    return %c0_i32, %c0_i32_0 : i32, i32
  }
  func.func @transform_8(%arg0: i32) -> (i32, i32) {
    %c0_i32 = arith.constant 0 : i32
    %c0_i32_0 = arith.constant 0 : i32
    %c0_i32_1 = arith.constant 0 : i32
    return %c0_i32, %c0_i32_0 : i32, i32
  }
  func.func @transform_9(%arg0: i32) -> (i32, i32) {
    %c0_i32 = arith.constant 0 : i32
    %c0_i32_0 = arith.constant 0 : i32
    %c0_i32_1 = arith.constant 0 : i32
    return %c0_i32, %c0_i32_0 : i32, i32
  }
  func.func @transform_10(%arg0: i32) -> (i32, i32) {
    %c0_i32 = arith.constant 0 : i32
    %c0_i32_0 = arith.constant 0 : i32
    %c0_i32_1 = arith.constant 0 : i32
    return %c0_i32, %c0_i32_0 : i32, i32
  }
  func.func @transform_11(%arg0: i32) -> (i32, i32) {
    %c0_i32 = arith.constant 0 : i32
    %c0_i32_0 = arith.constant 0 : i32
    %c0_i32_1 = arith.constant 0 : i32
    return %c0_i32, %c0_i32_0 : i32, i32
  }
  func.func @transform_12(%arg0: i32) -> (i32, i32, i32) {
    %c0_i32 = arith.constant 0 : i32
    %c0_i32_0 = arith.constant 0 : i32
    %c0_i32_1 = arith.constant 0 : i32
    return %arg0, %c0_i32, %c0_i32_0 : i32, i32, i32
  }
}

module attributes {stable_mosaic.version = 11 : i64} {
  func.func @kernel(%arg0: i32, %arg1: memref<1x24x32xf32, #tpu.memory_space<vmem>>, %arg2: memref<1x1x32xf32, #tpu.memory_space<vmem>>, %arg3: memref<1x24x1xf32, #tpu.memory_space<vmem>>, %arg4: memref<32x64xbf16, #tpu.memory_space<vmem>>, %arg5: memref<1x64xf32, #tpu.memory_space<vmem>>, %arg6: memref<32x80xbf16, #tpu.memory_space<vmem>>, %arg7: memref<1x80xf32, #tpu.memory_space<vmem>>, %arg8: memref<1x24x80xf32, #tpu.memory_space<vmem>>) attributes {dimension_semantics = [#tpu.dimension_semantics<parallel>], iteration_bounds = array<i64: 2>, scalar_prefetch = 0 : i64, scratch_operands = 0 : i64, tpu.core_type = #tpu.core_type<tc>, window_params = [{transform_indices = @transform_0, window_bounds = array<i64: 1, 24, 32>}, {transform_indices = @transform_1, window_bounds = array<i64: 1, 1, 32>}, {transform_indices = @transform_2, window_bounds = array<i64: 1, 24, 1>}, {pipeline_mode = #tpu.pipeline_mode<synchronous>, transform_indices = @transform_3, window_bounds = array<i64: 32, 64>}, {pipeline_mode = #tpu.pipeline_mode<synchronous>, transform_indices = @transform_4, window_bounds = array<i64: 1, 64>}, {pipeline_mode = #tpu.pipeline_mode<synchronous>, transform_indices = @transform_5, window_bounds = array<i64: 32, 80>}, {pipeline_mode = #tpu.pipeline_mode<synchronous>, transform_indices = @transform_6, window_bounds = array<i64: 1, 80>}, {transform_indices = @transform_7, window_bounds = array<i64: 1, 24, 80>}]} {
    %c0 = arith.constant 0 : index
    %c0_0 = arith.constant 0 : index
    %c0_1 = arith.constant 0 : index
    %0 = vector.load %arg1[%c0, %c0_0, %c0_1] : memref<1x24x32xf32, #tpu.memory_space<vmem>>, vector<1x24x32xf32>
    %1 = vector.shape_cast %0 : vector<1x24x32xf32> to vector<24x32xf32>
    %c0_2 = arith.constant 0 : index
    %c0_3 = arith.constant 0 : index
    %c0_4 = arith.constant 0 : index
    %2 = vector.load %arg2[%c0_2, %c0_3, %c0_4] : memref<1x1x32xf32, #tpu.memory_space<vmem>>, vector<1x1x32xf32>
    %3 = vector.shape_cast %2 : vector<1x1x32xf32> to vector<1x32xf32>
    %4 = arith.truncf %3 : vector<1x32xf32> to vector<1x32xbf16>
    %cst = arith.constant dense<0.000000e+00> : vector<24xf32>
    %5 = vector.multi_reduction <add>, %1, %cst [1] : vector<24x32xf32> to vector<24xf32>
    %6 = vector.shape_cast %5 : vector<24xf32> to vector<24x1xf32>
    %cst_5 = arith.constant 3.200000e+01 : f32
    %7 = vector.broadcast %cst_5 : f32 to vector<24x1xf32>
    %8 = arith.divf %6, %7 : vector<24x1xf32>
    %9 = vector.broadcast %8 : vector<24x1xf32> to vector<24x32xf32>
    %10 = arith.subf %1, %9 : vector<24x32xf32>
    %11 = arith.mulf %10, %10 : vector<24x32xf32>
    %cst_6 = arith.constant dense<0.000000e+00> : vector<24xf32>
    %12 = vector.multi_reduction <add>, %11, %cst_6 [1] : vector<24x32xf32> to vector<24xf32>
    %13 = vector.shape_cast %12 : vector<24xf32> to vector<24x1xf32>
    %cst_7 = arith.constant 3.200000e+01 : f32
    %14 = vector.broadcast %cst_7 : f32 to vector<24x1xf32>
    %15 = arith.divf %13, %14 : vector<24x1xf32>
    %16 = vector.broadcast %8 : vector<24x1xf32> to vector<24x32xf32>
    %17 = arith.subf %1, %16 : vector<24x32xf32>
    %cst_8 = arith.constant 9.99999974E-6 : f32
    %18 = vector.broadcast %cst_8 : f32 to vector<24x1xf32>
    %19 = arith.addf %15, %18 : vector<24x1xf32>
    %20 = math.rsqrt %19 : vector<24x1xf32>
    %21 = vector.broadcast %20 : vector<24x1xf32> to vector<24x32xf32>
    %22 = arith.mulf %17, %21 : vector<24x32xf32>
    %c0_9 = arith.constant 0 : index
    %c0_10 = arith.constant 0 : index
    %23 = vector.load %arg4[%c0_9, %c0_10] : memref<32x64xbf16, #tpu.memory_space<vmem>>, vector<32x64xbf16>
    %cst_11 = arith.constant dense<0.000000e+00> : vector<1x64xf32>
    %24 = tpu.matmul %4, %23, %cst_11 {dimension_numbers = #tpu.dot_dimension_numbers<[1], [0], [0], [1], [0, 0, 1, 1], [], []>} : vector<1x32xbf16>, vector<32x64xbf16>, vector<1x64xf32> -> vector<1x64xf32>
    %c0_12 = arith.constant 0 : index
    %c0_13 = arith.constant 0 : index
    %25 = vector.load %arg5[%c0_12, %c0_13] : memref<1x64xf32, #tpu.memory_space<vmem>>, vector<1x64xf32>
    %26 = arith.addf %24, %25 : vector<1x64xf32>
    %27 = vector.extract_strided_slice %26 {offsets = [0, 0], sizes = [1, 32], strides = [1, 1]} : vector<1x64xf32> to vector<1x32xf32>
    %cst_14 = arith.constant 1.000000e+00 : f32
    %28 = vector.broadcast %cst_14 : f32 to vector<1x32xf32>
    %29 = arith.addf %28, %27 : vector<1x32xf32>
    %30 = vector.broadcast %29 : vector<1x32xf32> to vector<24x32xf32>
    %31 = arith.mulf %22, %30 : vector<24x32xf32>
    %32 = vector.extract_strided_slice %26 {offsets = [0, 32], sizes = [1, 32], strides = [1, 1]} : vector<1x64xf32> to vector<1x32xf32>
    %33 = vector.broadcast %32 : vector<1x32xf32> to vector<24x32xf32>
    %34 = arith.addf %31, %33 : vector<24x32xf32>
    %c0_15 = arith.constant 0 : index
    %c0_16 = arith.constant 0 : index
    %c0_17 = arith.constant 0 : index
    %35 = vector.load %arg3[%c0_15, %c0_16, %c0_17] : memref<1x24x1xf32, #tpu.memory_space<vmem>>, vector<1x24x1xf32>
    %36 = vector.shape_cast %35 : vector<1x24x1xf32> to vector<24x1xf32>
    %37 = vector.broadcast %36 : vector<24x1xf32> to vector<24x32xf32>
    %38 = arith.mulf %34, %37 : vector<24x32xf32>
    %39 = arith.truncf %38 : vector<24x32xf32> to vector<24x32xbf16>
    %c0_18 = arith.constant 0 : index
    %c0_19 = arith.constant 0 : index
    %40 = vector.load %arg6[%c0_18, %c0_19] : memref<32x80xbf16, #tpu.memory_space<vmem>>, vector<32x80xbf16>
    %cst_20 = arith.constant dense<0.000000e+00> : vector<24x80xf32>
    %41 = tpu.matmul %39, %40, %cst_20 {dimension_numbers = #tpu.dot_dimension_numbers<[1], [0], [0], [1], [0, 0, 1, 1], [], []>} : vector<24x32xbf16>, vector<32x80xbf16>, vector<24x80xf32> -> vector<24x80xf32>
    %c0_21 = arith.constant 0 : index
    %c0_22 = arith.constant 0 : index
    %42 = vector.load %arg7[%c0_21, %c0_22] : memref<1x80xf32, #tpu.memory_space<vmem>>, vector<1x80xf32>
    %43 = vector.broadcast %42 : vector<1x80xf32> to vector<24x80xf32>
    %44 = arith.addf %41, %43 : vector<24x80xf32>
    %c0_23 = arith.constant 0 : index
    %c0_24 = arith.constant 0 : index
    %c0_25 = arith.constant 0 : index
    %45 = vector.load %arg8[%c0_23, %c0_24, %c0_25] : memref<1x24x80xf32, #tpu.memory_space<vmem>>, vector<1x24x80xf32>
    %46 = vector.shape_cast %45 : vector<1x24x80xf32> to vector<24x80xf32>
    %47 = vector.shape_cast %44 : vector<24x80xf32> to vector<1x24x80xf32>
    tpu.vector_store %arg8[%c0_23, %c0_24, %c0_25], %47 {strides = array<i32>} : memref<1x24x80xf32, #tpu.memory_space<vmem>>, vector<1x24x80xf32>,
    return
  }
  func.func @transform_0(%arg0: i32) -> (i32, i32, i32) {
    %c0_i32 = arith.constant 0 : i32
    %c0_i32_0 = arith.constant 0 : i32
    %c0_i32_1 = arith.constant 0 : i32
    return %arg0, %c0_i32, %c0_i32_0 : i32, i32, i32
  }
  func.func @transform_1(%arg0: i32) -> (i32, i32, i32) {
    %c0_i32 = arith.constant 0 : i32
    %c0_i32_0 = arith.constant 0 : i32
    %c0_i32_1 = arith.constant 0 : i32
    return %arg0, %c0_i32, %c0_i32_0 : i32, i32, i32
  }
  func.func @transform_2(%arg0: i32) -> (i32, i32, i32) {
    %c0_i32 = arith.constant 0 : i32
    %c0_i32_0 = arith.constant 0 : i32
    %c0_i32_1 = arith.constant 0 : i32
    return %arg0, %c0_i32, %c0_i32_0 : i32, i32, i32
  }
  func.func @transform_3(%arg0: i32) -> (i32, i32) {
    %c0_i32 = arith.constant 0 : i32
    %c0_i32_0 = arith.constant 0 : i32
    %c0_i32_1 = arith.constant 0 : i32
    return %c0_i32, %c0_i32_0 : i32, i32
  }
  func.func @transform_4(%arg0: i32) -> (i32, i32) {
    %c0_i32 = arith.constant 0 : i32
    %c0_i32_0 = arith.constant 0 : i32
    %c0_i32_1 = arith.constant 0 : i32
    return %c0_i32, %c0_i32_0 : i32, i32
  }
  func.func @transform_5(%arg0: i32) -> (i32, i32) {
    %c0_i32 = arith.constant 0 : i32
    %c0_i32_0 = arith.constant 0 : i32
    %c0_i32_1 = arith.constant 0 : i32
    return %c0_i32, %c0_i32_0 : i32, i32
  }
  func.func @transform_6(%arg0: i32) -> (i32, i32) {
    %c0_i32 = arith.constant 0 : i32
    %c0_i32_0 = arith.constant 0 : i32
    %c0_i32_1 = arith.constant 0 : i32
    return %c0_i32, %c0_i32_0 : i32, i32
  }
  func.func @transform_7(%arg0: i32) -> (i32, i32, i32) {
    %c0_i32 = arith.constant 0 : i32
    %c0_i32_0 = arith.constant 0 : i32
    %c0_i32_1 = arith.constant 0 : i32
    return %arg0, %c0_i32, %c0_i32_0 : i32, i32, i32
  }
}

module attributes {stable_mosaic.version = 11 : i64} {
  func.func @kernel(%arg0: i32, %arg1: memref<1x24x32xf32, #tpu.memory_space<vmem>>, %arg2: memref<1x24x1xf32, #tpu.memory_space<vmem>>, %arg3: memref<160x32xbf16, #tpu.memory_space<vmem>>, %arg4: memref<1x32xf32, #tpu.memory_space<vmem>>, %arg5: memref<1x32xf32, #tpu.memory_space<vmem>>, %arg6: memref<1x32xf32, #tpu.memory_space<vmem>>, %arg7: memref<160x32xbf16, #tpu.memory_space<vmem>>, %arg8: memref<1x32xf32, #tpu.memory_space<vmem>>, %arg9: memref<1x32xf32, #tpu.memory_space<vmem>>, %arg10: memref<1x32xf32, #tpu.memory_space<vmem>>, %arg11: memref<160x32xbf16, #tpu.memory_space<vmem>>, %arg12: memref<1x32xf32, #tpu.memory_space<vmem>>, %arg13: memref<1x32xf32, #tpu.memory_space<vmem>>, %arg14: memref<1x32xf32, #tpu.memory_space<vmem>>, %arg15: memref<160x32xbf16, #tpu.memory_space<vmem>>, %arg16: memref<1x32xf32, #tpu.memory_space<vmem>>, %arg17: memref<1x32xf32, #tpu.memory_space<vmem>>, %arg18: memref<1x32xf32, #tpu.memory_space<vmem>>, %arg19: memref<160x32xbf16, #tpu.memory_space<vmem>>, %arg20: memref<1x32xf32, #tpu.memory_space<vmem>>, %arg21: memref<1x32xf32, #tpu.memory_space<vmem>>, %arg22: memref<1x32xf32, #tpu.memory_space<vmem>>, %arg23: memref<32x2xbf16, #tpu.memory_space<vmem>>, %arg24: memref<1x2xf32, #tpu.memory_space<vmem>>, %arg25: memref<1x24x2xf32, #tpu.memory_space<vmem>>, %arg26: memref<28x32xf32, #tpu.memory_space<vmem>>) attributes {dimension_semantics = [#tpu.dimension_semantics<parallel>], iteration_bounds = array<i64: 2>, scalar_prefetch = 0 : i64, scratch_operands = 1 : i64, tpu.core_type = #tpu.core_type<tc>, window_params = [{transform_indices = @transform_0, window_bounds = array<i64: 1, 24, 32>}, {transform_indices = @transform_1, window_bounds = array<i64: 1, 24, 1>}, {pipeline_mode = #tpu.pipeline_mode<synchronous>, transform_indices = @transform_2, window_bounds = array<i64: 160, 32>}, {pipeline_mode = #tpu.pipeline_mode<synchronous>, transform_indices = @transform_3, window_bounds = array<i64: 1, 32>}, {pipeline_mode = #tpu.pipeline_mode<synchronous>, transform_indices = @transform_4, window_bounds = array<i64: 1, 32>}, {pipeline_mode = #tpu.pipeline_mode<synchronous>, transform_indices = @transform_5, window_bounds = array<i64: 1, 32>}, {pipeline_mode = #tpu.pipeline_mode<synchronous>, transform_indices = @transform_6, window_bounds = array<i64: 160, 32>}, {pipeline_mode = #tpu.pipeline_mode<synchronous>, transform_indices = @transform_7, window_bounds = array<i64: 1, 32>}, {pipeline_mode = #tpu.pipeline_mode<synchronous>, transform_indices = @transform_8, window_bounds = array<i64: 1, 32>}, {pipeline_mode = #tpu.pipeline_mode<synchronous>, transform_indices = @transform_9, window_bounds = array<i64: 1, 32>}, {pipeline_mode = #tpu.pipeline_mode<synchronous>, transform_indices = @transform_10, window_bounds = array<i64: 160, 32>}, {pipeline_mode = #tpu.pipeline_mode<synchronous>, transform_indices = @transform_11, window_bounds = array<i64: 1, 32>}, {pipeline_mode = #tpu.pipeline_mode<synchronous>, transform_indices = @transform_12, window_bounds = array<i64: 1, 32>}, {pipeline_mode = #tpu.pipeline_mode<synchronous>, transform_indices = @transform_13, window_bounds = array<i64: 1, 32>}, {pipeline_mode = #tpu.pipeline_mode<synchronous>, transform_indices = @transform_14, window_bounds = array<i64: 160, 32>}, {pipeline_mode = #tpu.pipeline_mode<synchronous>, transform_indices = @transform_15, window_bounds = array<i64: 1, 32>}, {pipeline_mode = #tpu.pipeline_mode<synchronous>, transform_indices = @transform_16, window_bounds = array<i64: 1, 32>}, {pipeline_mode = #tpu.pipeline_mode<synchronous>, transform_indices = @transform_17, window_bounds = array<i64: 1, 32>}, {pipeline_mode = #tpu.pipeline_mode<synchronous>, transform_indices = @transform_18, window_bounds = array<i64: 160, 32>}, {pipeline_mode = #tpu.pipeline_mode<synchronous>, transform_indices = @transform_19, window_bounds = array<i64: 1, 32>}, {pipeline_mode = #tpu.pipeline_mode<synchronous>, transform_indices = @transform_20, window_bounds = array<i64: 1, 32>}, {pipeline_mode = #tpu.pipeline_mode<synchronous>, transform_indices = @transform_21, window_bounds = array<i64: 1, 32>}, {pipeline_mode = #tpu.pipeline_mode<synchronous>, transform_indices = @transform_22, window_bounds = array<i64: 32, 2>}, {pipeline_mode = #tpu.pipeline_mode<synchronous>, transform_indices = @transform_23, window_bounds = array<i64: 1, 2>}, {transform_indices = @transform_24, window_bounds = array<i64: 1, 24, 2>}]} {
    %c0 = arith.constant 0 : index
    %c0_0 = arith.constant 0 : index
    %c0_1 = arith.constant 0 : index
    %0 = vector.load %arg1[%c0, %c0_0, %c0_1] : memref<1x24x32xf32, #tpu.memory_space<vmem>>, vector<1x24x32xf32>
    %1 = vector.shape_cast %0 : vector<1x24x32xf32> to vector<24x32xf32>
    %cst = arith.constant 0.000000e+00 : f32
    %2 = vector.broadcast %cst : f32 to vector<28x32xf32>
    %c0_2 = arith.constant 0 : index
    %c0_3 = arith.constant 0 : index
    %3 = vector.load %arg26[%c0_2, %c0_3] : memref<28x32xf32, #tpu.memory_space<vmem>>, vector<28x32xf32>
    tpu.vector_store %arg26[%c0_2, %c0_3], %2 {strides = array<i32>} : memref<28x32xf32, #tpu.memory_space<vmem>>, vector<28x32xf32>,
    %c2 = arith.constant 2 : index
    %c0_4 = arith.constant 0 : index
    %4 = vector.load %arg26[%c2, %c0_4] : memref<28x32xf32, #tpu.memory_space<vmem>>, vector<24x32xf32>
    tpu.vector_store %arg26[%c2, %c0_4], %1 {strides = array<i32>} : memref<28x32xf32, #tpu.memory_space<vmem>>, vector<24x32xf32>,
    %cst_5 = arith.constant 0.000000e+00 : f32
    %5 = vector.broadcast %cst_5 : f32 to vector<24x32xf32>
    %c0_6 = arith.constant 0 : index
    %c0_7 = arith.constant 0 : index
    %6 = vector.load %arg26[%c0_6, %c0_7] : memref<28x32xf32, #tpu.memory_space<vmem>>, vector<24x32xf32>
    %7 = arith.truncf %6 : vector<24x32xf32> to vector<24x32xbf16>
    %c0_8 = arith.constant 0 : index
    %c0_9 = arith.constant 0 : index
    %8 = vector.load %arg3[%c0_8, %c0_9] : memref<160x32xbf16, #tpu.memory_space<vmem>>, vector<32x32xbf16>
    %cst_10 = arith.constant dense<0.000000e+00> : vector<24x32xf32>
    %9 = tpu.matmul %7, %8, %cst_10 {dimension_numbers = #tpu.dot_dimension_numbers<[1], [0], [0], [1], [0, 0, 1, 1], [], []>} : vector<24x32xbf16>, vector<32x32xbf16>, vector<24x32xf32> -> vector<24x32xf32>
    %10 = arith.addf %5, %9 : vector<24x32xf32>
    %c1 = arith.constant 1 : index
    %c0_11 = arith.constant 0 : index
    %11 = vector.load %arg26[%c1, %c0_11] : memref<28x32xf32, #tpu.memory_space<vmem>>, vector<24x32xf32>
    %12 = arith.truncf %11 : vector<24x32xf32> to vector<24x32xbf16>
    %c32 = arith.constant 32 : index
    %c0_12 = arith.constant 0 : index
    %13 = vector.load %arg3[%c32, %c0_12] : memref<160x32xbf16, #tpu.memory_space<vmem>>, vector<32x32xbf16>
    %cst_13 = arith.constant dense<0.000000e+00> : vector<24x32xf32>
    %14 = tpu.matmul %12, %13, %cst_13 {dimension_numbers = #tpu.dot_dimension_numbers<[1], [0], [0], [1], [0, 0, 1, 1], [], []>} : vector<24x32xbf16>, vector<32x32xbf16>, vector<24x32xf32> -> vector<24x32xf32>
    %15 = arith.addf %10, %14 : vector<24x32xf32>
    %c2_14 = arith.constant 2 : index
    %c0_15 = arith.constant 0 : index
    %16 = vector.load %arg26[%c2_14, %c0_15] : memref<28x32xf32, #tpu.memory_space<vmem>>, vector<24x32xf32>
    %17 = arith.truncf %16 : vector<24x32xf32> to vector<24x32xbf16>
    %c64 = arith.constant 64 : index
    %c0_16 = arith.constant 0 : index
    %18 = vector.load %arg3[%c64, %c0_16] : memref<160x32xbf16, #tpu.memory_space<vmem>>, vector<32x32xbf16>
    %cst_17 = arith.constant dense<0.000000e+00> : vector<24x32xf32>
    %19 = tpu.matmul %17, %18, %cst_17 {dimension_numbers = #tpu.dot_dimension_numbers<[1], [0], [0], [1], [0, 0, 1, 1], [], []>} : vector<24x32xbf16>, vector<32x32xbf16>, vector<24x32xf32> -> vector<24x32xf32>
    %20 = arith.addf %15, %19 : vector<24x32xf32>
    %c3 = arith.constant 3 : index
    %c0_18 = arith.constant 0 : index
    %21 = vector.load %arg26[%c3, %c0_18] : memref<28x32xf32, #tpu.memory_space<vmem>>, vector<24x32xf32>
    %22 = arith.truncf %21 : vector<24x32xf32> to vector<24x32xbf16>
    %c96 = arith.constant 96 : index
    %c0_19 = arith.constant 0 : index
    %23 = vector.load %arg3[%c96, %c0_19] : memref<160x32xbf16, #tpu.memory_space<vmem>>, vector<32x32xbf16>
    %cst_20 = arith.constant dense<0.000000e+00> : vector<24x32xf32>
    %24 = tpu.matmul %22, %23, %cst_20 {dimension_numbers = #tpu.dot_dimension_numbers<[1], [0], [0], [1], [0, 0, 1, 1], [], []>} : vector<24x32xbf16>, vector<32x32xbf16>, vector<24x32xf32> -> vector<24x32xf32>
    %25 = arith.addf %20, %24 : vector<24x32xf32>
    %c4 = arith.constant 4 : index
    %c0_21 = arith.constant 0 : index
    %26 = vector.load %arg26[%c4, %c0_21] : memref<28x32xf32, #tpu.memory_space<vmem>>, vector<24x32xf32>
    %27 = arith.truncf %26 : vector<24x32xf32> to vector<24x32xbf16>
    %c128 = arith.constant 128 : index
    %c0_22 = arith.constant 0 : index
    %28 = vector.load %arg3[%c128, %c0_22] : memref<160x32xbf16, #tpu.memory_space<vmem>>, vector<32x32xbf16>
    %cst_23 = arith.constant dense<0.000000e+00> : vector<24x32xf32>
    %29 = tpu.matmul %27, %28, %cst_23 {dimension_numbers = #tpu.dot_dimension_numbers<[1], [0], [0], [1], [0, 0, 1, 1], [], []>} : vector<24x32xbf16>, vector<32x32xbf16>, vector<24x32xf32> -> vector<24x32xf32>
    %30 = arith.addf %25, %29 : vector<24x32xf32>
    %c0_24 = arith.constant 0 : index
    %c0_25 = arith.constant 0 : index
    %31 = vector.load %arg4[%c0_24, %c0_25] : memref<1x32xf32, #tpu.memory_space<vmem>>, vector<1x32xf32>
    %32 = vector.broadcast %31 : vector<1x32xf32> to vector<24x32xf32>
    %33 = arith.addf %30, %32 : vector<24x32xf32>
    %cst_26 = arith.constant 0.000000e+00 : f32
    %34 = vector.broadcast %cst_26 : f32 to vector<24x32xf32>
    %35 = arith.maximumf %33, %34 : vector<24x32xf32>
    %cst_27 = arith.constant dense<0.000000e+00> : vector<24xf32>
    %36 = vector.multi_reduction <add>, %35, %cst_27 [1] : vector<24x32xf32> to vector<24xf32>
    %37 = vector.shape_cast %36 : vector<24xf32> to vector<24x1xf32>
    %cst_28 = arith.constant 3.200000e+01 : f32
    %38 = vector.broadcast %cst_28 : f32 to vector<24x1xf32>
    %39 = arith.divf %37, %38 : vector<24x1xf32>
    %40 = vector.broadcast %39 : vector<24x1xf32> to vector<24x32xf32>
    %41 = arith.subf %35, %40 : vector<24x32xf32>
    %42 = arith.mulf %41, %41 : vector<24x32xf32>
    %cst_29 = arith.constant dense<0.000000e+00> : vector<24xf32>
    %43 = vector.multi_reduction <add>, %42, %cst_29 [1] : vector<24x32xf32> to vector<24xf32>
    %44 = vector.shape_cast %43 : vector<24xf32> to vector<24x1xf32>
    %cst_30 = arith.constant 3.200000e+01 : f32
    %45 = vector.broadcast %cst_30 : f32 to vector<24x1xf32>
    %46 = arith.divf %44, %45 : vector<24x1xf32>
    %47 = vector.broadcast %39 : vector<24x1xf32> to vector<24x32xf32>
    %48 = arith.subf %35, %47 : vector<24x32xf32>
    %cst_31 = arith.constant 9.99999974E-6 : f32
    %49 = vector.broadcast %cst_31 : f32 to vector<24x1xf32>
    %50 = arith.addf %46, %49 : vector<24x1xf32>
    %51 = math.rsqrt %50 : vector<24x1xf32>
    %52 = vector.broadcast %51 : vector<24x1xf32> to vector<24x32xf32>
    %53 = arith.mulf %48, %52 : vector<24x32xf32>
    %c0_32 = arith.constant 0 : index
    %c0_33 = arith.constant 0 : index
    %54 = vector.load %arg5[%c0_32, %c0_33] : memref<1x32xf32, #tpu.memory_space<vmem>>, vector<1x32xf32>
    %55 = vector.broadcast %54 : vector<1x32xf32> to vector<24x32xf32>
    %56 = arith.mulf %53, %55 : vector<24x32xf32>
    %c0_34 = arith.constant 0 : index
    %c0_35 = arith.constant 0 : index
    %57 = vector.load %arg6[%c0_34, %c0_35] : memref<1x32xf32, #tpu.memory_space<vmem>>, vector<1x32xf32>
    %58 = vector.broadcast %57 : vector<1x32xf32> to vector<24x32xf32>
    %59 = arith.addf %56, %58 : vector<24x32xf32>
    %cst_36 = arith.constant 0.000000e+00 : f32
    %60 = vector.broadcast %cst_36 : f32 to vector<28x32xf32>
    %c0_37 = arith.constant 0 : index
    %c0_38 = arith.constant 0 : index
    %61 = vector.load %arg26[%c0_37, %c0_38] : memref<28x32xf32, #tpu.memory_space<vmem>>, vector<28x32xf32>
    tpu.vector_store %arg26[%c0_37, %c0_38], %60 {strides = array<i32>} : memref<28x32xf32, #tpu.memory_space<vmem>>, vector<28x32xf32>,
    %c2_39 = arith.constant 2 : index
    %c0_40 = arith.constant 0 : index
    %62 = vector.load %arg26[%c2_39, %c0_40] : memref<28x32xf32, #tpu.memory_space<vmem>>, vector<24x32xf32>
    tpu.vector_store %arg26[%c2_39, %c0_40], %59 {strides = array<i32>} : memref<28x32xf32, #tpu.memory_space<vmem>>, vector<24x32xf32>,
    %cst_41 = arith.constant 0.000000e+00 : f32
    %63 = vector.broadcast %cst_41 : f32 to vector<24x32xf32>
    %c0_42 = arith.constant 0 : index
    %c0_43 = arith.constant 0 : index
    %64 = vector.load %arg26[%c0_42, %c0_43] : memref<28x32xf32, #tpu.memory_space<vmem>>, vector<24x32xf32>
    %65 = arith.truncf %64 : vector<24x32xf32> to vector<24x32xbf16>
    %c0_44 = arith.constant 0 : index
    %c0_45 = arith.constant 0 : index
    %66 = vector.load %arg7[%c0_44, %c0_45] : memref<160x32xbf16, #tpu.memory_space<vmem>>, vector<32x32xbf16>
    %cst_46 = arith.constant dense<0.000000e+00> : vector<24x32xf32>
    %67 = tpu.matmul %65, %66, %cst_46 {dimension_numbers = #tpu.dot_dimension_numbers<[1], [0], [0], [1], [0, 0, 1, 1], [], []>} : vector<24x32xbf16>, vector<32x32xbf16>, vector<24x32xf32> -> vector<24x32xf32>
    %68 = arith.addf %63, %67 : vector<24x32xf32>
    %c1_47 = arith.constant 1 : index
    %c0_48 = arith.constant 0 : index
    %69 = vector.load %arg26[%c1_47, %c0_48] : memref<28x32xf32, #tpu.memory_space<vmem>>, vector<24x32xf32>
    %70 = arith.truncf %69 : vector<24x32xf32> to vector<24x32xbf16>
    %c32_49 = arith.constant 32 : index
    %c0_50 = arith.constant 0 : index
    %71 = vector.load %arg7[%c32_49, %c0_50] : memref<160x32xbf16, #tpu.memory_space<vmem>>, vector<32x32xbf16>
    %cst_51 = arith.constant dense<0.000000e+00> : vector<24x32xf32>
    %72 = tpu.matmul %70, %71, %cst_51 {dimension_numbers = #tpu.dot_dimension_numbers<[1], [0], [0], [1], [0, 0, 1, 1], [], []>} : vector<24x32xbf16>, vector<32x32xbf16>, vector<24x32xf32> -> vector<24x32xf32>
    %73 = arith.addf %68, %72 : vector<24x32xf32>
    %c2_52 = arith.constant 2 : index
    %c0_53 = arith.constant 0 : index
    %74 = vector.load %arg26[%c2_52, %c0_53] : memref<28x32xf32, #tpu.memory_space<vmem>>, vector<24x32xf32>
    %75 = arith.truncf %74 : vector<24x32xf32> to vector<24x32xbf16>
    %c64_54 = arith.constant 64 : index
    %c0_55 = arith.constant 0 : index
    %76 = vector.load %arg7[%c64_54, %c0_55] : memref<160x32xbf16, #tpu.memory_space<vmem>>, vector<32x32xbf16>
    %cst_56 = arith.constant dense<0.000000e+00> : vector<24x32xf32>
    %77 = tpu.matmul %75, %76, %cst_56 {dimension_numbers = #tpu.dot_dimension_numbers<[1], [0], [0], [1], [0, 0, 1, 1], [], []>} : vector<24x32xbf16>, vector<32x32xbf16>, vector<24x32xf32> -> vector<24x32xf32>
    %78 = arith.addf %73, %77 : vector<24x32xf32>
    %c3_57 = arith.constant 3 : index
    %c0_58 = arith.constant 0 : index
    %79 = vector.load %arg26[%c3_57, %c0_58] : memref<28x32xf32, #tpu.memory_space<vmem>>, vector<24x32xf32>
    %80 = arith.truncf %79 : vector<24x32xf32> to vector<24x32xbf16>
    %c96_59 = arith.constant 96 : index
    %c0_60 = arith.constant 0 : index
    %81 = vector.load %arg7[%c96_59, %c0_60] : memref<160x32xbf16, #tpu.memory_space<vmem>>, vector<32x32xbf16>
    %cst_61 = arith.constant dense<0.000000e+00> : vector<24x32xf32>
    %82 = tpu.matmul %80, %81, %cst_61 {dimension_numbers = #tpu.dot_dimension_numbers<[1], [0], [0], [1], [0, 0, 1, 1], [], []>} : vector<24x32xbf16>, vector<32x32xbf16>, vector<24x32xf32> -> vector<24x32xf32>
    %83 = arith.addf %78, %82 : vector<24x32xf32>
    %c4_62 = arith.constant 4 : index
    %c0_63 = arith.constant 0 : index
    %84 = vector.load %arg26[%c4_62, %c0_63] : memref<28x32xf32, #tpu.memory_space<vmem>>, vector<24x32xf32>
    %85 = arith.truncf %84 : vector<24x32xf32> to vector<24x32xbf16>
    %c128_64 = arith.constant 128 : index
    %c0_65 = arith.constant 0 : index
    %86 = vector.load %arg7[%c128_64, %c0_65] : memref<160x32xbf16, #tpu.memory_space<vmem>>, vector<32x32xbf16>
    %cst_66 = arith.constant dense<0.000000e+00> : vector<24x32xf32>
    %87 = tpu.matmul %85, %86, %cst_66 {dimension_numbers = #tpu.dot_dimension_numbers<[1], [0], [0], [1], [0, 0, 1, 1], [], []>} : vector<24x32xbf16>, vector<32x32xbf16>, vector<24x32xf32> -> vector<24x32xf32>
    %88 = arith.addf %83, %87 : vector<24x32xf32>
    %c0_67 = arith.constant 0 : index
    %c0_68 = arith.constant 0 : index
    %89 = vector.load %arg8[%c0_67, %c0_68] : memref<1x32xf32, #tpu.memory_space<vmem>>, vector<1x32xf32>
    %90 = vector.broadcast %89 : vector<1x32xf32> to vector<24x32xf32>
    %91 = arith.addf %88, %90 : vector<24x32xf32>
    %cst_69 = arith.constant 0.000000e+00 : f32
    %92 = vector.broadcast %cst_69 : f32 to vector<24x32xf32>
    %93 = arith.maximumf %91, %92 : vector<24x32xf32>
    %cst_70 = arith.constant dense<0.000000e+00> : vector<24xf32>
    %94 = vector.multi_reduction <add>, %93, %cst_70 [1] : vector<24x32xf32> to vector<24xf32>
    %95 = vector.shape_cast %94 : vector<24xf32> to vector<24x1xf32>
    %cst_71 = arith.constant 3.200000e+01 : f32
    %96 = vector.broadcast %cst_71 : f32 to vector<24x1xf32>
    %97 = arith.divf %95, %96 : vector<24x1xf32>
    %98 = vector.broadcast %97 : vector<24x1xf32> to vector<24x32xf32>
    %99 = arith.subf %93, %98 : vector<24x32xf32>
    %100 = arith.mulf %99, %99 : vector<24x32xf32>
    %cst_72 = arith.constant dense<0.000000e+00> : vector<24xf32>
    %101 = vector.multi_reduction <add>, %100, %cst_72 [1] : vector<24x32xf32> to vector<24xf32>
    %102 = vector.shape_cast %101 : vector<24xf32> to vector<24x1xf32>
    %cst_73 = arith.constant 3.200000e+01 : f32
    %103 = vector.broadcast %cst_73 : f32 to vector<24x1xf32>
    %104 = arith.divf %102, %103 : vector<24x1xf32>
    %105 = vector.broadcast %97 : vector<24x1xf32> to vector<24x32xf32>
    %106 = arith.subf %93, %105 : vector<24x32xf32>
    %cst_74 = arith.constant 9.99999974E-6 : f32
    %107 = vector.broadcast %cst_74 : f32 to vector<24x1xf32>
    %108 = arith.addf %104, %107 : vector<24x1xf32>
    %109 = math.rsqrt %108 : vector<24x1xf32>
    %110 = vector.broadcast %109 : vector<24x1xf32> to vector<24x32xf32>
    %111 = arith.mulf %106, %110 : vector<24x32xf32>
    %c0_75 = arith.constant 0 : index
    %c0_76 = arith.constant 0 : index
    %112 = vector.load %arg9[%c0_75, %c0_76] : memref<1x32xf32, #tpu.memory_space<vmem>>, vector<1x32xf32>
    %113 = vector.broadcast %112 : vector<1x32xf32> to vector<24x32xf32>
    %114 = arith.mulf %111, %113 : vector<24x32xf32>
    %c0_77 = arith.constant 0 : index
    %c0_78 = arith.constant 0 : index
    %115 = vector.load %arg10[%c0_77, %c0_78] : memref<1x32xf32, #tpu.memory_space<vmem>>, vector<1x32xf32>
    %116 = vector.broadcast %115 : vector<1x32xf32> to vector<24x32xf32>
    %117 = arith.addf %114, %116 : vector<24x32xf32>
    %cst_79 = arith.constant 0.000000e+00 : f32
    %118 = vector.broadcast %cst_79 : f32 to vector<28x32xf32>
    %c0_80 = arith.constant 0 : index
    %c0_81 = arith.constant 0 : index
    %119 = vector.load %arg26[%c0_80, %c0_81] : memref<28x32xf32, #tpu.memory_space<vmem>>, vector<28x32xf32>
    tpu.vector_store %arg26[%c0_80, %c0_81], %118 {strides = array<i32>} : memref<28x32xf32, #tpu.memory_space<vmem>>, vector<28x32xf32>,
    %c2_82 = arith.constant 2 : index
    %c0_83 = arith.constant 0 : index
    %120 = vector.load %arg26[%c2_82, %c0_83] : memref<28x32xf32, #tpu.memory_space<vmem>>, vector<24x32xf32>
    tpu.vector_store %arg26[%c2_82, %c0_83], %117 {strides = array<i32>} : memref<28x32xf32, #tpu.memory_space<vmem>>, vector<24x32xf32>,
    %cst_84 = arith.constant 0.000000e+00 : f32
    %121 = vector.broadcast %cst_84 : f32 to vector<24x32xf32>
    %c0_85 = arith.constant 0 : index
    %c0_86 = arith.constant 0 : index
    %122 = vector.load %arg26[%c0_85, %c0_86] : memref<28x32xf32, #tpu.memory_space<vmem>>, vector<24x32xf32>
    %123 = arith.truncf %122 : vector<24x32xf32> to vector<24x32xbf16>
    %c0_87 = arith.constant 0 : index
    %c0_88 = arith.constant 0 : index
    %124 = vector.load %arg11[%c0_87, %c0_88] : memref<160x32xbf16, #tpu.memory_space<vmem>>, vector<32x32xbf16>
    %cst_89 = arith.constant dense<0.000000e+00> : vector<24x32xf32>
    %125 = tpu.matmul %123, %124, %cst_89 {dimension_numbers = #tpu.dot_dimension_numbers<[1], [0], [0], [1], [0, 0, 1, 1], [], []>} : vector<24x32xbf16>, vector<32x32xbf16>, vector<24x32xf32> -> vector<24x32xf32>
    %126 = arith.addf %121, %125 : vector<24x32xf32>
    %c1_90 = arith.constant 1 : index
    %c0_91 = arith.constant 0 : index
    %127 = vector.load %arg26[%c1_90, %c0_91] : memref<28x32xf32, #tpu.memory_space<vmem>>, vector<24x32xf32>
    %128 = arith.truncf %127 : vector<24x32xf32> to vector<24x32xbf16>
    %c32_92 = arith.constant 32 : index
    %c0_93 = arith.constant 0 : index
    %129 = vector.load %arg11[%c32_92, %c0_93] : memref<160x32xbf16, #tpu.memory_space<vmem>>, vector<32x32xbf16>
    %cst_94 = arith.constant dense<0.000000e+00> : vector<24x32xf32>
    %130 = tpu.matmul %128, %129, %cst_94 {dimension_numbers = #tpu.dot_dimension_numbers<[1], [0], [0], [1], [0, 0, 1, 1], [], []>} : vector<24x32xbf16>, vector<32x32xbf16>, vector<24x32xf32> -> vector<24x32xf32>
    %131 = arith.addf %126, %130 : vector<24x32xf32>
    %c2_95 = arith.constant 2 : index
    %c0_96 = arith.constant 0 : index
    %132 = vector.load %arg26[%c2_95, %c0_96] : memref<28x32xf32, #tpu.memory_space<vmem>>, vector<24x32xf32>
    %133 = arith.truncf %132 : vector<24x32xf32> to vector<24x32xbf16>
    %c64_97 = arith.constant 64 : index
    %c0_98 = arith.constant 0 : index
    %134 = vector.load %arg11[%c64_97, %c0_98] : memref<160x32xbf16, #tpu.memory_space<vmem>>, vector<32x32xbf16>
    %cst_99 = arith.constant dense<0.000000e+00> : vector<24x32xf32>
    %135 = tpu.matmul %133, %134, %cst_99 {dimension_numbers = #tpu.dot_dimension_numbers<[1], [0], [0], [1], [0, 0, 1, 1], [], []>} : vector<24x32xbf16>, vector<32x32xbf16>, vector<24x32xf32> -> vector<24x32xf32>
    %136 = arith.addf %131, %135 : vector<24x32xf32>
    %c3_100 = arith.constant 3 : index
    %c0_101 = arith.constant 0 : index
    %137 = vector.load %arg26[%c3_100, %c0_101] : memref<28x32xf32, #tpu.memory_space<vmem>>, vector<24x32xf32>
    %138 = arith.truncf %137 : vector<24x32xf32> to vector<24x32xbf16>
    %c96_102 = arith.constant 96 : index
    %c0_103 = arith.constant 0 : index
    %139 = vector.load %arg11[%c96_102, %c0_103] : memref<160x32xbf16, #tpu.memory_space<vmem>>, vector<32x32xbf16>
    %cst_104 = arith.constant dense<0.000000e+00> : vector<24x32xf32>
    %140 = tpu.matmul %138, %139, %cst_104 {dimension_numbers = #tpu.dot_dimension_numbers<[1], [0], [0], [1], [0, 0, 1, 1], [], []>} : vector<24x32xbf16>, vector<32x32xbf16>, vector<24x32xf32> -> vector<24x32xf32>
    %141 = arith.addf %136, %140 : vector<24x32xf32>
    %c4_105 = arith.constant 4 : index
    %c0_106 = arith.constant 0 : index
    %142 = vector.load %arg26[%c4_105, %c0_106] : memref<28x32xf32, #tpu.memory_space<vmem>>, vector<24x32xf32>
    %143 = arith.truncf %142 : vector<24x32xf32> to vector<24x32xbf16>
    %c128_107 = arith.constant 128 : index
    %c0_108 = arith.constant 0 : index
    %144 = vector.load %arg11[%c128_107, %c0_108] : memref<160x32xbf16, #tpu.memory_space<vmem>>, vector<32x32xbf16>
    %cst_109 = arith.constant dense<0.000000e+00> : vector<24x32xf32>
    %145 = tpu.matmul %143, %144, %cst_109 {dimension_numbers = #tpu.dot_dimension_numbers<[1], [0], [0], [1], [0, 0, 1, 1], [], []>} : vector<24x32xbf16>, vector<32x32xbf16>, vector<24x32xf32> -> vector<24x32xf32>
    %146 = arith.addf %141, %145 : vector<24x32xf32>
    %c0_110 = arith.constant 0 : index
    %c0_111 = arith.constant 0 : index
    %147 = vector.load %arg12[%c0_110, %c0_111] : memref<1x32xf32, #tpu.memory_space<vmem>>, vector<1x32xf32>
    %148 = vector.broadcast %147 : vector<1x32xf32> to vector<24x32xf32>
    %149 = arith.addf %146, %148 : vector<24x32xf32>
    %cst_112 = arith.constant 0.000000e+00 : f32
    %150 = vector.broadcast %cst_112 : f32 to vector<24x32xf32>
    %151 = arith.maximumf %149, %150 : vector<24x32xf32>
    %cst_113 = arith.constant dense<0.000000e+00> : vector<24xf32>
    %152 = vector.multi_reduction <add>, %151, %cst_113 [1] : vector<24x32xf32> to vector<24xf32>
    %153 = vector.shape_cast %152 : vector<24xf32> to vector<24x1xf32>
    %cst_114 = arith.constant 3.200000e+01 : f32
    %154 = vector.broadcast %cst_114 : f32 to vector<24x1xf32>
    %155 = arith.divf %153, %154 : vector<24x1xf32>
    %156 = vector.broadcast %155 : vector<24x1xf32> to vector<24x32xf32>
    %157 = arith.subf %151, %156 : vector<24x32xf32>
    %158 = arith.mulf %157, %157 : vector<24x32xf32>
    %cst_115 = arith.constant dense<0.000000e+00> : vector<24xf32>
    %159 = vector.multi_reduction <add>, %158, %cst_115 [1] : vector<24x32xf32> to vector<24xf32>
    %160 = vector.shape_cast %159 : vector<24xf32> to vector<24x1xf32>
    %cst_116 = arith.constant 3.200000e+01 : f32
    %161 = vector.broadcast %cst_116 : f32 to vector<24x1xf32>
    %162 = arith.divf %160, %161 : vector<24x1xf32>
    %163 = vector.broadcast %155 : vector<24x1xf32> to vector<24x32xf32>
    %164 = arith.subf %151, %163 : vector<24x32xf32>
    %cst_117 = arith.constant 9.99999974E-6 : f32
    %165 = vector.broadcast %cst_117 : f32 to vector<24x1xf32>
    %166 = arith.addf %162, %165 : vector<24x1xf32>
    %167 = math.rsqrt %166 : vector<24x1xf32>
    %168 = vector.broadcast %167 : vector<24x1xf32> to vector<24x32xf32>
    %169 = arith.mulf %164, %168 : vector<24x32xf32>
    %c0_118 = arith.constant 0 : index
    %c0_119 = arith.constant 0 : index
    %170 = vector.load %arg13[%c0_118, %c0_119] : memref<1x32xf32, #tpu.memory_space<vmem>>, vector<1x32xf32>
    %171 = vector.broadcast %170 : vector<1x32xf32> to vector<24x32xf32>
    %172 = arith.mulf %169, %171 : vector<24x32xf32>
    %c0_120 = arith.constant 0 : index
    %c0_121 = arith.constant 0 : index
    %173 = vector.load %arg14[%c0_120, %c0_121] : memref<1x32xf32, #tpu.memory_space<vmem>>, vector<1x32xf32>
    %174 = vector.broadcast %173 : vector<1x32xf32> to vector<24x32xf32>
    %175 = arith.addf %172, %174 : vector<24x32xf32>
    %cst_122 = arith.constant 0.000000e+00 : f32
    %176 = vector.broadcast %cst_122 : f32 to vector<28x32xf32>
    %c0_123 = arith.constant 0 : index
    %c0_124 = arith.constant 0 : index
    %177 = vector.load %arg26[%c0_123, %c0_124] : memref<28x32xf32, #tpu.memory_space<vmem>>, vector<28x32xf32>
    tpu.vector_store %arg26[%c0_123, %c0_124], %176 {strides = array<i32>} : memref<28x32xf32, #tpu.memory_space<vmem>>, vector<28x32xf32>,
    %c2_125 = arith.constant 2 : index
    %c0_126 = arith.constant 0 : index
    %178 = vector.load %arg26[%c2_125, %c0_126] : memref<28x32xf32, #tpu.memory_space<vmem>>, vector<24x32xf32>
    tpu.vector_store %arg26[%c2_125, %c0_126], %175 {strides = array<i32>} : memref<28x32xf32, #tpu.memory_space<vmem>>, vector<24x32xf32>,
    %cst_127 = arith.constant 0.000000e+00 : f32
    %179 = vector.broadcast %cst_127 : f32 to vector<24x32xf32>
    %c0_128 = arith.constant 0 : index
    %c0_129 = arith.constant 0 : index
    %180 = vector.load %arg26[%c0_128, %c0_129] : memref<28x32xf32, #tpu.memory_space<vmem>>, vector<24x32xf32>
    %181 = arith.truncf %180 : vector<24x32xf32> to vector<24x32xbf16>
    %c0_130 = arith.constant 0 : index
    %c0_131 = arith.constant 0 : index
    %182 = vector.load %arg15[%c0_130, %c0_131] : memref<160x32xbf16, #tpu.memory_space<vmem>>, vector<32x32xbf16>
    %cst_132 = arith.constant dense<0.000000e+00> : vector<24x32xf32>
    %183 = tpu.matmul %181, %182, %cst_132 {dimension_numbers = #tpu.dot_dimension_numbers<[1], [0], [0], [1], [0, 0, 1, 1], [], []>} : vector<24x32xbf16>, vector<32x32xbf16>, vector<24x32xf32> -> vector<24x32xf32>
    %184 = arith.addf %179, %183 : vector<24x32xf32>
    %c1_133 = arith.constant 1 : index
    %c0_134 = arith.constant 0 : index
    %185 = vector.load %arg26[%c1_133, %c0_134] : memref<28x32xf32, #tpu.memory_space<vmem>>, vector<24x32xf32>
    %186 = arith.truncf %185 : vector<24x32xf32> to vector<24x32xbf16>
    %c32_135 = arith.constant 32 : index
    %c0_136 = arith.constant 0 : index
    %187 = vector.load %arg15[%c32_135, %c0_136] : memref<160x32xbf16, #tpu.memory_space<vmem>>, vector<32x32xbf16>
    %cst_137 = arith.constant dense<0.000000e+00> : vector<24x32xf32>
    %188 = tpu.matmul %186, %187, %cst_137 {dimension_numbers = #tpu.dot_dimension_numbers<[1], [0], [0], [1], [0, 0, 1, 1], [], []>} : vector<24x32xbf16>, vector<32x32xbf16>, vector<24x32xf32> -> vector<24x32xf32>
    %189 = arith.addf %184, %188 : vector<24x32xf32>
    %c2_138 = arith.constant 2 : index
    %c0_139 = arith.constant 0 : index
    %190 = vector.load %arg26[%c2_138, %c0_139] : memref<28x32xf32, #tpu.memory_space<vmem>>, vector<24x32xf32>
    %191 = arith.truncf %190 : vector<24x32xf32> to vector<24x32xbf16>
    %c64_140 = arith.constant 64 : index
    %c0_141 = arith.constant 0 : index
    %192 = vector.load %arg15[%c64_140, %c0_141] : memref<160x32xbf16, #tpu.memory_space<vmem>>, vector<32x32xbf16>
    %cst_142 = arith.constant dense<0.000000e+00> : vector<24x32xf32>
    %193 = tpu.matmul %191, %192, %cst_142 {dimension_numbers = #tpu.dot_dimension_numbers<[1], [0], [0], [1], [0, 0, 1, 1], [], []>} : vector<24x32xbf16>, vector<32x32xbf16>, vector<24x32xf32> -> vector<24x32xf32>
    %194 = arith.addf %189, %193 : vector<24x32xf32>
    %c3_143 = arith.constant 3 : index
    %c0_144 = arith.constant 0 : index
    %195 = vector.load %arg26[%c3_143, %c0_144] : memref<28x32xf32, #tpu.memory_space<vmem>>, vector<24x32xf32>
    %196 = arith.truncf %195 : vector<24x32xf32> to vector<24x32xbf16>
    %c96_145 = arith.constant 96 : index
    %c0_146 = arith.constant 0 : index
    %197 = vector.load %arg15[%c96_145, %c0_146] : memref<160x32xbf16, #tpu.memory_space<vmem>>, vector<32x32xbf16>
    %cst_147 = arith.constant dense<0.000000e+00> : vector<24x32xf32>
    %198 = tpu.matmul %196, %197, %cst_147 {dimension_numbers = #tpu.dot_dimension_numbers<[1], [0], [0], [1], [0, 0, 1, 1], [], []>} : vector<24x32xbf16>, vector<32x32xbf16>, vector<24x32xf32> -> vector<24x32xf32>
    %199 = arith.addf %194, %198 : vector<24x32xf32>
    %c4_148 = arith.constant 4 : index
    %c0_149 = arith.constant 0 : index
    %200 = vector.load %arg26[%c4_148, %c0_149] : memref<28x32xf32, #tpu.memory_space<vmem>>, vector<24x32xf32>
    %201 = arith.truncf %200 : vector<24x32xf32> to vector<24x32xbf16>
    %c128_150 = arith.constant 128 : index
    %c0_151 = arith.constant 0 : index
    %202 = vector.load %arg15[%c128_150, %c0_151] : memref<160x32xbf16, #tpu.memory_space<vmem>>, vector<32x32xbf16>
    %cst_152 = arith.constant dense<0.000000e+00> : vector<24x32xf32>
    %203 = tpu.matmul %201, %202, %cst_152 {dimension_numbers = #tpu.dot_dimension_numbers<[1], [0], [0], [1], [0, 0, 1, 1], [], []>} : vector<24x32xbf16>, vector<32x32xbf16>, vector<24x32xf32> -> vector<24x32xf32>
    %204 = arith.addf %199, %203 : vector<24x32xf32>
    %c0_153 = arith.constant 0 : index
    %c0_154 = arith.constant 0 : index
    %205 = vector.load %arg16[%c0_153, %c0_154] : memref<1x32xf32, #tpu.memory_space<vmem>>, vector<1x32xf32>
    %206 = vector.broadcast %205 : vector<1x32xf32> to vector<24x32xf32>
    %207 = arith.addf %204, %206 : vector<24x32xf32>
    %cst_155 = arith.constant 0.000000e+00 : f32
    %208 = vector.broadcast %cst_155 : f32 to vector<24x32xf32>
    %209 = arith.maximumf %207, %208 : vector<24x32xf32>
    %cst_156 = arith.constant dense<0.000000e+00> : vector<24xf32>
    %210 = vector.multi_reduction <add>, %209, %cst_156 [1] : vector<24x32xf32> to vector<24xf32>
    %211 = vector.shape_cast %210 : vector<24xf32> to vector<24x1xf32>
    %cst_157 = arith.constant 3.200000e+01 : f32
    %212 = vector.broadcast %cst_157 : f32 to vector<24x1xf32>
    %213 = arith.divf %211, %212 : vector<24x1xf32>
    %214 = vector.broadcast %213 : vector<24x1xf32> to vector<24x32xf32>
    %215 = arith.subf %209, %214 : vector<24x32xf32>
    %216 = arith.mulf %215, %215 : vector<24x32xf32>
    %cst_158 = arith.constant dense<0.000000e+00> : vector<24xf32>
    %217 = vector.multi_reduction <add>, %216, %cst_158 [1] : vector<24x32xf32> to vector<24xf32>
    %218 = vector.shape_cast %217 : vector<24xf32> to vector<24x1xf32>
    %cst_159 = arith.constant 3.200000e+01 : f32
    %219 = vector.broadcast %cst_159 : f32 to vector<24x1xf32>
    %220 = arith.divf %218, %219 : vector<24x1xf32>
    %221 = vector.broadcast %213 : vector<24x1xf32> to vector<24x32xf32>
    %222 = arith.subf %209, %221 : vector<24x32xf32>
    %cst_160 = arith.constant 9.99999974E-6 : f32
    %223 = vector.broadcast %cst_160 : f32 to vector<24x1xf32>
    %224 = arith.addf %220, %223 : vector<24x1xf32>
    %225 = math.rsqrt %224 : vector<24x1xf32>
    %226 = vector.broadcast %225 : vector<24x1xf32> to vector<24x32xf32>
    %227 = arith.mulf %222, %226 : vector<24x32xf32>
    %c0_161 = arith.constant 0 : index
    %c0_162 = arith.constant 0 : index
    %228 = vector.load %arg17[%c0_161, %c0_162] : memref<1x32xf32, #tpu.memory_space<vmem>>, vector<1x32xf32>
    %229 = vector.broadcast %228 : vector<1x32xf32> to vector<24x32xf32>
    %230 = arith.mulf %227, %229 : vector<24x32xf32>
    %c0_163 = arith.constant 0 : index
    %c0_164 = arith.constant 0 : index
    %231 = vector.load %arg18[%c0_163, %c0_164] : memref<1x32xf32, #tpu.memory_space<vmem>>, vector<1x32xf32>
    %232 = vector.broadcast %231 : vector<1x32xf32> to vector<24x32xf32>
    %233 = arith.addf %230, %232 : vector<24x32xf32>
    %cst_165 = arith.constant 0.000000e+00 : f32
    %234 = vector.broadcast %cst_165 : f32 to vector<28x32xf32>
    %c0_166 = arith.constant 0 : index
    %c0_167 = arith.constant 0 : index
    %235 = vector.load %arg26[%c0_166, %c0_167] : memref<28x32xf32, #tpu.memory_space<vmem>>, vector<28x32xf32>
    tpu.vector_store %arg26[%c0_166, %c0_167], %234 {strides = array<i32>} : memref<28x32xf32, #tpu.memory_space<vmem>>, vector<28x32xf32>,
    %c2_168 = arith.constant 2 : index
    %c0_169 = arith.constant 0 : index
    %236 = vector.load %arg26[%c2_168, %c0_169] : memref<28x32xf32, #tpu.memory_space<vmem>>, vector<24x32xf32>
    tpu.vector_store %arg26[%c2_168, %c0_169], %233 {strides = array<i32>} : memref<28x32xf32, #tpu.memory_space<vmem>>, vector<24x32xf32>,
    %cst_170 = arith.constant 0.000000e+00 : f32
    %237 = vector.broadcast %cst_170 : f32 to vector<24x32xf32>
    %c0_171 = arith.constant 0 : index
    %c0_172 = arith.constant 0 : index
    %238 = vector.load %arg26[%c0_171, %c0_172] : memref<28x32xf32, #tpu.memory_space<vmem>>, vector<24x32xf32>
    %239 = arith.truncf %238 : vector<24x32xf32> to vector<24x32xbf16>
    %c0_173 = arith.constant 0 : index
    %c0_174 = arith.constant 0 : index
    %240 = vector.load %arg19[%c0_173, %c0_174] : memref<160x32xbf16, #tpu.memory_space<vmem>>, vector<32x32xbf16>
    %cst_175 = arith.constant dense<0.000000e+00> : vector<24x32xf32>
    %241 = tpu.matmul %239, %240, %cst_175 {dimension_numbers = #tpu.dot_dimension_numbers<[1], [0], [0], [1], [0, 0, 1, 1], [], []>} : vector<24x32xbf16>, vector<32x32xbf16>, vector<24x32xf32> -> vector<24x32xf32>
    %242 = arith.addf %237, %241 : vector<24x32xf32>
    %c1_176 = arith.constant 1 : index
    %c0_177 = arith.constant 0 : index
    %243 = vector.load %arg26[%c1_176, %c0_177] : memref<28x32xf32, #tpu.memory_space<vmem>>, vector<24x32xf32>
    %244 = arith.truncf %243 : vector<24x32xf32> to vector<24x32xbf16>
    %c32_178 = arith.constant 32 : index
    %c0_179 = arith.constant 0 : index
    %245 = vector.load %arg19[%c32_178, %c0_179] : memref<160x32xbf16, #tpu.memory_space<vmem>>, vector<32x32xbf16>
    %cst_180 = arith.constant dense<0.000000e+00> : vector<24x32xf32>
    %246 = tpu.matmul %244, %245, %cst_180 {dimension_numbers = #tpu.dot_dimension_numbers<[1], [0], [0], [1], [0, 0, 1, 1], [], []>} : vector<24x32xbf16>, vector<32x32xbf16>, vector<24x32xf32> -> vector<24x32xf32>
    %247 = arith.addf %242, %246 : vector<24x32xf32>
    %c2_181 = arith.constant 2 : index
    %c0_182 = arith.constant 0 : index
    %248 = vector.load %arg26[%c2_181, %c0_182] : memref<28x32xf32, #tpu.memory_space<vmem>>, vector<24x32xf32>
    %249 = arith.truncf %248 : vector<24x32xf32> to vector<24x32xbf16>
    %c64_183 = arith.constant 64 : index
    %c0_184 = arith.constant 0 : index
    %250 = vector.load %arg19[%c64_183, %c0_184] : memref<160x32xbf16, #tpu.memory_space<vmem>>, vector<32x32xbf16>
    %cst_185 = arith.constant dense<0.000000e+00> : vector<24x32xf32>
    %251 = tpu.matmul %249, %250, %cst_185 {dimension_numbers = #tpu.dot_dimension_numbers<[1], [0], [0], [1], [0, 0, 1, 1], [], []>} : vector<24x32xbf16>, vector<32x32xbf16>, vector<24x32xf32> -> vector<24x32xf32>
    %252 = arith.addf %247, %251 : vector<24x32xf32>
    %c3_186 = arith.constant 3 : index
    %c0_187 = arith.constant 0 : index
    %253 = vector.load %arg26[%c3_186, %c0_187] : memref<28x32xf32, #tpu.memory_space<vmem>>, vector<24x32xf32>
    %254 = arith.truncf %253 : vector<24x32xf32> to vector<24x32xbf16>
    %c96_188 = arith.constant 96 : index
    %c0_189 = arith.constant 0 : index
    %255 = vector.load %arg19[%c96_188, %c0_189] : memref<160x32xbf16, #tpu.memory_space<vmem>>, vector<32x32xbf16>
    %cst_190 = arith.constant dense<0.000000e+00> : vector<24x32xf32>
    %256 = tpu.matmul %254, %255, %cst_190 {dimension_numbers = #tpu.dot_dimension_numbers<[1], [0], [0], [1], [0, 0, 1, 1], [], []>} : vector<24x32xbf16>, vector<32x32xbf16>, vector<24x32xf32> -> vector<24x32xf32>
    %257 = arith.addf %252, %256 : vector<24x32xf32>
    %c4_191 = arith.constant 4 : index
    %c0_192 = arith.constant 0 : index
    %258 = vector.load %arg26[%c4_191, %c0_192] : memref<28x32xf32, #tpu.memory_space<vmem>>, vector<24x32xf32>
    %259 = arith.truncf %258 : vector<24x32xf32> to vector<24x32xbf16>
    %c128_193 = arith.constant 128 : index
    %c0_194 = arith.constant 0 : index
    %260 = vector.load %arg19[%c128_193, %c0_194] : memref<160x32xbf16, #tpu.memory_space<vmem>>, vector<32x32xbf16>
    %cst_195 = arith.constant dense<0.000000e+00> : vector<24x32xf32>
    %261 = tpu.matmul %259, %260, %cst_195 {dimension_numbers = #tpu.dot_dimension_numbers<[1], [0], [0], [1], [0, 0, 1, 1], [], []>} : vector<24x32xbf16>, vector<32x32xbf16>, vector<24x32xf32> -> vector<24x32xf32>
    %262 = arith.addf %257, %261 : vector<24x32xf32>
    %c0_196 = arith.constant 0 : index
    %c0_197 = arith.constant 0 : index
    %263 = vector.load %arg20[%c0_196, %c0_197] : memref<1x32xf32, #tpu.memory_space<vmem>>, vector<1x32xf32>
    %264 = vector.broadcast %263 : vector<1x32xf32> to vector<24x32xf32>
    %265 = arith.addf %262, %264 : vector<24x32xf32>
    %cst_198 = arith.constant 0.000000e+00 : f32
    %266 = vector.broadcast %cst_198 : f32 to vector<24x32xf32>
    %267 = arith.maximumf %265, %266 : vector<24x32xf32>
    %cst_199 = arith.constant dense<0.000000e+00> : vector<24xf32>
    %268 = vector.multi_reduction <add>, %267, %cst_199 [1] : vector<24x32xf32> to vector<24xf32>
    %269 = vector.shape_cast %268 : vector<24xf32> to vector<24x1xf32>
    %cst_200 = arith.constant 3.200000e+01 : f32
    %270 = vector.broadcast %cst_200 : f32 to vector<24x1xf32>
    %271 = arith.divf %269, %270 : vector<24x1xf32>
    %272 = vector.broadcast %271 : vector<24x1xf32> to vector<24x32xf32>
    %273 = arith.subf %267, %272 : vector<24x32xf32>
    %274 = arith.mulf %273, %273 : vector<24x32xf32>
    %cst_201 = arith.constant dense<0.000000e+00> : vector<24xf32>
    %275 = vector.multi_reduction <add>, %274, %cst_201 [1] : vector<24x32xf32> to vector<24xf32>
    %276 = vector.shape_cast %275 : vector<24xf32> to vector<24x1xf32>
    %cst_202 = arith.constant 3.200000e+01 : f32
    %277 = vector.broadcast %cst_202 : f32 to vector<24x1xf32>
    %278 = arith.divf %276, %277 : vector<24x1xf32>
    %279 = vector.broadcast %271 : vector<24x1xf32> to vector<24x32xf32>
    %280 = arith.subf %267, %279 : vector<24x32xf32>
    %cst_203 = arith.constant 9.99999974E-6 : f32
    %281 = vector.broadcast %cst_203 : f32 to vector<24x1xf32>
    %282 = arith.addf %278, %281 : vector<24x1xf32>
    %283 = math.rsqrt %282 : vector<24x1xf32>
    %284 = vector.broadcast %283 : vector<24x1xf32> to vector<24x32xf32>
    %285 = arith.mulf %280, %284 : vector<24x32xf32>
    %c0_204 = arith.constant 0 : index
    %c0_205 = arith.constant 0 : index
    %286 = vector.load %arg21[%c0_204, %c0_205] : memref<1x32xf32, #tpu.memory_space<vmem>>, vector<1x32xf32>
    %287 = vector.broadcast %286 : vector<1x32xf32> to vector<24x32xf32>
    %288 = arith.mulf %285, %287 : vector<24x32xf32>
    %c0_206 = arith.constant 0 : index
    %c0_207 = arith.constant 0 : index
    %289 = vector.load %arg22[%c0_206, %c0_207] : memref<1x32xf32, #tpu.memory_space<vmem>>, vector<1x32xf32>
    %290 = vector.broadcast %289 : vector<1x32xf32> to vector<24x32xf32>
    %291 = arith.addf %288, %290 : vector<24x32xf32>
    %292 = arith.truncf %291 : vector<24x32xf32> to vector<24x32xbf16>
    %c0_208 = arith.constant 0 : index
    %c0_209 = arith.constant 0 : index
    %293 = vector.load %arg23[%c0_208, %c0_209] : memref<32x2xbf16, #tpu.memory_space<vmem>>, vector<32x2xbf16>
    %cst_210 = arith.constant dense<0.000000e+00> : vector<24x2xf32>
    %294 = tpu.matmul %292, %293, %cst_210 {dimension_numbers = #tpu.dot_dimension_numbers<[1], [0], [0], [1], [0, 0, 1, 1], [], []>} : vector<24x32xbf16>, vector<32x2xbf16>, vector<24x2xf32> -> vector<24x2xf32>
    %c0_211 = arith.constant 0 : index
    %c0_212 = arith.constant 0 : index
    %295 = vector.load %arg24[%c0_211, %c0_212] : memref<1x2xf32, #tpu.memory_space<vmem>>, vector<1x2xf32>
    %296 = vector.broadcast %295 : vector<1x2xf32> to vector<24x2xf32>
    %297 = arith.addf %294, %296 : vector<24x2xf32>
    %c0_213 = arith.constant 0 : index
    %c0_214 = arith.constant 0 : index
    %c0_215 = arith.constant 0 : index
    %298 = vector.load %arg25[%c0_213, %c0_214, %c0_215] : memref<1x24x2xf32, #tpu.memory_space<vmem>>, vector<1x24x2xf32>
    %299 = vector.shape_cast %298 : vector<1x24x2xf32> to vector<24x2xf32>
    %300 = vector.shape_cast %297 : vector<24x2xf32> to vector<1x24x2xf32>
    tpu.vector_store %arg25[%c0_213, %c0_214, %c0_215], %300 {strides = array<i32>} : memref<1x24x2xf32, #tpu.memory_space<vmem>>, vector<1x24x2xf32>,
    return
  }
  func.func @transform_0(%arg0: i32) -> (i32, i32, i32) {
    %c0_i32 = arith.constant 0 : i32
    %c0_i32_0 = arith.constant 0 : i32
    %c0_i32_1 = arith.constant 0 : i32
    return %arg0, %c0_i32, %c0_i32_0 : i32, i32, i32
  }
  func.func @transform_1(%arg0: i32) -> (i32, i32, i32) {
    %c0_i32 = arith.constant 0 : i32
    %c0_i32_0 = arith.constant 0 : i32
    %c0_i32_1 = arith.constant 0 : i32
    return %arg0, %c0_i32, %c0_i32_0 : i32, i32, i32
  }
  func.func @transform_2(%arg0: i32) -> (i32, i32) {
    %c0_i32 = arith.constant 0 : i32
    %c0_i32_0 = arith.constant 0 : i32
    %c0_i32_1 = arith.constant 0 : i32
    return %c0_i32, %c0_i32_0 : i32, i32
  }
  func.func @transform_3(%arg0: i32) -> (i32, i32) {
    %c0_i32 = arith.constant 0 : i32
    %c0_i32_0 = arith.constant 0 : i32
    %c0_i32_1 = arith.constant 0 : i32
    return %c0_i32, %c0_i32_0 : i32, i32
  }
  func.func @transform_4(%arg0: i32) -> (i32, i32) {
    %c0_i32 = arith.constant 0 : i32
    %c0_i32_0 = arith.constant 0 : i32
    %c0_i32_1 = arith.constant 0 : i32
    return %c0_i32, %c0_i32_0 : i32, i32
  }
  func.func @transform_5(%arg0: i32) -> (i32, i32) {
    %c0_i32 = arith.constant 0 : i32
    %c0_i32_0 = arith.constant 0 : i32
    %c0_i32_1 = arith.constant 0 : i32
    return %c0_i32, %c0_i32_0 : i32, i32
  }
  func.func @transform_6(%arg0: i32) -> (i32, i32) {
    %c0_i32 = arith.constant 0 : i32
    %c0_i32_0 = arith.constant 0 : i32
    %c0_i32_1 = arith.constant 0 : i32
    return %c0_i32, %c0_i32_0 : i32, i32
  }
  func.func @transform_7(%arg0: i32) -> (i32, i32) {
    %c0_i32 = arith.constant 0 : i32
    %c0_i32_0 = arith.constant 0 : i32
    %c0_i32_1 = arith.constant 0 : i32
    return %c0_i32, %c0_i32_0 : i32, i32
  }
  func.func @transform_8(%arg0: i32) -> (i32, i32) {
    %c0_i32 = arith.constant 0 : i32
    %c0_i32_0 = arith.constant 0 : i32
    %c0_i32_1 = arith.constant 0 : i32
    return %c0_i32, %c0_i32_0 : i32, i32
  }
  func.func @transform_9(%arg0: i32) -> (i32, i32) {
    %c0_i32 = arith.constant 0 : i32
    %c0_i32_0 = arith.constant 0 : i32
    %c0_i32_1 = arith.constant 0 : i32
    return %c0_i32, %c0_i32_0 : i32, i32
  }
  func.func @transform_10(%arg0: i32) -> (i32, i32) {
    %c0_i32 = arith.constant 0 : i32
    %c0_i32_0 = arith.constant 0 : i32
    %c0_i32_1 = arith.constant 0 : i32
    return %c0_i32, %c0_i32_0 : i32, i32
  }
  func.func @transform_11(%arg0: i32) -> (i32, i32) {
    %c0_i32 = arith.constant 0 : i32
    %c0_i32_0 = arith.constant 0 : i32
    %c0_i32_1 = arith.constant 0 : i32
    return %c0_i32, %c0_i32_0 : i32, i32
  }
  func.func @transform_12(%arg0: i32) -> (i32, i32) {
    %c0_i32 = arith.constant 0 : i32
    %c0_i32_0 = arith.constant 0 : i32
    %c0_i32_1 = arith.constant 0 : i32
    return %c0_i32, %c0_i32_0 : i32, i32
  }
  func.func @transform_13(%arg0: i32) -> (i32, i32) {
    %c0_i32 = arith.constant 0 : i32
    %c0_i32_0 = arith.constant 0 : i32
    %c0_i32_1 = arith.constant 0 : i32
    return %c0_i32, %c0_i32_0 : i32, i32
  }
  func.func @transform_14(%arg0: i32) -> (i32, i32) {
    %c0_i32 = arith.constant 0 : i32
    %c0_i32_0 = arith.constant 0 : i32
    %c0_i32_1 = arith.constant 0 : i32
    return %c0_i32, %c0_i32_0 : i32, i32
  }
  func.func @transform_15(%arg0: i32) -> (i32, i32) {
    %c0_i32 = arith.constant 0 : i32
    %c0_i32_0 = arith.constant 0 : i32
    %c0_i32_1 = arith.constant 0 : i32
    return %c0_i32, %c0_i32_0 : i32, i32
  }
  func.func @transform_16(%arg0: i32) -> (i32, i32) {
    %c0_i32 = arith.constant 0 : i32
    %c0_i32_0 = arith.constant 0 : i32
    %c0_i32_1 = arith.constant 0 : i32
    return %c0_i32, %c0_i32_0 : i32, i32
  }
  func.func @transform_17(%arg0: i32) -> (i32, i32) {
    %c0_i32 = arith.constant 0 : i32
    %c0_i32_0 = arith.constant 0 : i32
    %c0_i32_1 = arith.constant 0 : i32
    return %c0_i32, %c0_i32_0 : i32, i32
  }
  func.func @transform_18(%arg0: i32) -> (i32, i32) {
    %c0_i32 = arith.constant 0 : i32
    %c0_i32_0 = arith.constant 0 : i32
    %c0_i32_1 = arith.constant 0 : i32
    return %c0_i32, %c0_i32_0 : i32, i32
  }
  func.func @transform_19(%arg0: i32) -> (i32, i32) {
    %c0_i32 = arith.constant 0 : i32
    %c0_i32_0 = arith.constant 0 : i32
    %c0_i32_1 = arith.constant 0 : i32
    return %c0_i32, %c0_i32_0 : i32, i32
  }
  func.func @transform_20(%arg0: i32) -> (i32, i32) {
    %c0_i32 = arith.constant 0 : i32
    %c0_i32_0 = arith.constant 0 : i32
    %c0_i32_1 = arith.constant 0 : i32
    return %c0_i32, %c0_i32_0 : i32, i32
  }
  func.func @transform_21(%arg0: i32) -> (i32, i32) {
    %c0_i32 = arith.constant 0 : i32
    %c0_i32_0 = arith.constant 0 : i32
    %c0_i32_1 = arith.constant 0 : i32
    return %c0_i32, %c0_i32_0 : i32, i32
  }
  func.func @transform_22(%arg0: i32) -> (i32, i32) {
    %c0_i32 = arith.constant 0 : i32
    %c0_i32_0 = arith.constant 0 : i32
    %c0_i32_1 = arith.constant 0 : i32
    return %c0_i32, %c0_i32_0 : i32, i32
  }
  func.func @transform_23(%arg0: i32) -> (i32, i32) {
    %c0_i32 = arith.constant 0 : i32
    %c0_i32_0 = arith.constant 0 : i32
    %c0_i32_1 = arith.constant 0 : i32
    return %c0_i32, %c0_i32_0 : i32, i32
  }
  func.func @transform_24(%arg0: i32) -> (i32, i32, i32) {
    %c0_i32 = arith.constant 0 : i32
    %c0_i32_0 = arith.constant 0 : i32
    %c0_i32_1 = arith.constant 0 : i32
    return %arg0, %c0_i32, %c0_i32_0 : i32, i32, i32
  }
}

module attributes {stable_mosaic.version = 11 : i64} {
  func.func @kernel(%arg0: i32, %arg1: memref<1x24x32xf32, #tpu.memory_space<vmem>>, %arg2: memref<1x1x32xf32, #tpu.memory_space<vmem>>, %arg3: memref<1x1x24xf32, #tpu.memory_space<vmem>>, %arg4: memref<1x24x1xf32, #tpu.memory_space<vmem>>, %arg5: memref<32x64xbf16, #tpu.memory_space<vmem>>, %arg6: memref<1x64xf32, #tpu.memory_space<vmem>>, %arg7: memref<32x96xbf16, #tpu.memory_space<vmem>>, %arg8: memref<1x96xf32, #tpu.memory_space<vmem>>, %arg9: memref<32x32xbf16, #tpu.memory_space<vmem>>, %arg10: memref<1x32xf32, #tpu.memory_space<vmem>>, %arg11: memref<32x64xbf16, #tpu.memory_space<vmem>>, %arg12: memref<1x64xf32, #tpu.memory_space<vmem>>, %arg13: memref<96x64xbf16, #tpu.memory_space<vmem>>, %arg14: memref<1x64xf32, #tpu.memory_space<vmem>>, %arg15: memref<64x32xbf16, #tpu.memory_space<vmem>>, %arg16: memref<1x32xf32, #tpu.memory_space<vmem>>, %arg17: memref<1x24x32xf32, #tpu.memory_space<vmem>>, %arg18: memref<26x32xf32, #tpu.memory_space<vmem>>) attributes {dimension_semantics = [#tpu.dimension_semantics<parallel>], iteration_bounds = array<i64: 2>, scalar_prefetch = 0 : i64, scratch_operands = 1 : i64, tpu.core_type = #tpu.core_type<tc>, window_params = [{transform_indices = @transform_0, window_bounds = array<i64: 1, 24, 32>}, {transform_indices = @transform_1, window_bounds = array<i64: 1, 1, 32>}, {transform_indices = @transform_2, window_bounds = array<i64: 1, 1, 24>}, {transform_indices = @transform_3, window_bounds = array<i64: 1, 24, 1>}, {pipeline_mode = #tpu.pipeline_mode<synchronous>, transform_indices = @transform_4, window_bounds = array<i64: 32, 64>}, {pipeline_mode = #tpu.pipeline_mode<synchronous>, transform_indices = @transform_5, window_bounds = array<i64: 1, 64>}, {pipeline_mode = #tpu.pipeline_mode<synchronous>, transform_indices = @transform_6, window_bounds = array<i64: 32, 96>}, {pipeline_mode = #tpu.pipeline_mode<synchronous>, transform_indices = @transform_7, window_bounds = array<i64: 1, 96>}, {pipeline_mode = #tpu.pipeline_mode<synchronous>, transform_indices = @transform_8, window_bounds = array<i64: 32, 32>}, {pipeline_mode = #tpu.pipeline_mode<synchronous>, transform_indices = @transform_9, window_bounds = array<i64: 1, 32>}, {pipeline_mode = #tpu.pipeline_mode<synchronous>, transform_indices = @transform_10, window_bounds = array<i64: 32, 64>}, {pipeline_mode = #tpu.pipeline_mode<synchronous>, transform_indices = @transform_11, window_bounds = array<i64: 1, 64>}, {pipeline_mode = #tpu.pipeline_mode<synchronous>, transform_indices = @transform_12, window_bounds = array<i64: 96, 64>}, {pipeline_mode = #tpu.pipeline_mode<synchronous>, transform_indices = @transform_13, window_bounds = array<i64: 1, 64>}, {pipeline_mode = #tpu.pipeline_mode<synchronous>, transform_indices = @transform_14, window_bounds = array<i64: 64, 32>}, {pipeline_mode = #tpu.pipeline_mode<synchronous>, transform_indices = @transform_15, window_bounds = array<i64: 1, 32>}, {transform_indices = @transform_16, window_bounds = array<i64: 1, 24, 32>}]} {
    %c0 = arith.constant 0 : index
    %c0_0 = arith.constant 0 : index
    %c0_1 = arith.constant 0 : index
    %0 = vector.load %arg1[%c0, %c0_0, %c0_1] : memref<1x24x32xf32, #tpu.memory_space<vmem>>, vector<1x24x32xf32>
    %1 = vector.shape_cast %0 : vector<1x24x32xf32> to vector<24x32xf32>
    %c0_2 = arith.constant 0 : index
    %c0_3 = arith.constant 0 : index
    %c0_4 = arith.constant 0 : index
    %2 = vector.load %arg2[%c0_2, %c0_3, %c0_4] : memref<1x1x32xf32, #tpu.memory_space<vmem>>, vector<1x1x32xf32>
    %3 = vector.shape_cast %2 : vector<1x1x32xf32> to vector<1x32xf32>
    %4 = arith.truncf %3 : vector<1x32xf32> to vector<1x32xbf16>
    %c0_5 = arith.constant 0 : index
    %c0_6 = arith.constant 0 : index
    %c0_7 = arith.constant 0 : index
    %5 = vector.load %arg3[%c0_5, %c0_6, %c0_7] : memref<1x1x24xf32, #tpu.memory_space<vmem>>, vector<1x1x24xf32>
    %6 = vector.shape_cast %5 : vector<1x1x24xf32> to vector<1x24xf32>
    %c0_8 = arith.constant 0 : index
    %c0_9 = arith.constant 0 : index
    %c0_10 = arith.constant 0 : index
    %7 = vector.load %arg4[%c0_8, %c0_9, %c0_10] : memref<1x24x1xf32, #tpu.memory_space<vmem>>, vector<1x24x1xf32>
    %8 = vector.shape_cast %7 : vector<1x24x1xf32> to vector<24x1xf32>
    %cst = arith.constant dense<0.000000e+00> : vector<24xf32>
    %9 = vector.multi_reduction <add>, %1, %cst [1] : vector<24x32xf32> to vector<24xf32>
    %10 = vector.shape_cast %9 : vector<24xf32> to vector<24x1xf32>
    %cst_11 = arith.constant 3.200000e+01 : f32
    %11 = vector.broadcast %cst_11 : f32 to vector<24x1xf32>
    %12 = arith.divf %10, %11 : vector<24x1xf32>
    %13 = vector.broadcast %12 : vector<24x1xf32> to vector<24x32xf32>
    %14 = arith.subf %1, %13 : vector<24x32xf32>
    %15 = arith.mulf %14, %14 : vector<24x32xf32>
    %cst_12 = arith.constant dense<0.000000e+00> : vector<24xf32>
    %16 = vector.multi_reduction <add>, %15, %cst_12 [1] : vector<24x32xf32> to vector<24xf32>
    %17 = vector.shape_cast %16 : vector<24xf32> to vector<24x1xf32>
    %cst_13 = arith.constant 3.200000e+01 : f32
    %18 = vector.broadcast %cst_13 : f32 to vector<24x1xf32>
    %19 = arith.divf %17, %18 : vector<24x1xf32>
    %20 = vector.broadcast %12 : vector<24x1xf32> to vector<24x32xf32>
    %21 = arith.subf %1, %20 : vector<24x32xf32>
    %cst_14 = arith.constant 9.99999974E-6 : f32
    %22 = vector.broadcast %cst_14 : f32 to vector<24x1xf32>
    %23 = arith.addf %19, %22 : vector<24x1xf32>
    %24 = math.rsqrt %23 : vector<24x1xf32>
    %25 = vector.broadcast %24 : vector<24x1xf32> to vector<24x32xf32>
    %26 = arith.mulf %21, %25 : vector<24x32xf32>
    %c0_15 = arith.constant 0 : index
    %c0_16 = arith.constant 0 : index
    %27 = vector.load %arg5[%c0_15, %c0_16] : memref<32x64xbf16, #tpu.memory_space<vmem>>, vector<32x64xbf16>
    %cst_17 = arith.constant dense<0.000000e+00> : vector<1x64xf32>
    %28 = tpu.matmul %4, %27, %cst_17 {dimension_numbers = #tpu.dot_dimension_numbers<[1], [0], [0], [1], [0, 0, 1, 1], [], []>} : vector<1x32xbf16>, vector<32x64xbf16>, vector<1x64xf32> -> vector<1x64xf32>
    %c0_18 = arith.constant 0 : index
    %c0_19 = arith.constant 0 : index
    %29 = vector.load %arg6[%c0_18, %c0_19] : memref<1x64xf32, #tpu.memory_space<vmem>>, vector<1x64xf32>
    %30 = arith.addf %28, %29 : vector<1x64xf32>
    %31 = vector.extract_strided_slice %30 {offsets = [0, 0], sizes = [1, 32], strides = [1, 1]} : vector<1x64xf32> to vector<1x32xf32>
    %cst_20 = arith.constant 1.000000e+00 : f32
    %32 = vector.broadcast %cst_20 : f32 to vector<1x32xf32>
    %33 = arith.addf %32, %31 : vector<1x32xf32>
    %34 = vector.broadcast %33 : vector<1x32xf32> to vector<24x32xf32>
    %35 = arith.mulf %26, %34 : vector<24x32xf32>
    %36 = vector.extract_strided_slice %30 {offsets = [0, 32], sizes = [1, 32], strides = [1, 1]} : vector<1x64xf32> to vector<1x32xf32>
    %37 = vector.broadcast %36 : vector<1x32xf32> to vector<24x32xf32>
    %38 = arith.addf %35, %37 : vector<24x32xf32>
    %39 = arith.truncf %38 : vector<24x32xf32> to vector<24x32xbf16>
    %c0_21 = arith.constant 0 : index
    %c0_22 = arith.constant 0 : index
    %40 = vector.load %arg7[%c0_21, %c0_22] : memref<32x96xbf16, #tpu.memory_space<vmem>>, vector<32x96xbf16>
    %cst_23 = arith.constant dense<0.000000e+00> : vector<24x96xf32>
    %41 = tpu.matmul %39, %40, %cst_23 {dimension_numbers = #tpu.dot_dimension_numbers<[1], [0], [0], [1], [0, 0, 1, 1], [], []>} : vector<24x32xbf16>, vector<32x96xbf16>, vector<24x96xf32> -> vector<24x96xf32>
    %c0_24 = arith.constant 0 : index
    %c0_25 = arith.constant 0 : index
    %42 = vector.load %arg8[%c0_24, %c0_25] : memref<1x96xf32, #tpu.memory_space<vmem>>, vector<1x96xf32>
    %43 = vector.broadcast %42 : vector<1x96xf32> to vector<24x96xf32>
    %44 = arith.addf %41, %43 : vector<24x96xf32>
    %cst_26 = arith.constant 0.000000e+00 : f32
    %45 = vector.broadcast %cst_26 : f32 to vector<24x32xf32>
    %46 = vector.extract_strided_slice %44 {offsets = [0, 0], sizes = [24, 16], strides = [1, 1]} : vector<24x96xf32> to vector<24x16xf32>
    %47 = arith.truncf %46 : vector<24x16xf32> to vector<24x16xbf16>
    %48 = vector.extract_strided_slice %44 {offsets = [0, 32], sizes = [24, 16], strides = [1, 1]} : vector<24x96xf32> to vector<24x16xf32>
    %49 = arith.truncf %48 : vector<24x16xf32> to vector<24x16xbf16>
    %50 = vector.extract_strided_slice %44 {offsets = [0, 64], sizes = [24, 16], strides = [1, 1]} : vector<24x96xf32> to vector<24x16xf32>
    %51 = arith.truncf %50 : vector<24x16xf32> to vector<24x16xbf16>
    %cst_27 = arith.constant dense<0.000000e+00> : vector<24x24xf32>
    %52 = tpu.matmul %47, %49, %cst_27 {dimension_numbers = #tpu.dot_dimension_numbers<[1], [1], [0], [0], [0, 0, 1, 0], [], []>} : vector<24x16xbf16>, vector<24x16xbf16>, vector<24x24xf32> -> vector<24x24xf32>
    %cst_28 = arith.constant 2.500000e-01 : f32
    %53 = vector.broadcast %cst_28 : f32 to vector<24x24xf32>
    %54 = arith.mulf %52, %53 : vector<24x24xf32>
    %55 = vector.broadcast %6 : vector<1x24xf32> to vector<24x24xf32>
    %56 = arith.addf %54, %55 : vector<24x24xf32>
    %cst_29 = arith.constant dense<0xFF800000> : vector<24xf32>
    %57 = vector.multi_reduction <maximumf>, %56, %cst_29 [1] : vector<24x24xf32> to vector<24xf32>
    %58 = vector.shape_cast %57 : vector<24xf32> to vector<24x1xf32>
    %59 = vector.broadcast %58 : vector<24x1xf32> to vector<24x24xf32>
    %60 = arith.subf %56, %59 : vector<24x24xf32>
    %61 = math.exp %60 : vector<24x24xf32>
    %cst_30 = arith.constant dense<0.000000e+00> : vector<24xf32>
    %62 = vector.multi_reduction <add>, %61, %cst_30 [1] : vector<24x24xf32> to vector<24xf32>
    %63 = vector.shape_cast %62 : vector<24xf32> to vector<24x1xf32>
    %64 = tpu.reciprocal %63 {approx = true} : vector<24x1xf32> -> vector<24x1xf32>
    %65 = arith.truncf %61 : vector<24x24xf32> to vector<24x24xbf16>
    %cst_31 = arith.constant dense<0.000000e+00> : vector<24x16xf32>
    %66 = tpu.matmul %65, %51, %cst_31 {dimension_numbers = #tpu.dot_dimension_numbers<[1], [0], [0], [1], [0, 0, 1, 1], [], []>} : vector<24x24xbf16>, vector<24x16xbf16>, vector<24x16xf32> -> vector<24x16xf32>
    %67 = vector.broadcast %64 : vector<24x1xf32> to vector<24x16xf32>
    %68 = arith.mulf %66, %67 : vector<24x16xf32>
    %69 = arith.truncf %68 : vector<24x16xf32> to vector<24x16xbf16>
    %c0_32 = arith.constant 0 : index
    %c0_33 = arith.constant 0 : index
    %70 = vector.load %arg9[%c0_32, %c0_33] : memref<32x32xbf16, #tpu.memory_space<vmem>>, vector<16x32xbf16>
    %cst_34 = arith.constant dense<0.000000e+00> : vector<24x32xf32>
    %71 = tpu.matmul %69, %70, %cst_34 {dimension_numbers = #tpu.dot_dimension_numbers<[1], [0], [0], [1], [0, 0, 1, 1], [], []>} : vector<24x16xbf16>, vector<16x32xbf16>, vector<24x32xf32> -> vector<24x32xf32>
    %72 = arith.addf %45, %71 : vector<24x32xf32>
    %73 = vector.extract_strided_slice %44 {offsets = [0, 16], sizes = [24, 16], strides = [1, 1]} : vector<24x96xf32> to vector<24x16xf32>
    %74 = arith.truncf %73 : vector<24x16xf32> to vector<24x16xbf16>
    %75 = vector.extract_strided_slice %44 {offsets = [0, 48], sizes = [24, 16], strides = [1, 1]} : vector<24x96xf32> to vector<24x16xf32>
    %76 = arith.truncf %75 : vector<24x16xf32> to vector<24x16xbf16>
    %77 = vector.extract_strided_slice %44 {offsets = [0, 80], sizes = [24, 16], strides = [1, 1]} : vector<24x96xf32> to vector<24x16xf32>
    %78 = arith.truncf %77 : vector<24x16xf32> to vector<24x16xbf16>
    %cst_35 = arith.constant dense<0.000000e+00> : vector<24x24xf32>
    %79 = tpu.matmul %74, %76, %cst_35 {dimension_numbers = #tpu.dot_dimension_numbers<[1], [1], [0], [0], [0, 0, 1, 0], [], []>} : vector<24x16xbf16>, vector<24x16xbf16>, vector<24x24xf32> -> vector<24x24xf32>
    %cst_36 = arith.constant 2.500000e-01 : f32
    %80 = vector.broadcast %cst_36 : f32 to vector<24x24xf32>
    %81 = arith.mulf %79, %80 : vector<24x24xf32>
    %82 = vector.broadcast %6 : vector<1x24xf32> to vector<24x24xf32>
    %83 = arith.addf %81, %82 : vector<24x24xf32>
    %cst_37 = arith.constant dense<0xFF800000> : vector<24xf32>
    %84 = vector.multi_reduction <maximumf>, %83, %cst_37 [1] : vector<24x24xf32> to vector<24xf32>
    %85 = vector.shape_cast %84 : vector<24xf32> to vector<24x1xf32>
    %86 = vector.broadcast %85 : vector<24x1xf32> to vector<24x24xf32>
    %87 = arith.subf %83, %86 : vector<24x24xf32>
    %88 = math.exp %87 : vector<24x24xf32>
    %cst_38 = arith.constant dense<0.000000e+00> : vector<24xf32>
    %89 = vector.multi_reduction <add>, %88, %cst_38 [1] : vector<24x24xf32> to vector<24xf32>
    %90 = vector.shape_cast %89 : vector<24xf32> to vector<24x1xf32>
    %91 = tpu.reciprocal %90 {approx = true} : vector<24x1xf32> -> vector<24x1xf32>
    %92 = arith.truncf %88 : vector<24x24xf32> to vector<24x24xbf16>
    %cst_39 = arith.constant dense<0.000000e+00> : vector<24x16xf32>
    %93 = tpu.matmul %92, %78, %cst_39 {dimension_numbers = #tpu.dot_dimension_numbers<[1], [0], [0], [1], [0, 0, 1, 1], [], []>} : vector<24x24xbf16>, vector<24x16xbf16>, vector<24x16xf32> -> vector<24x16xf32>
    %94 = vector.broadcast %91 : vector<24x1xf32> to vector<24x16xf32>
    %95 = arith.mulf %93, %94 : vector<24x16xf32>
    %96 = arith.truncf %95 : vector<24x16xf32> to vector<24x16xbf16>
    %c16 = arith.constant 16 : index
    %c0_40 = arith.constant 0 : index
    %97 = vector.load %arg9[%c16, %c0_40] : memref<32x32xbf16, #tpu.memory_space<vmem>>, vector<16x32xbf16>
    %cst_41 = arith.constant dense<0.000000e+00> : vector<24x32xf32>
    %98 = tpu.matmul %96, %97, %cst_41 {dimension_numbers = #tpu.dot_dimension_numbers<[1], [0], [0], [1], [0, 0, 1, 1], [], []>} : vector<24x16xbf16>, vector<16x32xbf16>, vector<24x32xf32> -> vector<24x32xf32>
    %99 = arith.addf %72, %98 : vector<24x32xf32>
    %100 = arith.addf %1, %99 : vector<24x32xf32>
    %c0_42 = arith.constant 0 : index
    %c0_43 = arith.constant 0 : index
    %101 = vector.load %arg10[%c0_42, %c0_43] : memref<1x32xf32, #tpu.memory_space<vmem>>, vector<1x32xf32>
    %102 = vector.broadcast %101 : vector<1x32xf32> to vector<24x32xf32>
    %103 = arith.addf %100, %102 : vector<24x32xf32>
    %104 = vector.broadcast %8 : vector<24x1xf32> to vector<24x32xf32>
    %105 = arith.mulf %103, %104 : vector<24x32xf32>
    %cst_44 = arith.constant dense<0.000000e+00> : vector<24xf32>
    %106 = vector.multi_reduction <add>, %105, %cst_44 [1] : vector<24x32xf32> to vector<24xf32>
    %107 = vector.shape_cast %106 : vector<24xf32> to vector<24x1xf32>
    %cst_45 = arith.constant 3.200000e+01 : f32
    %108 = vector.broadcast %cst_45 : f32 to vector<24x1xf32>
    %109 = arith.divf %107, %108 : vector<24x1xf32>
    %110 = vector.broadcast %109 : vector<24x1xf32> to vector<24x32xf32>
    %111 = arith.subf %105, %110 : vector<24x32xf32>
    %112 = arith.mulf %111, %111 : vector<24x32xf32>
    %cst_46 = arith.constant dense<0.000000e+00> : vector<24xf32>
    %113 = vector.multi_reduction <add>, %112, %cst_46 [1] : vector<24x32xf32> to vector<24xf32>
    %114 = vector.shape_cast %113 : vector<24xf32> to vector<24x1xf32>
    %cst_47 = arith.constant 3.200000e+01 : f32
    %115 = vector.broadcast %cst_47 : f32 to vector<24x1xf32>
    %116 = arith.divf %114, %115 : vector<24x1xf32>
    %117 = vector.broadcast %109 : vector<24x1xf32> to vector<24x32xf32>
    %118 = arith.subf %105, %117 : vector<24x32xf32>
    %cst_48 = arith.constant 9.99999974E-6 : f32
    %119 = vector.broadcast %cst_48 : f32 to vector<24x1xf32>
    %120 = arith.addf %116, %119 : vector<24x1xf32>
    %121 = math.rsqrt %120 : vector<24x1xf32>
    %122 = vector.broadcast %121 : vector<24x1xf32> to vector<24x32xf32>
    %123 = arith.mulf %118, %122 : vector<24x32xf32>
    %c0_49 = arith.constant 0 : index
    %c0_50 = arith.constant 0 : index
    %124 = vector.load %arg11[%c0_49, %c0_50] : memref<32x64xbf16, #tpu.memory_space<vmem>>, vector<32x64xbf16>
    %cst_51 = arith.constant dense<0.000000e+00> : vector<1x64xf32>
    %125 = tpu.matmul %4, %124, %cst_51 {dimension_numbers = #tpu.dot_dimension_numbers<[1], [0], [0], [1], [0, 0, 1, 1], [], []>} : vector<1x32xbf16>, vector<32x64xbf16>, vector<1x64xf32> -> vector<1x64xf32>
    %c0_52 = arith.constant 0 : index
    %c0_53 = arith.constant 0 : index
    %126 = vector.load %arg12[%c0_52, %c0_53] : memref<1x64xf32, #tpu.memory_space<vmem>>, vector<1x64xf32>
    %127 = arith.addf %125, %126 : vector<1x64xf32>
    %128 = vector.extract_strided_slice %127 {offsets = [0, 0], sizes = [1, 32], strides = [1, 1]} : vector<1x64xf32> to vector<1x32xf32>
    %cst_54 = arith.constant 1.000000e+00 : f32
    %129 = vector.broadcast %cst_54 : f32 to vector<1x32xf32>
    %130 = arith.addf %129, %128 : vector<1x32xf32>
    %131 = vector.broadcast %130 : vector<1x32xf32> to vector<24x32xf32>
    %132 = arith.mulf %123, %131 : vector<24x32xf32>
    %133 = vector.extract_strided_slice %127 {offsets = [0, 32], sizes = [1, 32], strides = [1, 1]} : vector<1x64xf32> to vector<1x32xf32>
    %134 = vector.broadcast %133 : vector<1x32xf32> to vector<24x32xf32>
    %135 = arith.addf %132, %134 : vector<24x32xf32>
    %cst_55 = arith.constant 0.000000e+00 : f32
    %136 = vector.broadcast %cst_55 : f32 to vector<26x32xf32>
    %c0_56 = arith.constant 0 : index
    %c0_57 = arith.constant 0 : index
    %137 = vector.load %arg18[%c0_56, %c0_57] : memref<26x32xf32, #tpu.memory_space<vmem>>, vector<26x32xf32>
    tpu.vector_store %arg18[%c0_56, %c0_57], %136 {strides = array<i32>} : memref<26x32xf32, #tpu.memory_space<vmem>>, vector<26x32xf32>,
    %c1 = arith.constant 1 : index
    %c0_58 = arith.constant 0 : index
    %138 = vector.load %arg18[%c1, %c0_58] : memref<26x32xf32, #tpu.memory_space<vmem>>, vector<24x32xf32>
    tpu.vector_store %arg18[%c1, %c0_58], %135 {strides = array<i32>} : memref<26x32xf32, #tpu.memory_space<vmem>>, vector<24x32xf32>,
    %cst_59 = arith.constant 0.000000e+00 : f32
    %139 = vector.broadcast %cst_59 : f32 to vector<24x64xf32>
    %c0_60 = arith.constant 0 : index
    %c0_61 = arith.constant 0 : index
    %140 = vector.load %arg18[%c0_60, %c0_61] : memref<26x32xf32, #tpu.memory_space<vmem>>, vector<24x32xf32>
    %141 = arith.truncf %140 : vector<24x32xf32> to vector<24x32xbf16>
    %c0_62 = arith.constant 0 : index
    %c0_63 = arith.constant 0 : index
    %142 = vector.load %arg13[%c0_62, %c0_63] : memref<96x64xbf16, #tpu.memory_space<vmem>>, vector<32x64xbf16>
    %cst_64 = arith.constant dense<0.000000e+00> : vector<24x64xf32>
    %143 = tpu.matmul %141, %142, %cst_64 {dimension_numbers = #tpu.dot_dimension_numbers<[1], [0], [0], [1], [0, 0, 1, 1], [], []>} : vector<24x32xbf16>, vector<32x64xbf16>, vector<24x64xf32> -> vector<24x64xf32>
    %144 = arith.addf %139, %143 : vector<24x64xf32>
    %c1_65 = arith.constant 1 : index
    %c0_66 = arith.constant 0 : index
    %145 = vector.load %arg18[%c1_65, %c0_66] : memref<26x32xf32, #tpu.memory_space<vmem>>, vector<24x32xf32>
    %146 = arith.truncf %145 : vector<24x32xf32> to vector<24x32xbf16>
    %c32 = arith.constant 32 : index
    %c0_67 = arith.constant 0 : index
    %147 = vector.load %arg13[%c32, %c0_67] : memref<96x64xbf16, #tpu.memory_space<vmem>>, vector<32x64xbf16>
    %cst_68 = arith.constant dense<0.000000e+00> : vector<24x64xf32>
    %148 = tpu.matmul %146, %147, %cst_68 {dimension_numbers = #tpu.dot_dimension_numbers<[1], [0], [0], [1], [0, 0, 1, 1], [], []>} : vector<24x32xbf16>, vector<32x64xbf16>, vector<24x64xf32> -> vector<24x64xf32>
    %149 = arith.addf %144, %148 : vector<24x64xf32>
    %c2 = arith.constant 2 : index
    %c0_69 = arith.constant 0 : index
    %150 = vector.load %arg18[%c2, %c0_69] : memref<26x32xf32, #tpu.memory_space<vmem>>, vector<24x32xf32>
    %151 = arith.truncf %150 : vector<24x32xf32> to vector<24x32xbf16>
    %c64 = arith.constant 64 : index
    %c0_70 = arith.constant 0 : index
    %152 = vector.load %arg13[%c64, %c0_70] : memref<96x64xbf16, #tpu.memory_space<vmem>>, vector<32x64xbf16>
    %cst_71 = arith.constant dense<0.000000e+00> : vector<24x64xf32>
    %153 = tpu.matmul %151, %152, %cst_71 {dimension_numbers = #tpu.dot_dimension_numbers<[1], [0], [0], [1], [0, 0, 1, 1], [], []>} : vector<24x32xbf16>, vector<32x64xbf16>, vector<24x64xf32> -> vector<24x64xf32>
    %154 = arith.addf %149, %153 : vector<24x64xf32>
    %c0_72 = arith.constant 0 : index
    %c0_73 = arith.constant 0 : index
    %155 = vector.load %arg14[%c0_72, %c0_73] : memref<1x64xf32, #tpu.memory_space<vmem>>, vector<1x64xf32>
    %156 = vector.broadcast %155 : vector<1x64xf32> to vector<24x64xf32>
    %157 = arith.addf %154, %156 : vector<24x64xf32>
    %cst_74 = arith.constant 0.000000e+00 : f32
    %158 = vector.broadcast %cst_74 : f32 to vector<24x64xf32>
    %159 = arith.maximumf %157, %158 : vector<24x64xf32>
    %160 = arith.truncf %159 : vector<24x64xf32> to vector<24x64xbf16>
    %c0_75 = arith.constant 0 : index
    %c0_76 = arith.constant 0 : index
    %161 = vector.load %arg15[%c0_75, %c0_76] : memref<64x32xbf16, #tpu.memory_space<vmem>>, vector<64x32xbf16>
    %cst_77 = arith.constant dense<0.000000e+00> : vector<24x32xf32>
    %162 = tpu.matmul %160, %161, %cst_77 {dimension_numbers = #tpu.dot_dimension_numbers<[1], [0], [0], [1], [0, 0, 1, 1], [], []>} : vector<24x64xbf16>, vector<64x32xbf16>, vector<24x32xf32> -> vector<24x32xf32>
    %c0_78 = arith.constant 0 : index
    %c0_79 = arith.constant 0 : index
    %163 = vector.load %arg16[%c0_78, %c0_79] : memref<1x32xf32, #tpu.memory_space<vmem>>, vector<1x32xf32>
    %164 = vector.broadcast %163 : vector<1x32xf32> to vector<24x32xf32>
    %165 = arith.addf %162, %164 : vector<24x32xf32>
    %166 = arith.addf %105, %165 : vector<24x32xf32>
    %167 = vector.broadcast %8 : vector<24x1xf32> to vector<24x32xf32>
    %168 = arith.mulf %166, %167 : vector<24x32xf32>
    %c0_80 = arith.constant 0 : index
    %c0_81 = arith.constant 0 : index
    %c0_82 = arith.constant 0 : index
    %169 = vector.load %arg17[%c0_80, %c0_81, %c0_82] : memref<1x24x32xf32, #tpu.memory_space<vmem>>, vector<1x24x32xf32>
    %170 = vector.shape_cast %169 : vector<1x24x32xf32> to vector<24x32xf32>
    %171 = vector.shape_cast %168 : vector<24x32xf32> to vector<1x24x32xf32>
    tpu.vector_store %arg17[%c0_80, %c0_81, %c0_82], %171 {strides = array<i32>} : memref<1x24x32xf32, #tpu.memory_space<vmem>>, vector<1x24x32xf32>,
    return
  }
  func.func @transform_0(%arg0: i32) -> (i32, i32, i32) {
    %c0_i32 = arith.constant 0 : i32
    %c0_i32_0 = arith.constant 0 : i32
    %c0_i32_1 = arith.constant 0 : i32
    return %arg0, %c0_i32, %c0_i32_0 : i32, i32, i32
  }
  func.func @transform_1(%arg0: i32) -> (i32, i32, i32) {
    %c0_i32 = arith.constant 0 : i32
    %c0_i32_0 = arith.constant 0 : i32
    %c0_i32_1 = arith.constant 0 : i32
    return %arg0, %c0_i32, %c0_i32_0 : i32, i32, i32
  }
  func.func @transform_2(%arg0: i32) -> (i32, i32, i32) {
    %c0_i32 = arith.constant 0 : i32
    %c0_i32_0 = arith.constant 0 : i32
    %c0_i32_1 = arith.constant 0 : i32
    return %arg0, %c0_i32, %c0_i32_0 : i32, i32, i32
  }
  func.func @transform_3(%arg0: i32) -> (i32, i32, i32) {
    %c0_i32 = arith.constant 0 : i32
    %c0_i32_0 = arith.constant 0 : i32
    %c0_i32_1 = arith.constant 0 : i32
    return %arg0, %c0_i32, %c0_i32_0 : i32, i32, i32
  }
  func.func @transform_4(%arg0: i32) -> (i32, i32) {
    %c0_i32 = arith.constant 0 : i32
    %c0_i32_0 = arith.constant 0 : i32
    %c0_i32_1 = arith.constant 0 : i32
    return %c0_i32, %c0_i32_0 : i32, i32
  }
  func.func @transform_5(%arg0: i32) -> (i32, i32) {
    %c0_i32 = arith.constant 0 : i32
    %c0_i32_0 = arith.constant 0 : i32
    %c0_i32_1 = arith.constant 0 : i32
    return %c0_i32, %c0_i32_0 : i32, i32
  }
  func.func @transform_6(%arg0: i32) -> (i32, i32) {
    %c0_i32 = arith.constant 0 : i32
    %c0_i32_0 = arith.constant 0 : i32
    %c0_i32_1 = arith.constant 0 : i32
    return %c0_i32, %c0_i32_0 : i32, i32
  }
  func.func @transform_7(%arg0: i32) -> (i32, i32) {
    %c0_i32 = arith.constant 0 : i32
    %c0_i32_0 = arith.constant 0 : i32
    %c0_i32_1 = arith.constant 0 : i32
    return %c0_i32, %c0_i32_0 : i32, i32
  }
  func.func @transform_8(%arg0: i32) -> (i32, i32) {
    %c0_i32 = arith.constant 0 : i32
    %c0_i32_0 = arith.constant 0 : i32
    %c0_i32_1 = arith.constant 0 : i32
    return %c0_i32, %c0_i32_0 : i32, i32
  }
  func.func @transform_9(%arg0: i32) -> (i32, i32) {
    %c0_i32 = arith.constant 0 : i32
    %c0_i32_0 = arith.constant 0 : i32
    %c0_i32_1 = arith.constant 0 : i32
    return %c0_i32, %c0_i32_0 : i32, i32
  }
  func.func @transform_10(%arg0: i32) -> (i32, i32) {
    %c0_i32 = arith.constant 0 : i32
    %c0_i32_0 = arith.constant 0 : i32
    %c0_i32_1 = arith.constant 0 : i32
    return %c0_i32, %c0_i32_0 : i32, i32
  }
  func.func @transform_11(%arg0: i32) -> (i32, i32) {
    %c0_i32 = arith.constant 0 : i32
    %c0_i32_0 = arith.constant 0 : i32
    %c0_i32_1 = arith.constant 0 : i32
    return %c0_i32, %c0_i32_0 : i32, i32
  }
  func.func @transform_12(%arg0: i32) -> (i32, i32) {
    %c0_i32 = arith.constant 0 : i32
    %c0_i32_0 = arith.constant 0 : i32
    %c0_i32_1 = arith.constant 0 : i32
    return %c0_i32, %c0_i32_0 : i32, i32
  }
  func.func @transform_13(%arg0: i32) -> (i32, i32) {
    %c0_i32 = arith.constant 0 : i32
    %c0_i32_0 = arith.constant 0 : i32
    %c0_i32_1 = arith.constant 0 : i32
    return %c0_i32, %c0_i32_0 : i32, i32
  }
  func.func @transform_14(%arg0: i32) -> (i32, i32) {
    %c0_i32 = arith.constant 0 : i32
    %c0_i32_0 = arith.constant 0 : i32
    %c0_i32_1 = arith.constant 0 : i32
    return %c0_i32, %c0_i32_0 : i32, i32
  }
  func.func @transform_15(%arg0: i32) -> (i32, i32) {
    %c0_i32 = arith.constant 0 : i32
    %c0_i32_0 = arith.constant 0 : i32
    %c0_i32_1 = arith.constant 0 : i32
    return %c0_i32, %c0_i32_0 : i32, i32
  }
  func.func @transform_16(%arg0: i32) -> (i32, i32, i32) {
    %c0_i32 = arith.constant 0 : i32
    %c0_i32_0 = arith.constant 0 : i32
    %c0_i32_1 = arith.constant 0 : i32
    return %arg0, %c0_i32, %c0_i32_0 : i32, i32, i32
  }
}

</mosaic_0001>

<bundles_post_ra>
// kernel: prompt_tts_forward.10
= control target key start
LH: loop header
LB: loop body
LE: loop exit
PB: predicated region body
PF: predicated region fallthrough
CT: control target
= control target key end

     0   :  { %s511_s18 = smov 0   ;;  %s552_s0 = inlined_call_operand.vmem [shape: f32[2,8,32], index: 0, kind: input, shape index: {}]   ;;  %s553_s1 = inlined_call_operand.vmem [shape: f32[2,1,32], index: 1, kind: input, shape index: {}]   ;;  %s554_s2 = inlined_call_operand.vmem [shape: f32[2,8,1], index: 2, kind: input, shape index: {}]   ;;  %s555_s3 = inlined_call_operand.vmem [shape: bf16[32,64], index: 3, kind: input, shape index: {}]   ;;  %s556_s4 = inlined_call_operand.vmem [shape: f32[1,64], index: 4, kind: input, shape index: {}]   ;;  %s557_s5 = inlined_call_operand.vmem [shape: f32[2,8,32], index: 5, kind: output, shape index: {}]  }
   0x1 LB: > { %s427_s19 = sadd.s32 4294967295, %s475_s18   ;;  %p431_p0 = scmp.ge.s32.totalorder %s475_s18, 1  ;;  %s475_s18 = sphi %s511_s18, %s15_s18  }
   0x2   : > { %p203_p1 = scmp.lt.s32.totalorder %s475_s18, 3 }
   0x4   : > { %p204_p2 = pnand %p431_p0, %p203_p1 }
   0x5   : > { %v465_v0 = vld [vmem:[%s555_s3] sm:$0xff] (!%p204_p2)   ;;  %v477_v1 = vmov (!%p204_p2), 0.0   ;;  %p236_p3 = scmp.lt.s32.totalorder (!%p204_p2), %s427_s19, 1  ;;  %v466_v2 = vld [vmem:[%s555_s3 + $0x8] sm:$0xff] (!%p204_p2)   ;;  %vm478_vm0 = vmmov (!%p204_p2), 0   ;;  %vm255_vm1 = vcmask (!%p204_p2), 261120   ;;  %v331_v14 = vlaneseq (!%p204_p2) }
   0x6   : > { %207 = sbr.rel (%p204_p2) target bundleno = 354 (0x162), region = 40  ;;  %443 = vmatprep.subr.bf16.mxu0 (!%p204_p2), %v477_v1  ;;  %447 = vmatprep.mubr.msk.bf16.mxu0 (!%p204_p2), %vm478_vm0, %v477_v1  ;;  %v479_v7 = vmov (!%p204_p2), 0   ;;  %v274_v16 = vld [vmem:[%s556_s4] sm:$0x1] (!%p204_p2)  ;;  %s480_s11 = smov (!%p204_p2), 96  }
   0x7   : > { %444 = vmatpush3.bf16.msra.mxu0 (!%p204_p2), %v465_v0  ;;  %463 = vset.pattern.permute.xlu1 (!%p204_p2), %v479_v7  ;;  %v332_v15 = vshrl.u32 (!%p204_p2), %v331_v14, 7 }
   0x8   : > { %445 = vmatprep.subr.bf16.mxu0 (!%p204_p2), %v477_v1  ;;  %464 = vset.pattern.permute.xlu0 (!%p204_p2), %v479_v7 }
   0x9   : > { %v333_v17 = vsub.s32 (!%p204_p2), 0, %v332_v15 }
   0xb   : > { %446 = vmatpush3.bf16.msra.mxu0 (!%p204_p2), %v466_v2 }
   0xd   : > { %s559_s19 = smov (!%p236_p3, %s427_s19), 1 }
   0xe   : > { %s525_s24 = sshll.u32 %s559_s19, 3  ;;  %s242_s27 = scalar_lea.vmem %s553_s1, %s559_s19 }
   0xf   : > { %s239_s30 = scalar_lea.vmem %s552_s0, %s525_s24  ;;  %v253_v3 = vld [vmem:[%s242_s27] sm:$0x1]  ;;  %s246_s8 = scalar_lea.vmem %s554_s2, %s525_s24 }
  0x10   : > { %v252_v4 = vld [vmem:[%s239_s30] sm:$0xff]  ;;  %v254_v5 = vpack.c.bf16 %v253_v3, %v253_v3  ;;  %s250_s14 = scalar_lea.vmem %s557_s5, %s525_s24 }
  0x11   : > { %v256_v6 = vsel %vm255_vm1, %v252_v4, 0.0  ;;  %v345_v8 = vld [vmem:[%s246_s8] sm:$0xff] }
  0x12   : > { %257 = vadd.xlane.f32.xlu0 %v256_v6  ;;  %448 = vmatmul.mubr.msk.bf16.vlgmr.msra.gmra.mrb[0].mxu0 %vm255_vm1, %v254_v5 }
  0x13   : > { %348 = vperm.xlu1 %463, %v345_v8  }
  0x92   : > { %v349_v30 = vpop.permute.xlu1 %348 }
  0x9f   : > { %v258_v9 = vpop.xlane.xlu0 %257 }
  0xa0   : > { %v260_v10 = vmul.f32 0.03125, %v258_v9 }
  0xa2   : > { %v261_v11 = vsub.f32 %v252_v4, %v260_v10 }
  0xa4   : > { %v262_v12 = vmul.f32 %v261_v11, %v261_v11 }
  0xa6   : > { %v263_v13 = vsel %vm255_vm1, %v262_v12, 0.0 }
  0xa7   : > { %264 = vadd.xlane.f32.xlu0 %v263_v13 }
  0xe5   : > { %v324_v18 = vpop.f32.mrb[0].mxu0 }
  0xe6   : > { %v325_v19 = vadd.f32 %v324_v18, %v274_v16  ;;  %v449_v20 = vpop.f32.mrb[1].mxu0 }
  0xe7   : > { %v327_v21 = vpop.f32.mrb[2].mxu0 }
  0xe8   : > { %v330_v22 = vadd.f32 1.0, %v325_v19  ;;  %v339_v23 = vrot.slane %v325_v19, %v333_v17  ;;  %v450_v24 = vpop.f32.mrb[3].mxu0 }
  0xea   : > { %341 = vrot.lane.b32.xlu1 %v339_v23, %s480_s11  ;;  %v334_v25 = vrot.slane %v330_v22, %v333_v17 }
 0x134   : > { %v265_v26 = vpop.xlane.xlu0 %264 }
 0x135   : > { %v266_v27 = vmul.f32 0.03125, %v265_v26 }
 0x137   : > { %v267_v28 = vadd.f32 1e-05, %v266_v27 }
 0x139   : > { %467 = vrsqrt.f32 %v267_v28 }
 0x143   : > { %v468_v29 = vpop.eup %467 }
 0x144   : > { %v269_v31 = vmul.f32 %v468_v29, %v261_v11 }
 0x146   : > { %v335_v32 = vmul.f32 %v334_v25, %v269_v31 }
 0x15c   : > { %v342_v33 = vpop.permute.xlu1 %341 }
 0x15d   : > { %v344_v34 = vadd.f32 %v342_v33, %v335_v32 }
 0x15f   : > { %v351_v35 = vmul.f32 %v349_v30, %v344_v34 }
 0x161   : > { %352 = vst.msk [vmem:[%s250_s14] sm:$0xff] %vm255_vm1, %v351_v35 }
 0x162 PF: > { %s15_s18 = sadd.s32 1, %s475_s18  }
 0x163   : > { %p12_p4 = scmp.ge.s32.totalorder %s15_s18, 4  }
 0x165   :  { %14 = sbr.rel (!%p12_p4) target bundleno = 1 (0x1), region = 76 }

// kernel: prompt_tts_forward.11
= control target key start
LH: loop header
LB: loop body
LE: loop exit
PB: predicated region body
PF: predicated region fallthrough
CT: control target
= control target key end

     0   :  { %s1251_s23 = smov 0   ;;  %s1389_s0 = inlined_call_operand.vmem [shape: f32[2,8,32], index: 0, kind: input, shape index: {}]   ;;  %s1390_s1 = inlined_call_operand.vmem [shape: f32[2,8,1], index: 1, kind: input, shape index: {}]   ;;  %s1391_s2 = inlined_call_operand.vmem [shape: bf16[96,32], index: 2, kind: input, shape index: {}]   ;;  %s1392_s3 = inlined_call_operand.vmem [shape: f32[1,32], index: 3, kind: input, shape index: {}, may-alias: {3,5,7,9}]   ;;  %s1393_s4 = inlined_call_operand.vmem [shape: f32[1,32], index: 4, kind: input, shape index: {}, may-alias: {4,8}]   ;;  %s1394_s5 = inlined_call_operand.vmem [shape: f32[1,32], index: 5, kind: input, shape index: {}, may-alias: {3,5,7,9}]   ;;  %s1395_s6 = inlined_call_operand.vmem [shape: bf16[96,32], index: 6, kind: input, shape index: {}]   ;;  %s1396_s7 = inlined_call_operand.vmem [shape: f32[1,32], index: 7, kind: input, shape index: {}, may-alias: {3,5,7,9}]   ;;  %s1397_s8 = inlined_call_operand.vmem [shape: f32[1,32], index: 8, kind: input, shape index: {}, may-alias: {4,8}]   ;;  %s1398_s9 = inlined_call_operand.vmem [shape: f32[1,32], index: 9, kind: input, shape index: {}, may-alias: {3,5,7,9}]   ;;  %s1399_s10 = inlined_call_operand.vmem [shape: bf16[32,1], index: 10, kind: input, shape index: {}]   ;;  %s1400_s11 = inlined_call_operand.<no memory space> [shape: f32[1,1], index: 11, kind: input, shape index: {}]   ;;  %s1401_s12 = inlined_call_operand.vmem [shape: f32[2,8,1], index: 12, kind: output, shape index: {}]  }
   0x1   :  { %v17_v0 = vstv %s1400_s11 }
   0x2   :  { %18 = vst [vmem:[#allocation3] sm:$0x1] %v17_v0 }
   0x3 LB: > { %s1026_s24 = sadd.s32 4294967295, %s1178_s23   ;;  %p1030_p0 = scmp.ge.s32.totalorder %s1178_s23, 1  ;;  %s1178_s23 = sphi %s1251_s23, %s24_s23  }
   0x4   : > { %p372_p1 = scmp.lt.s32.totalorder %s1178_s23, 3 }
   0x6   : > { %p373_p2 = pnand %p1030_p0, %p372_p1 }
   0x7   : > { %v1154_v1 = vld [vmem:[%s1391_s2 + $0x10] sm:$0xff] (!%p373_p2)   ;;  %v1180_v2 = vmov (!%p373_p2), 0.0   ;;  %v1155_v3 = vld [vmem:[%s1391_s2] sm:$0xff] (!%p373_p2)   ;;  %v1156_v4 = vld [vmem:[%s1391_s2 + $0x18] sm:$0xff] (!%p373_p2)   ;;  %vm1181_vm0 = vmmov (!%p373_p2), 0   ;;  %p416_p3 = scmp.lt.s32.totalorder (!%p373_p2), %s1026_s24, 1 }
   0x8   : > { %376 = sbr.rel (%p373_p2) target bundleno = 1340 (0x53c), region = 68  ;;  %1085 = vmatprep.subr.bf16.mxu0 (!%p373_p2), %v1180_v2  ;;  %1093 = vmatprep.subr.bf16.mxu1 (!%p373_p2), %v1180_v2  ;;  %v1157_v5 = vld [vmem:[%s1391_s2 + $0x8] sm:$0xff] (!%p373_p2)   ;;  %vm431_vm1 = vcmask (!%p373_p2), 261120   ;;  %vm433_vm2 = vcmask (!%p373_p2), 254976   ;;  %v1158_v7 = vld [vmem:[%s1391_s2 + $0x20] sm:$0xff] (!%p373_p2)   ;;  %v1182_v33 = vmov (!%p373_p2), 0  }
   0x9   : > { %1086 = vmatpush3.bf16.msra.mxu0 (!%p373_p2), %v1154_v1  ;;  %1089 = vmatprep.mubr.msk.bf16.mxu0 (!%p373_p2), %vm1181_vm0, %v1180_v2  ;;  %432 = vst.msk [vmem:[#allocation2] sm:$0xff] (!%p373_p2), %vm431_vm1, %v1180_v2  ;;  %v1159_v13 = vld [vmem:[%s1391_s2 + $0x28] sm:$0xff] (!%p373_p2)   ;;  %v1043_v25 = vld [vmem:[%s1392_s3] ss:$0 sm:$0xff] (!%p373_p2)  ;;  %v1160_v40 = vld [vmem:[%s1395_s6 + $0x10] sm:$0xff] (!%p373_p2)   ;;  %vm959_vm3 = vcmask (!%p373_p2), 7168  }
   0xa   : > { %1094 = vmatpush3.bf16.msra.mxu1 (!%p373_p2), %v1155_v3  ;;  %1087 = vmatprep.subr.bf16.mxu0 (!%p373_p2), %v1180_v2  ;;  %434 = vst.msk [vmem:[#allocation2 + $0x8] sm:$0x3] (!%p373_p2), %vm433_vm2, %v1180_v2  ;;  %v1161_v41 = vld [vmem:[%s1395_s6] sm:$0xff] (!%p373_p2)   ;;  %v1162_v42 = vld [vmem:[%s1395_s6 + $0x18] sm:$0xff] (!%p373_p2)   ;;  %v1163_v43 = vld [vmem:[%s1395_s6 + $0x8] sm:$0xff] (!%p373_p2)  }
   0xb   : > { %1095 = vmatprep.subr.bf16.mxu1 (!%p373_p2), %v1180_v2  ;;  %1097 = vmatprep.mubr.msk.bf16.mxu1 (!%p373_p2), %vm1181_vm0, %v1180_v2  ;;  %v1044_v48 = vld [vmem:[%s1393_s4] ss:$0 sm:$0xff] (!%p373_p2)  ;;  %v1165_v60 = vld [vmem:[%s1395_s6 + $0x28] sm:$0xff] (!%p373_p2)  }
   0xc   : > { %1152 = vset.pattern.permute.xlu1 (!%p373_p2), %v1182_v33  ;;  %1153 = vset.pattern.permute.xlu0 (!%p373_p2), %v1182_v33  ;;  %v1045_v50 = vld [vmem:[%s1394_s5] ss:$0 sm:$0xff] (!%p373_p2) }
   0xd   : > { %1088 = vmatpush3.bf16.msra.mxu0 (!%p373_p2), %v1156_v4  ;;  %v1164_v57 = vld [vmem:[%s1395_s6 + $0x20] sm:$0xff] (!%p373_p2)  }
   0xe   : > { %1096 = vmatpush3.bf16.msra.mxu1 (!%p373_p2), %v1157_v5  ;;  %1101 = vmatprep.subr.bf16.mxu0 (!%p373_p2), %v1180_v2 }
   0xf   : > { %s1403_s24 = smov (!%p416_p3, %s1026_s24), 1  ;;  %1109 = vmatprep.subr.bf16.mxu1 %v1180_v2 }
  0x10   : > { %s1283_s14 = sshll.u32 %s1403_s24, 3 }
  0x11   : > { %s419_s17 = scalar_lea.vmem %s1389_s0, %s1283_s14  ;;  %s423_s11 = scalar_lea.vmem %s1390_s1, %s1283_s14 }
  0x12   : > { %v429_v6 = vld [vmem:[%s419_s17] sm:$0xff]  ;;  %s427_s21 = scalar_lea.vmem %s1401_s12, %s1283_s14 }
  0x13   : > { %435 = vst.msk [vmem:[#allocation2 + $0x1] sm:$0xff] %vm431_vm1, %v429_v6  ;;  %v1321_v34 = vld [vmem:[%s423_s11] sm:$0xff] }
  0x14   : > { %661 = vperm.xlu1 %1152, %v1321_v34  }
  0x1a   : > { %v442_v8 = vld [vmem:[#allocation2 + $0x1] sm:$0xff] }
  0x1b   : > { %v436_v9 = vld [vmem:[#allocation2] sm:$0xff]  ;;  %v443_v11 = vpack.c.bf16 %v442_v8, %v442_v8 }
  0x1c   : > { %v558_v10 = vld [vmem:[#allocation2 + $0x2] sm:$0xff]  ;;  %v437_v12 = vpack.c.bf16 %v436_v9, %v436_v9 }
  0x1d   : > { %665 = vst.msk [vmem:[#allocation2] sm:$0xff] %vm431_vm1, %v1180_v2  ;;  %1090 = vmatmul.mubr.msk.bf16.vlgmr.msra.gmra.mrb[0].mxu0 %vm431_vm1, %v443_v11  ;;  %v559_v14 = vpack.c.bf16 %v558_v10, %v558_v10  ;;  %v1055_v10 = vld [vmem:[%s1396_s7] ss:$0 sm:$0xff] }
  0x1e   : > { %666 = vst.msk [vmem:[#allocation2 + $0x8] sm:$0x3] %vm433_vm2, %v1180_v2  ;;  %1098 = vmatmul.mubr.msk.bf16.vlgmr.msra.gmra.mrb[0].mxu1 %vm431_vm1, %v437_v12  ;;  %1102 = vmatpush3.bf16.msra.mxu0 %v1158_v7 }
  0x1f   : > { %1105 = vmatprep.mubr.msk.bf16.mxu0 %vm1181_vm0, %v1180_v2  ;;  %1103 = vmatprep.subr.bf16.mxu0 %v1180_v2 }
  0x20   : > { %1113 = vmatprep.mubr.msk.bf16.mxu1 %vm1181_vm0, %v1180_v2  ;;  %1110 = vmatpush3.bf16.msra.mxu1 %v1160_v40 }
  0x21   : > { %1111 = vmatprep.subr.bf16.mxu1 %v1180_v2 }
  0x22   : > { %1104 = vmatpush3.bf16.msra.mxu0 %v1159_v13 }
  0x23   : > { %1117 = vmatprep.subr.bf16.mxu0 %v1180_v2 }
  0x24   : > { %1112 = vmatpush3.bf16.msra.mxu1 %v1162_v42 }
  0x25   : > { %1106 = vmatmul.mubr.msk.bf16.vlgmr.msra.gmra.mrb[4].mxu0 %vm431_vm1, %v559_v14  ;;  %1125 = vmatprep.subr.bf16.mxu1 %v1180_v2 }
  0x26   : > { %1121 = vmatprep.mubr.msk.bf16.mxu0 %vm1181_vm0, %v1180_v2  ;;  %1118 = vmatpush3.bf16.msra.mxu0 %v1161_v41 }
  0x27   : > { %1119 = vmatprep.subr.bf16.mxu0 %v1180_v2 }
  0x2a   : > { %1120 = vmatpush3.bf16.msra.mxu0 %v1163_v43 }
  0x2b   : > { %1133 = vmatprep.subr.bf16.mxu0 %v1180_v2 }
  0x93   : > { %v662_v52 = vpop.permute.xlu1 %661 }
  0xf0   : > { %v497_v15 = vpop.f32.mrb[0].mxu0 }
  0xf1   : > { %v552_v16 = vpop.f32.mrb[0].mxu1  ;;  %v1091_v18 = vpop.f32.mrb[1].mxu0 }
  0xf2   : > { %v553_v17 = vadd.f32 %v552_v16, %v497_v15  ;;  %v1099_v19 = vpop.f32.mrb[1].mxu1  ;;  %v500_v20 = vpop.f32.mrb[2].mxu0 }
  0xf3   : > { %v555_v21 = vpop.f32.mrb[2].mxu1  ;;  %v1092_v22 = vpop.f32.mrb[3].mxu0 }
  0xf4   : > { %v1100_v23 = vpop.f32.mrb[3].mxu1 }
  0xf5   : > { %v1166_v23 = vld [vmem:[%s1399_s10] sm:$0xff]  }
  0xf8   : > { %v613_v24 = vpop.f32.mrb[4].mxu0 }
  0xf9   : > { %v619_v26 = vadd.f32 %v613_v24, %v553_v17  ;;  %v1107_v27 = vpop.f32.mrb[5].mxu0  ;;  %v1167_v24 = vld [vmem:[%s1399_s10 + $0x8] sm:$0xff]  }
  0xfa   : > { %v616_v28 = vpop.f32.mrb[6].mxu0 }
  0xfb   : > { %v1108_v29 = vpop.f32.mrb[7].mxu0  ;;  %v627_v30 = vadd.f32 %v1043_v25, %v619_v26 }
  0xfc   : > { %v1056_v29 = vld [vmem:[%s1397_s8] ss:$0 sm:$0xff] }
  0xfd   : > { %v628_v31 = vmax.f32 %v627_v30, 0.0 }
  0xff   : > { %v629_v32 = vsel %vm431_vm1, %v628_v31, 0.0 }
 0x100   : > { %630 = vadd.xlane.f32.xlu0 %v629_v32 }
 0x18d   : > { %v631_v35 = vpop.xlane.xlu0 %630 }
 0x18e   : > { %v633_v36 = vmul.f32 0.03125, %v631_v35 }
 0x190   : > { %v634_v37 = vsub.f32 %v628_v31, %v633_v36  ;;  %v1057_v31 = vld [vmem:[%s1398_s9] ss:$0 sm:$0xff]  ;;  %v1058_v36 = vld [vmem:[#allocation3] ss:$0 sm:$0xff] }
 0x192   : > { %v635_v38 = vmul.f32 %v634_v37, %v634_v37 }
 0x194   : > { %v636_v39 = vsel %vm431_vm1, %v635_v38, 0.0 }
 0x195   : > { %637 = vadd.xlane.f32.xlu0 %v636_v39 }
 0x222   : > { %v638_v44 = vpop.xlane.xlu0 %637 }
 0x223   : > { %v639_v45 = vmul.f32 0.03125, %v638_v44 }
 0x225   : > { %v640_v46 = vadd.f32 1e-05, %v639_v45 }
 0x227   : > { %1168 = vrsqrt.f32 %v640_v46 }
 0x231   : > { %v1169_v47 = vpop.eup %1168 }
 0x232   : > { %v642_v49 = vmul.f32 %v1169_v47, %v634_v37 }
 0x234   : > { %v650_v51 = vmul.f32 %v1044_v48, %v642_v49 }
 0x236   : > { %v658_v53 = vadd.f32 %v1045_v50, %v650_v51 }
 0x238   : > { %v664_v54 = vmul.f32 %v662_v52, %v658_v53 }
 0x23a   : > { %667 = vst.msk [vmem:[#allocation2 + $0x1] sm:$0xff] %vm431_vm1, %v664_v54 }
 0x241   : > { %v674_v55 = vld [vmem:[#allocation2 + $0x1] sm:$0xff] }
 0x242   : > { %v668_v56 = vld [vmem:[#allocation2] sm:$0xff]  ;;  %v675_v58 = vpack.c.bf16 %v674_v55, %v674_v55 }
 0x243   : > { %v669_v59 = vpack.c.bf16 %v668_v56, %v668_v56  ;;  %v790_v61 = vld [vmem:[#allocation2 + $0x2] sm:$0xff] }
 0x244   : > { %1114 = vmatmul.mubr.msk.bf16.vlgmr.msra.gmra.mrb[4].mxu1 %vm431_vm1, %v675_v58  ;;  %v791_v62 = vpack.c.bf16 %v790_v61, %v790_v61 }
 0x245   : > { %1122 = vmatmul.mubr.msk.bf16.vlgmr.msra.gmra.mrb[8].mxu0 %vm431_vm1, %v669_v59  ;;  %1126 = vmatpush3.bf16.msra.mxu1 %v1164_v57 }
 0x246   : > { %1129 = vmatprep.mubr.msk.bf16.mxu1 %vm1181_vm0, %v1180_v2  ;;  %1127 = vmatprep.subr.bf16.mxu1 %v1180_v2 }
 0x247   : > { %1137 = vmatprep.mubr.msk.bf16.mxu0 %vm1181_vm0, %v1180_v2  ;;  %1134 = vmatpush3.bf16.msra.mxu0 %v1166_v23 }
 0x248   : > { %1135 = vmatprep.subr.bf16.mxu0 %v1180_v2 }
 0x249   : > { %1128 = vmatpush3.bf16.msra.mxu1 %v1165_v60 }
 0x24b   : > { %1136 = vmatpush3.bf16.msra.mxu0 %v1167_v24 }
 0x24c   : > { %1130 = vmatmul.mubr.msk.bf16.vlgmr.msra.gmra.mrb[8].mxu1 %vm431_vm1, %v791_v62 }
 0x317   : > { %v729_v63 = vpop.f32.mrb[4].mxu1 }
 0x318   : > { %v784_v0 = vpop.f32.mrb[8].mxu0  ;;  %v1115_v3 = vpop.f32.mrb[5].mxu1 }
 0x319   : > { %v785_v1 = vadd.f32 %v784_v0, %v729_v63  ;;  %v1123_v4 = vpop.f32.mrb[9].mxu0  ;;  %v732_v5 = vpop.f32.mrb[6].mxu1 }
 0x31a   : > { %v787_v6 = vpop.f32.mrb[10].mxu0  ;;  %v1116_v7 = vpop.f32.mrb[7].mxu1 }
 0x31b   : > { %v1124_v8 = vpop.f32.mrb[11].mxu0 }
 0x31f   : > { %v845_v9 = vpop.f32.mrb[8].mxu1 }
 0x320   : > { %v851_v11 = vadd.f32 %v845_v9, %v785_v1  ;;  %v1131_v12 = vpop.f32.mrb[9].mxu1 }
 0x321   : > { %v848_v13 = vpop.f32.mrb[10].mxu1 }
 0x322   : > { %v859_v14 = vadd.f32 %v1055_v10, %v851_v11  ;;  %v1132_v15 = vpop.f32.mrb[11].mxu1 }
 0x324   : > { %v860_v16 = vmax.f32 %v859_v14, 0.0 }
 0x326   : > { %v861_v17 = vsel %vm431_vm1, %v860_v16, 0.0 }
 0x327   : > { %862 = vadd.xlane.f32.xlu1 %v861_v17 }
 0x3b4   : > { %v863_v18 = vpop.xlane.xlu1 %862 }
 0x3b5   : > { %v864_v19 = vmul.f32 0.03125, %v863_v18 }
 0x3b7   : > { %v865_v20 = vsub.f32 %v860_v16, %v864_v19 }
 0x3b9   : > { %v866_v21 = vmul.f32 %v865_v20, %v865_v20 }
 0x3bb   : > { %v867_v22 = vsel %vm431_vm1, %v866_v21, 0.0 }
 0x3bc   : > { %868 = vadd.xlane.f32.xlu0 %v867_v22 }
 0x449   : > { %v869_v25 = vpop.xlane.xlu0 %868 }
 0x44a   : > { %v870_v26 = vmul.f32 0.03125, %v869_v25 }
 0x44c   : > { %v871_v27 = vadd.f32 1e-05, %v870_v26 }
 0x44e   : > { %1170 = vrsqrt.f32 %v871_v27 }
 0x458   : > { %v1171_v28 = vpop.eup %1170 }
 0x459   : > { %v873_v30 = vmul.f32 %v1171_v28, %v865_v20 }
 0x45b   : > { %v881_v32 = vmul.f32 %v1056_v29, %v873_v30 }
 0x45d   : > { %v889_v33 = vadd.f32 %v1057_v31, %v881_v32 }
 0x45f   : > { %v890_v35 = vmul.f32 %v889_v33, %v662_v52 }
 0x461   : > { %v891_v2 = vpack.c.bf16 %v890_v35, %v890_v35 }
 0x463   : > { %1138 = vmatmul.mubr.msk.bf16.vlgmr.msra.gmra.mrb[12].mxu0 %vm431_vm1, %v891_v2 }
 0x536   : > { %v952_v37 = vpop.f32.mrb[12].mxu0 }
 0x537   : > { %v953_v38 = vadd.f32 %v1058_v36, %v952_v37  ;;  %v1139_v39 = vpop.f32.mrb[13].mxu0 }
 0x538   : > { %v955_v40 = vpop.f32.mrb[14].mxu0 }
 0x539   : > { %v958_v41 = vmul.f32 %v953_v38, %v1321_v34  ;;  %v1140_v42 = vpop.f32.mrb[15].mxu0 }
 0x53b   : > { %960 = vst.msk [vmem:[%s427_s21] sm:$0xff] %vm959_vm3, %v958_v41 }
 0x53c PF: > { %s24_s23 = sadd.s32 1, %s1178_s23  }
 0x53d   : > { %p21_p4 = scmp.ge.s32.totalorder %s24_s23, 4  }
 0x53f   :  { %23 = sbr.rel (!%p21_p4) target bundleno = 3 (0x3), region = 101 }

// kernel: prompt_tts_forward.8
= control target key start
LH: loop header
LB: loop body
LE: loop exit
PB: predicated region body
PF: predicated region fallthrough
CT: control target
= control target key end

     0   :  { %s1855_s21 = smov 0   ;;  %s2067_s0 = inlined_call_operand.vmem [shape: f32[2,8,32], index: 0, kind: input, shape index: {}]   ;;  %s2068_s1 = inlined_call_operand.vmem [shape: f32[2,1,32], index: 1, kind: input, shape index: {}]   ;;  %s2069_s2 = inlined_call_operand.vmem [shape: f32[2,1,8], index: 2, kind: input, shape index: {}]   ;;  %s2070_s3 = inlined_call_operand.vmem [shape: f32[2,8,1], index: 3, kind: input, shape index: {}]   ;;  %s2071_s4 = inlined_call_operand.vmem [shape: bf16[32,64], index: 4, kind: input, shape index: {}]   ;;  %s2072_s5 = inlined_call_operand.vmem [shape: f32[1,64], index: 5, kind: input, shape index: {}, may-alias: {5,11,13}]   ;;  %s2073_s6 = inlined_call_operand.vmem [shape: bf16[32,96], index: 6, kind: input, shape index: {}]   ;;  %s2074_s7 = inlined_call_operand.vmem [shape: f32[1,96], index: 7, kind: input, shape index: {}]   ;;  %s2075_s8 = inlined_call_operand.vmem [shape: bf16[32,32], index: 8, kind: input, shape index: {}]   ;;  %s2076_s9 = inlined_call_operand.vmem [shape: f32[1,32], index: 9, kind: input, shape index: {}, may-alias: {9,15}]   ;;  %s2077_s10 = inlined_call_operand.vmem [shape: bf16[32,64], index: 10, kind: input, shape index: {}]   ;;  %s2078_s11 = inlined_call_operand.vmem [shape: f32[1,64], index: 11, kind: input, shape index: {}, may-alias: {5,11,13}]   ;;  %s2079_s12 = inlined_call_operand.vmem [shape: bf16[96,64], index: 12, kind: input, shape index: {}]   ;;  %s2080_s13 = inlined_call_operand.vmem [shape: f32[1,64], index: 13, kind: input, shape index: {}, may-alias: {5,11,13}]   ;;  %s2081_s14 = inlined_call_operand.vmem [shape: bf16[64,32], index: 14, kind: input, shape index: {}]   ;;  %s2082_s15 = inlined_call_operand.vmem [shape: f32[1,32], index: 15, kind: input, shape index: {}, may-alias: {9,15}]   ;;  %s2083_s16 = inlined_call_operand.vmem [shape: f32[2,8,32], index: 16, kind: output, shape index: {}]  }
   0x1   :  { %2084 = sst [smem:[#allocation3_spill]] %s2067_s0 }
   0x2 LB: > { %s1529_s22 = sadd.s32 4294967295, %s1760_s21   ;;  %p1533_p0 = scmp.ge.s32.totalorder %s1760_s21, 1  ;;  %s1760_s21 = sphi %s1855_s21, %s26_s21  }
   0x3   : > { %p486_p1 = scmp.lt.s32.totalorder %s1760_s21, 3 }
   0x5   : > { %p487_p2 = pnand %p1533_p0, %p486_p1 }
   0x6   : > { %v1724_v0 = vld [vmem:[%s2071_s4] sm:$0xff] (!%p487_p2)   ;;  %v1762_v1 = vmov (!%p487_p2), 0.0   ;;  %v1725_v2 = vld [vmem:[%s2071_s4 + $0x8] sm:$0xff] (!%p487_p2)   ;;  %p544_p3 = scmp.lt.s32.totalorder (!%p487_p2), %s1529_s22, 1  ;;  %vm568_vm0 = vcmask (!%p487_p2), 261120   ;;  %vm1763_vm1 = vmmov (!%p487_p2), 0   ;;  %v644_v13 = vlaneseq (!%p487_p2) }
   0x7   : > { %490 = sbr.rel (%p487_p2) target bundleno = 2283 (0x8eb), region = 84  ;;  %1610 = vmatprep.subr.bf16.mxu1 (!%p487_p2), %v1762_v1  ;;  %1626 = vmatprep.subr.bf16.mxu0 (!%p487_p2), %v1762_v1  ;;  %1162 = vst.msk [vmem:[#allocation2] sm:$0xff] (!%p487_p2), %vm568_vm0, %v1762_v1  ;;  %s2085_s18 = sld [smem:[#allocation3_spill]] (!%p487_p2)  ;;  %v1726_v12 = vld [vmem:[%s2073_s6] sm:$0xff] (!%p487_p2)   ;;  %v1727_v14 = vld [vmem:[%s2073_s6 + $0x8] sm:$0xff] (!%p487_p2)   ;;  %vm729_vm2 = vcmask (!%p487_p2), 130048  }
   0x8   : > { %1611 = vmatpush3.bf16.msra.mxu1 (!%p487_p2), %v1724_v0  ;;  %1614 = vmatprep.mubr.msk.bf16.mxu1 (!%p487_p2), %vm1763_vm1, %v1762_v1  ;;  %v645_v15 = vshrl.u32 (!%p487_p2), %v644_v13, 7  ;;  %v587_v16 = vld [vmem:[%s2072_s5] sm:$0x1] (!%p487_p2)  ;;  %s1764_s29 = smov (!%p487_p2), 96   ;;  %s1765_s17 = smov (!%p487_p2), 80   ;;  %vm784_vm3 = vcmask (!%p487_p2), 64512  }
   0x9   : > { %1612 = vmatprep.subr.bf16.mxu1 (!%p487_p2), %v1762_v1  ;;  %1628 = vmatprep.mubr.msk.bf16.mxu0 (!%p487_p2), %vm1763_vm1, %v1762_v1  ;;  %v1540_v35 = vld [vmem:[%s2074_s7] ss:$0 sm:$0xff] (!%p487_p2)  ;;  %s1768_s24 = smov (!%p487_p2), 48   ;;  %vm801_vm4 = vcmask (!%p487_p2), 1043456   ;;  %vm1163_vm5 = vcmask (!%p487_p2), 254976   ;;  %vm1399_vm6 = vcmask (!%p487_p2), 523264  }
   0xa   : > { %v1915_v17 = vsub.s32 (!%p487_p2), 0, %v645_v15  ;;  %1164 = vst.msk [vmem:[#allocation2 + $0x8] sm:$0x3] (!%p487_p2), %vm1163_vm5, %v1762_v1 }
   0xc   : > { %1613 = vmatpush3.bf16.msra.mxu1 (!%p487_p2), %v1725_v2 }
   0xd   : > { %1618 = vmatprep.subr.bf16.mxu1 (!%p487_p2), %v1762_v1 }
   0xe   : > { %s2087_s22 = smov (!%p544_p3, %s1529_s22), 1 }
   0xf   : > { %s1881_s27 = sshll.u32 %s2087_s22, 3  ;;  %s550_s30 = scalar_lea.vmem %s2068_s1, %s2087_s22 }
  0x10   : > { %s547_s19 = scalar_lea.vmem %s2085_s18, %s1881_s27  ;;  %v564_v3 = vld [vmem:[%s550_s30] sm:$0x1]  ;;  %s1766_s18 = smov 112  }
  0x11   : > { %v1891_v4 = vld [vmem:[%s547_s19] sm:$0xff]  ;;  %v1893_v5 = vpack.c.bf16 %v564_v3, %v564_v3  ;;  %s553_s23 = scalar_lea.vmem %s2069_s2, %s2087_s22  ;;  %s1767_s22 = smov 64  }
  0x12   : > { %v569_v6 = vsel %vm568_vm0, %v1891_v4, 0.0  ;;  %v1545_v48 = vld [vmem:[%s553_s23] ss:$0 sm:$0xff]  ;;  %s561_s30 = scalar_lea.vmem %s2083_s16, %s1881_s27 }
  0x13   : > { %570 = vadd.xlane.f32.xlu0 %v569_v6  ;;  %1615 = vmatmul.mubr.msk.bf16.vlgmr.msra.gmra.mrb[0].mxu1 %vm568_vm0, %v1893_v5 }
  0x14   : > { %1622 = vmatprep.mubr.msk.bf16.mxu1 %vm1763_vm1, %v1762_v1  ;;  %1619 = vmatpush3.bf16.msra.mxu1 %v1726_v12 }
  0x15   : > { %1620 = vmatprep.subr.bf16.mxu1 %v1762_v1 }
  0x18   : > { %1621 = vmatpush3.bf16.msra.mxu1 %v1727_v14 }
  0x19   : > { %1632 = vmatprep.subr.bf16.mxu1 %v1762_v1 }
  0xa0   : > { %v571_v7 = vpop.xlane.xlu0 %570 }
  0xa1   : > { %v573_v8 = vmul.f32 0.03125, %v571_v7 }
  0xa3   : > { %v574_v9 = vsub.f32 %v1891_v4, %v573_v8 }
  0xa5   : > { %v575_v10 = vmul.f32 %v574_v9, %v574_v9 }
  0xa7   : > { %v576_v11 = vsel %vm568_vm0, %v575_v10, 0.0 }
  0xa8   : > { %577 = vadd.xlane.f32.xlu0 %v576_v11 }
  0xe6   : > { %v637_v18 = vpop.f32.mrb[0].mxu1 }
  0xe7   : > { %v638_v19 = vadd.f32 %v637_v18, %v587_v16  ;;  %v1616_v20 = vpop.f32.mrb[1].mxu1  ;;  %v1728_v18 = vld [vmem:[%s2075_s8] sm:$0xff]  }
  0xe8   : > { %v640_v21 = vpop.f32.mrb[2].mxu1  ;;  %v1769_v20 = vmov 0  }
  0xe9   : > { %v1617_v22 = vpop.f32.mrb[3].mxu1  ;;  %v652_v23 = vrot.slane %v638_v19, %v1915_v17  ;;  %v643_v28 = vadd.f32 1.0, %v638_v19  ;;  %v1729_v19 = vld [vmem:[%s2075_s8 + $0x8] sm:$0xff]   ;;  %1722 = vset.pattern.permute.xlu1 %v1769_v20  ;;  %1723 = vset.pattern.permute.xlu0 %v1769_v20 }
  0xeb   : > { %654 = vrot.lane.b32.xlu1 %v652_v23, %s1764_s29  ;;  %v647_v30 = vrot.slane %v643_v28, %v1915_v17 }
 0x135   : > { %v578_v24 = vpop.xlane.xlu0 %577 }
 0x136   : > { %v579_v25 = vmul.f32 0.03125, %v578_v24 }
 0x138   : > { %v580_v26 = vadd.f32 1e-05, %v579_v25 }
 0x13a   : > { %1742 = vrsqrt.f32 %v580_v26 }
 0x144   : > { %v1743_v27 = vpop.eup %1742 }
 0x145   : > { %v582_v29 = vmul.f32 %v1743_v27, %v574_v9 }
 0x147   : > { %v648_v31 = vmul.f32 %v647_v30, %v582_v29 }
 0x15d   : > { %v655_v32 = vpop.permute.xlu1 %654 }
 0x15e   : > { %v657_v33 = vadd.f32 %v655_v32, %v648_v31 }
 0x160   : > { %v658_v34 = vpack.c.bf16 %v657_v33, %v657_v33 }
 0x162   : > { %1623 = vmatmul.mubr.msk.bf16.vlgmr.msra.gmra.mrb[4].mxu1 %vm568_vm0, %v658_v34 }
 0x163   : > { %1634 = vmatprep.mubr.msk.bf16.mxu1 %vm1763_vm1, %v1762_v1 }
 0x235   : > { %v719_v36 = vpop.f32.mrb[4].mxu1 }
 0x236   : > { %v720_v37 = vadd.f32 %v1540_v35, %v719_v36  ;;  %v1624_v38 = vpop.f32.mrb[5].mxu1  ;;  %v1730_v36 = vld [vmem:[%s2077_s10] sm:$0xff]  }
 0x237   : > { %v722_v39 = vpop.f32.mrb[6].mxu1 }
 0x238   : > { %v725_v40 = vpack.c.bf16 %v720_v37, %v720_v37  ;;  %v1625_v41 = vpop.f32.mrb[7].mxu1  ;;  %v1731_v39 = vld [vmem:[%s2077_s10 + $0x8] sm:$0xff]  }
 0x23a   : > { %851 = vrot.lane.b32.xlu0 %v725_v40, %s1765_s17  ;;  %727 = vrot.lane.b32.xlu1 %v725_v40, %s1764_s29 }
 0x23e   : > { %849 = vrot.lane.b32.xlu1 %v725_v40, %s1766_s18  ;;  %s557_s18 = scalar_lea.vmem %s2070_s3, %s1881_s27 }
 0x23f   : > { %v567_v21 = vld [vmem:[%s557_s18] sm:$0xff] }
 0x2ac   : > { %v728_v42 = vpop.permute.xlu1 %727  ;;  %v852_v44 = vpop.permute.xlu0 %851 }
 0x2ad   : > { %v734_v43 = vsel %vm729_vm2, %v728_v42, 0  ;;  %v857_v45 = vsel %vm729_vm2, %v852_v44, 0 }
 0x2ae   : > { %1627 = vmatpush3.bf16.xpose.msra.mxu0 %v734_v43 }
 0x2af   : > { %1638 = vmatprep.subr.bf16.mxu0 %v1762_v1 }
 0x2b0   : > { %v850_v46 = vpop.permute.xlu1 %849 }
 0x2b5   : > { %1629 = vmatmul.mubr.msk.bf16.vlgmr.msra.gmra.mrb[0].mxu0 %vm729_vm2, %v725_v40 }
 0x2b6   : > { %1639 = vmatpush3.bf16.xpose.msra.mxu0 %v857_v45  ;;  %1640 = vmatprep.mubr.msk.bf16.mxu0 %vm1763_vm1, %v1762_v1 }
 0x2b7   : > { %1650 = vmatprep.subr.bf16.mxu0 %v1762_v1 }
 0x2bd   : > { %1641 = vmatmul.mubr.msk.bf16.vlgmr.msra.gmra.mrb[4].mxu0 %vm729_vm2, %v850_v46 }
 0x2be   : > { %1652 = vmatprep.mubr.msk.bf16.mxu0 %vm1763_vm1, %v1762_v1  ;;  %1651 = vmatpush3.bf16.msra.mxu0 %v1729_v19 }
 0x2bf   : > { %1662 = vmatprep.subr.bf16.mxu0 %v1762_v1 }
 0x388   : > { %v770_v47 = vpop.f32.mrb[0].mxu0 }
 0x389   : > { %v776_v49 = vmul.f32 0.25, %v770_v47  ;;  %v1630_v50 = vpop.f32.mrb[1].mxu0 }
 0x38a   : > { %v773_v51 = vpop.f32.mrb[2].mxu0 }
 0x38b   : > { %v1631_v52 = vpop.f32.mrb[3].mxu0  ;;  %v783_v53 = vadd.f32 %v1545_v48, %v776_v49 }
 0x38d   : > { %v785_v54 = vsel %vm784_vm3, %v783_v53, -inf }
 0x38e   : > { %786 = vmax.xlane.f32.xlu1 %v785_v54  ;;  %v1094_v54 = vld [vmem:[%s2078_s11] sm:$0x1] }
 0x390   : > { %v893_v55 = vpop.f32.mrb[4].mxu0 }
 0x391   : > { %v899_v56 = vmul.f32 0.25, %v893_v55  ;;  %v1642_v57 = vpop.f32.mrb[5].mxu0 }
 0x392   : > { %v896_v58 = vpop.f32.mrb[6].mxu0 }
 0x393   : > { %v1643_v59 = vpop.f32.mrb[7].mxu0  ;;  %v900_v60 = vadd.f32 %v1545_v48, %v899_v56  ;;  %v1553_v48 = vld [vmem:[%s2076_s9] ss:$0 sm:$0xff] }
 0x395   : > { %v901_v61 = vsel %vm784_vm3, %v900_v60, -inf }
 0x396   : > { %902 = vmax.xlane.f32.xlu0 %v901_v61 }
 0x39f   : > { %796 = vrot.lane.b32.xlu1 %v725_v40, %s1767_s22 }
 0x3ac   : > { %912 = vrot.lane.b32.xlu0 %v725_v40, %s1768_s24 }
 0x41b   : > { %v787_v62 = vpop.xlane.xlu1 %786 }
 0x41c   : > { %v788_v63 = vsub.f32 %v783_v53, %v787_v62 }
 0x41e   : > { %v789_v0 = vmul.f32 1.442695, %v788_v63 }
 0x41f   : > { %v797_v2 = vpop.permute.xlu1 %796 }
 0x420   : > { %1744 = vpow2.f32 %v789_v0  ;;  %v803_v3 = vsel %vm801_vm4, %v797_v2, 0  ;;  %v1732_v2 = vld [vmem:[%s2079_s12 + $0x10] sm:$0xff]  }
 0x421   : > { %1633 = vmatpush3.bf16.msra.mxu1 %v803_v3  ;;  %v1733_v3 = vld [vmem:[%s2079_s12] sm:$0xff]  }
 0x422   : > { %1644 = vmatprep.subr.bf16.mxu1 %v1762_v1 }
 0x423   : > { %v903_v6 = vpop.xlane.xlu0 %902 }
 0x424   : > { %v904_v7 = vsub.f32 %v900_v60, %v903_v6  ;;  %v1734_v6 = vld [vmem:[%s2079_s12 + $0x18] sm:$0xff]  }
 0x426   : > { %v905_v8 = vmul.f32 1.442695, %v904_v7  ;;  %v1735_v7 = vld [vmem:[%s2079_s12 + $0x8] sm:$0xff]  }
 0x427   : > { %v913_v10 = vpop.permute.xlu0 %912 }
 0x428   : > { %1746 = vpow2.f32 %v905_v8  ;;  %v918_v13 = vsel %vm801_vm4, %v913_v10, 0 }
 0x42a   : > { %v1745_v9 = vpop.eup %1744 }
 0x42b   : > { %v791_v11 = vsel %vm784_vm3, %v1745_v9, 0.0  ;;  %v795_v12 = vpack.c.bf16 %v1745_v9, %v1745_v9 }
 0x42c   : > { %792 = vadd.xlane.f32.xlu1 %v791_v11 }
 0x42d   : > { %1635 = vmatmul.mubr.msk.bf16.vlgmr.msra.gmra.mrb[8].mxu1 %vm784_vm3, %v795_v12 }
 0x42e   : > { %1645 = vmatpush3.bf16.msra.mxu1 %v918_v13  ;;  %1646 = vmatprep.mubr.msk.bf16.mxu1 %vm1763_vm1, %v1762_v1 }
 0x42f   : > { %1656 = vmatprep.subr.bf16.mxu1 %v1762_v1 }
 0x432   : > { %v1747_v14 = vpop.eup %1746 }
 0x433   : > { %v907_v15 = vsel %vm784_vm3, %v1747_v14, 0.0  ;;  %v911_v16 = vpack.c.bf16 %v1747_v14, %v1747_v14 }
 0x434   : > { %908 = vadd.xlane.f32.xlu0 %v907_v15 }
 0x435   : > { %1647 = vmatmul.mubr.msk.bf16.vlgmr.msra.gmra.mrb[12].mxu1 %vm784_vm3, %v911_v16 }
 0x436   : > { %1658 = vmatprep.mubr.msk.bf16.mxu1 %vm1763_vm1, %v1762_v1  ;;  %1657 = vmatpush3.bf16.msra.mxu1 %v1728_v18 }
 0x437   : > { %1670 = vmatprep.subr.bf16.mxu1 %v1762_v1 }
 0x43d   : > { %1073 = vperm.xlu1 %1722, %v567_v21   ;;  %v1736_v21 = vld [vmem:[%s2079_s12 + $0x20] sm:$0xff]  }
 0x4b9   : > { %v793_v22 = vpop.xlane.xlu1 %792 }
 0x4ba   : > { %1748 = vrcp.f32 %v793_v22 }
 0x4bd   : > { %v1989_v51 = vpop.permute.xlu1 %1073 }
 0x4c1   : > { %v909_v23 = vpop.xlane.xlu0 %908 }
 0x4c2   : > { %1750 = vrcp.f32 %v909_v23 }
 0x4c4   : > { %v1749_v24 = vpop.eup %1748 }
 0x4cc   : > { %v1751_v31 = vpop.eup %1750 }
 0x500   : > { %v839_v25 = vpop.f32.mrb[8].mxu1 }
 0x501   : > { %v845_v26 = vmul.f32 %v1749_v24, %v839_v25  ;;  %v1636_v27 = vpop.f32.mrb[9].mxu1 }
 0x502   : > { %v842_v28 = vpop.f32.mrb[10].mxu1  ;;  %v1739_v27 = vld [vmem:[%s2081_s14 + $0x8] sm:$0xff]  }
 0x503   : > { %v846_v29 = vpack.c.bf16 %v845_v26, %v845_v26  ;;  %v1637_v30 = vpop.f32.mrb[11].mxu1  ;;  %v1738_v26 = vld [vmem:[%s2081_s14] sm:$0xff]   ;;  %v1740_v28 = vld [vmem:[%s2081_s14 + $0x10] sm:$0xff]  }
 0x505   : > { %1659 = vmatmul.mubr.msk.bf16.vlgmr.msra.gmra.mrb[16].mxu1 %vm729_vm2, %v846_v29  ;;  %v1741_v29 = vld [vmem:[%s2081_s14 + $0x18] sm:$0xff]  }
 0x506   : > { %1674 = vmatprep.mubr.msk.bf16.mxu1 %vm1763_vm1, %v1762_v1  ;;  %1671 = vmatpush3.bf16.msra.mxu1 %v1732_v2 }
 0x507   : > { %1672 = vmatprep.subr.bf16.mxu1 %v1762_v1 }
 0x508   : > { %v954_v32 = vpop.f32.mrb[12].mxu1 }
 0x509   : > { %v960_v33 = vmul.f32 %v1751_v31, %v954_v32  ;;  %v1648_v34 = vpop.f32.mrb[13].mxu1 }
 0x50a   : > { %v957_v35 = vpop.f32.mrb[14].mxu1  ;;  %1673 = vmatpush3.bf16.msra.mxu1 %v1734_v6 }
 0x50b   : > { %v961_v37 = vpack.c.bf16 %v960_v33, %v960_v33  ;;  %v1649_v38 = vpop.f32.mrb[15].mxu1  ;;  %1686 = vmatprep.subr.bf16.mxu1 %v1762_v1 }
 0x50d   : > { %1653 = vmatmul.mubr.msk.bf16.vlgmr.msra.gmra.mrb[8].mxu0 %vm729_vm2, %v961_v37 }
 0x50e   : > { %1663 = vmatpush3.bf16.msra.mxu0 %v1730_v36  ;;  %1666 = vmatprep.mubr.msk.bf16.mxu0 %vm1763_vm1, %v1762_v1 }
 0x50f   : > { %1664 = vmatprep.subr.bf16.mxu0 %v1762_v1 }
 0x512   : > { %1665 = vmatpush3.bf16.msra.mxu0 %v1731_v39 }
 0x513   : > { %1678 = vmatprep.subr.bf16.mxu0 %v1762_v1 }
 0x515   : > { %1667 = vmatmul.mubr.msk.bf16.vlgmr.msra.gmra.mrb[12].mxu0 %vm568_vm0, %v1893_v5 }
 0x516   : > { %1682 = vmatprep.mubr.msk.bf16.mxu0 %vm1763_vm1, %v1762_v1  ;;  %1679 = vmatpush3.bf16.msra.mxu0 %v1733_v3 }
 0x517   : > { %1680 = vmatprep.subr.bf16.mxu0 %v1762_v1 }
 0x51a   : > { %1681 = vmatpush3.bf16.msra.mxu0 %v1735_v7 }
 0x51b   : > { %1694 = vmatprep.subr.bf16.mxu0 %v1762_v1 }
 0x5d8   : > { %v1056_v40 = vpop.f32.mrb[16].mxu1 }
 0x5d9   : > { %v1660_v41 = vpop.f32.mrb[17].mxu1 }
 0x5da   : > { %v1059_v42 = vpop.f32.mrb[18].mxu1 }
 0x5db   : > { %v1661_v43 = vpop.f32.mrb[19].mxu1 }
 0x5e0   : > { %v1007_v44 = vpop.f32.mrb[8].mxu0 }
 0x5e1   : > { %v1057_v45 = vadd.f32 %v1056_v40, %v1007_v44  ;;  %v1654_v46 = vpop.f32.mrb[9].mxu0  ;;  %v1566_v40 = vld [vmem:[%s2080_s13] ss:$0 sm:$0xff] }
 0x5e2   : > { %v1010_v47 = vpop.f32.mrb[10].mxu0 }
 0x5e3   : > { %v1062_v49 = vadd.f32 %v1057_v45, %v1891_v4  ;;  %v1655_v50 = vpop.f32.mrb[11].mxu0  ;;  %v1567_v47 = vld [vmem:[%s2082_s15] ss:$0 sm:$0xff] }
 0x5e5   : > { %v1070_v5 = vadd.f32 %v1553_v48, %v1062_v49 }
 0x5e7   : > { %v1992_v52 = vmul.f32 %v1989_v51, %v1070_v5 }
 0x5e8   : > { %v1141_v55 = vpop.f32.mrb[12].mxu0 }
 0x5e9   : > { %v1077_v53 = vsel %vm568_vm0, %v1992_v52, 0.0  ;;  %v1142_v56 = vadd.f32 %v1141_v55, %v1094_v54  ;;  %v1668_v57 = vpop.f32.mrb[13].mxu0 }
 0x5ea   : > { %1078 = vadd.xlane.f32.xlu0 %v1077_v53  ;;  %v1144_v58 = vpop.f32.mrb[14].mxu0 }
 0x5eb   : > { %v1156_v4 = vrot.slane %v1142_v56, %v1915_v17  ;;  %v1669_v59 = vpop.f32.mrb[15].mxu0  ;;  %v1147_v11 = vadd.f32 1.0, %v1142_v56 }
 0x5ed   : > { %1158 = vrot.lane.b32.xlu1 %v1156_v4, %s1764_s29  ;;  %v1151_v14 = vrot.slane %v1147_v11, %v1915_v17  ;;  %v1737_v17 = vld [vmem:[%s2079_s12 + $0x28] sm:$0xff]  }
 0x65f   : > { %v1159_v15 = vpop.permute.xlu1 %1158 }
 0x677   : > { %v1079_v60 = vpop.xlane.xlu0 %1078 }
 0x678   : > { %v1080_v61 = vmul.f32 0.03125, %v1079_v60 }
 0x67a   : > { %v1081_v62 = vsub.f32 %v1992_v52, %v1080_v61 }
 0x67c   : > { %v1082_v63 = vmul.f32 %v1081_v62, %v1081_v62 }
 0x67e   : > { %v1083_v0 = vsel %vm568_vm0, %v1082_v63, 0.0 }
 0x67f   : > { %1084 = vadd.xlane.f32.xlu0 %v1083_v0 }
 0x70c   : > { %v1085_v8 = vpop.xlane.xlu0 %1084 }
 0x70d   : > { %v1086_v9 = vmul.f32 0.03125, %v1085_v8 }
 0x70f   : > { %v1087_v10 = vadd.f32 1e-05, %v1086_v9 }
 0x711   : > { %1752 = vrsqrt.f32 %v1087_v10 }
 0x71b   : > { %v1753_v12 = vpop.eup %1752 }
 0x71c   : > { %v1089_v13 = vmul.f32 %v1753_v12, %v1081_v62 }
 0x71e   : > { %v1152_v16 = vmul.f32 %v1151_v14, %v1089_v13 }
 0x720   : > { %v1161_v18 = vadd.f32 %v1159_v15, %v1152_v16 }
 0x722   : > { %1165 = vst.msk [vmem:[#allocation2 + $0x1] sm:$0xff] %vm568_vm0, %v1161_v18 }
 0x729   : > { %v1172_v19 = vld [vmem:[#allocation2 + $0x1] sm:$0xff] }
 0x72a   : > { %v1166_v20 = vld [vmem:[#allocation2] sm:$0xff]  ;;  %v1173_v22 = vpack.c.bf16 %v1172_v19, %v1172_v19 }
 0x72b   : > { %v1167_v23 = vpack.c.bf16 %v1166_v20, %v1166_v20  ;;  %v1288_v24 = vld [vmem:[#allocation2 + $0x2] sm:$0xff] }
 0x72c   : > { %1675 = vmatmul.mubr.msk.bf16.vlgmr.msra.gmra.mrb[20].mxu1 %vm568_vm0, %v1173_v22  ;;  %v1289_v25 = vpack.c.bf16 %v1288_v24, %v1288_v24 }
 0x72d   : > { %1683 = vmatmul.mubr.msk.bf16.vlgmr.msra.gmra.mrb[16].mxu0 %vm568_vm0, %v1167_v23  ;;  %1687 = vmatpush3.bf16.msra.mxu1 %v1736_v21 }
 0x72e   : > { %1690 = vmatprep.mubr.msk.bf16.mxu1 %vm1763_vm1, %v1762_v1  ;;  %1688 = vmatprep.subr.bf16.mxu1 %v1762_v1 }
 0x72f   : > { %1702 = vmatprep.mubr.msk.bf16.mxu0 %vm1763_vm1, %v1762_v1  ;;  %1695 = vmatpush3.bf16.msra.mxu0 %v1738_v26 }
 0x730   : > { %1696 = vmatprep.subr.bf16.mxu0 %v1762_v1 }
 0x731   : > { %1689 = vmatpush3.bf16.msra.mxu1 %v1737_v17 }
 0x733   : > { %1697 = vmatpush3.bf16.msra.mxu0 %v1739_v27 }
 0x734   : > { %1691 = vmatmul.mubr.msk.bf16.vlgmr.msra.gmra.mrb[24].mxu1 %vm568_vm0, %v1289_v25  ;;  %1698 = vmatprep.subr.bf16.mxu0 %v1762_v1 }
 0x737   : > { %1699 = vmatpush3.bf16.msra.mxu0 %v1740_v28 }
 0x738   : > { %1700 = vmatprep.subr.bf16.mxu0 %v1762_v1 }
 0x73b   : > { %1701 = vmatpush3.bf16.msra.mxu0 %v1741_v29 }
 0x7ff   : > { %v1227_v30 = vpop.f32.mrb[20].mxu1 }
 0x800   : > { %v1282_v31 = vpop.f32.mrb[16].mxu0  ;;  %v1676_v33 = vpop.f32.mrb[21].mxu1 }
 0x801   : > { %v1283_v32 = vadd.f32 %v1282_v31, %v1227_v30  ;;  %v1684_v34 = vpop.f32.mrb[17].mxu0  ;;  %v1230_v35 = vpop.f32.mrb[22].mxu1 }
 0x802   : > { %v1285_v36 = vpop.f32.mrb[18].mxu0  ;;  %v1677_v37 = vpop.f32.mrb[23].mxu1 }
 0x803   : > { %v1685_v38 = vpop.f32.mrb[19].mxu0 }
 0x807   : > { %v1343_v39 = vpop.f32.mrb[24].mxu1 }
 0x808   : > { %v1349_v1 = vadd.f32 %v1343_v39, %v1283_v32  ;;  %v1692_v41 = vpop.f32.mrb[25].mxu1 }
 0x809   : > { %v1346_v42 = vpop.f32.mrb[26].mxu1 }
 0x80a   : > { %v1357_v43 = vadd.f32 %v1566_v40, %v1349_v1  ;;  %v1693_v44 = vpop.f32.mrb[27].mxu1 }
 0x80c   : > { %v1358_v45 = vmax.f32 %v1357_v43, 0.0 }
 0x80e   : > { %v1359_v46 = vpack.c.bf16 %v1358_v45, %v1358_v45 }
 0x810   : > { %1703 = vmatmul.mubr.msk.bf16.vlgmr.msra.gmra.mrb[20].mxu0 %vm1399_vm6, %v1359_v46 }
 0x8e3   : > { %v1437_v48 = vpop.f32.mrb[20].mxu0 }
 0x8e4   : > { %v1438_v49 = vadd.f32 %v1567_v47, %v1437_v48  ;;  %v1704_v50 = vpop.f32.mrb[21].mxu0 }
 0x8e5   : > { %v1440_v5 = vpop.f32.mrb[22].mxu0 }
 0x8e6   : > { %v1443_v53 = vadd.f32 %v1438_v49, %v1992_v52  ;;  %v1705_v54 = vpop.f32.mrb[23].mxu0 }
 0x8e8   : > { %v1444_v55 = vmul.f32 %v1443_v53, %v1989_v51 }
 0x8ea   : > { %1445 = vst.msk [vmem:[%s561_s30] sm:$0xff] %vm568_vm0, %v1444_v55 }
 0x8eb PF: > { %s26_s21 = sadd.s32 1, %s1760_s21  }
 0x8ec   : > { %p23_p4 = scmp.ge.s32.totalorder %s26_s21, 4  }
 0x8ee   :  { %25 = sbr.rel (!%p23_p4) target bundleno = 2 (0x2), region = 123 }

// kernel: prompt_tts_forward.15
= control target key start
LH: loop header
LB: loop body
LE: loop exit
PB: predicated region body
PF: predicated region fallthrough
CT: control target
= control target key end

     0   :  { %12 = vsyncpa [#allocation3], 0  ;;  %s993_s0 = inlined_call_operand.vmem [shape: f32[2,24,32], index: 0, kind: input, shape index: {}]   ;;  %s994_s1 = inlined_call_operand.vmem [shape: f32[2,1,32], index: 1, kind: input, shape index: {}]   ;;  %s995_s2 = inlined_call_operand.vmem [shape: f32[2,24,1], index: 2, kind: input, shape index: {}]   ;;  %s996_s3 = inlined_call_operand.vmem [shape: bf16[32,64], index: 3, kind: input, shape index: {}]   ;;  %s997_s4 = inlined_call_operand.vmem [shape: f32[1,64], index: 4, kind: input, shape index: {}]   ;;  %s998_s5 = inlined_call_operand.vmem [shape: bf16[32,80], index: 5, kind: input, shape index: {}]   ;;  %s999_s6 = inlined_call_operand.vmem [shape: f32[1,80], index: 6, kind: input, shape index: {}]   ;;  %s1000_s7 = inlined_call_operand.hbm [shape: f32[2,24,80], index: 7, kind: output, shape index: {}]  }
   0x1   :  { %14 = vsyncpa [#allocation3 + $0x1], 0  ;;  %s849_s24 = smov 0   ;;  %s851_s25 = smov 0  }
   0x2   :  { %s853_s26 = smov 0   ;;  %s855_s27 = smov 0  }
   0x3 LB: > { %s870_s28 = sadd.s32 4294967295, %s800_s27   ;;  %s638_s29 = sadd.s32 4294967294, %s800_s27   ;;  %s800_s27 = sphi %s855_s27, %s1006_s27   ;;  %s796_s26 = sphi %s853_s26, %s1005_s26   ;;  %s792_s25 = sphi %s851_s25, %s1004_s25   ;;  %s788_s24 = sphi %s849_s24, %s1003_s24  }
   0x4   : > { %s874_s30 = sadd.s32 1, %s800_s27   ;;  %s189_s8 = sadd.s32 1, %s796_s26 }
   0x5   : > { %s186_s9 = ssub.s32 %s800_s27, %s874_s30  ;;  %p199_p0 = scmp.ne.s32.totalorder %s796_s26, %s792_s25 }
   0x6   : > { %p187_p1 = scmp.eq.s32.totalorder %s186_s9, 0  ;;  %p200_p2 = scmp.eq.s32.totalorder %s870_s28, 1 }
   0x7   : > { %p205_p3 = scmp.ne.s32.totalorder %s792_s25, %s788_s24  ;;  %p206_p4 = scmp.eq.s32.totalorder %s638_s29, 1 }
   0x8   : > { %s885_s10 = scalar_select %p187_p1, %s796_s26, %s189_s8  }
   0x9   : > { %p887_p5 = por %p200_p2, %p199_p0  ;;  %p891_p6 = por %p206_p4, %p205_p3 }
   0xa   : > { %p641_p7 = scmp.ge.s32.totalorder %s800_s27, 1  ;;  %p258_p8 = scmp.lt.s32.totalorder %s800_s27, 3 }
   0xc   : > { %p259_p9 = pnand %p641_p7, %p258_p8 }
   0xd   : > { %p298_p10 = scmp.lt.s32.totalorder (!%p259_p9), %s870_s28, 1  ;;  %v728_v0 = vld [vmem:[%s996_s3] sm:$0xff] (!%p259_p9)   ;;  %v802_v1 = vmov (!%p259_p9), 0.0   ;;  %v729_v2 = vld [vmem:[%s996_s3 + $0x8] sm:$0xff] (!%p259_p9)   ;;  %vm803_vm0 = vmmov (!%p259_p9), 0   ;;  %vm317_vm1 = vcmask (!%p259_p9), 261120   ;;  %v419_v30 = vlaneseq (!%p259_p9) }
   0xe   : > { %262 = sbr.rel (%p259_p9) target bundleno = 633 (0x279), region = 48  ;;  %662 = vmatprep.subr.bf16.mxu0 (!%p259_p9), %v802_v1  ;;  %666 = vmatprep.mubr.msk.bf16.mxu0 (!%p259_p9), %vm803_vm0, %v802_v1  ;;  %v804_v11 = vmov (!%p259_p9), 0   ;;  %v362_v31 = vld [vmem:[%s997_s4] sm:$0x1] (!%p259_p9)  ;;  %s805_s16 = smov (!%p259_p9), 96   ;;  %v731_v43 = vld [vmem:[%s998_s5 + $0x8] sm:$0xff] (!%p259_p9)  }
   0xf   : > { %663 = vmatpush3.bf16.msra.mxu0 (!%p259_p9), %v728_v0  ;;  %727 = vset.pattern.permute.xlu1 (!%p259_p9), %v804_v11  ;;  %v420_v32 = vshrl.u32 (!%p259_p9), %v419_v30, 7  ;;  %v730_v42 = vld [vmem:[%s998_s5] sm:$0xff] (!%p259_p9)   ;;  %s680_s8 = smul.u32 (!%p259_p9), 384, %s870_s28  ;;  %vm537_vm2 = vcmask (!%p259_p9), 654336  }
  0x10   : > { %664 = vmatprep.subr.bf16.mxu0 (!%p259_p9), %v802_v1  ;;  %726 = vset.pattern.permute.xlu0 (!%p259_p9), %v804_v11 }
  0x11   : > { %v421_v38 = vsub.s32 (!%p259_p9), 0, %v420_v32  ;;  %670 = vmatprep.subr.bf16.mxu1 (!%p259_p9), %v730_v42 }
  0x12   : > { %671 = vmatpush3.bf16.msra.mxu1 (!%p259_p9), %v730_v42 }
  0x13   : > { %665 = vmatpush3.bf16.msra.mxu0 (!%p259_p9), %v729_v2  ;;  %672 = vmatprep.subr.bf16.mxu1 (!%p259_p9), %v731_v43 }
  0x15   : > { %s902_s15 = scalar_select %p298_p10, %s870_s28, 1 }
  0x16   : > { %673 = vmatpush3.bf16.msra.mxu1 %v731_v43  ;;  %s950_s28 = scalar_lea.hbm %s1000_s7, %s680_s8 }
  0x17   : > { %s679_s18 = smul.u32 24, %s902_s15  ;;  %s305_s21 = scalar_lea.vmem %s994_s1, %s902_s15 }
  0x18   : > { %v315_v3 = vld [vmem:[%s305_s21] sm:$0x1]  ;;  %s295_s21 = sand.u32 1, %s792_s25  }
  0x19   : > { %s302_s29 = scalar_lea.vmem %s993_s0, %s679_s18  ;;  %v316_v4 = vpack.c.bf16 %v315_v3, %v315_v3  ;;  %s310_s13 = scalar_lea.vmem %s995_s2, %s679_s18 }
  0x1a   : > { %v312_v5 = vld [vmem:[%s302_s29] sm:$0xff]  ;;  %v313_v6 = vld [vmem:[%s302_s29 + $0x8] sm:$0xff]  ;;  %v314_v7 = vld [vmem:[%s302_s29 + $0x10] sm:$0xff]  ;;  %s678_s22 = smul.u32 24, %s295_s21  ;;  %s806_s18 = smov [#allocation2]  }
  0x1b   : > { %v318_v8 = vsel %vm317_vm1, %v312_v5, 0.0  ;;  %v324_v9 = vsel %vm317_vm1, %v314_v7, 0.0  ;;  %667 = vmatmul.mubr.msk.bf16.vlgmr.msra.gmra.mrb[0].mxu0 %vm317_vm1, %v316_v4  ;;  %v321_v10 = vsel %vm317_vm1, %v313_v6, 0.0  ;;  %v438_v22 = vld [vmem:[%s310_s13 + $0x8] sm:$0xff]  ;;  %v439_v23 = vld [vmem:[%s310_s13 + $0x10] sm:$0xff]  ;;  %v437_v24 = vld [vmem:[%s310_s13] sm:$0xff] }
  0x1c   : > { %319 = vadd.xlane.f32.xlu0 %v318_v8  ;;  %325 = vadd.xlane.f32.xlu1 %v324_v9  ;;  %s297_s9 = scalar_lea.vmem [#allocation2], %s678_s22  ;;  %s742_s19 = sshll.u32 %s806_s18, 4  ;;  %s743_s19 = int_to_ptr.vmem [resolvable:$false] %s742_s19 }
  0x1d   : > { %s555_s13 = sshll.u32 %s297_s9, 4  ;;  %s744_s20 = scalar_lea.vmem %s743_s19, 768  ;;  %s945_s13 = int_to_ptr.vmem [resolvable:$true] %s555_s13 }
  0x1e   : > { %s738_s17 = scalar_lea.vmem %s945_s13, 384  ;;  %p745_p0 = scmp.lt.s32.totalorder %s945_s13, %s743_s19 }
  0x1f   : > { %p739_p11 = scmp.ne.s32.totalorder %s945_s13, %s738_s17  ;;  %p746_p1 = scmp.lt.s32.totalorder %s744_s20, %s738_s17 }
  0x20   : > { %322 = vadd.xlane.f32.xlu0 %v321_v10  ;;  %v647_v10 = vld [vmem:[%s999_s6] ss:$0 sm:$0xff] }
  0x21   : > { %p740_p12 = pnand %p739_p11, %p887_p5  ;;  %p747_p2 = por %p746_p1, %p745_p0 }
  0x23   : > { %p741_p13 = pneg %p740_p12 }
  0x25   : > { %p748_p3 = pnand %p747_p2, %p741_p13 }
  0xa9   : > { %v320_v12 = vpop.xlane.xlu0 %319  ;;  %v326_v25 = vpop.xlane.xlu1 %325 }
  0xaa   : > { %v328_v13 = vmul.f32 0.03125, %v320_v12  ;;  %v330_v26 = vmul.f32 0.03125, %v326_v25 }
  0xac   : > { %v331_v14 = vsub.f32 %v312_v5, %v328_v13  ;;  %v333_v27 = vsub.f32 %v314_v7, %v330_v26 }
  0xad   : > { %v323_v15 = vpop.xlane.xlu0 %322 }
  0xae   : > { %v329_v16 = vmul.f32 0.03125, %v323_v15  ;;  %v334_v17 = vmul.f32 %v331_v14, %v331_v14  ;;  %v336_v28 = vmul.f32 %v333_v27, %v333_v27 }
  0xb0   : > { %v332_v18 = vsub.f32 %v313_v6, %v329_v16  ;;  %v337_v19 = vsel %vm317_vm1, %v334_v17, 0.0  ;;  %v343_v29 = vsel %vm317_vm1, %v336_v28, 0.0 }
  0xb1   : > { %338 = vadd.xlane.f32.xlu1 %v337_v19 }
  0xb2   : > { %v335_v20 = vmul.f32 %v332_v18, %v332_v18 }
  0xb4   : > { %v340_v21 = vsel %vm317_vm1, %v335_v20, 0.0 }
  0xb5   : > { %341 = vadd.xlane.f32.xlu0 %v340_v21 }
  0xc2   : > { %447 = vperm.xlu1 %727, %v438_v22  }
  0xc6   : > { %452 = vperm.xlu1 %727, %v439_v23  }
  0xcb   : > { %442 = vperm.xlu0 %726, %v437_v24  }
  0xea   : > { %344 = vadd.xlane.f32.xlu1 %v343_v29 }
  0xee   : > { %v412_v33 = vpop.f32.mrb[0].mxu0 }
  0xef   : > { %v413_v34 = vadd.f32 %v412_v33, %v362_v31  ;;  %v668_v35 = vpop.f32.mrb[1].mxu0 }
  0xf0   : > { %v415_v36 = vpop.f32.mrb[2].mxu0 }
  0xf1   : > { %v418_v37 = vadd.f32 1.0, %v413_v34  ;;  %v669_v39 = vpop.f32.mrb[3].mxu0  ;;  %v429_v41 = vrot.slane %v413_v34, %v421_v38 }
  0xf3   : > { %v422_v40 = vrot.slane %v418_v37, %v421_v38 }
  0xfb   : > { %431 = vrot.lane.b32.xlu1 %v429_v41, %s805_s16  ;;  %s952_s16 = scalar_lea.sflag [#allocation3], %s295_s21 }
 0x13e   : > { %v339_v44 = vpop.xlane.xlu1 %338 }
 0x13f   : > { %v346_v46 = vmul.f32 0.03125, %v339_v44 }
 0x141   : > { %v349_v48 = vadd.f32 1e-05, %v346_v46 }
 0x142   : > { %v342_v45 = vpop.xlane.xlu0 %341  ;;  %v448_v50 = vpop.permute.xlu1 %447 }
 0x143   : > { %v347_v47 = vmul.f32 0.03125, %v342_v45  ;;  %732 = vrsqrt.f32 %v349_v48 }
 0x145   : > { %v350_v49 = vadd.f32 1e-05, %v347_v47 }
 0x146   : > { %v453_v53 = vpop.permute.xlu1 %452 }
 0x147   : > { %734 = vrsqrt.f32 %v350_v49 }
 0x14a   : > { %v443_v62 = vpop.permute.xlu0 %442 }
 0x14d   : > { %v733_v51 = vpop.eup %732 }
 0x14e   : > { %v355_v54 = vmul.f32 %v733_v51, %v331_v14 }
 0x150   : > { %v423_v59 = vmul.f32 %v422_v40, %v355_v54 }
 0x151   : > { %v735_v52 = vpop.eup %734 }
 0x152   : > { %v356_v55 = vmul.f32 %v735_v52, %v332_v18 }
 0x154   : > { %v424_v60 = vmul.f32 %v422_v40, %v356_v55 }
 0x177   : > { %v345_v56 = vpop.xlane.xlu1 %344 }
 0x178   : > { %v348_v57 = vmul.f32 0.03125, %v345_v56 }
 0x17a   : > { %v351_v58 = vadd.f32 1e-05, %v348_v57 }
 0x17b   : > { %v432_v61 = vpop.permute.xlu1 %431 }
 0x17c   : > { %736 = vrsqrt.f32 %v351_v58  ;;  %v434_v63 = vadd.f32 %v432_v61, %v423_v59  ;;  %v435_v0 = vadd.f32 %v432_v61, %v424_v60 }
 0x17e   : > { %v455_v1 = vmul.f32 %v443_v62, %v434_v63  ;;  %v456_v2 = vmul.f32 %v448_v50, %v435_v0 }
 0x180   : > { %v458_v3 = vpack.c.bf16 %v456_v2, %v455_v1 }
 0x182   : > { %674 = vmatprep.mubr.msk.bf16.mxu1 %vm317_vm1, %v458_v3 }
 0x186   : > { %v737_v4 = vpop.eup %736 }
 0x187   : > { %v357_v5 = vmul.f32 %v737_v4, %v333_v27 }
 0x189   : > { %v425_v6 = vmul.f32 %v422_v40, %v357_v5 }
 0x18b   : > { %v436_v7 = vadd.f32 %v432_v61, %v425_v6 }
 0x18d   : > { %v457_v8 = vmul.f32 %v453_v53, %v436_v7 }
 0x18f   : > { %v459_v9 = vpack.c.bf16 %v457_v8, %v457_v8 }
 0x191   : > { %675 = vmatmul.mubr.msk.bf16.vlgmr.msra.gmra.mrb[0].mxu1 %vm317_vm1, %v459_v9 }
 0x264   : > { %v676_v11 = vpop.f32.mrb[0].mxu1 }
 0x265   : > { %v532_v12 = vadd.f32 %v676_v11, %v647_v10  ;;  %v523_v13 = vpop.f32.mrb[1].mxu1 }
 0x266   : > { %v524_v14 = vadd.f32 %v647_v10, %v523_v13  ;;  %v677_v15 = vpop.f32.mrb[2].mxu1 }
 0x267   : > { %540 = vst.msk [vmem:[%s297_s9 + $0x10] sm:$0xff] %vm537_vm2, %v532_v12  ;;  %v526_v16 = vpop.f32.mrb[3].mxu1 }
 0x268   : > { %538 = vst.msk [vmem:[%s297_s9] sm:$0xff] %vm537_vm2, %v524_v14  ;;  %v527_v17 = vadd.f32 %v647_v10, %v526_v16 }
 0x26a   : > { %539 = vst.msk [vmem:[%s297_s9 + $0x8] sm:$0xff] %vm537_vm2, %v527_v17 }
 0x26b   : > { %751 = shalt.err (!%p748_p3)
}
 0x26c   : > { %s752_s21 = scalar_lea.hbm %s950_s28, 384  ;;  %s756_s29 = scalar_lea.hbm %s1000_s7, 768 }
 0x26d   : > { %p753_p4 = scmp.ne.s32.totalorder %s950_s28, %s752_s21  ;;  %p757_p9 = scmp.lt.u32.totalorder %s950_s28, %s1000_s7 }
 0x26e   : > { %p758_p10 = scmp.lt.u32.totalorder %s756_s29, %s752_s21  ;;  %p760_p12 = scmp.lt.u32.totalorder %s752_s21, %s950_s28 }
 0x26f   : > { %p754_p7 = pnand %p753_p4, %p887_p5 }
 0x270   : > { %p759_p11 = por %p758_p10, %p757_p9 }
 0x271   : > { %p755_p8 = pneg %p754_p7 }
 0x272   : > { %p761_p13 = por %p760_p12, %p759_p11 }
 0x274   : > { %p762_p0 = pnand %p761_p13, %p755_p8 }
 0x276   : > { %765 = shalt.err (!%p762_p0)
}
 0x277   : > { %s807_s14 = smov 128   ;;  %s808_s15 = smov 8  }
 0x278   : > { %681 = dma.vmem_to_hbm [thread:$0]  (%p887_p5), %s945_s13, 384, %s950_s28, %s952_s16, %s807_s14, %s807_s14, %s808_s15  }
 0x279 PF: > { %p687_p1 = scmp.ge.s32.totalorder %s800_s27, 2  ;;  %s570_s17 = sand.u32 1, %s788_s24  }
 0x27a   : > { %s571_s18 = scalar_lea.sflag [#allocation3], %s570_s17 }
 0x27b   : > { %p684_p2 = pnand %p687_p1, %p891_p6 }
 0x27d   : > { %783 = dma.done.wait (!%p684_p2), %s571_s18, 384  }
 0x27e   : > { %785 = vsyncadd (!%p684_p2), %s571_s18, 4294966912  ;;  %p17_p3 = scmp.ge.s32.totalorder %s874_s30, 4   ;;  %s1003_s24 = smov %s792_s25 }
 0x27f   : > { %s1004_s25 = smov %s796_s26  ;;  %s1005_s26 = smov %s885_s10 }
 0x280   : > { %s1006_s27 = smov %s874_s30  ;;  %19 = sbr.rel (!%p17_p3) target bundleno = 3 (0x3), region = 89 }
 0x287   :  { %576 = vsyncpa [#allocation3], 1 }
 0x288   :  { %578 = vsyncpa [#allocation3 + $0x1], 1 }

// kernel: prompt_tts_forward.13
= control target key start
LH: loop header
LB: loop body
LE: loop exit
PB: predicated region body
PF: predicated region fallthrough
CT: control target
= control target key end

     0   :  { %s2234_s21 = smov 0   ;;  %s2510_s0 = inlined_call_operand.vmem [shape: f32[2,24,32], index: 0, kind: input, shape index: {}]   ;;  %s2511_s1 = inlined_call_operand.vmem [shape: f32[2,1,32], index: 1, kind: input, shape index: {}]   ;;  %s2512_s2 = inlined_call_operand.vmem [shape: f32[2,1,24], index: 2, kind: input, shape index: {}]   ;;  %s2513_s3 = inlined_call_operand.vmem [shape: f32[2,24,1], index: 3, kind: input, shape index: {}]   ;;  %s2514_s4 = inlined_call_operand.vmem [shape: bf16[32,64], index: 4, kind: input, shape index: {}]   ;;  %s2515_s5 = inlined_call_operand.vmem [shape: f32[1,64], index: 5, kind: input, shape index: {}, may-alias: {5,11,13}]   ;;  %s2516_s6 = inlined_call_operand.vmem [shape: bf16[32,96], index: 6, kind: input, shape index: {}]   ;;  %s2517_s7 = inlined_call_operand.vmem [shape: f32[1,96], index: 7, kind: input, shape index: {}]   ;;  %s2518_s8 = inlined_call_operand.vmem [shape: bf16[32,32], index: 8, kind: input, shape index: {}]   ;;  %s2519_s9 = inlined_call_operand.vmem [shape: f32[1,32], index: 9, kind: input, shape index: {}, may-alias: {9,15}]   ;;  %s2520_s10 = inlined_call_operand.vmem [shape: bf16[32,64], index: 10, kind: input, shape index: {}]   ;;  %s2521_s11 = inlined_call_operand.vmem [shape: f32[1,64], index: 11, kind: input, shape index: {}, may-alias: {5,11,13}]   ;;  %s2522_s12 = inlined_call_operand.vmem [shape: bf16[96,64], index: 12, kind: input, shape index: {}]   ;;  %s2523_s13 = inlined_call_operand.vmem [shape: f32[1,64], index: 13, kind: input, shape index: {}, may-alias: {5,11,13}]   ;;  %s2524_s14 = inlined_call_operand.vmem [shape: bf16[64,32], index: 14, kind: input, shape index: {}]   ;;  %s2525_s15 = inlined_call_operand.vmem [shape: f32[1,32], index: 15, kind: input, shape index: {}, may-alias: {9,15}]   ;;  %s2526_s16 = inlined_call_operand.vmem [shape: f32[2,24,32], index: 16, kind: output, shape index: {}]  }
   0x1   :  { %2527 = sst [smem:[#allocation3_spill]] %s2510_s0 }
   0x2 LB: > { %s1843_s22 = sadd.s32 4294967295, %s2139_s21   ;;  %p1847_p0 = scmp.ge.s32.totalorder %s2139_s21, 1  ;;  %s2139_s21 = sphi %s2234_s21, %s26_s21  }
   0x3   : > { %p488_p1 = scmp.lt.s32.totalorder %s2139_s21, 3 }
   0x5   : > { %p489_p2 = pnand %p1847_p0, %p488_p1 }
   0x6   : > { %v2079_v0 = vld [vmem:[%s2514_s4] sm:$0xff] (!%p489_p2)   ;;  %v2141_v1 = vmov (!%p489_p2), 0.0   ;;  %v2080_v2 = vld [vmem:[%s2514_s4 + $0x8] sm:$0xff] (!%p489_p2)   ;;  %vm2142_vm0 = vmmov (!%p489_p2), 0   ;;  %p549_p3 = scmp.lt.s32.totalorder (!%p489_p2), %s1843_s22, 1  ;;  %vm580_vm1 = vcmask (!%p489_p2), 261120   ;;  %v682_v27 = vlaneseq (!%p489_p2) }
   0x7   : > { %492 = sbr.rel (%p489_p2) target bundleno = 2714 (0xa9a), region = 84  ;;  %1950 = vmatprep.subr.bf16.mxu1 (!%p489_p2), %v2141_v1  ;;  %1954 = vmatprep.mubr.msk.bf16.mxu1 (!%p489_p2), %vm2142_vm0, %v2141_v1  ;;  %1404 = vst.msk [vmem:[#allocation2] sm:$0xff] (!%p489_p2), %vm580_vm1, %v2141_v1  ;;  %1405 = vst.msk [vmem:[#allocation2 + $0x8] sm:$0xff] (!%p489_p2), %vm580_vm1, %v2141_v1  ;;  %s2528_s18 = sld [smem:[#allocation3_spill]] (!%p489_p2)  ;;  %v2081_v26 = vld [vmem:[%s2516_s6] sm:$0xff] (!%p489_p2)   ;;  %v2082_v28 = vld [vmem:[%s2516_s6 + $0x8] sm:$0xff] (!%p489_p2)  }
   0x8   : > { %1951 = vmatpush3.bf16.msra.mxu1 (!%p489_p2), %v2079_v0  ;;  %1406 = vst.msk [vmem:[#allocation2 + $0x10] sm:$0xff] (!%p489_p2), %vm580_vm1, %v2141_v1  ;;  %v683_v29 = vshrl.u32 (!%p489_p2), %v682_v27, 7  ;;  %v625_v30 = vld [vmem:[%s2515_s5] sm:$0x1] (!%p489_p2)  ;;  %s2143_s29 = smov (!%p489_p2), 96   ;;  %vm787_vm2 = vcmask (!%p489_p2), 130048  }
   0x9   : > { %1952 = vmatprep.subr.bf16.mxu1 (!%p489_p2), %v2141_v1  ;;  %vm860_vm3 = vcmask (!%p489_p2), 195584   ;;  %s2145_s20 = smov (!%p489_p2), 80   ;;  %s2146_s23 = smov (!%p489_p2), 112   ;;  %vm904_vm4 = vcmask (!%p489_p2), 1043456   ;;  %vm1407_vm5 = vcmask (!%p489_p2), 254976   ;;  %vm1694_vm6 = vcmask (!%p489_p2), 523264  }
   0xa   : > { %v2302_v31 = vsub.s32 (!%p489_p2), 0, %v683_v29  ;;  %s2147_s24 = smov (!%p489_p2), 48   ;;  %1408 = vst.msk [vmem:[#allocation2 + $0x18] sm:$0x3] (!%p489_p2), %vm1407_vm5, %v2141_v1 }
   0xc   : > { %1953 = vmatpush3.bf16.msra.mxu1 (!%p489_p2), %v2080_v2  ;;  %v1854_v2 = vld [vmem:[%s2517_s7] ss:$0 sm:$0xff] (!%p489_p2) }
   0xd   : > { %1958 = vmatprep.subr.bf16.mxu1 (!%p489_p2), %v2081_v26 }
   0xe   : > { %s2530_s22 = smov (!%p549_p3, %s1843_s22), 1 }
   0xf   : > { %s2261_s27 = smul.u32 24, %s2530_s22  ;;  %s556_s30 = scalar_lea.vmem %s2511_s1, %s2530_s22 }
  0x10   : > { %v574_v3 = vld [vmem:[%s556_s30] sm:$0x1] }
  0x11   : > { %s553_s19 = scalar_lea.vmem %s2528_s18, %s2261_s27  ;;  %v2271_v4 = vpack.c.bf16 %v574_v3, %v574_v3  ;;  %s564_s18 = scalar_lea.vmem %s2513_s3, %s2261_s27 }
  0x12   : > { %v2273_v5 = vld [vmem:[%s553_s19] sm:$0xff]  ;;  %v2275_v6 = vld [vmem:[%s553_s19 + $0x10] sm:$0xff]  ;;  %v2277_v7 = vld [vmem:[%s553_s19 + $0x8] sm:$0xff]  ;;  %s559_s19 = scalar_lea.vmem %s2512_s2, %s2530_s22  ;;  %s2144_s22 = smov 64  }
  0x13   : > { %v581_v8 = vsel %vm580_vm1, %v2273_v5, 0.0  ;;  %1955 = vmatmul.mubr.msk.bf16.vlgmr.msra.gmra.mrb[0].mxu1 %vm580_vm1, %v2271_v4  ;;  %v587_v9 = vsel %vm580_vm1, %v2275_v6, 0.0  ;;  %v584_v10 = vsel %vm580_vm1, %v2277_v7, 0.0  ;;  %s569_s30 = scalar_lea.vmem %s2526_s16, %s2261_s27 }
  0x14   : > { %582 = vadd.xlane.f32.xlu0 %v581_v8  ;;  %588 = vadd.xlane.f32.xlu1 %v587_v9 }
  0x15   : > { %1959 = vmatpush3.bf16.msra.mxu1 %v2081_v26 }
  0x16   : > { %1960 = vmatprep.subr.bf16.mxu1 %v2082_v28 }
  0x18   : > { %585 = vadd.xlane.f32.xlu0 %v584_v10 }
  0x19   : > { %1961 = vmatpush3.bf16.msra.mxu1 %v2082_v28 }
  0xa1   : > { %v583_v11 = vpop.xlane.xlu0 %582  ;;  %v589_v12 = vpop.xlane.xlu1 %588 }
  0xa2   : > { %v591_v13 = vmul.f32 0.03125, %v583_v11  ;;  %v593_v14 = vmul.f32 0.03125, %v589_v12 }
  0xa4   : > { %v594_v15 = vsub.f32 %v2273_v5, %v591_v13  ;;  %v596_v16 = vsub.f32 %v2275_v6, %v593_v14 }
  0xa5   : > { %v586_v17 = vpop.xlane.xlu0 %585 }
  0xa6   : > { %v592_v18 = vmul.f32 0.03125, %v586_v17  ;;  %v597_v19 = vmul.f32 %v594_v15, %v594_v15  ;;  %v599_v20 = vmul.f32 %v596_v16, %v596_v16 }
  0xa8   : > { %v595_v21 = vsub.f32 %v2277_v7, %v592_v18  ;;  %v600_v22 = vsel %vm580_vm1, %v597_v19, 0.0  ;;  %v606_v23 = vsel %vm580_vm1, %v599_v20, 0.0  ;;  %v2332_v20 = vld [vmem:[%s559_s19] ss:$0 sm:$0xff] }
  0xa9   : > { %601 = vadd.xlane.f32.xlu1 %v600_v22 }
  0xaa   : > { %v598_v24 = vmul.f32 %v595_v21, %v595_v21 }
  0xac   : > { %v603_v25 = vsel %vm580_vm1, %v598_v24, 0.0 }
  0xad   : > { %607 = vadd.xlane.f32.xlu1 %v606_v23  ;;  %604 = vadd.xlane.f32.xlu0 %v603_v25 }
  0xe6   : > { %v675_v32 = vpop.f32.mrb[0].mxu1 }
  0xe7   : > { %v676_v33 = vadd.f32 %v675_v32, %v625_v30  ;;  %v1956_v34 = vpop.f32.mrb[1].mxu1 }
  0xe8   : > { %v678_v35 = vpop.f32.mrb[2].mxu1 }
  0xe9   : > { %v692_v36 = vrot.slane %v676_v33, %v2302_v31  ;;  %v1957_v37 = vpop.f32.mrb[3].mxu1  ;;  %v681_v50 = vadd.f32 1.0, %v676_v33 }
  0xeb   : > { %694 = vrot.lane.b32.xlu0 %v692_v36, %s2143_s29  ;;  %v685_v54 = vrot.slane %v681_v50, %v2302_v31 }
 0x136   : > { %v602_v38 = vpop.xlane.xlu1 %601 }
 0x137   : > { %v609_v41 = vmul.f32 0.03125, %v602_v38 }
 0x139   : > { %v612_v44 = vadd.f32 1e-05, %v609_v41 }
 0x13a   : > { %v608_v39 = vpop.xlane.xlu1 %607  ;;  %v605_v40 = vpop.xlane.xlu0 %604 }
 0x13b   : > { %v611_v42 = vmul.f32 0.03125, %v608_v39  ;;  %v610_v43 = vmul.f32 0.03125, %v605_v40  ;;  %2097 = vrsqrt.f32 %v612_v44 }
 0x13d   : > { %v614_v45 = vadd.f32 1e-05, %v611_v42  ;;  %v613_v46 = vadd.f32 1e-05, %v610_v43 }
 0x13f   : > { %2099 = vrsqrt.f32 %v614_v45 }
 0x140   : > { %2101 = vrsqrt.f32 %v613_v46 }
 0x145   : > { %v2098_v47 = vpop.eup %2097 }
 0x146   : > { %v618_v51 = vmul.f32 %v2098_v47, %v594_v15 }
 0x148   : > { %v686_v55 = vmul.f32 %v685_v54, %v618_v51 }
 0x149   : > { %v2100_v48 = vpop.eup %2099 }
 0x14a   : > { %v2102_v49 = vpop.eup %2101  ;;  %v620_v53 = vmul.f32 %v2100_v48, %v596_v16 }
 0x14b   : > { %v619_v52 = vmul.f32 %v2102_v49, %v595_v21 }
 0x14c   : > { %v688_v57 = vmul.f32 %v685_v54, %v620_v53 }
 0x14d   : > { %v687_v56 = vmul.f32 %v685_v54, %v619_v52 }
 0x15d   : > { %v695_v58 = vpop.permute.xlu0 %694 }
 0x15e   : > { %v697_v59 = vadd.f32 %v695_v58, %v686_v55  ;;  %v698_v60 = vadd.f32 %v695_v58, %v687_v56  ;;  %v699_v61 = vadd.f32 %v695_v58, %v688_v57 }
 0x160   : > { %v700_v62 = vpack.c.bf16 %v698_v60, %v697_v59  ;;  %v701_v63 = vpack.c.bf16 %v699_v61, %v699_v61 }
 0x162   : > { %1962 = vmatprep.mubr.msk.bf16.mxu1 %vm580_vm1, %v700_v62 }
 0x163   : > { %1963 = vmatmul.mubr.msk.bf16.vlgmr.msra.gmra.mrb[4].mxu1 %vm580_vm1, %v701_v63 }
 0x236   : > { %v1964_v0 = vpop.f32.mrb[4].mxu1 }
 0x237   : > { %v765_v3 = vpop.f32.mrb[5].mxu1  ;;  %v774_v12 = vadd.f32 %v1964_v0, %v1854_v2 }
 0x238   : > { %v1965_v8 = vpop.f32.mrb[6].mxu1  ;;  %v766_v10 = vadd.f32 %v1854_v2, %v765_v3 }
 0x239   : > { %v768_v9 = vpop.f32.mrb[7].mxu1  ;;  %v2318_v14 = vpack.c.bf16 %v774_v12, %v774_v12 }
 0x23a   : > { %v769_v11 = vadd.f32 %v1854_v2, %v768_v9 }
 0x23c   : > { %v2312_v13 = vpack.c.bf16 %v769_v11, %v766_v10 }
 0x23e   : > { %783 = vrot.lane.b32.xlu1 %v2312_v13, %s2143_s29  ;;  %1970 = vmatprep.mubr.msk.bf16.mxu0 %vm787_vm2, %v2312_v13 }
 0x242   : > { %785 = vrot.lane.b32.xlu1 %v2318_v14, %s2143_s29 }
 0x2b0   : > { %v784_v15 = vpop.permute.xlu1 %783 }
 0x2b1   : > { %2054 = vmatprep.subr.msk.bf16.mxu0 %vm787_vm2, %v784_v15  ;;  %v795_v16 = vsel %vm787_vm2, %v784_v15, 0 }
 0x2b2   : > { %1967 = vmatpush3.bf16.xpose.msra.mxu0 %v795_v16 }
 0x2b4   : > { %v786_v17 = vpop.permute.xlu1 %785 }
 0x2b5   : > { %2055 = vmatprep.subr.msk.bf16.mxu0 %vm787_vm2, %v786_v17  ;;  %v798_v18 = vsel %vm787_vm2, %v786_v17, 0 }
 0x2ba   : > { %1969 = vmatpush3.bf16.xpose.msra.mxu0 %v798_v18 }
 0x2c1   : > { %1971 = vmatmul.mubr.msk.bf16.vlgmr.msra.gmra.mrb[0].mxu0 %vm787_vm2, %v2318_v14 }
 0x394   : > { %v1972_v19 = vpop.f32.mrb[0].mxu0 }
 0x395   : > { %v850_v21 = vmul.f32 0.25, %v1972_v19  ;;  %v834_v22 = vpop.f32.mrb[1].mxu0 }
 0x396   : > { %v848_v23 = vmul.f32 0.25, %v834_v22  ;;  %v1973_v24 = vpop.f32.mrb[2].mxu0 }
 0x397   : > { %v837_v25 = vpop.f32.mrb[3].mxu0  ;;  %v859_v26 = vadd.f32 %v2332_v20, %v850_v21 }
 0x398   : > { %v849_v27 = vmul.f32 0.25, %v837_v25  ;;  %v857_v28 = vadd.f32 %v2332_v20, %v848_v23 }
 0x399   : > { %v867_v29 = vsel %vm860_vm3, %v859_v26, -inf }
 0x39a   : > { %868 = vmax.xlane.f32.xlu0 %v867_v29  ;;  %v861_v30 = vsel %vm860_vm3, %v857_v28, -inf  ;;  %v858_v32 = vadd.f32 %v2332_v20, %v849_v27 }
 0x39b   : > { %862 = vmax.xlane.f32.xlu1 %v861_v30 }
 0x39c   : > { %v864_v33 = vsel %vm860_vm3, %v858_v32, -inf }
 0x39e   : > { %865 = vmax.xlane.f32.xlu0 %v864_v33 }
 0x3ac   : > { %895 = vrot.lane.b32.xlu1 %v2318_v14, %s2144_s22 }
 0x3b0   : > { %967 = vrot.lane.b32.xlu1 %v2312_v13, %s2145_s20 }
 0x3b4   : > { %969 = vrot.lane.b32.xlu1 %v2318_v14, %s2145_s20  ;;  %893 = vrot.lane.b32.xlu0 %v2312_v13, %s2144_s22 }
 0x3b8   : > { %965 = vrot.lane.b32.xlu1 %v2318_v14, %s2146_s23  ;;  %963 = vrot.lane.b32.xlu0 %v2312_v13, %s2146_s23 }
 0x427   : > { %v869_v34 = vpop.xlane.xlu0 %868 }
 0x428   : > { %v872_v35 = vsub.f32 %v859_v26, %v869_v34  ;;  %v863_v36 = vpop.xlane.xlu1 %862 }
 0x429   : > { %v870_v37 = vsub.f32 %v857_v28, %v863_v36 }
 0x42a   : > { %v877_v38 = vmul.f32 1.442695, %v872_v35 }
 0x42b   : > { %v873_v39 = vmul.f32 1.442695, %v870_v37  ;;  %v866_v40 = vpop.xlane.xlu0 %865 }
 0x42c   : > { %v871_v41 = vsub.f32 %v858_v32, %v866_v40  ;;  %2103 = vpow2.f32 %v877_v38  ;;  %v896_v43 = vpop.permute.xlu1 %895 }
 0x42d   : > { %2105 = vpow2.f32 %v873_v39  ;;  %v906_v45 = vsel %vm904_vm4, %v896_v43, 0 }
 0x42e   : > { %v875_v42 = vmul.f32 1.442695, %v871_v41 }
 0x42f   : > { %v894_v44 = vpop.permute.xlu0 %893 }
 0x430   : > { %2107 = vpow2.f32 %v875_v42  ;;  %1974 = vmatprep.subr.bf16.mxu1 %v894_v44  ;;  %v968_v46 = vpop.permute.xlu1 %967 }
 0x431   : > { %1975 = vmatpush3.bf16.msra.mxu1 %v894_v44  ;;  %v978_v52 = vsel %vm787_vm2, %v968_v46, 0 }
 0x432   : > { %2056 = vmatprep.subr.msk.bf16.mxu1 %vm904_vm4, %v896_v43 }
 0x433   : > { %v964_v53 = vpop.permute.xlu0 %963 }
 0x434   : > { %v970_v54 = vpop.permute.xlu1 %969 }
 0x435   : > { %1977 = vmatpush3.bf16.msra.mxu1 %v906_v45  ;;  %v981_v55 = vsel %vm787_vm2, %v970_v54, 0 }
 0x436   : > { %2057 = vmatprep.subr.msk.bf16.mxu1 %vm787_vm2, %v968_v46  ;;  %v2104_v47 = vpop.eup %2103 }
 0x437   : > { %v2106_v48 = vpop.eup %2105  ;;  %v892_v51 = vpack.c.bf16 %v2104_v47, %v2104_v47  ;;  %v885_v19 = vsel %vm860_vm3, %v2104_v47, 0.0 }
 0x438   : > { %v966_v56 = vpop.permute.xlu1 %965  ;;  %v879_v17 = vsel %vm860_vm3, %v2106_v48, 0.0 }
 0x43a   : > { %v2108_v49 = vpop.eup %2107 }
 0x43b   : > { %v891_v50 = vpack.c.bf16 %v2108_v49, %v2106_v48  ;;  %v882_v18 = vsel %vm860_vm3, %v2108_v49, 0.0 }
 0x43d   : > { %1978 = vmatprep.mubr.msk.bf16.mxu1 %vm860_vm3, %v891_v50 }
 0x43e   : > { %1979 = vmatmul.mubr.msk.bf16.vlgmr.msra.gmra.mrb[8].mxu1 %vm860_vm3, %v892_v51  ;;  %v2084_v51 = vld [vmem:[%s2518_s8 + $0x8] sm:$0xff]  }
 0x43f   : > { %1983 = vmatpush3.bf16.xpose.msra.mxu1 %v978_v52  ;;  %1986 = vmatprep.mubr.msk.bf16.mxu1 %vm787_vm2, %v964_v53  ;;  %v2148_v52 = vmov 0   ;;  %v577_v53 = vld [vmem:[%s564_s18] sm:$0xff] }
 0x440   : > { %2058 = vmatprep.subr.msk.bf16.mxu1 %vm787_vm2, %v970_v54  ;;  %2077 = vset.pattern.permute.xlu1 %v2148_v52  ;;  %v578_v54 = vld [vmem:[%s564_s18 + $0x8] sm:$0xff] }
 0x441   : > { %2078 = vset.pattern.permute.xlu0 %v2148_v52 }
 0x447   : > { %1985 = vmatpush3.bf16.xpose.msra.mxu1 %v981_v55  ;;  %v579_v55 = vld [vmem:[%s564_s18 + $0x10] sm:$0xff] }
 0x44e   : > { %1987 = vmatmul.mubr.msk.bf16.vlgmr.msra.gmra.mrb[12].mxu1 %vm787_vm2, %v966_v56 }
 0x511   : > { %v2356_v57 = vpop.f32.mrb[8].mxu1 }
 0x512   : > { %v2358_v58 = vpop.f32.mrb[9].mxu1 }
 0x513   : > { %v1981_v59 = vpop.f32.mrb[10].mxu1 }
 0x514   : > { %v2360_v60 = vpop.f32.mrb[11].mxu1 }
 0x521   : > { %v1988_v61 = vpop.f32.mrb[12].mxu1 }
 0x522   : > { %v1033_v62 = vmul.f32 0.25, %v1988_v61  ;;  %v1017_v63 = vpop.f32.mrb[13].mxu1 }
 0x523   : > { %v1031_v0 = vmul.f32 0.25, %v1017_v63  ;;  %v1989_v2 = vpop.f32.mrb[14].mxu1 }
 0x524   : > { %v1020_v3 = vpop.f32.mrb[15].mxu1  ;;  %v1036_v8 = vadd.f32 %v2332_v20, %v1033_v62 }
 0x525   : > { %v1032_v9 = vmul.f32 0.25, %v1020_v3  ;;  %v1034_v11 = vadd.f32 %v2332_v20, %v1031_v0 }
 0x526   : > { %v1043_v10 = vsel %vm860_vm3, %v1036_v8, -inf }
 0x527   : > { %1044 = vmax.xlane.f32.xlu0 %v1043_v10  ;;  %v1035_v12 = vadd.f32 %v2332_v20, %v1032_v9  ;;  %v1037_v16 = vsel %vm860_vm3, %v1034_v11, -inf  ;;  %v2083_v20 = vld [vmem:[%s2518_s8] sm:$0xff]  }
 0x528   : > { %2004 = vmatprep.subr.bf16.mxu1 %v2083_v20 }
 0x529   : > { %v1040_v15 = vsel %vm860_vm3, %v1035_v12, -inf  ;;  %2005 = vmatpush3.bf16.msra.mxu1 %v2083_v20 }
 0x52a   : > { %1041 = vmax.xlane.f32.xlu1 %v1040_v15  ;;  %v2086_v15 = vld [vmem:[%s2520_s10 + $0x8] sm:$0xff]  }
 0x52b   : > { %1038 = vmax.xlane.f32.xlu0 %v1037_v16 }
 0x53b   : > { %1071 = vrot.lane.b32.xlu1 %v2318_v14, %s2147_s24 }
 0x541   : > { %1069 = vrot.lane.b32.xlu0 %v2312_v13, %s2147_s24 }
 0x55f   : > { %880 = vadd.xlane.f32.xlu1 %v879_v17 }
 0x560   : > { %883 = vadd.xlane.f32.xlu0 %v882_v18 }
 0x563   : > { %886 = vadd.xlane.f32.xlu1 %v885_v19 }
 0x574   : > { %1273 = vperm.xlu1 %2077, %v577_v53  }
 0x578   : > { %1283 = vperm.xlu1 %2077, %v579_v55  }
 0x5b4   : > { %v1045_v21 = vpop.xlane.xlu0 %1044 }
 0x5b5   : > { %v1048_v22 = vsub.f32 %v1036_v8, %v1045_v21 }
 0x5b7   : > { %v1053_v14 = vmul.f32 1.442695, %v1048_v22  ;;  %v1042_v23 = vpop.xlane.xlu1 %1041 }
 0x5b8   : > { %v1047_v13 = vsub.f32 %v1035_v12, %v1042_v23  ;;  %v1039_v24 = vpop.xlane.xlu0 %1038 }
 0x5b9   : > { %v1046_v25 = vsub.f32 %v1034_v11, %v1039_v24  ;;  %2109 = vpow2.f32 %v1053_v14  ;;  %v2085_v11 = vld [vmem:[%s2520_s10] sm:$0xff]  }
 0x5ba   : > { %v1051_v26 = vmul.f32 1.442695, %v1047_v13 }
 0x5bb   : > { %v1049_v27 = vmul.f32 1.442695, %v1046_v25  ;;  %v1072_v29 = vpop.permute.xlu1 %1071  ;;  %v1874_v25 = vld [vmem:[%s2519_s9] ss:$0 sm:$0xff] }
 0x5bc   : > { %2111 = vpow2.f32 %v1051_v26  ;;  %v1070_v28 = vpop.permute.xlu0 %1069  ;;  %v1081_v30 = vsel %vm904_vm4, %v1072_v29, 0 }
 0x5bd   : > { %2113 = vpow2.f32 %v1049_v27  ;;  %1990 = vmatprep.subr.bf16.mxu0 %v1070_v28 }
 0x5be   : > { %1991 = vmatpush3.bf16.msra.mxu0 %v1070_v28 }
 0x5bf   : > { %2059 = vmatprep.subr.msk.bf16.mxu0 %vm904_vm4, %v1072_v29 }
 0x5c2   : > { %1993 = vmatpush3.bf16.msra.mxu0 %v1081_v30 }
 0x5c3   : > { %v2110_v32 = vpop.eup %2109  ;;  %1998 = vmatprep.subr.bf16.mxu0 %v2084_v51 }
 0x5c4   : > { %v1068_v37 = vpack.c.bf16 %v2110_v32, %v2110_v32  ;;  %v1061_v39 = vsel %vm860_vm3, %v2110_v32, 0.0 }
 0x5c6   : > { %v2112_v33 = vpop.eup %2111 }
 0x5c7   : > { %v2114_v34 = vpop.eup %2113  ;;  %v1058_v38 = vsel %vm860_vm3, %v2112_v33, 0.0 }
 0x5c8   : > { %v1055_v35 = vsel %vm860_vm3, %v2114_v34, 0.0  ;;  %v1067_v36 = vpack.c.bf16 %v2112_v33, %v2114_v34 }
 0x5c9   : > { %1056 = vadd.xlane.f32.xlu0 %v1055_v35 }
 0x5ca   : > { %1994 = vmatprep.mubr.msk.bf16.mxu0 %vm860_vm3, %v1067_v36 }
 0x5cb   : > { %1995 = vmatmul.mubr.msk.bf16.vlgmr.msra.gmra.mrb[4].mxu0 %vm860_vm3, %v1068_v37 }
 0x5cc   : > { %1999 = vmatpush3.bf16.msra.mxu0 %v2084_v51 }
 0x5cd   : > { %1059 = vadd.xlane.f32.xlu0 %v1058_v38  ;;  %2010 = vmatprep.subr.bf16.mxu0 %v2141_v1 }
 0x5d1   : > { %1062 = vadd.xlane.f32.xlu0 %v1061_v39 }
 0x5e7   : > { %1278 = vperm.xlu0 %2078, %v578_v54  }
 0x5ec   : > { %v881_v40 = vpop.xlane.xlu1 %880 }
 0x5ed   : > { %2115 = vrcp.f32 %v881_v40  ;;  %v884_v41 = vpop.xlane.xlu0 %883 }
 0x5ee   : > { %2117 = vrcp.f32 %v884_v41 }
 0x5f0   : > { %v887_v42 = vpop.xlane.xlu1 %886 }
 0x5f1   : > { %2119 = vrcp.f32 %v887_v42 }
 0x5f4   : > { %v2409_v14 = vpop.permute.xlu1 %1273 }
 0x5f7   : > { %v2116_v43 = vpop.eup %2115 }
 0x5f8   : > { %v2118_v44 = vpop.eup %2117  ;;  %v956_v45 = vmul.f32 %v2116_v43, %v2358_v58  ;;  %v2417_v32 = vpop.permute.xlu1 %1283 }
 0x5f9   : > { %v957_v46 = vmul.f32 %v2118_v44, %v2360_v60 }
 0x5fb   : > { %v2120_v47 = vpop.eup %2119  ;;  %v959_v48 = vpack.c.bf16 %v957_v46, %v956_v45 }
 0x5fc   : > { %v958_v49 = vmul.f32 %v2120_v47, %v2356_v57 }
 0x5fd   : > { %2006 = vmatprep.mubr.msk.bf16.mxu1 %vm787_vm2, %v959_v48 }
 0x5fe   : > { %v960_v50 = vpack.c.bf16 %v958_v49, %v958_v49 }
 0x600   : > { %2007 = vmatmul.mubr.msk.bf16.vlgmr.msra.gmra.mrb[16].mxu1 %vm787_vm2, %v960_v50 }
 0x656   : > { %v1057_v56 = vpop.xlane.xlu0 %1056 }
 0x657   : > { %2121 = vrcp.f32 %v1057_v56 }
 0x65a   : > { %v1060_v57 = vpop.xlane.xlu0 %1059 }
 0x65e   : > { %v1063_v58 = vpop.xlane.xlu0 %1062 }
 0x65f   : > { %2123 = vrcp.f32 %v1063_v58 }
 0x660   : > { %2125 = vrcp.f32 %v1060_v57  ;;  %v1332_v57 = vld [vmem:[%s2521_s11] sm:$0x1] }
 0x661   : > { %v2122_v60 = vpop.eup %2121 }
 0x666   : > { %v2419_v33 = vpop.permute.xlu0 %1278 }
 0x669   : > { %v2124_v62 = vpop.eup %2123 }
 0x66a   : > { %v2126_v0 = vpop.eup %2125 }
 0x69e   : > { %v1996_v59 = vpop.f32.mrb[4].mxu0 }
 0x69f   : > { %v1117_v61 = vpop.f32.mrb[5].mxu0  ;;  %v1133_v2 = vmul.f32 %v2124_v62, %v1996_v59  ;;  %v2089_v62 = vld [vmem:[%s2522_s12 + $0x18] sm:$0xff]  }
 0x6a0   : > { %v1997_v63 = vpop.f32.mrb[6].mxu0  ;;  %v1131_v8 = vmul.f32 %v2122_v60, %v1117_v61  ;;  %v2087_v60 = vld [vmem:[%s2522_s12 + $0x10] sm:$0xff]   ;;  %v2088_v61 = vld [vmem:[%s2522_s12] sm:$0xff]  }
 0x6a1   : > { %v1120_v3 = vpop.f32.mrb[7].mxu0  ;;  %v1135_v12 = vpack.c.bf16 %v1133_v2, %v1133_v2  ;;  %v2090_v63 = vld [vmem:[%s2522_s12 + $0x8] sm:$0xff]   ;;  %2018 = vmatprep.subr.bf16.mxu1 %v2087_v60 }
 0x6a2   : > { %v1132_v9 = vmul.f32 %v2126_v0, %v1120_v3  ;;  %2019 = vmatpush3.bf16.msra.mxu1 %v2087_v60 }
 0x6a3   : > { %2020 = vmatprep.subr.bf16.mxu1 %v2089_v62 }
 0x6a4   : > { %v1134_v10 = vpack.c.bf16 %v1132_v9, %v1131_v8 }
 0x6a6   : > { %2000 = vmatprep.mubr.msk.bf16.mxu0 %vm787_vm2, %v1134_v10  ;;  %2021 = vmatpush3.bf16.msra.mxu1 %v2089_v62 }
 0x6a7   : > { %2001 = vmatmul.mubr.msk.bf16.vlgmr.msra.gmra.mrb[8].mxu0 %vm787_vm2, %v1135_v12 }
 0x6a8   : > { %2011 = vmatpush3.bf16.msra.mxu0 %v2085_v11  ;;  %2014 = vmatprep.mubr.msk.bf16.mxu0 %vm2142_vm0, %v2141_v1 }
 0x6a9   : > { %2012 = vmatprep.subr.bf16.mxu0 %v2141_v1  ;;  %v2091_v1 = vld [vmem:[%s2522_s12 + $0x20] sm:$0xff]  }
 0x6aa   : > { %2034 = vmatprep.subr.bf16.mxu1 %v2091_v1 }
 0x6ac   : > { %2013 = vmatpush3.bf16.msra.mxu0 %v2086_v15 }
 0x6ad   : > { %2026 = vmatprep.subr.bf16.mxu0 %v2088_v61 }
 0x6af   : > { %2015 = vmatmul.mubr.msk.bf16.vlgmr.msra.gmra.mrb[12].mxu0 %vm580_vm1, %v2271_v4 }
 0x6b0   : > { %2027 = vmatpush3.bf16.msra.mxu0 %v2088_v61 }
 0x6b1   : > { %2028 = vmatprep.subr.bf16.mxu0 %v2090_v63 }
 0x6b4   : > { %2029 = vmatpush3.bf16.msra.mxu0 %v2090_v63  ;;  %v1890_v63 = vld [vmem:[%s2523_s13] ss:$0 sm:$0xff] }
 0x6d3   : > { %v2008_v16 = vpop.f32.mrb[16].mxu1 }
 0x6d4   : > { %v1244_v17 = vpop.f32.mrb[17].mxu1 }
 0x6d5   : > { %v2009_v18 = vpop.f32.mrb[18].mxu1 }
 0x6d6   : > { %v1247_v19 = vpop.f32.mrb[19].mxu1 }
 0x77a   : > { %v2002_v20 = vpop.f32.mrb[8].mxu0 }
 0x77b   : > { %v1253_v21 = vadd.f32 %v2008_v16, %v2002_v20  ;;  %v1184_v22 = vpop.f32.mrb[9].mxu0 }
 0x77c   : > { %v1245_v23 = vadd.f32 %v1244_v17, %v1184_v22  ;;  %v2003_v13 = vpop.f32.mrb[10].mxu0 }
 0x77d   : > { %v1260_v24 = vadd.f32 %v1253_v21, %v2275_v6  ;;  %v1187_v26 = vpop.f32.mrb[11].mxu0 }
 0x77e   : > { %v1258_v4 = vadd.f32 %v1245_v23, %v2273_v5  ;;  %v1248_v27 = vadd.f32 %v1247_v19, %v1187_v26 }
 0x77f   : > { %v1270_v30 = vadd.f32 %v1874_v25, %v1260_v24 }
 0x780   : > { %v1268_v28 = vadd.f32 %v1874_v25, %v1258_v4  ;;  %v1259_v29 = vadd.f32 %v1248_v27, %v2277_v7 }
 0x781   : > { %v2425_v35 = vmul.f32 %v2417_v32, %v1270_v30 }
 0x782   : > { %v2422_v34 = vmul.f32 %v2409_v14, %v1268_v28  ;;  %v1269_v6 = vadd.f32 %v1874_v25, %v1259_v29  ;;  %v1379_v38 = vpop.f32.mrb[12].mxu0 }
 0x783   : > { %v1295_v37 = vsel %vm580_vm1, %v2425_v35, 0.0  ;;  %v2016_v39 = vpop.f32.mrb[13].mxu0  ;;  %v1380_v58 = vadd.f32 %v1379_v38, %v1332_v57 }
 0x784   : > { %v2428_v36 = vmul.f32 %v2419_v33, %v1269_v6  ;;  %v1289_v5 = vsel %vm580_vm1, %v2422_v34, 0.0  ;;  %v1382_v40 = vpop.f32.mrb[14].mxu0 }
 0x785   : > { %1290 = vadd.xlane.f32.xlu1 %v1289_v5  ;;  %v2017_v41 = vpop.f32.mrb[15].mxu0  ;;  %v1396_v59 = vrot.slane %v1380_v58, %v2302_v31  ;;  %v1385_v16 = vadd.f32 1.0, %v1380_v58 }
 0x786   : > { %v1292_v7 = vsel %vm580_vm1, %v2428_v36, 0.0 }
 0x787   : > { %1293 = vadd.xlane.f32.xlu0 %v1292_v7  ;;  %v1389_v18 = vrot.slane %v1385_v16, %v2302_v31 }
 0x789   : > { %1296 = vadd.xlane.f32.xlu1 %v1295_v37 }
 0x812   : > { %v1291_v42 = vpop.xlane.xlu1 %1290 }
 0x813   : > { %v1298_v43 = vmul.f32 0.03125, %v1291_v42 }
 0x814   : > { %v1294_v44 = vpop.xlane.xlu0 %1293 }
 0x815   : > { %v1301_v47 = vsub.f32 %v2422_v34, %v1298_v43  ;;  %v1299_v48 = vmul.f32 0.03125, %v1294_v44  ;;  %v2092_v43 = vld [vmem:[%s2522_s12 + $0x28] sm:$0xff]  }
 0x816   : > { %v1297_v45 = vpop.xlane.xlu1 %1296 }
 0x817   : > { %v1300_v46 = vmul.f32 0.03125, %v1297_v45  ;;  %v1302_v51 = vsub.f32 %v2428_v36, %v1299_v48  ;;  %v1304_v53 = vmul.f32 %v1301_v47, %v1301_v47  ;;  %v2094_v48 = vld [vmem:[%s2524_s14 + $0x8] sm:$0xff]  }
 0x819   : > { %v1303_v49 = vsub.f32 %v2425_v35, %v1300_v46  ;;  %v1307_v54 = vsel %vm580_vm1, %v1304_v53, 0.0  ;;  %v1305_v55 = vmul.f32 %v1302_v51, %v1302_v51 }
 0x81b   : > { %v1306_v50 = vmul.f32 %v1303_v49, %v1303_v49  ;;  %v1310_v56 = vsel %vm580_vm1, %v1305_v55, 0.0 }
 0x81d   : > { %v1313_v52 = vsel %vm580_vm1, %v1306_v50, 0.0  ;;  %v2096_v50 = vld [vmem:[%s2524_s14 + $0x18] sm:$0xff]  }
 0x81e   : > { %1314 = vadd.xlane.f32.xlu1 %v1313_v52 }
 0x822   : > { %1308 = vadd.xlane.f32.xlu1 %v1307_v54 }
 0x826   : > { %1311 = vadd.xlane.f32.xlu1 %v1310_v56 }
 0x837   : > { %1398 = vrot.lane.b32.xlu1 %v1396_v59, %s2143_s29 }
 0x8ab   : > { %v1315_v0 = vpop.xlane.xlu1 %1314 }
 0x8ac   : > { %v1318_v2 = vmul.f32 0.03125, %v1315_v0 }
 0x8ae   : > { %v1321_v3 = vadd.f32 1e-05, %v1318_v2 }
 0x8af   : > { %v1309_v8 = vpop.xlane.xlu1 %1308 }
 0x8b0   : > { %2127 = vrsqrt.f32 %v1321_v3  ;;  %v1316_v9 = vmul.f32 0.03125, %v1309_v8 }
 0x8b2   : > { %v1319_v10 = vadd.f32 1e-05, %v1316_v9 }
 0x8b3   : > { %v1312_v11 = vpop.xlane.xlu1 %1311 }
 0x8b4   : > { %2129 = vrsqrt.f32 %v1319_v10  ;;  %v1317_v12 = vmul.f32 0.03125, %v1312_v11 }
 0x8b6   : > { %v1320_v15 = vadd.f32 1e-05, %v1317_v12 }
 0x8b7   : > { %v1399_v20 = vpop.permute.xlu1 %1398 }
 0x8b8   : > { %2131 = vrsqrt.f32 %v1320_v15 }
 0x8ba   : > { %v2128_v17 = vpop.eup %2127 }
 0x8bb   : > { %v1327_v19 = vmul.f32 %v2128_v17, %v1303_v49  ;;  %v2095_v49 = vld [vmem:[%s2524_s14 + $0x10] sm:$0xff]  }
 0x8bd   : > { %v1392_v21 = vmul.f32 %v1389_v18, %v1327_v19 }
 0x8be   : > { %v2130_v22 = vpop.eup %2129 }
 0x8bf   : > { %v1325_v23 = vmul.f32 %v2130_v22, %v1301_v47  ;;  %v1403_v13 = vadd.f32 %v1399_v20, %v1392_v21  ;;  %v2093_v47 = vld [vmem:[%s2524_s14] sm:$0xff]  }
 0x8c0   : > { %2042 = vmatprep.subr.bf16.mxu0 %v2093_v47 }
 0x8c1   : > { %v1390_v24 = vmul.f32 %v1389_v18, %v1325_v23  ;;  %1411 = vst.msk [vmem:[#allocation2 + $0x11] sm:$0xff] %vm580_vm1, %v1403_v13 }
 0x8c2   : > { %v2132_v25 = vpop.eup %2131 }
 0x8c3   : > { %v1326_v26 = vmul.f32 %v2132_v25, %v1302_v51  ;;  %v1401_v4 = vadd.f32 %v1399_v20, %v1390_v24 }
 0x8c5   : > { %v1391_v27 = vmul.f32 %v1389_v18, %v1326_v26  ;;  %1409 = vst.msk [vmem:[#allocation2 + $0x1] sm:$0xff] %vm580_vm1, %v1401_v4 }
 0x8c7   : > { %v1402_v28 = vadd.f32 %v1399_v20, %v1391_v27  ;;  %v1891_v20 = vld [vmem:[%s2525_s15] ss:$0 sm:$0xff] }
 0x8c8   : > { %v1423_v30 = vld [vmem:[#allocation2 + $0x11] sm:$0xff] }
 0x8c9   : > { %1410 = vst.msk [vmem:[#allocation2 + $0x9] sm:$0xff] %vm580_vm1, %v1402_v28  ;;  %v1425_v42 = vpack.c.bf16 %v1423_v30, %v1423_v30  ;;  %v1564_v45 = vld [vmem:[#allocation2 + $0x12] sm:$0xff] }
 0x8ca   : > { %v1566_v46 = vpack.c.bf16 %v1564_v45, %v1564_v45 }
 0x8cc   : > { %v1421_v29 = vld [vmem:[#allocation2 + $0x1] sm:$0xff] }
 0x8cd   : > { %v1412_v31 = vld [vmem:[#allocation2] sm:$0xff] }
 0x8d0   : > { %v1422_v6 = vld [vmem:[#allocation2 + $0x9] sm:$0xff] }
 0x8d1   : > { %v1413_v5 = vld [vmem:[#allocation2 + $0x8] sm:$0xff]  ;;  %v1414_v7 = vld [vmem:[#allocation2 + $0x10] sm:$0xff]  ;;  %v1424_v37 = vpack.c.bf16 %v1422_v6, %v1421_v29 }
 0x8d2   : > { %v1415_v38 = vpack.c.bf16 %v1413_v5, %v1412_v31  ;;  %v1416_v39 = vpack.c.bf16 %v1414_v7, %v1414_v7  ;;  %v1562_v40 = vld [vmem:[#allocation2 + $0x2] sm:$0xff]  ;;  %v1563_v41 = vld [vmem:[#allocation2 + $0xa] sm:$0xff] }
 0x8d3   : > { %2022 = vmatprep.mubr.msk.bf16.mxu1 %vm580_vm1, %v1424_v37  ;;  %v1565_v44 = vpack.c.bf16 %v1563_v41, %v1562_v40 }
 0x8d4   : > { %2030 = vmatprep.mubr.msk.bf16.mxu0 %vm580_vm1, %v1415_v38  ;;  %2023 = vmatmul.mubr.msk.bf16.vlgmr.msra.gmra.mrb[20].mxu1 %vm580_vm1, %v1425_v42 }
 0x8d5   : > { %2031 = vmatmul.mubr.msk.bf16.vlgmr.msra.gmra.mrb[16].mxu0 %vm580_vm1, %v1416_v39  ;;  %2035 = vmatpush3.bf16.msra.mxu1 %v2091_v1 }
 0x8d6   : > { %2038 = vmatprep.mubr.msk.bf16.mxu1 %vm580_vm1, %v1565_v44  ;;  %2036 = vmatprep.subr.bf16.mxu1 %v2092_v43 }
 0x8d7   : > { %2043 = vmatpush3.bf16.msra.mxu0 %v2093_v47 }
 0x8d8   : > { %2044 = vmatprep.subr.bf16.mxu0 %v2094_v48 }
 0x8d9   : > { %2037 = vmatpush3.bf16.msra.mxu1 %v2092_v43 }
 0x8db   : > { %2045 = vmatpush3.bf16.msra.mxu0 %v2094_v48 }
 0x8dc   : > { %2039 = vmatmul.mubr.msk.bf16.vlgmr.msra.gmra.mrb[24].mxu1 %vm580_vm1, %v1566_v46  ;;  %2046 = vmatprep.subr.bf16.mxu0 %v2095_v49 }
 0x8df   : > { %2047 = vmatpush3.bf16.msra.mxu0 %v2095_v49 }
 0x8e0   : > { %2048 = vmatprep.subr.bf16.mxu0 %v2096_v50 }
 0x8e3   : > { %2049 = vmatpush3.bf16.msra.mxu0 %v2096_v50 }
 0x9a7   : > { %v2024_v51 = vpop.f32.mrb[20].mxu1 }
 0x9a8   : > { %v2032_v52 = vpop.f32.mrb[16].mxu0  ;;  %v1482_v54 = vpop.f32.mrb[21].mxu1 }
 0x9a9   : > { %v1557_v53 = vadd.f32 %v2032_v52, %v2024_v51  ;;  %v1548_v55 = vpop.f32.mrb[17].mxu0  ;;  %v2025_v57 = vpop.f32.mrb[22].mxu1 }
 0x9aa   : > { %v1549_v56 = vadd.f32 %v1548_v55, %v1482_v54  ;;  %v2033_v58 = vpop.f32.mrb[18].mxu0  ;;  %v1485_v59 = vpop.f32.mrb[23].mxu1 }
 0x9ab   : > { %v1551_v60 = vpop.f32.mrb[19].mxu0 }
 0x9ac   : > { %v1552_v61 = vadd.f32 %v1551_v60, %v1485_v59 }
 0x9af   : > { %v2040_v62 = vpop.f32.mrb[24].mxu1 }
 0x9b0   : > { %v1639_v1 = vadd.f32 %v2040_v62, %v1557_v53  ;;  %v1623_v0 = vpop.f32.mrb[25].mxu1 }
 0x9b1   : > { %v1637_v2 = vadd.f32 %v1623_v0, %v1549_v56  ;;  %v2041_v3 = vpop.f32.mrb[26].mxu1 }
 0x9b2   : > { %v1649_v8 = vadd.f32 %v1890_v63, %v1639_v1  ;;  %v1626_v9 = vpop.f32.mrb[27].mxu1 }
 0x9b3   : > { %v1647_v10 = vadd.f32 %v1890_v63, %v1637_v2  ;;  %v1638_v11 = vadd.f32 %v1626_v9, %v1552_v61 }
 0x9b4   : > { %v1652_v15 = vmax.f32 %v1649_v8, 0.0 }
 0x9b5   : > { %v1648_v12 = vadd.f32 %v1890_v63, %v1638_v11  ;;  %v1650_v16 = vmax.f32 %v1647_v10, 0.0 }
 0x9b6   : > { %v1654_v19 = vpack.c.bf16 %v1652_v15, %v1652_v15 }
 0x9b7   : > { %v1651_v17 = vmax.f32 %v1648_v12, 0.0 }
 0x9b9   : > { %v1653_v18 = vpack.c.bf16 %v1651_v17, %v1650_v16 }
 0x9bb   : > { %2050 = vmatprep.mubr.msk.bf16.mxu0 %vm1694_vm6, %v1653_v18 }
 0x9bc   : > { %2051 = vmatmul.mubr.msk.bf16.vlgmr.msra.gmra.mrb[20].mxu0 %vm1694_vm6, %v1654_v19 }
 0xa8f   : > { %v2052_v21 = vpop.f32.mrb[20].mxu0 }
 0xa90   : > { %v1744_v22 = vadd.f32 %v2052_v21, %v1891_v20  ;;  %v1735_v23 = vpop.f32.mrb[21].mxu0 }
 0xa91   : > { %v1736_v13 = vadd.f32 %v1891_v20, %v1735_v23  ;;  %v2053_v24 = vpop.f32.mrb[22].mxu0 }
 0xa92   : > { %v1751_v25 = vadd.f32 %v1744_v22, %v2425_v35  ;;  %v1738_v26 = vpop.f32.mrb[23].mxu0 }
 0xa93   : > { %v1749_v4 = vadd.f32 %v1736_v13, %v2422_v34  ;;  %v1739_v27 = vadd.f32 %v1891_v20, %v1738_v26 }
 0xa94   : > { %v1754_v28 = vmul.f32 %v1751_v25, %v2417_v32 }
 0xa95   : > { %v1752_v29 = vmul.f32 %v1749_v4, %v2409_v14  ;;  %v1750_v31 = vadd.f32 %v1739_v27, %v2428_v36 }
 0xa96   : > { %1757 = vst.msk [vmem:[%s569_s30 + $0x10] sm:$0xff] %vm580_vm1, %v1754_v28 }
 0xa97   : > { %1755 = vst.msk [vmem:[%s569_s30] sm:$0xff] %vm580_vm1, %v1752_v29  ;;  %v1753_v35 = vmul.f32 %v1750_v31, %v2419_v33 }
 0xa99   : > { %1756 = vst.msk [vmem:[%s569_s30 + $0x8] sm:$0xff] %vm580_vm1, %v1753_v35 }
 0xa9a PF: > { %s26_s21 = sadd.s32 1, %s2139_s21  }
 0xa9b   : > { %p23_p4 = scmp.ge.s32.totalorder %s26_s21, 4  }
 0xa9d   :  { %25 = sbr.rel (!%p23_p4) target bundleno = 2 (0x2), region = 123 }

// kernel: prompt_tts_forward.12
= control target key start
LH: loop header
LB: loop body
LE: loop exit
PB: predicated region body
PF: predicated region fallthrough
CT: control target
= control target key end

     0   :  { %s4286_s0 = inlined_call_operand.vmem [shape: f32[2,24,32], index: 0, kind: input, shape index: {}]   ;;  %s4287_s1 = inlined_call_operand.vmem [shape: f32[2,24,1], index: 1, kind: input, shape index: {}]   ;;  %s4288_s2 = inlined_call_operand.vmem [shape: bf16[160,32], index: 2, kind: input, shape index: {}]   ;;  %s4289_s3 = inlined_call_operand.vmem [shape: f32[1,32], index: 3, kind: input, shape index: {}, may-alias: {3,5,7,9,11,13,15,17,19,21}]   ;;  %s4290_s4 = inlined_call_operand.vmem [shape: f32[1,32], index: 4, kind: input, shape index: {}, may-alias: {4,8,12,16,20}]   ;;  %s4291_s5 = inlined_call_operand.vmem [shape: f32[1,32], index: 5, kind: input, shape index: {}, may-alias: {3,5,7,9,11,13,15,17,19,21}]   ;;  %s4292_s6 = inlined_call_operand.vmem [shape: bf16[160,32], index: 6, kind: input, shape index: {}]   ;;  %s4293_s7 = inlined_call_operand.vmem [shape: f32[1,32], index: 7, kind: input, shape index: {}, may-alias: {3,5,7,9,11,13,15,17,19,21}]   ;;  %s4294_s8 = inlined_call_operand.vmem [shape: f32[1,32], index: 8, kind: input, shape index: {}, may-alias: {4,8,12,16,20}]   ;;  %s4295_s9 = inlined_call_operand.vmem [shape: f32[1,32], index: 9, kind: input, shape index: {}, may-alias: {3,5,7,9,11,13,15,17,19,21}]   ;;  %s4296_s10 = inlined_call_operand.vmem [shape: bf16[160,32], index: 10, kind: input, shape index: {}]   ;;  %s4297_s11 = inlined_call_operand.vmem [shape: f32[1,32], index: 11, kind: input, shape index: {}, may-alias: {3,5,7,9,11,13,15,17,19,21}]   ;;  %s4298_s12 = inlined_call_operand.vmem [shape: f32[1,32], index: 12, kind: input, shape index: {}, may-alias: {4,8,12,16,20}]   ;;  %s4299_s13 = inlined_call_operand.vmem [shape: f32[1,32], index: 13, kind: input, shape index: {}, may-alias: {3,5,7,9,11,13,15,17,19,21}]   ;;  %s4300_s14 = inlined_call_operand.vmem [shape: bf16[160,32], index: 14, kind: input, shape index: {}]   ;;  %s4301_s15 = inlined_call_operand.vmem [shape: f32[1,32], index: 15, kind: input, shape index: {}, may-alias: {3,5,7,9,11,13,15,17,19,21}]   ;;  %s4302_s16 = inlined_call_operand.vmem [shape: f32[1,32], index: 16, kind: input, shape index: {}, may-alias: {4,8,12,16,20}]   ;;  %s4303_s17 = inlined_call_operand.vmem [shape: f32[1,32], index: 17, kind: input, shape index: {}, may-alias: {3,5,7,9,11,13,15,17,19,21}]   ;;  %s4304_s18 = inlined_call_operand.vmem [shape: bf16[160,32], index: 18, kind: input, shape index: {}]   ;;  %s4305_s19 = inlined_call_operand.vmem [shape: f32[1,32], index: 19, kind: input, shape index: {}, may-alias: {3,5,7,9,11,13,15,17,19,21}]   ;;  %s4306_s20 = inlined_call_operand.vmem [shape: f32[1,32], index: 20, kind: input, shape index: {}, may-alias: {4,8,12,16,20}]   ;;  %s4307_s21 = inlined_call_operand.vmem [shape: f32[1,32], index: 21, kind: input, shape index: {}, may-alias: {3,5,7,9,11,13,15,17,19,21}]   ;;  %s4308_s22 = inlined_call_operand.vmem [shape: bf16[32,2], index: 22, kind: input, shape index: {}]   ;;  %s4309_s23 = inlined_call_operand.vmem [shape: f32[1,2], index: 23, kind: input, shape index: {}]   ;;  %s4310_s24 = inlined_call_operand.vmem [shape: f32[2,24,2], index: 24, kind: output, shape index: {}]  }
   0x1   :  { %4313 = sst [smem:[#allocation3_spill]] %s4286_s0 }
   0x2   :  { %4314 = sst [smem:[#allocation4_spill]] %s4288_s2 }
   0x3   :  { %4315 = sst [smem:[#allocation5_spill]] %s4289_s3 }
   0x4   :  { %4316 = sst [smem:[#allocation6_spill]] %s4290_s4 }
   0x5   :  { %4317 = sst [smem:[#allocation7_spill]] %s4291_s5  ;;  %s3897_s5 = smov 0  }
   0x6   :  { %4318 = sst [smem:[#allocation8_spill]] %s4292_s6 }
   0x7   :  { %4319 = sst [smem:[#allocation9_spill]] %s4293_s7 }
   0x8   :  { %4320 = sst [smem:[#allocation10_spill]] %s4294_s8 }
   0x9 LB: > { %s3230_s26 = sadd.s32 4294967295, %s3769_s5   ;;  %p3234_p0 = scmp.ge.s32.totalorder %s3769_s5, 1  ;;  %s3769_s5 = sphi %s3897_s5, %s34_s5  }
   0xa   : > { %p672_p1 = scmp.lt.s32.totalorder %s3769_s5, 3 }
   0xc   : > { %p673_p2 = pnand %p3234_p0, %p672_p1 }
   0xd   : > { %s4321_s6 = sld [smem:[#allocation4_spill]] (!%p673_p2)  ;;  %p743_p3 = scmp.lt.s32.totalorder (!%p673_p2), %s3230_s26, 1  ;;  %vm762_vm0 = vcmask (!%p673_p2), 261120   ;;  %v3771_v4 = vmov (!%p673_p2), 0.0   ;;  %vm766_vm1 = vcmask (!%p673_p2), 257024   ;;  %vm3159_vm2 = vcmask (!%p673_p2), 15360  }
   0xe   : > { %676 = sbr.rel (%p673_p2) target bundleno = 3063 (0xbf7), region = 116  ;;  %763 = vst.msk [vmem:[#allocation2] sm:$0xff] (!%p673_p2), %vm762_vm0, %v3771_v4  ;;  %764 = vst.msk [vmem:[#allocation2 + $0x8] sm:$0xff] (!%p673_p2), %vm762_vm0, %v3771_v4  ;;  %s4322_s28 = sld [smem:[#allocation3_spill]] (!%p673_p2) }
   0xf   : > { %765 = vst.msk [vmem:[#allocation2 + $0x10] sm:$0xff] (!%p673_p2), %vm762_vm0, %v3771_v4  ;;  %s4323_s0 = sld [smem:[#allocation5_spill]] (!%p673_p2)  ;;  %s4324_s3 = sld [smem:[#allocation8_spill]] (!%p673_p2) }
  0x10   : > { %767 = vst.msk [vmem:[#allocation2 + $0x18] sm:$0xf] (!%p673_p2), %vm766_vm1, %v3771_v4  ;;  %s4325_s1 = sld [smem:[#allocation6_spill]] (!%p673_p2)  ;;  %s4327_s29 = sld [smem:[#allocation9_spill]] (!%p673_p2) }
  0x11   : > { %s4328_s4 = sld [smem:[#allocation10_spill]] (!%p673_p2) }
  0x13   : > { %v3681_v0 = vld [vmem:[%s4321_s6 + $0x10] sm:$0xff] (!%p673_p2)   ;;  %v3682_v1 = vld [vmem:[%s4321_s6] sm:$0xff] (!%p673_p2)   ;;  %v3683_v2 = vld [vmem:[%s4321_s6 + $0x18] sm:$0xff] (!%p673_p2)  }
  0x14   : > { %3463 = vmatprep.subr.bf16.mxu0 (!%p673_p2), %v3681_v0  ;;  %3471 = vmatprep.subr.bf16.mxu1 (!%p673_p2), %v3682_v1  ;;  %v3684_v3 = vld [vmem:[%s4321_s6 + $0x8] sm:$0xff] (!%p673_p2)   ;;  %v3685_v5 = vld [vmem:[%s4321_s6 + $0x20] sm:$0xff] (!%p673_p2)   ;;  %v3686_v6 = vld [vmem:[%s4321_s6 + $0x30] sm:$0xff] (!%p673_p2)  }
  0x15   : > { %s4330_s26 = smov (!%p743_p3, %s3230_s26), 1  ;;  %3464 = vmatpush3.bf16.msra.mxu0 %v3681_v0  ;;  %3472 = vmatpush3.bf16.msra.mxu1 %v3682_v1  ;;  %v3687_v13 = vld [vmem:[%s4321_s6 + $0x28] sm:$0xff]   ;;  %v3688_v18 = vld [vmem:[%s4321_s6 + $0x38] sm:$0xff]   ;;  %v3689_v29 = vld [vmem:[%s4321_s6 + $0x40] sm:$0xff]  }
  0x16   : > { %3465 = vmatprep.subr.bf16.mxu0 %v3683_v2  ;;  %s3671_s25 = smul.u32 24, %s4330_s26  ;;  %3473 = vmatprep.subr.bf16.mxu1 %v3684_v3  ;;  %v3690_v35 = vld [vmem:[%s4321_s6 + $0x48] sm:$0xff]   ;;  %v3257_v1 = vld [vmem:[%s4323_s0] ss:$0 sm:$0xff] }
  0x18   : > { %s747_s2 = scalar_lea.vmem %s4322_s28, %s3671_s25  ;;  %s757_s7 = scalar_lea.vmem %s4310_s24, %s3671_s25 }
  0x19   : > { %3466 = vmatpush3.bf16.msra.mxu0 %v3683_v2  ;;  %v759_v7 = vld [vmem:[%s747_s2] sm:$0xff]  ;;  %v760_v8 = vld [vmem:[%s747_s2 + $0x8] sm:$0xff]  ;;  %v761_v9 = vld [vmem:[%s747_s2 + $0x10] sm:$0xff]  ;;  %3474 = vmatpush3.bf16.msra.mxu1 %v3684_v3  ;;  %s4326_s2 = sld [smem:[#allocation7_spill]] }
  0x1a   : > { %768 = vst.msk [vmem:[#allocation2 + $0x2] sm:$0xff] %vm762_vm0, %v759_v7  ;;  %769 = vst.msk [vmem:[#allocation2 + $0xa] sm:$0xff] %vm762_vm0, %v760_v8  ;;  %3479 = vmatprep.subr.bf16.mxu0 %v3685_v5  ;;  %3487 = vmatprep.subr.bf16.mxu1 %v3686_v6 }
  0x1b   : > { %770 = vst.msk [vmem:[#allocation2 + $0x12] sm:$0xff] %vm762_vm0, %v761_v9 }
  0x21   : > { %v780_v10 = vld [vmem:[#allocation2 + $0x1] sm:$0xff]  ;;  %v781_v11 = vld [vmem:[#allocation2 + $0x9] sm:$0xff] }
  0x22   : > { %v771_v12 = vld [vmem:[#allocation2] sm:$0xff]  ;;  %v783_v14 = vpack.c.bf16 %v781_v11, %v780_v10  ;;  %v772_v15 = vld [vmem:[#allocation2 + $0x8] sm:$0xff]  ;;  %v782_v16 = vld [vmem:[#allocation2 + $0x11] sm:$0xff] }
  0x23   : > { %v773_v17 = vld [vmem:[#allocation2 + $0x10] sm:$0xff]  ;;  %v774_v19 = vpack.c.bf16 %v772_v15, %v771_v12  ;;  %v784_v20 = vpack.c.bf16 %v782_v16, %v782_v16  ;;  %v921_v22 = vld [vmem:[#allocation2 + $0x2] sm:$0xff] }
  0x24   : > { %v775_v21 = vpack.c.bf16 %v773_v17, %v773_v17  ;;  %v922_v23 = vld [vmem:[#allocation2 + $0xa] sm:$0xff]  ;;  %3467 = vmatprep.mubr.msk.bf16.mxu0 %vm762_vm0, %v783_v14  ;;  %v923_v30 = vld [vmem:[#allocation2 + $0x12] sm:$0xff] }
  0x25   : > { %v999_v24 = vld [vmem:[#allocation2 + $0x3] sm:$0xff]  ;;  %v924_v25 = vpack.c.bf16 %v922_v23, %v921_v22  ;;  %v1000_v26 = vld [vmem:[#allocation2 + $0xb] sm:$0xff]  ;;  %3475 = vmatprep.mubr.msk.bf16.mxu1 %vm762_vm0, %v774_v19  ;;  %3468 = vmatmul.mubr.msk.bf16.vlgmr.msra.gmra.mrb[0].mxu0 %vm762_vm0, %v784_v20  ;;  %v1001_v31 = vld [vmem:[#allocation2 + $0x13] sm:$0xff]  ;;  %v925_v34 = vpack.c.bf16 %v923_v30, %v923_v30 }
  0x26   : > { %v1077_v27 = vld [vmem:[#allocation2 + $0x4] sm:$0xff]  ;;  %v1078_v28 = vld [vmem:[#allocation2 + $0xc] sm:$0xff]  ;;  %v1079_v32 = vld [vmem:[#allocation2 + $0x14] sm:$0xff]  ;;  %v1002_v33 = vpack.c.bf16 %v1000_v26, %v999_v24  ;;  %3476 = vmatmul.mubr.msk.bf16.vlgmr.msra.gmra.mrb[0].mxu1 %vm762_vm0, %v775_v21  ;;  %3480 = vmatpush3.bf16.msra.mxu0 %v3685_v5  ;;  %v1003_v36 = vpack.c.bf16 %v1001_v31, %v1001_v31 }
  0x27   : > { %1228 = vst.msk [vmem:[#allocation2] sm:$0xff] %vm762_vm0, %v3771_v4  ;;  %1229 = vst.msk [vmem:[#allocation2 + $0x8] sm:$0xff] %vm762_vm0, %v3771_v4  ;;  %3481 = vmatprep.subr.bf16.mxu0 %v3687_v13  ;;  %3488 = vmatpush3.bf16.msra.mxu1 %v3686_v6  ;;  %v1080_v37 = vpack.c.bf16 %v1078_v28, %v1077_v27  ;;  %v1081_v38 = vpack.c.bf16 %v1079_v32, %v1079_v32 }
  0x28   : > { %1230 = vst.msk [vmem:[#allocation2 + $0x10] sm:$0xff] %vm762_vm0, %v3771_v4  ;;  %3489 = vmatprep.subr.bf16.mxu1 %v3688_v18  ;;  %3483 = vmatprep.mubr.msk.bf16.mxu0 %vm762_vm0, %v924_v25 }
  0x29   : > { %1231 = vst.msk [vmem:[#allocation2 + $0x18] sm:$0xf] %vm766_vm1, %v3771_v4  ;;  %3491 = vmatprep.mubr.msk.bf16.mxu1 %vm762_vm0, %v1002_v33  ;;  %v3691_v33 = vld [vmem:[%s4324_s3 + $0x10] sm:$0xff]  }
  0x2a   : > { %3482 = vmatpush3.bf16.msra.mxu0 %v3687_v13 }
  0x2b   : > { %3490 = vmatpush3.bf16.msra.mxu1 %v3688_v18  ;;  %3495 = vmatprep.subr.bf16.mxu0 %v3689_v29 }
  0x2c   : > { %3503 = vmatprep.subr.bf16.mxu1 %v3691_v33 }
  0x2d   : > { %3484 = vmatmul.mubr.msk.bf16.vlgmr.msra.gmra.mrb[4].mxu0 %vm762_vm0, %v925_v34  ;;  %v3692_v34 = vld [vmem:[%s4324_s3] sm:$0xff]  }
  0x2e   : > { %3496 = vmatpush3.bf16.msra.mxu0 %v3689_v29  ;;  %3492 = vmatmul.mubr.msk.bf16.vlgmr.msra.gmra.mrb[4].mxu1 %vm762_vm0, %v1003_v36  ;;  %v3694_v36 = vld [vmem:[%s4324_s3 + $0x8] sm:$0xff]  }
  0x2f   : > { %3497 = vmatprep.subr.bf16.mxu0 %v3690_v35  ;;  %3499 = vmatprep.mubr.msk.bf16.mxu0 %vm762_vm0, %v1080_v37  ;;  %v3996_v37 = vld [vmem:[%s4324_s3 + $0x20] sm:$0xff]  }
  0x30   : > { %3504 = vmatpush3.bf16.msra.mxu1 %v3691_v33 }
  0x32   : > { %3498 = vmatpush3.bf16.msra.mxu0 %v3690_v35  ;;  %v3693_v35 = vld [vmem:[%s4324_s3 + $0x18] sm:$0xff]  }
  0x33   : > { %3511 = vmatprep.subr.bf16.mxu0 %v3692_v34  ;;  %3505 = vmatprep.subr.bf16.mxu1 %v3693_v35 }
  0x34   : > { %3506 = vmatpush3.bf16.msra.mxu1 %v3693_v35 }
  0x35   : > { %3500 = vmatmul.mubr.msk.bf16.vlgmr.msra.gmra.mrb[8].mxu0 %vm762_vm0, %v1081_v38  ;;  %v4001_v38 = vld [vmem:[%s4324_s3 + $0x30] sm:$0xff]   ;;  %3519 = vmatprep.subr.bf16.mxu1 %v3996_v37 }
  0x36   : > { %3512 = vmatpush3.bf16.msra.mxu0 %v3692_v34 }
  0x37   : > { %3513 = vmatprep.subr.bf16.mxu0 %v3694_v36 }
  0x3a   : > { %3514 = vmatpush3.bf16.msra.mxu0 %v3694_v36 }
  0x3b   : > { %3527 = vmatprep.subr.bf16.mxu0 %v4001_v38 }
  0xf8   : > { %v3469_v39 = vpop.f32.mrb[0].mxu0 }
  0xf9   : > { %v3477_v40 = vpop.f32.mrb[0].mxu1  ;;  %v841_v41 = vpop.f32.mrb[1].mxu0 }
  0xfa   : > { %v916_v42 = vadd.f32 %v3477_v40, %v3469_v39  ;;  %v907_v43 = vpop.f32.mrb[1].mxu1  ;;  %v3470_v44 = vpop.f32.mrb[2].mxu0 }
  0xfb   : > { %v908_v45 = vadd.f32 %v907_v43, %v841_v41  ;;  %v3478_v46 = vpop.f32.mrb[2].mxu1  ;;  %v844_v47 = vpop.f32.mrb[3].mxu0 }
  0xfc   : > { %v910_v48 = vpop.f32.mrb[3].mxu1 }
  0xfd   : > { %v911_v49 = vadd.f32 %v910_v48, %v844_v47 }
 0x100   : > { %v3485_v50 = vpop.f32.mrb[4].mxu0 }
 0x101   : > { %v998_v51 = vadd.f32 %v3485_v50, %v916_v42  ;;  %v982_v52 = vpop.f32.mrb[5].mxu0  ;;  %v3493_v53 = vpop.f32.mrb[4].mxu1 }
 0x102   : > { %v996_v54 = vadd.f32 %v982_v52, %v908_v45  ;;  %v3486_v55 = vpop.f32.mrb[6].mxu0  ;;  %v1060_v56 = vpop.f32.mrb[5].mxu1 }
 0x103   : > { %v1076_v57 = vadd.f32 %v3493_v53, %v998_v51  ;;  %v985_v58 = vpop.f32.mrb[7].mxu0  ;;  %v3494_v59 = vpop.f32.mrb[6].mxu1  ;;  %v3259_v51 = vld [vmem:[%s4326_s2] ss:$0 sm:$0xff] }
 0x104   : > { %v997_v60 = vadd.f32 %v985_v58, %v911_v49  ;;  %v1074_v61 = vadd.f32 %v1060_v56, %v996_v54  ;;  %v1063_v62 = vpop.f32.mrb[7].mxu1  ;;  %v3258_v49 = vld [vmem:[%s4325_s1] ss:$0 sm:$0xff] }
 0x106   : > { %v1075_v63 = vadd.f32 %v1063_v62, %v997_v60 }
 0x108   : > { %v3501_v0 = vpop.f32.mrb[8].mxu0 }
 0x109   : > { %v1154_v2 = vadd.f32 %v3501_v0, %v1076_v57  ;;  %v1138_v3 = vpop.f32.mrb[9].mxu0 }
 0x10a   : > { %v1152_v5 = vadd.f32 %v1138_v3, %v1074_v61  ;;  %v3502_v6 = vpop.f32.mrb[10].mxu0 }
 0x10b   : > { %v1141_v7 = vpop.f32.mrb[11].mxu0  ;;  %v1164_v8 = vadd.f32 %v3257_v1, %v1154_v2 }
 0x10c   : > { %v1153_v9 = vadd.f32 %v1141_v7, %v1075_v63  ;;  %v1162_v10 = vadd.f32 %v3257_v1, %v1152_v5 }
 0x10d   : > { %v1167_v11 = vmax.f32 %v1164_v8, 0.0 }
 0x10e   : > { %v1163_v12 = vadd.f32 %v3257_v1, %v1153_v9  ;;  %v1165_v13 = vmax.f32 %v1162_v10, 0.0 }
 0x10f   : > { %v1174_v14 = vsel %vm762_vm0, %v1167_v11, 0.0 }
 0x110   : > { %1175 = vadd.xlane.f32.xlu1 %v1174_v14  ;;  %v1168_v15 = vsel %vm762_vm0, %v1165_v13, 0.0  ;;  %v1166_v16 = vmax.f32 %v1163_v12, 0.0 }
 0x111   : > { %1169 = vadd.xlane.f32.xlu0 %v1168_v15 }
 0x112   : > { %v1171_v17 = vsel %vm762_vm0, %v1166_v16, 0.0 }
 0x115   : > { %1172 = vadd.xlane.f32.xlu0 %v1171_v17 }
 0x19d   : > { %v1176_v18 = vpop.xlane.xlu1 %1175 }
 0x19e   : > { %v1180_v19 = vmul.f32 0.03125, %v1176_v18  ;;  %v1170_v20 = vpop.xlane.xlu0 %1169 }
 0x19f   : > { %v1178_v21 = vmul.f32 0.03125, %v1170_v20  ;;  %v3698_v20 = vld [vmem:[%s4324_s3 + $0x38] sm:$0xff]  }
 0x1a0   : > { %v1183_v22 = vsub.f32 %v1167_v11, %v1180_v19  ;;  %v3697_v19 = vld [vmem:[%s4324_s3 + $0x28] sm:$0xff]  }
 0x1a1   : > { %v1181_v23 = vsub.f32 %v1165_v13, %v1178_v21 }
 0x1a2   : > { %v1173_v24 = vpop.xlane.xlu0 %1172  ;;  %v1186_v29 = vmul.f32 %v1183_v22, %v1183_v22 }
 0x1a3   : > { %v1179_v25 = vmul.f32 0.03125, %v1173_v24  ;;  %v1184_v26 = vmul.f32 %v1181_v23, %v1181_v23  ;;  %v3700_v24 = vld [vmem:[%s4324_s3 + $0x48] sm:$0xff]  }
 0x1a4   : > { %v1193_v31 = vsel %vm762_vm0, %v1186_v29, 0.0 }
 0x1a5   : > { %v1182_v27 = vsub.f32 %v1166_v16, %v1179_v25  ;;  %v1187_v28 = vsel %vm762_vm0, %v1184_v26, 0.0 }
 0x1a6   : > { %1188 = vadd.xlane.f32.xlu1 %v1187_v28 }
 0x1a7   : > { %v1185_v30 = vmul.f32 %v1182_v27, %v1182_v27 }
 0x1a9   : > { %v1190_v32 = vsel %vm762_vm0, %v1185_v30, 0.0 }
 0x1aa   : > { %1194 = vadd.xlane.f32.xlu1 %v1193_v31  ;;  %1191 = vadd.xlane.f32.xlu0 %v1190_v32 }
 0x233   : > { %v1189_v39 = vpop.xlane.xlu1 %1188 }
 0x234   : > { %v1196_v40 = vmul.f32 0.03125, %v1189_v39 }
 0x236   : > { %v1199_v41 = vadd.f32 1e-05, %v1196_v40 }
 0x237   : > { %v1195_v42 = vpop.xlane.xlu1 %1194  ;;  %v1192_v43 = vpop.xlane.xlu0 %1191 }
 0x238   : > { %3733 = vrsqrt.f32 %v1199_v41  ;;  %v1198_v44 = vmul.f32 0.03125, %v1195_v42  ;;  %v1197_v45 = vmul.f32 0.03125, %v1192_v43 }
 0x23a   : > { %v1201_v46 = vadd.f32 1e-05, %v1198_v44  ;;  %v1200_v47 = vadd.f32 1e-05, %v1197_v45 }
 0x23c   : > { %3735 = vrsqrt.f32 %v1201_v46 }
 0x23d   : > { %3737 = vrsqrt.f32 %v1200_v47 }
 0x242   : > { %v3734_v48 = vpop.eup %3733 }
 0x243   : > { %v1205_v50 = vmul.f32 %v3734_v48, %v1181_v23 }
 0x245   : > { %v1215_v52 = vmul.f32 %v3258_v49, %v1205_v50 }
 0x246   : > { %v3736_v53 = vpop.eup %3735 }
 0x247   : > { %v3738_v54 = vpop.eup %3737  ;;  %v1225_v55 = vadd.f32 %v3259_v51, %v1215_v52  ;;  %v1207_v56 = vmul.f32 %v3736_v53, %v1183_v22  ;;  %v3699_v22 = vld [vmem:[%s4324_s3 + $0x40] sm:$0xff]  }
 0x248   : > { %v1206_v57 = vmul.f32 %v3738_v54, %v1182_v27 }
 0x249   : > { %1232 = vst.msk [vmem:[#allocation2 + $0x2] sm:$0xff] %vm762_vm0, %v1225_v55  ;;  %v1217_v58 = vmul.f32 %v3258_v49, %v1207_v56  ;;  %v3280_v55 = vld [vmem:[%s4327_s29] ss:$0 sm:$0xff] }
 0x24a   : > { %v1216_v59 = vmul.f32 %v3258_v49, %v1206_v57 }
 0x24b   : > { %v1227_v60 = vadd.f32 %v3259_v51, %v1217_v58 }
 0x24c   : > { %v1226_v61 = vadd.f32 %v3259_v51, %v1216_v59 }
 0x24d   : > { %1234 = vst.msk [vmem:[#allocation2 + $0x12] sm:$0xff] %vm762_vm0, %v1227_v60 }
 0x24e   : > { %1233 = vst.msk [vmem:[#allocation2 + $0xa] sm:$0xff] %vm762_vm0, %v1226_v61 }
 0x250   : > { %v1244_v62 = vld [vmem:[#allocation2 + $0x1] sm:$0xff] }
 0x251   : > { %v1235_v63 = vld [vmem:[#allocation2] sm:$0xff] }
 0x252   : > { %v1385_v7 = vld [vmem:[#allocation2 + $0x2] sm:$0xff] }
 0x254   : > { %v1387_v0 = vld [vmem:[#allocation2 + $0x12] sm:$0xff] }
 0x255   : > { %v1465_v1 = vld [vmem:[#allocation2 + $0x13] sm:$0xff]  ;;  %v1245_v3 = vld [vmem:[#allocation2 + $0x9] sm:$0xff]  ;;  %v1389_v23 = vpack.c.bf16 %v1387_v0, %v1387_v0 }
 0x256   : > { %v1543_v2 = vld [vmem:[#allocation2 + $0x14] sm:$0xff]  ;;  %v1236_v5 = vld [vmem:[#allocation2 + $0x8] sm:$0xff]  ;;  %v1247_v8 = vpack.c.bf16 %v1245_v3, %v1244_v62  ;;  %v1467_v25 = vpack.c.bf16 %v1465_v1, %v1465_v1 }
 0x257   : > { %v1246_v6 = vld [vmem:[#allocation2 + $0x11] sm:$0xff]  ;;  %v1238_v9 = vpack.c.bf16 %v1236_v5, %v1235_v63  ;;  %v1463_v13 = vld [vmem:[#allocation2 + $0x3] sm:$0xff]  ;;  %v1545_v27 = vpack.c.bf16 %v1543_v2, %v1543_v2 }
 0x258   : > { %v1248_v10 = vpack.c.bf16 %v1246_v6, %v1246_v6  ;;  %v1237_v11 = vld [vmem:[#allocation2 + $0x10] sm:$0xff]  ;;  %1694 = vst.msk [vmem:[#allocation2 + $0x18] sm:$0xf] %vm766_vm1, %v3771_v4  ;;  %v1541_v15 = vld [vmem:[#allocation2 + $0x4] sm:$0xff]  ;;  %3507 = vmatprep.mubr.msk.bf16.mxu1 %vm762_vm0, %v1247_v8 }
 0x259   : > { %v1386_v12 = vld [vmem:[#allocation2 + $0xa] sm:$0xff]  ;;  %v1239_v14 = vpack.c.bf16 %v1237_v11, %v1237_v11  ;;  %3515 = vmatprep.mubr.msk.bf16.mxu0 %vm762_vm0, %v1238_v9  ;;  %1691 = vst.msk [vmem:[#allocation2] sm:$0xff] %vm762_vm0, %v3771_v4 }
 0x25a   : > { %v1464_v16 = vld [vmem:[#allocation2 + $0xb] sm:$0xff]  ;;  %v1388_v18 = vpack.c.bf16 %v1386_v12, %v1385_v7  ;;  %3508 = vmatmul.mubr.msk.bf16.vlgmr.msra.gmra.mrb[8].mxu1 %vm762_vm0, %v1248_v10 }
 0x25b   : > { %v1542_v17 = vld [vmem:[#allocation2 + $0xc] sm:$0xff]  ;;  %3516 = vmatmul.mubr.msk.bf16.vlgmr.msra.gmra.mrb[12].mxu0 %vm762_vm0, %v1239_v14  ;;  %v1466_v21 = vpack.c.bf16 %v1464_v16, %v1463_v13  ;;  %3520 = vmatpush3.bf16.msra.mxu1 %v3996_v37 }
 0x25c   : > { %1692 = vst.msk [vmem:[#allocation2 + $0x8] sm:$0xff] %vm762_vm0, %v3771_v4  ;;  %1693 = vst.msk [vmem:[#allocation2 + $0x10] sm:$0xff] %vm762_vm0, %v3771_v4  ;;  %3523 = vmatprep.mubr.msk.bf16.mxu1 %vm762_vm0, %v1388_v18  ;;  %3528 = vmatpush3.bf16.msra.mxu0 %v4001_v38  ;;  %v1544_v26 = vpack.c.bf16 %v1542_v17, %v1541_v15 }
 0x25d   : > { %3531 = vmatprep.mubr.msk.bf16.mxu0 %vm762_vm0, %v1466_v21  ;;  %3521 = vmatprep.subr.bf16.mxu1 %v3697_v19 }
 0x25e   : > { %3529 = vmatprep.subr.bf16.mxu0 %v3698_v20 }
 0x25f   : > { %3522 = vmatpush3.bf16.msra.mxu1 %v3697_v19 }
 0x260   : > { %3530 = vmatpush3.bf16.msra.mxu0 %v3698_v20  ;;  %3535 = vmatprep.subr.bf16.mxu1 %v3699_v22 }
 0x262   : > { %3524 = vmatmul.mubr.msk.bf16.vlgmr.msra.gmra.mrb[12].mxu1 %vm762_vm0, %v1389_v23  ;;  %v3702_v23 = vld [vmem:[%s4296_s10] sm:$0xff]  }
 0x263   : > { %3532 = vmatmul.mubr.msk.bf16.vlgmr.msra.gmra.mrb[16].mxu0 %vm762_vm0, %v1467_v25  ;;  %3536 = vmatpush3.bf16.msra.mxu1 %v3699_v22  ;;  %v3701_v22 = vld [vmem:[%s4296_s10 + $0x10] sm:$0xff]   ;;  %v3704_v25 = vld [vmem:[%s4296_s10 + $0x8] sm:$0xff]  }
 0x264   : > { %3539 = vmatprep.mubr.msk.bf16.mxu1 %vm762_vm0, %v1544_v26  ;;  %3537 = vmatprep.subr.bf16.mxu1 %v3700_v24  ;;  %v4070_v26 = vld [vmem:[%s4296_s10 + $0x20] sm:$0xff]  }
 0x265   : > { %3543 = vmatprep.subr.bf16.mxu0 %v3701_v22 }
 0x266   : > { %3544 = vmatpush3.bf16.msra.mxu0 %v3701_v22 }
 0x267   : > { %3538 = vmatpush3.bf16.msra.mxu1 %v3700_v24  ;;  %v3703_v24 = vld [vmem:[%s4296_s10 + $0x18] sm:$0xff]  }
 0x268   : > { %3551 = vmatprep.subr.bf16.mxu1 %v3702_v23  ;;  %3545 = vmatprep.subr.bf16.mxu0 %v3703_v24 }
 0x26a   : > { %3540 = vmatmul.mubr.msk.bf16.vlgmr.msra.gmra.mrb[16].mxu1 %vm762_vm0, %v1545_v27  ;;  %3546 = vmatpush3.bf16.msra.mxu0 %v3703_v24  ;;  %v4076_v27 = vld [vmem:[%s4296_s10 + $0x30] sm:$0xff]  }
 0x26b   : > { %3552 = vmatpush3.bf16.msra.mxu1 %v3702_v23  ;;  %3559 = vmatprep.subr.bf16.mxu0 %v4070_v26 }
 0x26c   : > { %3553 = vmatprep.subr.bf16.mxu1 %v3704_v25 }
 0x26f   : > { %3554 = vmatpush3.bf16.msra.mxu1 %v3704_v25 }
 0x270   : > { %3567 = vmatprep.subr.bf16.mxu1 %v4076_v27 }
 0x32d   : > { %v3509_v28 = vpop.f32.mrb[8].mxu1 }
 0x32e   : > { %v3517_v29 = vpop.f32.mrb[12].mxu0  ;;  %v1305_v31 = vpop.f32.mrb[9].mxu1 }
 0x32f   : > { %v1380_v30 = vadd.f32 %v3517_v29, %v3509_v28  ;;  %v1371_v32 = vpop.f32.mrb[13].mxu0  ;;  %v3510_v34 = vpop.f32.mrb[10].mxu1 }
 0x330   : > { %v1372_v33 = vadd.f32 %v1371_v32, %v1305_v31  ;;  %v3518_v35 = vpop.f32.mrb[14].mxu0  ;;  %v1308_v36 = vpop.f32.mrb[11].mxu1 }
 0x331   : > { %v1374_v37 = vpop.f32.mrb[15].mxu0 }
 0x332   : > { %v1375_v38 = vadd.f32 %v1374_v37, %v1308_v36 }
 0x335   : > { %v3525_v39 = vpop.f32.mrb[12].mxu1 }
 0x336   : > { %v1462_v40 = vadd.f32 %v3525_v39, %v1380_v30  ;;  %v3533_v41 = vpop.f32.mrb[16].mxu0  ;;  %v1446_v42 = vpop.f32.mrb[13].mxu1 }
 0x337   : > { %v1460_v43 = vadd.f32 %v1446_v42, %v1372_v33  ;;  %v1524_v44 = vpop.f32.mrb[17].mxu0  ;;  %v3526_v45 = vpop.f32.mrb[14].mxu1 }
 0x338   : > { %v1540_v46 = vadd.f32 %v3533_v41, %v1462_v40  ;;  %v3534_v47 = vpop.f32.mrb[18].mxu0  ;;  %v1449_v48 = vpop.f32.mrb[15].mxu1  ;;  %v3282_v41 = vld [vmem:[%s4295_s9] ss:$0 sm:$0xff] }
 0x339   : > { %v1538_v49 = vadd.f32 %v1524_v44, %v1460_v43  ;;  %v1461_v50 = vadd.f32 %v1449_v48, %v1375_v38  ;;  %v1527_v51 = vpop.f32.mrb[19].mxu0  ;;  %v3281_v38 = vld [vmem:[%s4328_s4] ss:$0 sm:$0xff] }
 0x33b   : > { %v1539_v52 = vadd.f32 %v1527_v51, %v1461_v50 }
 0x33d   : > { %v3541_v53 = vpop.f32.mrb[16].mxu1 }
 0x33e   : > { %v1618_v54 = vadd.f32 %v3541_v53, %v1540_v46  ;;  %v1602_v56 = vpop.f32.mrb[17].mxu1 }
 0x33f   : > { %v1616_v57 = vadd.f32 %v1602_v56, %v1538_v49  ;;  %v3542_v58 = vpop.f32.mrb[18].mxu1 }
 0x340   : > { %v1605_v59 = vpop.f32.mrb[19].mxu1  ;;  %v1628_v60 = vadd.f32 %v3280_v55, %v1618_v54 }
 0x341   : > { %v1626_v61 = vadd.f32 %v3280_v55, %v1616_v57  ;;  %v1617_v62 = vadd.f32 %v1605_v59, %v1539_v52 }
 0x342   : > { %v1631_v3 = vmax.f32 %v1628_v60, 0.0 }
 0x343   : > { %v1627_v63 = vadd.f32 %v3280_v55, %v1617_v62  ;;  %v1629_v0 = vmax.f32 %v1626_v61, 0.0 }
 0x344   : > { %v1638_v6 = vsel %vm762_vm0, %v1631_v3, 0.0 }
 0x345   : > { %v1632_v1 = vsel %vm762_vm0, %v1629_v0, 0.0  ;;  %v1630_v2 = vmax.f32 %v1627_v63, 0.0 }
 0x346   : > { %1633 = vadd.xlane.f32.xlu0 %v1632_v1 }
 0x347   : > { %v1635_v5 = vsel %vm762_vm0, %v1630_v2, 0.0 }
 0x348   : > { %1636 = vadd.xlane.f32.xlu1 %v1635_v5  ;;  %v3708_v5 = vld [vmem:[%s4296_s10 + $0x38] sm:$0xff]  }
 0x34a   : > { %1639 = vadd.xlane.f32.xlu0 %v1638_v6 }
 0x3d3   : > { %v1634_v7 = vpop.xlane.xlu0 %1633 }
 0x3d4   : > { %v1641_v8 = vmul.f32 0.03125, %v1634_v7 }
 0x3d5   : > { %v1637_v9 = vpop.xlane.xlu1 %1636 }
 0x3d6   : > { %v1644_v10 = vsub.f32 %v1629_v0, %v1641_v8  ;;  %v1642_v11 = vmul.f32 0.03125, %v1637_v9 }
 0x3d7   : > { %v1640_v12 = vpop.xlane.xlu0 %1639 }
 0x3d8   : > { %v1645_v13 = vsub.f32 %v1630_v2, %v1642_v11  ;;  %v1643_v14 = vmul.f32 0.03125, %v1640_v12  ;;  %v1647_v15 = vmul.f32 %v1644_v10, %v1644_v10  ;;  %v3709_v11 = vld [vmem:[%s4296_s10 + $0x40] sm:$0xff]  }
 0x3da   : > { %v1646_v16 = vsub.f32 %v1631_v3, %v1643_v14  ;;  %v1650_v17 = vsel %vm762_vm0, %v1647_v15, 0.0  ;;  %v1648_v18 = vmul.f32 %v1645_v13, %v1645_v13  ;;  %v3707_v3 = vld [vmem:[%s4296_s10 + $0x28] sm:$0xff]  }
 0x3db   : > { %1651 = vadd.xlane.f32.xlu1 %v1650_v17 }
 0x3dc   : > { %v1653_v19 = vsel %vm762_vm0, %v1648_v18, 0.0  ;;  %v1649_v20 = vmul.f32 %v1646_v16, %v1646_v16 }
 0x3dd   : > { %1654 = vadd.xlane.f32.xlu0 %v1653_v19 }
 0x3de   : > { %v1656_v21 = vsel %vm762_vm0, %v1649_v20, 0.0 }
 0x3df   : > { %1657 = vadd.xlane.f32.xlu1 %v1656_v21 }
 0x468   : > { %v1652_v28 = vpop.xlane.xlu1 %1651 }
 0x469   : > { %v1659_v29 = vmul.f32 0.03125, %v1652_v28 }
 0x46a   : > { %v1655_v30 = vpop.xlane.xlu0 %1654 }
 0x46b   : > { %v1662_v31 = vadd.f32 1e-05, %v1659_v29  ;;  %v1660_v32 = vmul.f32 0.03125, %v1655_v30 }
 0x46c   : > { %v1658_v33 = vpop.xlane.xlu1 %1657 }
 0x46d   : > { %3739 = vrsqrt.f32 %v1662_v31  ;;  %v1663_v34 = vadd.f32 1e-05, %v1660_v32  ;;  %v1661_v35 = vmul.f32 0.03125, %v1658_v33 }
 0x46f   : > { %3741 = vrsqrt.f32 %v1663_v34  ;;  %v1664_v36 = vadd.f32 1e-05, %v1661_v35 }
 0x471   : > { %3743 = vrsqrt.f32 %v1664_v36 }
 0x477   : > { %v3740_v37 = vpop.eup %3739 }
 0x478   : > { %v1668_v39 = vmul.f32 %v3740_v37, %v1644_v10 }
 0x479   : > { %v3742_v40 = vpop.eup %3741 }
 0x47a   : > { %v1678_v42 = vmul.f32 %v3281_v38, %v1668_v39  ;;  %v1669_v43 = vmul.f32 %v3742_v40, %v1645_v13  ;;  %v3710_v13 = vld [vmem:[%s4296_s10 + $0x48] sm:$0xff]  }
 0x47b   : > { %v3744_v44 = vpop.eup %3743 }
 0x47c   : > { %v1688_v45 = vadd.f32 %v3282_v41, %v1678_v42  ;;  %v1679_v46 = vmul.f32 %v3281_v38, %v1669_v43  ;;  %v1670_v47 = vmul.f32 %v3744_v44, %v1646_v16  ;;  %v3303_v44 = vld [vmem:[%s4297_s11] ss:$0 sm:$0xff] }
 0x47e   : > { %1695 = vst.msk [vmem:[#allocation2 + $0x2] sm:$0xff] %vm762_vm0, %v1688_v45  ;;  %v1689_v48 = vadd.f32 %v3282_v41, %v1679_v46  ;;  %v1680_v49 = vmul.f32 %v3281_v38, %v1670_v47 }
 0x480   : > { %1696 = vst.msk [vmem:[#allocation2 + $0xa] sm:$0xff] %vm762_vm0, %v1689_v48  ;;  %v1690_v50 = vadd.f32 %v3282_v41, %v1680_v49 }
 0x482   : > { %1697 = vst.msk [vmem:[#allocation2 + $0x12] sm:$0xff] %vm762_vm0, %v1690_v50 }
 0x485   : > { %v1707_v51 = vld [vmem:[#allocation2 + $0x1] sm:$0xff] }
 0x486   : > { %v1698_v52 = vld [vmem:[#allocation2] sm:$0xff] }
 0x487   : > { %v1708_v53 = vld [vmem:[#allocation2 + $0x9] sm:$0xff] }
 0x488   : > { %v1699_v54 = vld [vmem:[#allocation2 + $0x8] sm:$0xff]  ;;  %v1710_v56 = vpack.c.bf16 %v1708_v53, %v1707_v51 }
 0x489   : > { %v1848_v55 = vld [vmem:[#allocation2 + $0x2] sm:$0xff]  ;;  %v1701_v57 = vpack.c.bf16 %v1699_v54, %v1698_v52  ;;  %v1849_v58 = vld [vmem:[#allocation2 + $0xa] sm:$0xff]  ;;  %v1850_v8 = vld [vmem:[#allocation2 + $0x12] sm:$0xff] }
 0x48a   : > { %v1926_v59 = vld [vmem:[#allocation2 + $0x3] sm:$0xff]  ;;  %v1709_v61 = vld [vmem:[#allocation2 + $0x11] sm:$0xff]  ;;  %3547 = vmatprep.mubr.msk.bf16.mxu0 %vm762_vm0, %v1710_v56  ;;  %v1851_v7 = vpack.c.bf16 %v1849_v58, %v1848_v55  ;;  %v1852_v12 = vpack.c.bf16 %v1850_v8, %v1850_v8 }
 0x48b   : > { %v2004_v60 = vld [vmem:[#allocation2 + $0x4] sm:$0xff]  ;;  %v1700_v62 = vld [vmem:[#allocation2 + $0x10] sm:$0xff]  ;;  %3555 = vmatprep.mubr.msk.bf16.mxu1 %vm762_vm0, %v1701_v57  ;;  %v1711_v0 = vpack.c.bf16 %v1709_v61, %v1709_v61 }
 0x48c   : > { %v1927_v63 = vld [vmem:[#allocation2 + $0xb] sm:$0xff]  ;;  %2154 = vst.msk [vmem:[#allocation2] sm:$0xff] %vm762_vm0, %v3771_v4  ;;  %v1702_v1 = vpack.c.bf16 %v1700_v62, %v1700_v62  ;;  %v1928_v9 = vld [vmem:[#allocation2 + $0x13] sm:$0xff] }
 0x48d   : > { %v1929_v2 = vpack.c.bf16 %v1927_v63, %v1926_v59  ;;  %v2005_v6 = vld [vmem:[#allocation2 + $0xc] sm:$0xff]  ;;  %v2006_v10 = vld [vmem:[#allocation2 + $0x14] sm:$0xff]  ;;  %3548 = vmatmul.mubr.msk.bf16.vlgmr.msra.gmra.mrb[20].mxu0 %vm762_vm0, %v1711_v0  ;;  %v1930_v14 = vpack.c.bf16 %v1928_v9, %v1928_v9 }
 0x48e   : > { %2155 = vst.msk [vmem:[#allocation2 + $0x8] sm:$0xff] %vm762_vm0, %v3771_v4  ;;  %3556 = vmatmul.mubr.msk.bf16.vlgmr.msra.gmra.mrb[20].mxu1 %vm762_vm0, %v1702_v1  ;;  %2156 = vst.msk [vmem:[#allocation2 + $0x10] sm:$0xff] %vm762_vm0, %v3771_v4  ;;  %3560 = vmatpush3.bf16.msra.mxu0 %v4070_v26  ;;  %v2007_v15 = vpack.c.bf16 %v2005_v6, %v2004_v60  ;;  %v2008_v16 = vpack.c.bf16 %v2006_v10, %v2006_v10 }
 0x48f   : > { %2157 = vst.msk [vmem:[#allocation2 + $0x18] sm:$0xf] %vm766_vm1, %v3771_v4  ;;  %3563 = vmatprep.mubr.msk.bf16.mxu0 %vm762_vm0, %v1851_v7  ;;  %3568 = vmatpush3.bf16.msra.mxu1 %v4076_v27 }
 0x490   : > { %3571 = vmatprep.mubr.msk.bf16.mxu1 %vm762_vm0, %v1929_v2  ;;  %3561 = vmatprep.subr.bf16.mxu0 %v3707_v3 }
 0x491   : > { %3569 = vmatprep.subr.bf16.mxu1 %v3708_v5 }
 0x492   : > { %3562 = vmatpush3.bf16.msra.mxu0 %v3707_v3 }
 0x493   : > { %3570 = vmatpush3.bf16.msra.mxu1 %v3708_v5  ;;  %3575 = vmatprep.subr.bf16.mxu0 %v3709_v11 }
 0x495   : > { %3564 = vmatmul.mubr.msk.bf16.vlgmr.msra.gmra.mrb[24].mxu0 %vm762_vm0, %v1852_v12  ;;  %v3712_v12 = vld [vmem:[%s4300_s14] sm:$0xff]  }
 0x496   : > { %3572 = vmatmul.mubr.msk.bf16.vlgmr.msra.gmra.mrb[24].mxu1 %vm762_vm0, %v1930_v14  ;;  %3576 = vmatpush3.bf16.msra.mxu0 %v3709_v11  ;;  %v3711_v11 = vld [vmem:[%s4300_s14 + $0x10] sm:$0xff]   ;;  %v3714_v14 = vld [vmem:[%s4300_s14 + $0x8] sm:$0xff]  }
 0x497   : > { %3579 = vmatprep.mubr.msk.bf16.mxu0 %vm762_vm0, %v2007_v15  ;;  %3577 = vmatprep.subr.bf16.mxu0 %v3710_v13  ;;  %v4144_v15 = vld [vmem:[%s4300_s14 + $0x20] sm:$0xff]  }
 0x498   : > { %3583 = vmatprep.subr.bf16.mxu1 %v3711_v11 }
 0x499   : > { %3584 = vmatpush3.bf16.msra.mxu1 %v3711_v11 }
 0x49a   : > { %3578 = vmatpush3.bf16.msra.mxu0 %v3710_v13  ;;  %v3713_v13 = vld [vmem:[%s4300_s14 + $0x18] sm:$0xff]  }
 0x49b   : > { %3591 = vmatprep.subr.bf16.mxu0 %v3712_v12  ;;  %3585 = vmatprep.subr.bf16.mxu1 %v3713_v13 }
 0x49d   : > { %3580 = vmatmul.mubr.msk.bf16.vlgmr.msra.gmra.mrb[28].mxu0 %vm762_vm0, %v2008_v16  ;;  %3586 = vmatpush3.bf16.msra.mxu1 %v3713_v13  ;;  %v4150_v16 = vld [vmem:[%s4300_s14 + $0x30] sm:$0xff]  }
 0x49e   : > { %3592 = vmatpush3.bf16.msra.mxu0 %v3712_v12  ;;  %3599 = vmatprep.subr.bf16.mxu1 %v4144_v15 }
 0x49f   : > { %3593 = vmatprep.subr.bf16.mxu0 %v3714_v14 }
 0x4a2   : > { %3594 = vmatpush3.bf16.msra.mxu0 %v3714_v14 }
 0x4a3   : > { %3607 = vmatprep.subr.bf16.mxu0 %v4150_v16 }
 0x560   : > { %v3549_v17 = vpop.f32.mrb[20].mxu0 }
 0x561   : > { %v3557_v18 = vpop.f32.mrb[20].mxu1  ;;  %v1768_v20 = vpop.f32.mrb[21].mxu0 }
 0x562   : > { %v1843_v19 = vadd.f32 %v3557_v18, %v3549_v17  ;;  %v1834_v21 = vpop.f32.mrb[21].mxu1  ;;  %v3550_v23 = vpop.f32.mrb[22].mxu0 }
 0x563   : > { %v1835_v22 = vadd.f32 %v1834_v21, %v1768_v20  ;;  %v3558_v24 = vpop.f32.mrb[22].mxu1  ;;  %v1771_v25 = vpop.f32.mrb[23].mxu0 }
 0x564   : > { %v1837_v26 = vpop.f32.mrb[23].mxu1 }
 0x565   : > { %v1838_v27 = vadd.f32 %v1837_v26, %v1771_v25 }
 0x568   : > { %v3565_v28 = vpop.f32.mrb[24].mxu0 }
 0x569   : > { %v1925_v29 = vadd.f32 %v3565_v28, %v1843_v19  ;;  %v3573_v30 = vpop.f32.mrb[24].mxu1  ;;  %v1909_v31 = vpop.f32.mrb[25].mxu0 }
 0x56a   : > { %v1923_v32 = vadd.f32 %v1909_v31, %v1835_v22  ;;  %v1987_v33 = vpop.f32.mrb[25].mxu1  ;;  %v3566_v34 = vpop.f32.mrb[26].mxu0 }
 0x56b   : > { %v2003_v35 = vadd.f32 %v3573_v30, %v1925_v29  ;;  %v3574_v36 = vpop.f32.mrb[26].mxu1  ;;  %v1912_v37 = vpop.f32.mrb[27].mxu0  ;;  %v3305_v30 = vld [vmem:[%s4299_s13] ss:$0 sm:$0xff] }
 0x56c   : > { %v2001_v38 = vadd.f32 %v1987_v33, %v1923_v32  ;;  %v1924_v39 = vadd.f32 %v1912_v37, %v1838_v27  ;;  %v1990_v40 = vpop.f32.mrb[27].mxu1  ;;  %v3304_v27 = vld [vmem:[%s4298_s12] ss:$0 sm:$0xff] }
 0x56e   : > { %v2002_v41 = vadd.f32 %v1990_v40, %v1924_v39 }
 0x570   : > { %v3581_v42 = vpop.f32.mrb[28].mxu0 }
 0x571   : > { %v2081_v43 = vadd.f32 %v3581_v42, %v2003_v35  ;;  %v2065_v45 = vpop.f32.mrb[29].mxu0 }
 0x572   : > { %v2079_v46 = vadd.f32 %v2065_v45, %v2001_v38  ;;  %v3582_v47 = vpop.f32.mrb[30].mxu0 }
 0x573   : > { %v2068_v48 = vpop.f32.mrb[31].mxu0  ;;  %v2091_v49 = vadd.f32 %v3303_v44, %v2081_v43 }
 0x574   : > { %v2089_v50 = vadd.f32 %v3303_v44, %v2079_v46  ;;  %v2080_v51 = vadd.f32 %v2068_v48, %v2002_v41 }
 0x575   : > { %v2094_v56 = vmax.f32 %v2091_v49, 0.0 }
 0x576   : > { %v2090_v52 = vadd.f32 %v3303_v44, %v2080_v51  ;;  %v2092_v53 = vmax.f32 %v2089_v50, 0.0 }
 0x577   : > { %v2101_v58 = vsel %vm762_vm0, %v2094_v56, 0.0 }
 0x578   : > { %v2095_v54 = vsel %vm762_vm0, %v2092_v53, 0.0  ;;  %v2093_v55 = vmax.f32 %v2090_v52, 0.0 }
 0x579   : > { %2096 = vadd.xlane.f32.xlu0 %v2095_v54 }
 0x57a   : > { %v2098_v57 = vsel %vm762_vm0, %v2093_v55, 0.0 }
 0x57b   : > { %2099 = vadd.xlane.f32.xlu1 %v2098_v57  ;;  %v3718_v57 = vld [vmem:[%s4300_s14 + $0x38] sm:$0xff]  }
 0x57d   : > { %2102 = vadd.xlane.f32.xlu0 %v2101_v58 }
 0x606   : > { %v2097_v59 = vpop.xlane.xlu0 %2096 }
 0x607   : > { %v2104_v60 = vmul.f32 0.03125, %v2097_v59 }
 0x608   : > { %v2100_v61 = vpop.xlane.xlu1 %2099 }
 0x609   : > { %v2107_v62 = vsub.f32 %v2092_v53, %v2104_v60  ;;  %v2105_v63 = vmul.f32 0.03125, %v2100_v61 }
 0x60a   : > { %v2103_v0 = vpop.xlane.xlu0 %2102 }
 0x60b   : > { %v2108_v1 = vsub.f32 %v2093_v55, %v2105_v63  ;;  %v2106_v2 = vmul.f32 0.03125, %v2103_v0  ;;  %v2110_v3 = vmul.f32 %v2107_v62, %v2107_v62  ;;  %v3719_v63 = vld [vmem:[%s4300_s14 + $0x40] sm:$0xff]  }
 0x60d   : > { %v2109_v5 = vsub.f32 %v2094_v56, %v2106_v2  ;;  %v2113_v6 = vsel %vm762_vm0, %v2110_v3, 0.0  ;;  %v2111_v7 = vmul.f32 %v2108_v1, %v2108_v1  ;;  %v3717_v56 = vld [vmem:[%s4300_s14 + $0x28] sm:$0xff]  }
 0x60e   : > { %2114 = vadd.xlane.f32.xlu1 %v2113_v6 }
 0x60f   : > { %v2116_v8 = vsel %vm762_vm0, %v2111_v7, 0.0  ;;  %v2112_v9 = vmul.f32 %v2109_v5, %v2109_v5 }
 0x610   : > { %2117 = vadd.xlane.f32.xlu0 %v2116_v8 }
 0x611   : > { %v2119_v10 = vsel %vm762_vm0, %v2112_v9, 0.0 }
 0x612   : > { %2120 = vadd.xlane.f32.xlu1 %v2119_v10 }
 0x69b   : > { %v2115_v17 = vpop.xlane.xlu1 %2114 }
 0x69c   : > { %v2122_v18 = vmul.f32 0.03125, %v2115_v17 }
 0x69d   : > { %v2118_v19 = vpop.xlane.xlu0 %2117 }
 0x69e   : > { %v2125_v20 = vadd.f32 1e-05, %v2122_v18  ;;  %v2123_v21 = vmul.f32 0.03125, %v2118_v19 }
 0x69f   : > { %v2121_v22 = vpop.xlane.xlu1 %2120 }
 0x6a0   : > { %3745 = vrsqrt.f32 %v2125_v20  ;;  %v2126_v23 = vadd.f32 1e-05, %v2123_v21  ;;  %v2124_v24 = vmul.f32 0.03125, %v2121_v22 }
 0x6a2   : > { %3747 = vrsqrt.f32 %v2126_v23  ;;  %v2127_v25 = vadd.f32 1e-05, %v2124_v24 }
 0x6a4   : > { %3749 = vrsqrt.f32 %v2127_v25 }
 0x6aa   : > { %v3746_v26 = vpop.eup %3745 }
 0x6ab   : > { %v2131_v28 = vmul.f32 %v3746_v26, %v2107_v62 }
 0x6ac   : > { %v3748_v29 = vpop.eup %3747 }
 0x6ad   : > { %v2141_v31 = vmul.f32 %v3304_v27, %v2131_v28  ;;  %v2132_v32 = vmul.f32 %v3748_v29, %v2108_v1 }
 0x6ae   : > { %v3750_v33 = vpop.eup %3749 }
 0x6af   : > { %v2151_v34 = vadd.f32 %v3305_v30, %v2141_v31  ;;  %v2142_v35 = vmul.f32 %v3304_v27, %v2132_v32  ;;  %v2133_v36 = vmul.f32 %v3750_v33, %v2109_v5  ;;  %v3326_v32 = vld [vmem:[%s4301_s15] ss:$0 sm:$0xff] }
 0x6b1   : > { %2158 = vst.msk [vmem:[#allocation2 + $0x2] sm:$0xff] %vm762_vm0, %v2151_v34  ;;  %v2152_v37 = vadd.f32 %v3305_v30, %v2142_v35  ;;  %v2143_v38 = vmul.f32 %v3304_v27, %v2133_v36 }
 0x6b3   : > { %2159 = vst.msk [vmem:[#allocation2 + $0xa] sm:$0xff] %vm762_vm0, %v2152_v37  ;;  %v2153_v39 = vadd.f32 %v3305_v30, %v2143_v38 }
 0x6b5   : > { %2160 = vst.msk [vmem:[#allocation2 + $0x12] sm:$0xff] %vm762_vm0, %v2153_v39 }
 0x6b8   : > { %v2170_v40 = vld [vmem:[#allocation2 + $0x1] sm:$0xff] }
 0x6b9   : > { %v2161_v41 = vld [vmem:[#allocation2] sm:$0xff] }
 0x6ba   : > { %v2171_v42 = vld [vmem:[#allocation2 + $0x9] sm:$0xff] }
 0x6bb   : > { %v2162_v43 = vld [vmem:[#allocation2 + $0x8] sm:$0xff]  ;;  %v2173_v45 = vpack.c.bf16 %v2171_v42, %v2170_v40 }
 0x6bc   : > { %v2311_v44 = vld [vmem:[#allocation2 + $0x2] sm:$0xff]  ;;  %v2164_v46 = vpack.c.bf16 %v2162_v43, %v2161_v41  ;;  %v2312_v47 = vld [vmem:[#allocation2 + $0xa] sm:$0xff]  ;;  %v2313_v60 = vld [vmem:[#allocation2 + $0x12] sm:$0xff] }
 0x6bd   : > { %v2389_v48 = vld [vmem:[#allocation2 + $0x3] sm:$0xff]  ;;  %v2172_v50 = vld [vmem:[#allocation2 + $0x11] sm:$0xff]  ;;  %3587 = vmatprep.mubr.msk.bf16.mxu1 %vm762_vm0, %v2173_v45  ;;  %v2314_v59 = vpack.c.bf16 %v2312_v47, %v2311_v44  ;;  %v2315_v0 = vpack.c.bf16 %v2313_v60, %v2313_v60 }
 0x6be   : > { %v2467_v49 = vld [vmem:[#allocation2 + $0x4] sm:$0xff]  ;;  %v2163_v51 = vld [vmem:[#allocation2 + $0x10] sm:$0xff]  ;;  %3595 = vmatprep.mubr.msk.bf16.mxu0 %vm762_vm0, %v2164_v46  ;;  %v2174_v53 = vpack.c.bf16 %v2172_v50, %v2172_v50 }
 0x6bf   : > { %v2390_v52 = vld [vmem:[#allocation2 + $0xb] sm:$0xff]  ;;  %2617 = vst.msk [vmem:[#allocation2] sm:$0xff] %vm762_vm0, %v3771_v4  ;;  %v2165_v54 = vpack.c.bf16 %v2163_v51, %v2163_v51  ;;  %v2391_v61 = vld [vmem:[#allocation2 + $0x13] sm:$0xff] }
 0x6c0   : > { %v2392_v55 = vpack.c.bf16 %v2390_v52, %v2389_v48  ;;  %v2468_v58 = vld [vmem:[#allocation2 + $0xc] sm:$0xff]  ;;  %v2469_v62 = vld [vmem:[#allocation2 + $0x14] sm:$0xff]  ;;  %3588 = vmatmul.mubr.msk.bf16.vlgmr.msra.gmra.mrb[28].mxu1 %vm762_vm0, %v2174_v53  ;;  %v2393_v1 = vpack.c.bf16 %v2391_v61, %v2391_v61 }
 0x6c1   : > { %2618 = vst.msk [vmem:[#allocation2 + $0x8] sm:$0xff] %vm762_vm0, %v3771_v4  ;;  %3596 = vmatmul.mubr.msk.bf16.vlgmr.msra.gmra.mrb[32].mxu0 %vm762_vm0, %v2165_v54  ;;  %2619 = vst.msk [vmem:[#allocation2 + $0x10] sm:$0xff] %vm762_vm0, %v3771_v4  ;;  %3600 = vmatpush3.bf16.msra.mxu1 %v4144_v15  ;;  %v2470_v2 = vpack.c.bf16 %v2468_v58, %v2467_v49  ;;  %v2471_v3 = vpack.c.bf16 %v2469_v62, %v2469_v62  ;;  %v3721_v62 = vld [vmem:[%s4304_s18 + $0x10] sm:$0xff]  }
 0x6c2   : > { %2620 = vst.msk [vmem:[#allocation2 + $0x18] sm:$0xf] %vm766_vm1, %v3771_v4  ;;  %3603 = vmatprep.mubr.msk.bf16.mxu1 %vm762_vm0, %v2314_v59  ;;  %3608 = vmatpush3.bf16.msra.mxu0 %v4150_v16  ;;  %v3720_v4 = vld [vmem:[%s4300_s14 + $0x48] sm:$0xff]  }
 0x6c3   : > { %3611 = vmatprep.mubr.msk.bf16.mxu0 %vm762_vm0, %v2392_v55  ;;  %3601 = vmatprep.subr.bf16.mxu1 %v3717_v56 }
 0x6c4   : > { %3609 = vmatprep.subr.bf16.mxu0 %v3718_v57 }
 0x6c5   : > { %3602 = vmatpush3.bf16.msra.mxu1 %v3717_v56 }
 0x6c6   : > { %3610 = vmatpush3.bf16.msra.mxu0 %v3718_v57  ;;  %3615 = vmatprep.subr.bf16.mxu1 %v3719_v63 }
 0x6c7   : > { %3623 = vmatprep.subr.bf16.mxu0 %v3721_v62 }
 0x6c8   : > { %3604 = vmatmul.mubr.msk.bf16.vlgmr.msra.gmra.mrb[32].mxu1 %vm762_vm0, %v2315_v0  ;;  %v3723_v0 = vld [vmem:[%s4304_s18 + $0x18] sm:$0xff]  }
 0x6c9   : > { %3612 = vmatmul.mubr.msk.bf16.vlgmr.msra.gmra.mrb[36].mxu0 %vm762_vm0, %v2393_v1  ;;  %3616 = vmatpush3.bf16.msra.mxu1 %v3719_v63  ;;  %v3722_v63 = vld [vmem:[%s4304_s18] sm:$0xff]  }
 0x6ca   : > { %3619 = vmatprep.mubr.msk.bf16.mxu1 %vm762_vm0, %v2470_v2  ;;  %3617 = vmatprep.subr.bf16.mxu1 %v3720_v4  ;;  %v3725_v1 = vld [vmem:[%s4304_s18 + $0x20] sm:$0xff]   ;;  %v3726_v2 = vld [vmem:[%s4304_s18 + $0x30] sm:$0xff]  }
 0x6cb   : > { %3624 = vmatpush3.bf16.msra.mxu0 %v3721_v62 }
 0x6cc   : > { %3625 = vmatprep.subr.bf16.mxu0 %v3723_v0 }
 0x6cd   : > { %3618 = vmatpush3.bf16.msra.mxu1 %v3720_v4  ;;  %v3724_v4 = vld [vmem:[%s4304_s18 + $0x8] sm:$0xff]  }
 0x6ce   : > { %3631 = vmatprep.subr.bf16.mxu1 %v3722_v63 }
 0x6cf   : > { %3626 = vmatpush3.bf16.msra.mxu0 %v3723_v0 }
 0x6d0   : > { %3620 = vmatmul.mubr.msk.bf16.vlgmr.msra.gmra.mrb[36].mxu1 %vm762_vm0, %v2471_v3  ;;  %3639 = vmatprep.subr.bf16.mxu0 %v3725_v1 }
 0x6d1   : > { %3632 = vmatpush3.bf16.msra.mxu1 %v3722_v63 }
 0x6d2   : > { %3633 = vmatprep.subr.bf16.mxu1 %v3724_v4 }
 0x6d5   : > { %3634 = vmatpush3.bf16.msra.mxu1 %v3724_v4 }
 0x6d6   : > { %3647 = vmatprep.subr.bf16.mxu1 %v3726_v2 }
 0x793   : > { %v3589_v5 = vpop.f32.mrb[28].mxu1 }
 0x794   : > { %v3597_v6 = vpop.f32.mrb[32].mxu0  ;;  %v2231_v8 = vpop.f32.mrb[29].mxu1 }
 0x795   : > { %v2306_v7 = vadd.f32 %v3597_v6, %v3589_v5  ;;  %v2297_v9 = vpop.f32.mrb[33].mxu0  ;;  %v3590_v11 = vpop.f32.mrb[30].mxu1 }
 0x796   : > { %v2298_v10 = vadd.f32 %v2297_v9, %v2231_v8  ;;  %v3598_v12 = vpop.f32.mrb[34].mxu0  ;;  %v2234_v13 = vpop.f32.mrb[31].mxu1 }
 0x797   : > { %v2300_v14 = vpop.f32.mrb[35].mxu0 }
 0x798   : > { %v2301_v15 = vadd.f32 %v2300_v14, %v2234_v13  ;;  %v3327_v14 = vld [vmem:[%s4302_s16] ss:$0 sm:$0xff] }
 0x79b   : > { %v3605_v16 = vpop.f32.mrb[32].mxu1 }
 0x79c   : > { %v2388_v17 = vadd.f32 %v3605_v16, %v2306_v7  ;;  %v3613_v18 = vpop.f32.mrb[36].mxu0  ;;  %v2372_v19 = vpop.f32.mrb[33].mxu1 }
 0x79d   : > { %v2386_v20 = vadd.f32 %v2372_v19, %v2298_v10  ;;  %v2450_v21 = vpop.f32.mrb[37].mxu0  ;;  %v3606_v22 = vpop.f32.mrb[34].mxu1 }
 0x79e   : > { %v2466_v23 = vadd.f32 %v3613_v18, %v2388_v17  ;;  %v3614_v24 = vpop.f32.mrb[38].mxu0  ;;  %v2375_v25 = vpop.f32.mrb[35].mxu1  ;;  %v3328_v17 = vld [vmem:[%s4303_s17] ss:$0 sm:$0xff] }
 0x79f   : > { %v2464_v26 = vadd.f32 %v2450_v21, %v2386_v20  ;;  %v2387_v27 = vadd.f32 %v2375_v25, %v2301_v15  ;;  %v2453_v28 = vpop.f32.mrb[39].mxu0 }
 0x7a1   : > { %v2465_v29 = vadd.f32 %v2453_v28, %v2387_v27 }
 0x7a3   : > { %v3621_v30 = vpop.f32.mrb[36].mxu1 }
 0x7a4   : > { %v2544_v31 = vadd.f32 %v3621_v30, %v2466_v23  ;;  %v2528_v33 = vpop.f32.mrb[37].mxu1 }
 0x7a5   : > { %v2542_v34 = vadd.f32 %v2528_v33, %v2464_v26  ;;  %v3622_v35 = vpop.f32.mrb[38].mxu1 }
 0x7a6   : > { %v2531_v36 = vpop.f32.mrb[39].mxu1  ;;  %v2554_v37 = vadd.f32 %v3326_v32, %v2544_v31 }
 0x7a7   : > { %v2552_v38 = vadd.f32 %v3326_v32, %v2542_v34  ;;  %v2543_v39 = vadd.f32 %v2531_v36, %v2465_v29 }
 0x7a8   : > { %v2557_v44 = vmax.f32 %v2554_v37, 0.0 }
 0x7a9   : > { %v2553_v40 = vadd.f32 %v3326_v32, %v2543_v39  ;;  %v2555_v41 = vmax.f32 %v2552_v38, 0.0 }
 0x7aa   : > { %v2564_v46 = vsel %vm762_vm0, %v2557_v44, 0.0 }
 0x7ab   : > { %v2558_v42 = vsel %vm762_vm0, %v2555_v41, 0.0  ;;  %v2556_v43 = vmax.f32 %v2553_v40, 0.0 }
 0x7ac   : > { %2559 = vadd.xlane.f32.xlu0 %v2558_v42 }
 0x7ad   : > { %v2561_v45 = vsel %vm762_vm0, %v2556_v43, 0.0 }
 0x7ae   : > { %2562 = vadd.xlane.f32.xlu1 %v2561_v45  ;;  %v3729_v45 = vld [vmem:[%s4304_s18 + $0x40] sm:$0xff]  }
 0x7b0   : > { %2565 = vadd.xlane.f32.xlu0 %v2564_v46 }
 0x839   : > { %v2560_v47 = vpop.xlane.xlu0 %2559 }
 0x83a   : > { %v2567_v48 = vmul.f32 0.03125, %v2560_v47 }
 0x83b   : > { %v2563_v49 = vpop.xlane.xlu1 %2562 }
 0x83c   : > { %v2570_v50 = vsub.f32 %v2555_v41, %v2567_v48  ;;  %v2568_v51 = vmul.f32 0.03125, %v2563_v49 }
 0x83d   : > { %v2566_v52 = vpop.xlane.xlu0 %2565 }
 0x83e   : > { %v2571_v53 = vsub.f32 %v2556_v43, %v2568_v51  ;;  %v2569_v54 = vmul.f32 0.03125, %v2566_v52  ;;  %v2573_v55 = vmul.f32 %v2570_v50, %v2570_v50  ;;  %v3727_v43 = vld [vmem:[%s4304_s18 + $0x28] sm:$0xff]  }
 0x840   : > { %v2572_v56 = vsub.f32 %v2557_v44, %v2569_v54  ;;  %v2576_v57 = vsel %vm762_vm0, %v2573_v55, 0.0  ;;  %v2574_v58 = vmul.f32 %v2571_v53, %v2571_v53  ;;  %v3728_v44 = vld [vmem:[%s4304_s18 + $0x38] sm:$0xff]  }
 0x841   : > { %2577 = vadd.xlane.f32.xlu1 %v2576_v57 }
 0x842   : > { %v2579_v59 = vsel %vm762_vm0, %v2574_v58, 0.0  ;;  %v2575_v60 = vmul.f32 %v2572_v56, %v2572_v56 }
 0x843   : > { %2580 = vadd.xlane.f32.xlu0 %v2579_v59 }
 0x844   : > { %v2582_v61 = vsel %vm762_vm0, %v2575_v60, 0.0 }
 0x845   : > { %2583 = vadd.xlane.f32.xlu1 %v2582_v61 }
 0x8ce   : > { %v2578_v3 = vpop.xlane.xlu1 %2577 }
 0x8cf   : > { %v2585_v5 = vmul.f32 0.03125, %v2578_v3 }
 0x8d0   : > { %v2581_v6 = vpop.xlane.xlu0 %2580 }
 0x8d1   : > { %v2588_v7 = vadd.f32 1e-05, %v2585_v5  ;;  %v2586_v8 = vmul.f32 0.03125, %v2581_v6 }
 0x8d2   : > { %v2584_v9 = vpop.xlane.xlu1 %2583 }
 0x8d3   : > { %3751 = vrsqrt.f32 %v2588_v7  ;;  %v2589_v10 = vadd.f32 1e-05, %v2586_v8  ;;  %v2587_v11 = vmul.f32 0.03125, %v2584_v9 }
 0x8d5   : > { %3753 = vrsqrt.f32 %v2589_v10  ;;  %v2590_v12 = vadd.f32 1e-05, %v2587_v11 }
 0x8d7   : > { %3755 = vrsqrt.f32 %v2590_v12 }
 0x8dd   : > { %v3752_v13 = vpop.eup %3751 }
 0x8de   : > { %v2594_v15 = vmul.f32 %v3752_v13, %v2570_v50  ;;  %v3730_v50 = vld [vmem:[%s4304_s18 + $0x48] sm:$0xff]  }
 0x8df   : > { %v3754_v16 = vpop.eup %3753 }
 0x8e0   : > { %v2604_v18 = vmul.f32 %v3327_v14, %v2594_v15  ;;  %v2595_v19 = vmul.f32 %v3754_v16, %v2571_v53 }
 0x8e1   : > { %v3756_v20 = vpop.eup %3755 }
 0x8e2   : > { %v2614_v21 = vadd.f32 %v3328_v17, %v2604_v18  ;;  %v2605_v22 = vmul.f32 %v3327_v14, %v2595_v19  ;;  %v2596_v23 = vmul.f32 %v3756_v20, %v2572_v56  ;;  %v3349_v19 = vld [vmem:[%s4305_s19] ss:$0 sm:$0xff] }
 0x8e4   : > { %2621 = vst.msk [vmem:[#allocation2 + $0x2] sm:$0xff] %vm762_vm0, %v2614_v21  ;;  %v2615_v24 = vadd.f32 %v3328_v17, %v2605_v22  ;;  %v2606_v25 = vmul.f32 %v3327_v14, %v2596_v23 }
 0x8e6   : > { %2622 = vst.msk [vmem:[#allocation2 + $0xa] sm:$0xff] %vm762_vm0, %v2615_v24  ;;  %v2616_v26 = vadd.f32 %v3328_v17, %v2606_v25 }
 0x8e8   : > { %2623 = vst.msk [vmem:[#allocation2 + $0x12] sm:$0xff] %vm762_vm0, %v2616_v26 }
 0x8eb   : > { %v2633_v27 = vld [vmem:[#allocation2 + $0x1] sm:$0xff] }
 0x8ec   : > { %v2624_v29 = vld [vmem:[#allocation2] sm:$0xff] }
 0x8ed   : > { %v2634_v28 = vld [vmem:[#allocation2 + $0x9] sm:$0xff] }
 0x8ee   : > { %v2625_v30 = vld [vmem:[#allocation2 + $0x8] sm:$0xff]  ;;  %v2636_v31 = vpack.c.bf16 %v2634_v28, %v2633_v27 }
 0x8ef   : > { %v2627_v32 = vpack.c.bf16 %v2625_v30, %v2624_v29  ;;  %v2775_v33 = vld [vmem:[#allocation2 + $0xa] sm:$0xff]  ;;  %v2774_v40 = vld [vmem:[#allocation2 + $0x2] sm:$0xff]  ;;  %v2776_v46 = vld [vmem:[#allocation2 + $0x12] sm:$0xff] }
 0x8f0   : > { %v2852_v34 = vld [vmem:[#allocation2 + $0x3] sm:$0xff]  ;;  %v2635_v35 = vld [vmem:[#allocation2 + $0x11] sm:$0xff]  ;;  %3627 = vmatprep.mubr.msk.bf16.mxu0 %vm762_vm0, %v2636_v31  ;;  %v2777_v42 = vpack.c.bf16 %v2775_v33, %v2774_v40  ;;  %v2778_v49 = vpack.c.bf16 %v2776_v46, %v2776_v46 }
 0x8f1   : > { %v2626_v36 = vld [vmem:[#allocation2 + $0x10] sm:$0xff]  ;;  %3635 = vmatprep.mubr.msk.bf16.mxu1 %vm762_vm0, %v2627_v32  ;;  %v2637_v38 = vpack.c.bf16 %v2635_v35, %v2635_v35  ;;  %v2930_v52 = vld [vmem:[#allocation2 + $0x4] sm:$0xff] }
 0x8f2   : > { %v2853_v37 = vld [vmem:[#allocation2 + $0xb] sm:$0xff]  ;;  %v2628_v39 = vpack.c.bf16 %v2626_v36, %v2626_v36  ;;  %v2854_v47 = vld [vmem:[#allocation2 + $0x13] sm:$0xff] }
 0x8f3   : > { %v2855_v41 = vpack.c.bf16 %v2853_v37, %v2852_v34  ;;  %3628 = vmatmul.mubr.msk.bf16.vlgmr.msra.gmra.mrb[40].mxu0 %vm762_vm0, %v2637_v38  ;;  %v2931_v48 = vld [vmem:[#allocation2 + $0xc] sm:$0xff]  ;;  %v2856_v51 = vpack.c.bf16 %v2854_v47, %v2854_v47  ;;  %v2932_v54 = vld [vmem:[#allocation2 + $0x14] sm:$0xff] }
 0x8f4   : > { %3636 = vmatmul.mubr.msk.bf16.vlgmr.msra.gmra.mrb[40].mxu1 %vm762_vm0, %v2628_v39  ;;  %3640 = vmatpush3.bf16.msra.mxu0 %v3725_v1  ;;  %v2933_v53 = vpack.c.bf16 %v2931_v48, %v2930_v52  ;;  %v2934_v55 = vpack.c.bf16 %v2932_v54, %v2932_v54 }
 0x8f5   : > { %3643 = vmatprep.mubr.msk.bf16.mxu0 %vm762_vm0, %v2777_v42  ;;  %3648 = vmatpush3.bf16.msra.mxu1 %v3726_v2 }
 0x8f6   : > { %3651 = vmatprep.mubr.msk.bf16.mxu1 %vm762_vm0, %v2855_v41  ;;  %3641 = vmatprep.subr.bf16.mxu0 %v3727_v43 }
 0x8f7   : > { %3649 = vmatprep.subr.bf16.mxu1 %v3728_v44 }
 0x8f8   : > { %3642 = vmatpush3.bf16.msra.mxu0 %v3727_v43 }
 0x8f9   : > { %3650 = vmatpush3.bf16.msra.mxu1 %v3728_v44  ;;  %3655 = vmatprep.subr.bf16.mxu0 %v3729_v45 }
 0x8fb   : > { %3644 = vmatmul.mubr.msk.bf16.vlgmr.msra.gmra.mrb[44].mxu0 %vm762_vm0, %v2778_v49  ;;  %v3731_v49 = vld [vmem:[%s4308_s22] sm:$0xff]  }
 0x8fc   : > { %3652 = vmatmul.mubr.msk.bf16.vlgmr.msra.gmra.mrb[44].mxu1 %vm762_vm0, %v2856_v51  ;;  %3656 = vmatpush3.bf16.msra.mxu0 %v3729_v45 }
 0x8fd   : > { %3659 = vmatprep.mubr.msk.bf16.mxu0 %vm762_vm0, %v2933_v53  ;;  %3657 = vmatprep.subr.bf16.mxu0 %v3730_v50 }
 0x8fe   : > { %3663 = vmatprep.subr.bf16.mxu1 %v3731_v49 }
 0x8ff   : > { %3664 = vmatpush3.bf16.msra.mxu1 %v3731_v49 }
 0x900   : > { %3658 = vmatpush3.bf16.msra.mxu0 %v3730_v50  ;;  %v3732_v50 = vld [vmem:[%s4308_s22 + $0x8] sm:$0xff]  }
 0x901   : > { %3665 = vmatprep.subr.bf16.mxu1 %v3732_v50 }
 0x903   : > { %3660 = vmatmul.mubr.msk.bf16.vlgmr.msra.gmra.mrb[48].mxu0 %vm762_vm0, %v2934_v55  ;;  %3666 = vmatpush3.bf16.msra.mxu1 %v3732_v50 }
 0x9c6   : > { %v3629_v56 = vpop.f32.mrb[40].mxu0 }
 0x9c7   : > { %v3637_v57 = vpop.f32.mrb[40].mxu1  ;;  %v2694_v59 = vpop.f32.mrb[41].mxu0 }
 0x9c8   : > { %v2769_v58 = vadd.f32 %v3637_v57, %v3629_v56  ;;  %v2760_v60 = vpop.f32.mrb[41].mxu1  ;;  %v3630_v62 = vpop.f32.mrb[42].mxu0 }
 0x9c9   : > { %v2761_v61 = vadd.f32 %v2760_v60, %v2694_v59  ;;  %v3638_v63 = vpop.f32.mrb[42].mxu1  ;;  %v2697_v0 = vpop.f32.mrb[43].mxu0 }
 0x9ca   : > { %v2763_v4 = vpop.f32.mrb[43].mxu1 }
 0x9cb   : > { %v2764_v1 = vadd.f32 %v2763_v4, %v2697_v0 }
 0x9ce   : > { %v3645_v2 = vpop.f32.mrb[44].mxu0 }
 0x9cf   : > { %v2851_v3 = vadd.f32 %v3645_v2, %v2769_v58  ;;  %v3653_v5 = vpop.f32.mrb[44].mxu1  ;;  %v2835_v6 = vpop.f32.mrb[45].mxu0  ;;  %v3351_v2 = vld [vmem:[%s4307_s21] ss:$0 sm:$0xff] }
 0x9d0   : > { %v2849_v7 = vadd.f32 %v2835_v6, %v2761_v61  ;;  %v2913_v8 = vpop.f32.mrb[45].mxu1  ;;  %v3646_v9 = vpop.f32.mrb[46].mxu0  ;;  %v3350_v61 = vld [vmem:[%s4306_s20] ss:$0 sm:$0xff] }
 0x9d1   : > { %v2929_v10 = vadd.f32 %v3653_v5, %v2851_v3  ;;  %v3654_v11 = vpop.f32.mrb[46].mxu1  ;;  %v2838_v12 = vpop.f32.mrb[47].mxu0 }
 0x9d2   : > { %v2927_v13 = vadd.f32 %v2913_v8, %v2849_v7  ;;  %v2850_v14 = vadd.f32 %v2838_v12, %v2764_v1  ;;  %v2916_v15 = vpop.f32.mrb[47].mxu1  ;;  %v3352_v12 = vld [vmem:[%s4309_s23] ss:$0 sm:$0xff] }
 0x9d4   : > { %v2928_v16 = vadd.f32 %v2916_v15, %v2850_v14 }
 0x9d6   : > { %v3661_v17 = vpop.f32.mrb[48].mxu0 }
 0x9d7   : > { %v3007_v18 = vadd.f32 %v3661_v17, %v2929_v10  ;;  %v2991_v20 = vpop.f32.mrb[49].mxu0 }
 0x9d8   : > { %v3005_v21 = vadd.f32 %v2991_v20, %v2927_v13  ;;  %v3662_v22 = vpop.f32.mrb[50].mxu0 }
 0x9d9   : > { %v2994_v23 = vpop.f32.mrb[51].mxu0  ;;  %v3017_v24 = vadd.f32 %v3349_v19, %v3007_v18 }
 0x9da   : > { %v3015_v25 = vadd.f32 %v3349_v19, %v3005_v21  ;;  %v3006_v26 = vadd.f32 %v2994_v23, %v2928_v16 }
 0x9db   : > { %v3020_v31 = vmax.f32 %v3017_v24, 0.0 }
 0x9dc   : > { %v3016_v27 = vadd.f32 %v3349_v19, %v3006_v26  ;;  %v3018_v28 = vmax.f32 %v3015_v25, 0.0 }
 0x9dd   : > { %v3027_v33 = vsel %vm762_vm0, %v3020_v31, 0.0 }
 0x9de   : > { %v3021_v29 = vsel %vm762_vm0, %v3018_v28, 0.0  ;;  %v3019_v30 = vmax.f32 %v3016_v27, 0.0 }
 0x9df   : > { %3022 = vadd.xlane.f32.xlu0 %v3021_v29 }
 0x9e0   : > { %v3024_v32 = vsel %vm762_vm0, %v3019_v30, 0.0 }
 0x9e1   : > { %3025 = vadd.xlane.f32.xlu1 %v3024_v32 }
 0x9e3   : > { %3028 = vadd.xlane.f32.xlu0 %v3027_v33 }
 0xa6c   : > { %v3023_v34 = vpop.xlane.xlu0 %3022 }
 0xa6d   : > { %v3030_v35 = vmul.f32 0.03125, %v3023_v34 }
 0xa6e   : > { %v3026_v36 = vpop.xlane.xlu1 %3025 }
 0xa6f   : > { %v3033_v37 = vsub.f32 %v3018_v28, %v3030_v35  ;;  %v3031_v38 = vmul.f32 0.03125, %v3026_v36 }
 0xa70   : > { %v3029_v39 = vpop.xlane.xlu0 %3028 }
 0xa71   : > { %v3034_v40 = vsub.f32 %v3019_v30, %v3031_v38  ;;  %v3032_v41 = vmul.f32 0.03125, %v3029_v39  ;;  %v3036_v42 = vmul.f32 %v3033_v37, %v3033_v37 }
 0xa73   : > { %v3035_v43 = vsub.f32 %v3020_v31, %v3032_v41  ;;  %v3039_v44 = vsel %vm762_vm0, %v3036_v42, 0.0  ;;  %v3037_v45 = vmul.f32 %v3034_v40, %v3034_v40 }
 0xa74   : > { %3040 = vadd.xlane.f32.xlu1 %v3039_v44 }
 0xa75   : > { %v3042_v46 = vsel %vm762_vm0, %v3037_v45, 0.0  ;;  %v3038_v47 = vmul.f32 %v3035_v43, %v3035_v43 }
 0xa76   : > { %3043 = vadd.xlane.f32.xlu0 %v3042_v46 }
 0xa77   : > { %v3045_v48 = vsel %vm762_vm0, %v3038_v47, 0.0 }
 0xa78   : > { %3046 = vadd.xlane.f32.xlu1 %v3045_v48 }
 0xb01   : > { %v3041_v51 = vpop.xlane.xlu1 %3040 }
 0xb02   : > { %v3048_v52 = vmul.f32 0.03125, %v3041_v51 }
 0xb03   : > { %v3044_v53 = vpop.xlane.xlu0 %3043 }
 0xb04   : > { %v3051_v54 = vadd.f32 1e-05, %v3048_v52  ;;  %v3049_v55 = vmul.f32 0.03125, %v3044_v53 }
 0xb05   : > { %v3047_v56 = vpop.xlane.xlu1 %3046 }
 0xb06   : > { %3757 = vrsqrt.f32 %v3051_v54  ;;  %v3052_v57 = vadd.f32 1e-05, %v3049_v55  ;;  %v3050_v58 = vmul.f32 0.03125, %v3047_v56 }
 0xb08   : > { %3759 = vrsqrt.f32 %v3052_v57  ;;  %v3053_v59 = vadd.f32 1e-05, %v3050_v58 }
 0xb0a   : > { %3761 = vrsqrt.f32 %v3053_v59 }
 0xb10   : > { %v3758_v60 = vpop.eup %3757 }
 0xb11   : > { %v3057_v62 = vmul.f32 %v3758_v60, %v3033_v37 }
 0xb12   : > { %v3760_v63 = vpop.eup %3759 }
 0xb13   : > { %v3058_v0 = vmul.f32 %v3760_v63, %v3034_v40  ;;  %v3067_v4 = vmul.f32 %v3350_v61, %v3057_v62 }
 0xb14   : > { %v3762_v1 = vpop.eup %3761 }
 0xb15   : > { %v3059_v3 = vmul.f32 %v3762_v1, %v3035_v43  ;;  %v3068_v5 = vmul.f32 %v3350_v61, %v3058_v0  ;;  %v3077_v7 = vadd.f32 %v3351_v2, %v3067_v4 }
 0xb17   : > { %v3069_v6 = vmul.f32 %v3350_v61, %v3059_v3  ;;  %v3078_v8 = vadd.f32 %v3351_v2, %v3068_v5 }
 0xb19   : > { %v3080_v9 = vpack.c.bf16 %v3078_v8, %v3077_v7  ;;  %v3079_v10 = vadd.f32 %v3351_v2, %v3069_v6 }
 0xb1b   : > { %3667 = vmatprep.mubr.msk.bf16.mxu1 %vm762_vm0, %v3080_v9  ;;  %v3081_v11 = vpack.c.bf16 %v3079_v10, %v3079_v10 }
 0xb1d   : > { %3668 = vmatmul.mubr.msk.bf16.vlgmr.msra.gmra.mrb[48].mxu1 %vm762_vm0, %v3081_v11 }
 0xbf0   : > { %v3669_v13 = vpop.f32.mrb[48].mxu1 }
 0xbf1   : > { %v3154_v14 = vadd.f32 %v3669_v13, %v3352_v12  ;;  %v3145_v15 = vpop.f32.mrb[49].mxu1 }
 0xbf2   : > { %v3146_v16 = vadd.f32 %v3352_v12, %v3145_v15  ;;  %v3670_v17 = vpop.f32.mrb[50].mxu1 }
 0xbf3   : > { %3162 = vst.msk [vmem:[%s757_s7 + $0x10] sm:$0xff] %vm3159_vm2, %v3154_v14  ;;  %v3148_v18 = vpop.f32.mrb[51].mxu1 }
 0xbf4   : > { %3160 = vst.msk [vmem:[%s757_s7] sm:$0xff] %vm3159_vm2, %v3146_v16  ;;  %v3149_v19 = vadd.f32 %v3352_v12, %v3148_v18 }
 0xbf6   : > { %3161 = vst.msk [vmem:[%s757_s7 + $0x8] sm:$0xff] %vm3159_vm2, %v3149_v19 }
 0xbf7 PF: > { %s34_s5 = sadd.s32 1, %s3769_s5  }
 0xbf8   : > { %p31_p4 = scmp.ge.s32.totalorder %s34_s5, 4  }
 0xbfa   :  { %33 = sbr.rel (!%p31_p4) target bundleno = 9 (0x9), region = 149 }

</bundles_post_ra>
